<compile_context>
chip_gen: v7x
topology: tpu7x:2x2x1
jax: 0.10.0
libtpu: 0.0.40
codegen_flags: <defaults>
</compile_context>

<pallas_src>
import numpy as np
import jax
import jax.numpy as jnp
from jax.experimental import pallas as pl
from jax.experimental.pallas import tpu as pltpu


# ----------------------------------------------------------------------------
# static (numpy) tables built once at parameter-preparation time
# ----------------------------------------------------------------------------
def relative_position_index(ws):
    coords = np.stack(np.meshgrid(np.arange(ws), np.arange(ws), indexing="ij"))
    coords = coords.reshape(2, -1)
    rel = coords[:, :, None] - coords[:, None, :]
    rel = rel.transpose(1, 2, 0).astype(np.int64)
    rel[:, :, 0] += ws - 1
    rel[:, :, 1] += ws - 1
    rel[:, :, 0] *= 2 * ws - 1
    return rel.sum(-1)                                   # [N, N]


def dense_attn_bias_np(Hg, Wg, ws, shift, rel_tab, num_heads):
    """Dense (heads, T, T) additive bias implementing (shifted-)window MHSA.

    Folds: window structure (-1e4 outside the window -> exp underflows to 0),
    the SW-MSA region mask (-100, PyTorch semantics) and the relative-position
    bias (indexed by in-window coordinates of the ROLLED grid)."""
    rel_idx = relative_position_index(ws)                            # (N, N)
    rr, cc = np.meshgrid(np.arange(Hg), np.arange(Wg), indexing="ij")
    r_roll = (rr - shift) % Hg
    c_roll = (cc - shift) % Wg
    win_id = (r_roll // ws) * (Wg // ws) + (c_roll // ws)
    slot = (r_roll % ws) * ws + (c_roll % ws)
    if shift > 0:
        img = np.zeros((Hg, Wg), np.int64)
        cnt = 0
        for hs in (slice(0, -ws), slice(-ws, -shift), slice(-shift, None)):
            for wsl in (slice(0, -ws), slice(-ws, -shift), slice(-shift, None)):
                img[hs, wsl] = cnt
                cnt += 1
        region = img[r_roll, c_roll]
    else:
        region = np.zeros((Hg, Wg), np.int64)
    win_id = win_id.reshape(-1)
    slot = slot.reshape(-1)
    region = region.reshape(-1)

    rel = rel_tab[rel_idx[slot[:, None], slot[None, :]]]             # (T, T, H)
    rel = np.transpose(rel, (2, 0, 1)).astype(np.float32)            # (H, T, T)
    same_win = (win_id[:, None] == win_id[None, :])[None]
    same_reg = (region[:, None] == region[None, :])[None]
    bias = np.where(same_reg, rel, rel - 100.0)
    bias = np.where(same_win, bias, np.float32(-1e4))
    return bias.astype(np.float32)


def merge_selection_np(Hg, Wg):
    """(4, T/4, T) 0/1 selection matrices implementing PatchMerging gathers."""
    T = Hg * Wg
    Ho, Wo = Hg // 2, Wg // 2
    sel = np.zeros((4, Ho * Wo, T), np.float32)
    offs = [(0, 0), (1, 0), (0, 1), (1, 1)]              # x0, x1, x2, x3
    for k, (dr, dc) in enumerate(offs):
        for r2 in range(Ho):
            for c2 in range(Wo):
                src = (2 * r2 + dr) * Wg + (2 * c2 + dc)
                sel[k, r2 * Wo + c2, src] = 1.0
    return sel


def bilinear_matrix(out_size, in_size):
    """align_corners=False (PyTorch) 1-D bilinear resize matrix."""
    scale = in_size / out_size
    W = np.zeros((out_size, in_size), np.float32)
    for i in range(out_size):
        src = max((i + 0.5) * scale - 0.5, 0.0)
        i0 = min(int(np.floor(src)), in_size - 1)
        i1 = min(i0 + 1, in_size - 1)
        lam = src - i0
        W[i, i0] += 1.0 - lam
        W[i, i1] += lam
    return W


def build_interp_t(out_hw, in_hw):
    Ah = bilinear_matrix(out_hw[0], in_hw[0])
    Aw = bilinear_matrix(out_hw[1], in_hw[1])
    # TODO(synk): at large resolutions replace this Kronecker operand with two
    # separable row/col resize matmuls to keep the VMEM operand bounded.
    return np.kron(Ah, Aw).T.astype(np.float32)          # (T_in, T_out)


# ----------------------------------------------------------------------------
# in-kernel helpers (all values stay in registers / VMEM)
# ----------------------------------------------------------------------------
def _ln(x, g, b, eps=1e-5):
    mu = jnp.mean(x, axis=-1, keepdims=True)
    var = jnp.mean(jnp.square(x - mu), axis=-1, keepdims=True)
    return (x - mu) * jax.lax.rsqrt(var + eps) * g + b


_BLOCK_NREFS = 13  # refs per Swin block (see _swin_block_body unpacking)


def _swin_block_body(x, refs):
    """One Swin block: LN1 -> masked-dense window MHSA -> +res -> LN2 -> MLP -> +res.

    x: (T, C) f32 residual stream."""
    (ln1g, ln1b, wqkv, bqkv, bias, wproj, projb,
     ln2g, ln2b, fc1w, fc1b, fc2w, fc2b) = refs
    nheads = wqkv.shape[0] // 3

    xn = _ln(x, ln1g[...], ln1b[...]).astype(jnp.bfloat16)
    acc = x + projb[...]                                  # residual + proj bias
    for h in range(nheads):                               # static unroll (2 or 4)
        q = jnp.dot(xn, wqkv[h], preferred_element_type=jnp.float32) + bqkv[h]
        k = jnp.dot(xn, wqkv[nheads + h],
                    preferred_element_type=jnp.float32) + bqkv[nheads + h]
        v = jnp.dot(xn, wqkv[2 * nheads + h],
                    preferred_element_type=jnp.float32) + bqkv[2 * nheads + h]
        s = jax.lax.dot_general(q.astype(jnp.bfloat16), k.astype(jnp.bfloat16),
                                (((1,), (1,)), ((), ())),
                                preferred_element_type=jnp.float32)
        s = s + bias[h]                                    # rel-pos + window mask
        s = s - jnp.max(s, axis=-1, keepdims=True)
        p = jnp.exp(s)
        p = p * pl.reciprocal(jnp.sum(p, axis=-1, keepdims=True), approx=True)
        o = jnp.dot(p.astype(jnp.bfloat16), v.astype(jnp.bfloat16),
                    preferred_element_type=jnp.float32)
        acc = acc + jnp.dot(o.astype(jnp.bfloat16), wproj[h],
                            preferred_element_type=jnp.float32)

    yn = _ln(acc, ln2g[...], ln2b[...]).astype(jnp.bfloat16)
    y = jnp.dot(yn, fc1w[...], preferred_element_type=jnp.float32) + fc1b[...]
    # TODO(synk): PyTorch nn.GELU default is exact erf; tanh approximation used.
    y = jax.nn.gelu(y, approximate=True)
    y = jnp.dot(y.astype(jnp.bfloat16), fc2w[...],
                preferred_element_type=jnp.float32) + fc2b[...]
    return acc + y


def _patch_merge_body(feat, sel_ref, g_ref, b_ref, w_ref):
    """PatchMerging: gather 2x2 neighbourhoods (selection matmuls), LayerNorm
    over the 4*C concatenated channels (concat-free), linear 4C -> 2C."""
    pieces = [jnp.dot(sel_ref[k], feat, preferred_element_type=jnp.float32)
              for k in range(4)]                          # 4 x (T/4, C)
    tot = float(4 * pieces[0].shape[-1])
    mu = sum(jnp.sum(p, axis=-1, keepdims=True) for p in pieces) / tot
    var = sum(jnp.sum(jnp.square(p - mu), axis=-1, keepdims=True)
              for p in pieces) / tot
    rstd = jax.lax.rsqrt(var + 1e-5)
    merged = None
    for k in range(4):
        yk = (pieces[k] - mu) * rstd * g_ref[k] + b_ref[k]
        t = jnp.dot(yk.astype(jnp.bfloat16), w_ref[k],
                    preferred_element_type=jnp.float32)
        merged = t if merged is None else merged + t
    return merged                                          # (T/4, 2C) f32


# ----------------------------------------------------------------------------
# the single fused forward kernel (one grid step == one image)
# ----------------------------------------------------------------------------
def _fused_swin_kernel(*refs):
    o_ref = refs[-1]
    x_ref, pe_w, pe_b, pe_g, pe_bn = refs[:5]
    idx = 5
    blk0 = refs[idx:idx + _BLOCK_NREFS]; idx += _BLOCK_NREFS
    blk1 = refs[idx:idx + _BLOCK_NREFS]; idx += _BLOCK_NREFS
    mg_sel, mg_g, mg_b, mg_w = refs[idx:idx + 4]; idx += 4
    blk2 = refs[idx:idx + _BLOCK_NREFS]; idx += _BLOCK_NREFS
    nf_g, nf_b, head_wt, head_b, interp_t = refs[idx:idx + 5]

    # ---- patch embed (linear patch projection + LayerNorm) ----
    feat = jnp.dot(x_ref[...], pe_w[...],
                   preferred_element_type=jnp.float32) + pe_b[...]
    feat = _ln(feat, pe_g[...], pe_bn[...])                # (64, 32) f32

    # ---- stage 0: W-MSA block, SW-MSA block (masked dense attention) ----
    feat = _swin_block_body(feat, blk0)
    feat = _swin_block_body(feat, blk1)

    # ---- patch merging ----
    feat = _patch_merge_body(feat, mg_sel, mg_g, mg_b, mg_w)   # (16, 64)

    # ---- stage 1 ----
    feat = _swin_block_body(feat, blk2)

    # ---- final LN + 1x1-conv head (channel-major) + bilinear upsample ----
    xn = _ln(feat, nf_g[...], nf_b[...]).astype(jnp.bfloat16)  # (16, 64)
    logits_t = jax.lax.dot_general(head_wt[...], xn, (((1,), (1,)), ((), ())),
                                   preferred_element_type=jnp.float32)
    logits_t = logits_t + head_b[...]                          # (8, 16)
    o_ref[...] = jnp.dot(logits_t, interp_t[...],
                         preferred_element_type=jnp.float32)   # (8, H*W)


def _resident_spec(a):
    nd = a.ndim
    return pl.BlockSpec(a.shape, lambda b, _nd=nd: (0,) * _nd)


# ----------------------------------------------------------------------------
# public forward wrapper (one pallas_call; only trivial XLA layout glue)
# ----------------------------------------------------------------------------
def swin_segmentation_forward(x, operands, num_classes=5, patch=4):
    B, Cin, H, W = x.shape
    Hp, Wp = H // patch, W // patch
    pd = Cin * patch * patch
    ncp = ((num_classes + 7) // 8) * 8

    x_tok = x.reshape(B, Cin, Hp, patch, Wp, patch)
    x_tok = x_tok.transpose(0, 2, 4, 1, 3, 5).reshape(B, Hp * Wp, pd)
    x_tok = x_tok.astype(jnp.bfloat16)

    in_specs = [pl.BlockSpec((None, Hp * Wp, pd), lambda b: (b, 0, 0))]
    in_specs += [_resident_spec(a) for a in operands]

    out = pl.pallas_call(
        _fused_swin_kernel,
        out_shape=jax.ShapeDtypeStruct((B, ncp, H * W), jnp.float32),
        grid=(B,),
        in_specs=in_specs,
        out_specs=pl.BlockSpec((None, ncp, H * W), lambda b: (b, 0, 0)),
        compiler_params=pltpu.CompilerParams(dimension_semantics=("parallel",)),
    )(x_tok, *operands)

    # already channel-major (NCHW): just drop the class padding and reshape
    return out[:, :num_classes, :].reshape(B, num_classes, H, W)


# ----------------------------------------------------------------------------
# parameter init (deterministic, synthetic) and one-time operand preparation
# ----------------------------------------------------------------------------
def _dense(key, fan_in, fan_out):
    return jax.random.normal(key, (fan_in, fan_out), jnp.float32) * 0.02


def init_block_params(key, dim, num_heads, ws, shift, mlp_ratio=4):
    ks = jax.random.split(key, 5)
    return {
        "shift": shift,
        "ln1_g": jnp.ones((dim,)), "ln1_b": jnp.zeros((dim,)),
        "qkv_w": _dense(ks[0], dim, 3 * dim), "qkv_b": jnp.zeros((3 * dim,)),
        "rel_tab": jax.random.normal(ks[1], ((2 * ws - 1) ** 2, num_heads),
                                     jnp.float32) * 0.02,
        "proj_w": _dense(ks[2], dim, dim), "proj_b": jnp.zeros((dim,)),
        "ln2_g": jnp.ones((dim,)), "ln2_b": jnp.zeros((dim,)),
        "fc1_w": _dense(ks[3], dim, mlp_ratio * dim),
        "fc1_b": jnp.zeros((mlp_ratio * dim,)),
        "fc2_w": _dense(ks[4], mlp_ratio * dim, dim), "fc2_b": jnp.zeros((dim,)),
    }


def init_params(key, in_chans=3, patch=4, embed_dim=32, ws=4, num_classes=5):
    ks = jax.random.split(key, 8)
    patch_dim = in_chans * patch * patch
    return {
        "patch_embed": {
            "w": _dense(ks[0], patch_dim, embed_dim), "b": jnp.zeros((embed_dim,)),
            "ln_g": jnp.ones((embed_dim,)), "ln_b": jnp.zeros((embed_dim,)),
        },
        "stage0": [
            init_block_params(ks[1], embed_dim, 2, ws, 0),
            init_block_params(ks[2], embed_dim, 2, ws, ws // 2),
        ],
        "merge": {
            "ln_g": jnp.ones((4 * embed_dim,)), "ln_b": jnp.zeros((4 * embed_dim,)),
            "red_w": _dense(ks[3], 4 * embed_dim, 2 * embed_dim),
        },
        "stage1": [init_block_params(ks[4], 2 * embed_dim, 4, ws, 0)],
        "norm_g": jnp.ones((2 * embed_dim,)), "norm_b": jnp.zeros((2 * embed_dim,)),
        "head_w": _dense(ks[5], 2 * embed_dim, num_classes),
        "head_b": jnp.zeros((num_classes,)),
    }


def _prep_block(p, num_heads, grid_hw, ws):
    """Per-head weight packing, scale folding and dense attention-bias table."""
    qkv_w = np.asarray(p["qkv_w"], np.float32)            # (C, 3C)
    qkv_b = np.asarray(p["qkv_b"], np.float32)            # (3C,)
    C = qkv_w.shape[0]
    hd = C // num_heads
    scale = hd ** -0.5

    wq = [qkv_w[:, h * hd:(h + 1) * hd] * scale for h in range(num_heads)]
    wk = [qkv_w[:, C + h * hd:C + (h + 1) * hd] for h in range(num_heads)]
    wv = [qkv_w[:, 2 * C + h * hd:2 * C + (h + 1) * hd] for h in range(num_heads)]
    wqkv = np.stack(wq + wk + wv)                          # (3H, C, hd)
    bq = [qkv_b[h * hd:(h + 1) * hd] * scale for h in range(num_heads)]
    bk = [qkv_b[C + h * hd:C + (h + 1) * hd] for h in range(num_heads)]
    bv = [qkv_b[2 * C + h * hd:2 * C + (h + 1) * hd] for h in range(num_heads)]
    bqkv = np.stack(bq + bk + bv)[:, None, :]              # (3H, 1, hd)
    proj_w = np.asarray(p["proj_w"], np.float32)
    wproj = np.stack([proj_w[h * hd:(h + 1) * hd, :] for h in range(num_heads)])

    Hg, Wg = grid_hw
    bias = dense_attn_bias_np(Hg, Wg, ws, p["shift"],
                              np.asarray(p["rel_tab"], np.float32), num_heads)
    return [
        jnp.asarray(p["ln1_g"], jnp.float32).reshape(1, C),
        jnp.asarray(p["ln1_b"], jnp.float32).reshape(1, C),
        jnp.asarray(wqkv, jnp.bfloat16),
        jnp.asarray(bqkv, jnp.float32),
        jnp.asarray(bias, jnp.float32),
        jnp.asarray(wproj, jnp.bfloat16),
        jnp.asarray(p["proj_b"], jnp.float32).reshape(1, C),
        jnp.asarray(p["ln2_g"], jnp.float32).reshape(1, C),
        jnp.asarray(p["ln2_b"], jnp.float32).reshape(1, C),
        jnp.asarray(p["fc1_w"], jnp.bfloat16),
        jnp.asarray(p["fc1_b"], jnp.float32).reshape(1, -1),
        jnp.asarray(p["fc2_w"], jnp.bfloat16),
        jnp.asarray(p["fc2_b"], jnp.float32).reshape(1, C),
    ]


def prepare_operands(params, img_hw=(32, 32), patch=4, ws=4):
    H, W = img_hw
    Hp, Wp = H // patch, W // patch                        # stage-0 grid (8, 8)
    Hm, Wm = Hp // 2, Wp // 2                              # stage-1 grid (4, 4)

    pe = params["patch_embed"]
    C0 = pe["w"].shape[1]
    ops = [
        jnp.asarray(pe["w"], jnp.bfloat16),
        jnp.asarray(pe["b"], jnp.float32).reshape(1, -1),
        jnp.asarray(pe["ln_g"], jnp.float32).reshape(1, -1),
        jnp.asarray(pe["ln_b"], jnp.float32).reshape(1, -1),
    ]
    for blk in params["stage0"]:
        ops += _prep_block(blk, num_heads=2, grid_hw=(Hp, Wp), ws=ws)

    mg = params["merge"]
    ops += [
        jnp.asarray(merge_selection_np(Hp, Wp), jnp.float32),
        jnp.asarray(np.asarray(mg["ln_g"], np.float32).reshape(4, 1, C0)),
        jnp.asarray(np.asarray(mg["ln_b"], np.float32).reshape(4, 1, C0)),
        jnp.asarray(np.asarray(mg["red_w"], np.float32).reshape(4, C0, 2 * C0),
                    jnp.bfloat16),
    ]
    for blk in params["stage1"]:
        ops += _prep_block(blk, num_heads=4, grid_hw=(Hm, Wm), ws=ws)

    nc = params["head_w"].shape[1]
    ncp = ((nc + 7) // 8) * 8
    C2 = params["head_w"].shape[0]
    hwt = np.zeros((ncp, C2), np.float32)
    hwt[:nc] = np.asarray(params["head_w"], np.float32).T
    hb = np.zeros((ncp, 1), np.float32)
    hb[:nc, 0] = np.asarray(params["head_b"], np.float32)
    ops += [
        jnp.asarray(params["norm_g"], jnp.float32).reshape(1, -1),
        jnp.asarray(params["norm_b"], jnp.float32).reshape(1, -1),
        jnp.asarray(hwt, jnp.bfloat16),
        jnp.asarray(hb, jnp.float32),
        jnp.asarray(build_interp_t((H, W), (Hm, Wm)), jnp.float32),
    ]
    return ops


if __name__ == "__main__":
    key = jax.random.PRNGKey(0)
    pkey, xkey = jax.random.split(key)

    params = init_params(pkey)
    operands = prepare_operands(params, img_hw=(32, 32))
    x = jax.random.normal(xkey, (2, 3, 32, 32), jnp.float32)

    fwd = jax.jit(swin_segmentation_forward)
    out = jax.block_until_ready(fwd(x, operands))

    assert out.shape == (2, 5, 32, 32), out.shape
    assert bool(jnp.isfinite(out).all())
    print("KERNEL_OK")
</pallas_src>

<mosaic_0001>
module attributes {stable_mosaic.version = 11 : i64} {
  func.func @_fused_swin_kernel(%arg0: i32, %arg1: memref<1x64x48xbf16, #tpu.memory_space<vmem>>, %arg2: memref<48x32xbf16, #tpu.memory_space<vmem>>, %arg3: memref<1x32xf32, #tpu.memory_space<vmem>>, %arg4: memref<1x32xf32, #tpu.memory_space<vmem>>, %arg5: memref<1x32xf32, #tpu.memory_space<vmem>>, %arg6: memref<1x32xf32, #tpu.memory_space<vmem>>, %arg7: memref<1x32xf32, #tpu.memory_space<vmem>>, %arg8: memref<6x32x16xbf16, #tpu.memory_space<vmem>>, %arg9: memref<6x1x16xf32, #tpu.memory_space<vmem>>, %arg10: memref<2x64x64xf32, #tpu.memory_space<vmem>>, %arg11: memref<2x16x32xbf16, #tpu.memory_space<vmem>>, %arg12: memref<1x32xf32, #tpu.memory_space<vmem>>, %arg13: memref<1x32xf32, #tpu.memory_space<vmem>>, %arg14: memref<1x32xf32, #tpu.memory_space<vmem>>, %arg15: memref<32x128xbf16, #tpu.memory_space<vmem>>, %arg16: memref<1x128xf32, #tpu.memory_space<vmem>>, %arg17: memref<128x32xbf16, #tpu.memory_space<vmem>>, %arg18: memref<1x32xf32, #tpu.memory_space<vmem>>, %arg19: memref<1x32xf32, #tpu.memory_space<vmem>>, %arg20: memref<1x32xf32, #tpu.memory_space<vmem>>, %arg21: memref<6x32x16xbf16, #tpu.memory_space<vmem>>, %arg22: memref<6x1x16xf32, #tpu.memory_space<vmem>>, %arg23: memref<2x64x64xf32, #tpu.memory_space<vmem>>, %arg24: memref<2x16x32xbf16, #tpu.memory_space<vmem>>, %arg25: memref<1x32xf32, #tpu.memory_space<vmem>>, %arg26: memref<1x32xf32, #tpu.memory_space<vmem>>, %arg27: memref<1x32xf32, #tpu.memory_space<vmem>>, %arg28: memref<32x128xbf16, #tpu.memory_space<vmem>>, %arg29: memref<1x128xf32, #tpu.memory_space<vmem>>, %arg30: memref<128x32xbf16, #tpu.memory_space<vmem>>, %arg31: memref<1x32xf32, #tpu.memory_space<vmem>>, %arg32: memref<4x16x64xf32, #tpu.memory_space<vmem>>, %arg33: memref<4x1x32xf32, #tpu.memory_space<vmem>>, %arg34: memref<4x1x32xf32, #tpu.memory_space<vmem>>, %arg35: memref<4x32x64xbf16, #tpu.memory_space<vmem>>, %arg36: memref<1x64xf32, #tpu.memory_space<vmem>>, %arg37: memref<1x64xf32, #tpu.memory_space<vmem>>, %arg38: memref<12x64x16xbf16, #tpu.memory_space<vmem>>, %arg39: memref<12x1x16xf32, #tpu.memory_space<vmem>>, %arg40: memref<4x16x16xf32, #tpu.memory_space<vmem>>, %arg41: memref<4x16x64xbf16, #tpu.memory_space<vmem>>, %arg42: memref<1x64xf32, #tpu.memory_space<vmem>>, %arg43: memref<1x64xf32, #tpu.memory_space<vmem>>, %arg44: memref<1x64xf32, #tpu.memory_space<vmem>>, %arg45: memref<64x256xbf16, #tpu.memory_space<vmem>>, %arg46: memref<1x256xf32, #tpu.memory_space<vmem>>, %arg47: memref<256x64xbf16, #tpu.memory_space<vmem>>, %arg48: memref<1x64xf32, #tpu.memory_space<vmem>>, %arg49: memref<1x64xf32, #tpu.memory_space<vmem>>, %arg50: memref<1x64xf32, #tpu.memory_space<vmem>>, %arg51: memref<8x64xbf16, #tpu.memory_space<vmem>>, %arg52: memref<8x1xf32, #tpu.memory_space<vmem>>, %arg53: memref<16x1024xf32, #tpu.memory_space<vmem>>, %arg54: memref<1x8x1024xf32, #tpu.memory_space<vmem>>) attributes {dimension_semantics = [#tpu.dimension_semantics<parallel>], iteration_bounds = array<i64: 2>, scalar_prefetch = 0 : i64, scratch_operands = 0 : i64, tpu.core_type = #tpu.core_type<tc>, window_params = [{transform_indices = @transform_0, window_bounds = array<i64: 1, 64, 48>}, {pipeline_mode = #tpu.pipeline_mode<synchronous>, transform_indices = @transform_1, window_bounds = array<i64: 48, 32>}, {pipeline_mode = #tpu.pipeline_mode<synchronous>, transform_indices = @transform_2, window_bounds = array<i64: 1, 32>}, {pipeline_mode = #tpu.pipeline_mode<synchronous>, transform_indices = @transform_3, window_bounds = array<i64: 1, 32>}, {pipeline_mode = #tpu.pipeline_mode<synchronous>, transform_indices = @transform_4, window_bounds = array<i64: 1, 32>}, {pipeline_mode = #tpu.pipeline_mode<synchronous>, transform_indices = @transform_5, window_bounds = array<i64: 1, 32>}, {pipeline_mode = #tpu.pipeline_mode<synchronous>, transform_indices = @transform_6, window_bounds = array<i64: 1, 32>}, {pipeline_mode = #tpu.pipeline_mode<synchronous>, transform_indices = @transform_7, window_bounds = array<i64: 6, 32, 16>}, {pipeline_mode = #tpu.pipeline_mode<synchronous>, transform_indices = @transform_8, window_bounds = array<i64: 6, 1, 16>}, {pipeline_mode = #tpu.pipeline_mode<synchronous>, transform_indices = @transform_9, window_bounds = array<i64: 2, 64, 64>}, {pipeline_mode = #tpu.pipeline_mode<synchronous>, transform_indices = @transform_10, window_bounds = array<i64: 2, 16, 32>}, {pipeline_mode = #tpu.pipeline_mode<synchronous>, transform_indices = @transform_11, window_bounds = array<i64: 1, 32>}, {pipeline_mode = #tpu.pipeline_mode<synchronous>, transform_indices = @transform_12, window_bounds = array<i64: 1, 32>}, {pipeline_mode = #tpu.pipeline_mode<synchronous>, transform_indices = @transform_13, window_bounds = array<i64: 1, 32>}, {pipeline_mode = #tpu.pipeline_mode<synchronous>, transform_indices = @transform_14, window_bounds = array<i64: 32, 128>}, {pipeline_mode = #tpu.pipeline_mode<synchronous>, transform_indices = @transform_15, window_bounds = array<i64: 1, 128>}, {pipeline_mode = #tpu.pipeline_mode<synchronous>, transform_indices = @transform_16, window_bounds = array<i64: 128, 32>}, {pipeline_mode = #tpu.pipeline_mode<synchronous>, transform_indices = @transform_17, window_bounds = array<i64: 1, 32>}, {pipeline_mode = #tpu.pipeline_mode<synchronous>, transform_indices = @transform_18, window_bounds = array<i64: 1, 32>}, {pipeline_mode = #tpu.pipeline_mode<synchronous>, transform_indices = @transform_19, window_bounds = array<i64: 1, 32>}, {pipeline_mode = #tpu.pipeline_mode<synchronous>, transform_indices = @transform_20, window_bounds = array<i64: 6, 32, 16>}, {pipeline_mode = #tpu.pipeline_mode<synchronous>, transform_indices = @transform_21, window_bounds = array<i64: 6, 1, 16>}, {pipeline_mode = #tpu.pipeline_mode<synchronous>, transform_indices = @transform_22, window_bounds = array<i64: 2, 64, 64>}, {pipeline_mode = #tpu.pipeline_mode<synchronous>, transform_indices = @transform_23, window_bounds = array<i64: 2, 16, 32>}, {pipeline_mode = #tpu.pipeline_mode<synchronous>, transform_indices = @transform_24, window_bounds = array<i64: 1, 32>}, {pipeline_mode = #tpu.pipeline_mode<synchronous>, transform_indices = @transform_25, window_bounds = array<i64: 1, 32>}, {pipeline_mode = #tpu.pipeline_mode<synchronous>, transform_indices = @transform_26, window_bounds = array<i64: 1, 32>}, {pipeline_mode = #tpu.pipeline_mode<synchronous>, transform_indices = @transform_27, window_bounds = array<i64: 32, 128>}, {pipeline_mode = #tpu.pipeline_mode<synchronous>, transform_indices = @transform_28, window_bounds = array<i64: 1, 128>}, {pipeline_mode = #tpu.pipeline_mode<synchronous>, transform_indices = @transform_29, window_bounds = array<i64: 128, 32>}, {pipeline_mode = #tpu.pipeline_mode<synchronous>, transform_indices = @transform_30, window_bounds = array<i64: 1, 32>}, {pipeline_mode = #tpu.pipeline_mode<synchronous>, transform_indices = @transform_31, window_bounds = array<i64: 4, 16, 64>}, {pipeline_mode = #tpu.pipeline_mode<synchronous>, transform_indices = @transform_32, window_bounds = array<i64: 4, 1, 32>}, {pipeline_mode = #tpu.pipeline_mode<synchronous>, transform_indices = @transform_33, window_bounds = array<i64: 4, 1, 32>}, {pipeline_mode = #tpu.pipeline_mode<synchronous>, transform_indices = @transform_34, window_bounds = array<i64: 4, 32, 64>}, {pipeline_mode = #tpu.pipeline_mode<synchronous>, transform_indices = @transform_35, window_bounds = array<i64: 1, 64>}, {pipeline_mode = #tpu.pipeline_mode<synchronous>, transform_indices = @transform_36, window_bounds = array<i64: 1, 64>}, {pipeline_mode = #tpu.pipeline_mode<synchronous>, transform_indices = @transform_37, window_bounds = array<i64: 12, 64, 16>}, {pipeline_mode = #tpu.pipeline_mode<synchronous>, transform_indices = @transform_38, window_bounds = array<i64: 12, 1, 16>}, {pipeline_mode = #tpu.pipeline_mode<synchronous>, transform_indices = @transform_39, window_bounds = array<i64: 4, 16, 16>}, {pipeline_mode = #tpu.pipeline_mode<synchronous>, transform_indices = @transform_40, window_bounds = array<i64: 4, 16, 64>}, {pipeline_mode = #tpu.pipeline_mode<synchronous>, transform_indices = @transform_41, window_bounds = array<i64: 1, 64>}, {pipeline_mode = #tpu.pipeline_mode<synchronous>, transform_indices = @transform_42, window_bounds = array<i64: 1, 64>}, {pipeline_mode = #tpu.pipeline_mode<synchronous>, transform_indices = @transform_43, window_bounds = array<i64: 1, 64>}, {pipeline_mode = #tpu.pipeline_mode<synchronous>, transform_indices = @transform_44, window_bounds = array<i64: 64, 256>}, {pipeline_mode = #tpu.pipeline_mode<synchronous>, transform_indices = @transform_45, window_bounds = array<i64: 1, 256>}, {pipeline_mode = #tpu.pipeline_mode<synchronous>, transform_indices = @transform_46, window_bounds = array<i64: 256, 64>}, {pipeline_mode = #tpu.pipeline_mode<synchronous>, transform_indices = @transform_47, window_bounds = array<i64: 1, 64>}, {pipeline_mode = #tpu.pipeline_mode<synchronous>, transform_indices = @transform_48, window_bounds = array<i64: 1, 64>}, {pipeline_mode = #tpu.pipeline_mode<synchronous>, transform_indices = @transform_49, window_bounds = array<i64: 1, 64>}, {pipeline_mode = #tpu.pipeline_mode<synchronous>, transform_indices = @transform_50, window_bounds = array<i64: 8, 64>}, {pipeline_mode = #tpu.pipeline_mode<synchronous>, transform_indices = @transform_51, window_bounds = array<i64: 8, 1>}, {pipeline_mode = #tpu.pipeline_mode<synchronous>, transform_indices = @transform_52, window_bounds = array<i64: 16, 1024>}, {transform_indices = @transform_53, window_bounds = array<i64: 1, 8, 1024>}]} {
    %c0 = arith.constant 0 : index
    %c0_0 = arith.constant 0 : index
    %c0_1 = arith.constant 0 : index
    %0 = vector.load %arg1[%c0, %c0_0, %c0_1] : memref<1x64x48xbf16, #tpu.memory_space<vmem>>, vector<1x64x48xbf16>
    %1 = vector.shape_cast %0 : vector<1x64x48xbf16> to vector<64x48xbf16>
    %c0_2 = arith.constant 0 : index
    %c0_3 = arith.constant 0 : index
    %2 = vector.load %arg2[%c0_2, %c0_3] : memref<48x32xbf16, #tpu.memory_space<vmem>>, vector<48x32xbf16>
    %cst = arith.constant dense<0.000000e+00> : vector<64x32xf32>
    %3 = tpu.matmul %1, %2, %cst {dimension_numbers = #tpu.dot_dimension_numbers<[1], [0], [0], [1], [0, 0, 1, 1], [], []>} : vector<64x48xbf16>, vector<48x32xbf16>, vector<64x32xf32> -> vector<64x32xf32>
    %c0_4 = arith.constant 0 : index
    %c0_5 = arith.constant 0 : index
    %4 = vector.load %arg3[%c0_4, %c0_5] : memref<1x32xf32, #tpu.memory_space<vmem>>, vector<1x32xf32>
    %5 = vector.broadcast %4 : vector<1x32xf32> to vector<64x32xf32>
    %6 = arith.addf %3, %5 : vector<64x32xf32>
    %c0_6 = arith.constant 0 : index
    %c0_7 = arith.constant 0 : index
    %7 = vector.load %arg4[%c0_6, %c0_7] : memref<1x32xf32, #tpu.memory_space<vmem>>, vector<1x32xf32>
    %c0_8 = arith.constant 0 : index
    %c0_9 = arith.constant 0 : index
    %8 = vector.load %arg5[%c0_8, %c0_9] : memref<1x32xf32, #tpu.memory_space<vmem>>, vector<1x32xf32>
    %cst_10 = arith.constant dense<0.000000e+00> : vector<64xf32>
    %9 = vector.multi_reduction <add>, %6, %cst_10 [1] : vector<64x32xf32> to vector<64xf32>
    %10 = vector.shape_cast %9 : vector<64xf32> to vector<64x1xf32>
    %cst_11 = arith.constant 3.200000e+01 : f32
    %11 = vector.broadcast %cst_11 : f32 to vector<64x1xf32>
    %12 = arith.divf %10, %11 : vector<64x1xf32>
    %13 = vector.broadcast %12 : vector<64x1xf32> to vector<64x32xf32>
    %14 = arith.subf %6, %13 : vector<64x32xf32>
    %15 = arith.mulf %14, %14 : vector<64x32xf32>
    %cst_12 = arith.constant dense<0.000000e+00> : vector<64xf32>
    %16 = vector.multi_reduction <add>, %15, %cst_12 [1] : vector<64x32xf32> to vector<64xf32>
    %17 = vector.shape_cast %16 : vector<64xf32> to vector<64x1xf32>
    %cst_13 = arith.constant 3.200000e+01 : f32
    %18 = vector.broadcast %cst_13 : f32 to vector<64x1xf32>
    %19 = arith.divf %17, %18 : vector<64x1xf32>
    %20 = vector.broadcast %12 : vector<64x1xf32> to vector<64x32xf32>
    %21 = arith.subf %6, %20 : vector<64x32xf32>
    %cst_14 = arith.constant 9.99999974E-6 : f32
    %22 = vector.broadcast %cst_14 : f32 to vector<64x1xf32>
    %23 = arith.addf %19, %22 : vector<64x1xf32>
    %24 = math.rsqrt %23 : vector<64x1xf32>
    %25 = vector.broadcast %24 : vector<64x1xf32> to vector<64x32xf32>
    %26 = arith.mulf %21, %25 : vector<64x32xf32>
    %27 = vector.broadcast %7 : vector<1x32xf32> to vector<64x32xf32>
    %28 = arith.mulf %26, %27 : vector<64x32xf32>
    %29 = vector.broadcast %8 : vector<1x32xf32> to vector<64x32xf32>
    %30 = arith.addf %28, %29 : vector<64x32xf32>
    %c0_15 = arith.constant 0 : index
    %c0_16 = arith.constant 0 : index
    %31 = vector.load %arg6[%c0_15, %c0_16] : memref<1x32xf32, #tpu.memory_space<vmem>>, vector<1x32xf32>
    %c0_17 = arith.constant 0 : index
    %c0_18 = arith.constant 0 : index
    %32 = vector.load %arg7[%c0_17, %c0_18] : memref<1x32xf32, #tpu.memory_space<vmem>>, vector<1x32xf32>
    %cst_19 = arith.constant dense<0.000000e+00> : vector<64xf32>
    %33 = vector.multi_reduction <add>, %30, %cst_19 [1] : vector<64x32xf32> to vector<64xf32>
    %34 = vector.shape_cast %33 : vector<64xf32> to vector<64x1xf32>
    %cst_20 = arith.constant 3.200000e+01 : f32
    %35 = vector.broadcast %cst_20 : f32 to vector<64x1xf32>
    %36 = arith.divf %34, %35 : vector<64x1xf32>
    %37 = vector.broadcast %36 : vector<64x1xf32> to vector<64x32xf32>
    %38 = arith.subf %30, %37 : vector<64x32xf32>
    %39 = arith.mulf %38, %38 : vector<64x32xf32>
    %cst_21 = arith.constant dense<0.000000e+00> : vector<64xf32>
    %40 = vector.multi_reduction <add>, %39, %cst_21 [1] : vector<64x32xf32> to vector<64xf32>
    %41 = vector.shape_cast %40 : vector<64xf32> to vector<64x1xf32>
    %cst_22 = arith.constant 3.200000e+01 : f32
    %42 = vector.broadcast %cst_22 : f32 to vector<64x1xf32>
    %43 = arith.divf %41, %42 : vector<64x1xf32>
    %44 = vector.broadcast %36 : vector<64x1xf32> to vector<64x32xf32>
    %45 = arith.subf %30, %44 : vector<64x32xf32>
    %cst_23 = arith.constant 9.99999974E-6 : f32
    %46 = vector.broadcast %cst_23 : f32 to vector<64x1xf32>
    %47 = arith.addf %43, %46 : vector<64x1xf32>
    %48 = math.rsqrt %47 : vector<64x1xf32>
    %49 = vector.broadcast %48 : vector<64x1xf32> to vector<64x32xf32>
    %50 = arith.mulf %45, %49 : vector<64x32xf32>
    %51 = vector.broadcast %31 : vector<1x32xf32> to vector<64x32xf32>
    %52 = arith.mulf %50, %51 : vector<64x32xf32>
    %53 = vector.broadcast %32 : vector<1x32xf32> to vector<64x32xf32>
    %54 = arith.addf %52, %53 : vector<64x32xf32>
    %55 = arith.truncf %54 : vector<64x32xf32> to vector<64x32xbf16>
    %c0_24 = arith.constant 0 : index
    %c0_25 = arith.constant 0 : index
    %56 = vector.load %arg12[%c0_24, %c0_25] : memref<1x32xf32, #tpu.memory_space<vmem>>, vector<1x32xf32>
    %57 = vector.broadcast %56 : vector<1x32xf32> to vector<64x32xf32>
    %58 = arith.addf %30, %57 : vector<64x32xf32>
    %c0_26 = arith.constant 0 : index
    %c0_27 = arith.constant 0 : index
    %c0_28 = arith.constant 0 : index
    %59 = vector.load %arg8[%c0_26, %c0_27, %c0_28] : memref<6x32x16xbf16, #tpu.memory_space<vmem>>, vector<1x32x16xbf16>
    %60 = vector.shape_cast %59 : vector<1x32x16xbf16> to vector<32x16xbf16>
    %cst_29 = arith.constant dense<0.000000e+00> : vector<64x16xf32>
    %61 = tpu.matmul %55, %60, %cst_29 {dimension_numbers = #tpu.dot_dimension_numbers<[1], [0], [0], [1], [0, 0, 1, 1], [], []>} : vector<64x32xbf16>, vector<32x16xbf16>, vector<64x16xf32> -> vector<64x16xf32>
    %c0_30 = arith.constant 0 : index
    %c0_31 = arith.constant 0 : index
    %c0_32 = arith.constant 0 : index
    %62 = vector.load %arg9[%c0_30, %c0_31, %c0_32] : memref<6x1x16xf32, #tpu.memory_space<vmem>>, vector<1x1x16xf32>
    %63 = vector.shape_cast %62 : vector<1x1x16xf32> to vector<1x16xf32>
    %64 = vector.broadcast %63 : vector<1x16xf32> to vector<64x16xf32>
    %65 = arith.addf %61, %64 : vector<64x16xf32>
    %c2 = arith.constant 2 : index
    %c0_33 = arith.constant 0 : index
    %c0_34 = arith.constant 0 : index
    %66 = vector.load %arg8[%c2, %c0_33, %c0_34] : memref<6x32x16xbf16, #tpu.memory_space<vmem>>, vector<1x32x16xbf16>
    %67 = vector.shape_cast %66 : vector<1x32x16xbf16> to vector<32x16xbf16>
    %cst_35 = arith.constant dense<0.000000e+00> : vector<64x16xf32>
    %68 = tpu.matmul %55, %67, %cst_35 {dimension_numbers = #tpu.dot_dimension_numbers<[1], [0], [0], [1], [0, 0, 1, 1], [], []>} : vector<64x32xbf16>, vector<32x16xbf16>, vector<64x16xf32> -> vector<64x16xf32>
    %c2_36 = arith.constant 2 : index
    %c0_37 = arith.constant 0 : index
    %c0_38 = arith.constant 0 : index
    %69 = vector.load %arg9[%c2_36, %c0_37, %c0_38] : memref<6x1x16xf32, #tpu.memory_space<vmem>>, vector<1x1x16xf32>
    %70 = vector.shape_cast %69 : vector<1x1x16xf32> to vector<1x16xf32>
    %71 = vector.broadcast %70 : vector<1x16xf32> to vector<64x16xf32>
    %72 = arith.addf %68, %71 : vector<64x16xf32>
    %c4 = arith.constant 4 : index
    %c0_39 = arith.constant 0 : index
    %c0_40 = arith.constant 0 : index
    %73 = vector.load %arg8[%c4, %c0_39, %c0_40] : memref<6x32x16xbf16, #tpu.memory_space<vmem>>, vector<1x32x16xbf16>
    %74 = vector.shape_cast %73 : vector<1x32x16xbf16> to vector<32x16xbf16>
    %cst_41 = arith.constant dense<0.000000e+00> : vector<64x16xf32>
    %75 = tpu.matmul %55, %74, %cst_41 {dimension_numbers = #tpu.dot_dimension_numbers<[1], [0], [0], [1], [0, 0, 1, 1], [], []>} : vector<64x32xbf16>, vector<32x16xbf16>, vector<64x16xf32> -> vector<64x16xf32>
    %c4_42 = arith.constant 4 : index
    %c0_43 = arith.constant 0 : index
    %c0_44 = arith.constant 0 : index
    %76 = vector.load %arg9[%c4_42, %c0_43, %c0_44] : memref<6x1x16xf32, #tpu.memory_space<vmem>>, vector<1x1x16xf32>
    %77 = vector.shape_cast %76 : vector<1x1x16xf32> to vector<1x16xf32>
    %78 = vector.broadcast %77 : vector<1x16xf32> to vector<64x16xf32>
    %79 = arith.addf %75, %78 : vector<64x16xf32>
    %80 = arith.truncf %65 : vector<64x16xf32> to vector<64x16xbf16>
    %81 = arith.truncf %72 : vector<64x16xf32> to vector<64x16xbf16>
    %cst_45 = arith.constant dense<0.000000e+00> : vector<64x64xf32>
    %82 = tpu.matmul %80, %81, %cst_45 {dimension_numbers = #tpu.dot_dimension_numbers<[1], [1], [0], [0], [0, 0, 1, 0], [], []>} : vector<64x16xbf16>, vector<64x16xbf16>, vector<64x64xf32> -> vector<64x64xf32>
    %c0_46 = arith.constant 0 : index
    %c0_47 = arith.constant 0 : index
    %c0_48 = arith.constant 0 : index
    %83 = vector.load %arg10[%c0_46, %c0_47, %c0_48] : memref<2x64x64xf32, #tpu.memory_space<vmem>>, vector<1x64x64xf32>
    %84 = vector.shape_cast %83 : vector<1x64x64xf32> to vector<64x64xf32>
    %85 = arith.addf %82, %84 : vector<64x64xf32>
    %cst_49 = arith.constant dense<0xFF800000> : vector<64xf32>
    %86 = vector.multi_reduction <maximumf>, %85, %cst_49 [1] : vector<64x64xf32> to vector<64xf32>
    %87 = vector.shape_cast %86 : vector<64xf32> to vector<64x1xf32>
    %88 = vector.broadcast %87 : vector<64x1xf32> to vector<64x64xf32>
    %89 = arith.subf %85, %88 : vector<64x64xf32>
    %90 = math.exp %89 : vector<64x64xf32>
    %cst_50 = arith.constant dense<0.000000e+00> : vector<64xf32>
    %91 = vector.multi_reduction <add>, %90, %cst_50 [1] : vector<64x64xf32> to vector<64xf32>
    %92 = vector.shape_cast %91 : vector<64xf32> to vector<64x1xf32>
    %93 = tpu.reciprocal %92 {approx = true} : vector<64x1xf32> -> vector<64x1xf32>
    %94 = vector.broadcast %93 : vector<64x1xf32> to vector<64x64xf32>
    %95 = arith.mulf %90, %94 : vector<64x64xf32>
    %96 = arith.truncf %95 : vector<64x64xf32> to vector<64x64xbf16>
    %97 = arith.truncf %79 : vector<64x16xf32> to vector<64x16xbf16>
    %cst_51 = arith.constant dense<0.000000e+00> : vector<64x16xf32>
    %98 = tpu.matmul %96, %97, %cst_51 {dimension_numbers = #tpu.dot_dimension_numbers<[1], [0], [0], [1], [0, 0, 1, 1], [], []>} : vector<64x64xbf16>, vector<64x16xbf16>, vector<64x16xf32> -> vector<64x16xf32>
    %99 = arith.truncf %98 : vector<64x16xf32> to vector<64x16xbf16>
    %c0_52 = arith.constant 0 : index
    %c0_53 = arith.constant 0 : index
    %c0_54 = arith.constant 0 : index
    %100 = vector.load %arg11[%c0_52, %c0_53, %c0_54] : memref<2x16x32xbf16, #tpu.memory_space<vmem>>, vector<1x16x32xbf16>
    %101 = vector.shape_cast %100 : vector<1x16x32xbf16> to vector<16x32xbf16>
    %cst_55 = arith.constant dense<0.000000e+00> : vector<64x32xf32>
    %102 = tpu.matmul %99, %101, %cst_55 {dimension_numbers = #tpu.dot_dimension_numbers<[1], [0], [0], [1], [0, 0, 1, 1], [], []>} : vector<64x16xbf16>, vector<16x32xbf16>, vector<64x32xf32> -> vector<64x32xf32>
    %103 = arith.addf %58, %102 : vector<64x32xf32>
    %c1 = arith.constant 1 : index
    %c0_56 = arith.constant 0 : index
    %c0_57 = arith.constant 0 : index
    %104 = vector.load %arg8[%c1, %c0_56, %c0_57] : memref<6x32x16xbf16, #tpu.memory_space<vmem>>, vector<1x32x16xbf16>
    %105 = vector.shape_cast %104 : vector<1x32x16xbf16> to vector<32x16xbf16>
    %cst_58 = arith.constant dense<0.000000e+00> : vector<64x16xf32>
    %106 = tpu.matmul %55, %105, %cst_58 {dimension_numbers = #tpu.dot_dimension_numbers<[1], [0], [0], [1], [0, 0, 1, 1], [], []>} : vector<64x32xbf16>, vector<32x16xbf16>, vector<64x16xf32> -> vector<64x16xf32>
    %c1_59 = arith.constant 1 : index
    %c0_60 = arith.constant 0 : index
    %c0_61 = arith.constant 0 : index
    %107 = vector.load %arg9[%c1_59, %c0_60, %c0_61] : memref<6x1x16xf32, #tpu.memory_space<vmem>>, vector<1x1x16xf32>
    %108 = vector.shape_cast %107 : vector<1x1x16xf32> to vector<1x16xf32>
    %109 = vector.broadcast %108 : vector<1x16xf32> to vector<64x16xf32>
    %110 = arith.addf %106, %109 : vector<64x16xf32>
    %c3 = arith.constant 3 : index
    %c0_62 = arith.constant 0 : index
    %c0_63 = arith.constant 0 : index
    %111 = vector.load %arg8[%c3, %c0_62, %c0_63] : memref<6x32x16xbf16, #tpu.memory_space<vmem>>, vector<1x32x16xbf16>
    %112 = vector.shape_cast %111 : vector<1x32x16xbf16> to vector<32x16xbf16>
    %cst_64 = arith.constant dense<0.000000e+00> : vector<64x16xf32>
    %113 = tpu.matmul %55, %112, %cst_64 {dimension_numbers = #tpu.dot_dimension_numbers<[1], [0], [0], [1], [0, 0, 1, 1], [], []>} : vector<64x32xbf16>, vector<32x16xbf16>, vector<64x16xf32> -> vector<64x16xf32>
    %c3_65 = arith.constant 3 : index
    %c0_66 = arith.constant 0 : index
    %c0_67 = arith.constant 0 : index
    %114 = vector.load %arg9[%c3_65, %c0_66, %c0_67] : memref<6x1x16xf32, #tpu.memory_space<vmem>>, vector<1x1x16xf32>
    %115 = vector.shape_cast %114 : vector<1x1x16xf32> to vector<1x16xf32>
    %116 = vector.broadcast %115 : vector<1x16xf32> to vector<64x16xf32>
    %117 = arith.addf %113, %116 : vector<64x16xf32>
    %c5 = arith.constant 5 : index
    %c0_68 = arith.constant 0 : index
    %c0_69 = arith.constant 0 : index
    %118 = vector.load %arg8[%c5, %c0_68, %c0_69] : memref<6x32x16xbf16, #tpu.memory_space<vmem>>, vector<1x32x16xbf16>
    %119 = vector.shape_cast %118 : vector<1x32x16xbf16> to vector<32x16xbf16>
    %cst_70 = arith.constant dense<0.000000e+00> : vector<64x16xf32>
    %120 = tpu.matmul %55, %119, %cst_70 {dimension_numbers = #tpu.dot_dimension_numbers<[1], [0], [0], [1], [0, 0, 1, 1], [], []>} : vector<64x32xbf16>, vector<32x16xbf16>, vector<64x16xf32> -> vector<64x16xf32>
    %c5_71 = arith.constant 5 : index
    %c0_72 = arith.constant 0 : index
    %c0_73 = arith.constant 0 : index
    %121 = vector.load %arg9[%c5_71, %c0_72, %c0_73] : memref<6x1x16xf32, #tpu.memory_space<vmem>>, vector<1x1x16xf32>
    %122 = vector.shape_cast %121 : vector<1x1x16xf32> to vector<1x16xf32>
    %123 = vector.broadcast %122 : vector<1x16xf32> to vector<64x16xf32>
    %124 = arith.addf %120, %123 : vector<64x16xf32>
    %125 = arith.truncf %110 : vector<64x16xf32> to vector<64x16xbf16>
    %126 = arith.truncf %117 : vector<64x16xf32> to vector<64x16xbf16>
    %cst_74 = arith.constant dense<0.000000e+00> : vector<64x64xf32>
    %127 = tpu.matmul %125, %126, %cst_74 {dimension_numbers = #tpu.dot_dimension_numbers<[1], [1], [0], [0], [0, 0, 1, 0], [], []>} : vector<64x16xbf16>, vector<64x16xbf16>, vector<64x64xf32> -> vector<64x64xf32>
    %c1_75 = arith.constant 1 : index
    %c0_76 = arith.constant 0 : index
    %c0_77 = arith.constant 0 : index
    %128 = vector.load %arg10[%c1_75, %c0_76, %c0_77] : memref<2x64x64xf32, #tpu.memory_space<vmem>>, vector<1x64x64xf32>
    %129 = vector.shape_cast %128 : vector<1x64x64xf32> to vector<64x64xf32>
    %130 = arith.addf %127, %129 : vector<64x64xf32>
    %cst_78 = arith.constant dense<0xFF800000> : vector<64xf32>
    %131 = vector.multi_reduction <maximumf>, %130, %cst_78 [1] : vector<64x64xf32> to vector<64xf32>
    %132 = vector.shape_cast %131 : vector<64xf32> to vector<64x1xf32>
    %133 = vector.broadcast %132 : vector<64x1xf32> to vector<64x64xf32>
    %134 = arith.subf %130, %133 : vector<64x64xf32>
    %135 = math.exp %134 : vector<64x64xf32>
    %cst_79 = arith.constant dense<0.000000e+00> : vector<64xf32>
    %136 = vector.multi_reduction <add>, %135, %cst_79 [1] : vector<64x64xf32> to vector<64xf32>
    %137 = vector.shape_cast %136 : vector<64xf32> to vector<64x1xf32>
    %138 = tpu.reciprocal %137 {approx = true} : vector<64x1xf32> -> vector<64x1xf32>
    %139 = vector.broadcast %138 : vector<64x1xf32> to vector<64x64xf32>
    %140 = arith.mulf %135, %139 : vector<64x64xf32>
    %141 = arith.truncf %140 : vector<64x64xf32> to vector<64x64xbf16>
    %142 = arith.truncf %124 : vector<64x16xf32> to vector<64x16xbf16>
    %cst_80 = arith.constant dense<0.000000e+00> : vector<64x16xf32>
    %143 = tpu.matmul %141, %142, %cst_80 {dimension_numbers = #tpu.dot_dimension_numbers<[1], [0], [0], [1], [0, 0, 1, 1], [], []>} : vector<64x64xbf16>, vector<64x16xbf16>, vector<64x16xf32> -> vector<64x16xf32>
    %144 = arith.truncf %143 : vector<64x16xf32> to vector<64x16xbf16>
    %c1_81 = arith.constant 1 : index
    %c0_82 = arith.constant 0 : index
    %c0_83 = arith.constant 0 : index
    %145 = vector.load %arg11[%c1_81, %c0_82, %c0_83] : memref<2x16x32xbf16, #tpu.memory_space<vmem>>, vector<1x16x32xbf16>
    %146 = vector.shape_cast %145 : vector<1x16x32xbf16> to vector<16x32xbf16>
    %cst_84 = arith.constant dense<0.000000e+00> : vector<64x32xf32>
    %147 = tpu.matmul %144, %146, %cst_84 {dimension_numbers = #tpu.dot_dimension_numbers<[1], [0], [0], [1], [0, 0, 1, 1], [], []>} : vector<64x16xbf16>, vector<16x32xbf16>, vector<64x32xf32> -> vector<64x32xf32>
    %148 = arith.addf %103, %147 : vector<64x32xf32>
    %c0_85 = arith.constant 0 : index
    %c0_86 = arith.constant 0 : index
    %149 = vector.load %arg13[%c0_85, %c0_86] : memref<1x32xf32, #tpu.memory_space<vmem>>, vector<1x32xf32>
    %c0_87 = arith.constant 0 : index
    %c0_88 = arith.constant 0 : index
    %150 = vector.load %arg14[%c0_87, %c0_88] : memref<1x32xf32, #tpu.memory_space<vmem>>, vector<1x32xf32>
    %cst_89 = arith.constant dense<0.000000e+00> : vector<64xf32>
    %151 = vector.multi_reduction <add>, %148, %cst_89 [1] : vector<64x32xf32> to vector<64xf32>
    %152 = vector.shape_cast %151 : vector<64xf32> to vector<64x1xf32>
    %cst_90 = arith.constant 3.200000e+01 : f32
    %153 = vector.broadcast %cst_90 : f32 to vector<64x1xf32>
    %154 = arith.divf %152, %153 : vector<64x1xf32>
    %155 = vector.broadcast %154 : vector<64x1xf32> to vector<64x32xf32>
    %156 = arith.subf %148, %155 : vector<64x32xf32>
    %157 = arith.mulf %156, %156 : vector<64x32xf32>
    %cst_91 = arith.constant dense<0.000000e+00> : vector<64xf32>
    %158 = vector.multi_reduction <add>, %157, %cst_91 [1] : vector<64x32xf32> to vector<64xf32>
    %159 = vector.shape_cast %158 : vector<64xf32> to vector<64x1xf32>
    %cst_92 = arith.constant 3.200000e+01 : f32
    %160 = vector.broadcast %cst_92 : f32 to vector<64x1xf32>
    %161 = arith.divf %159, %160 : vector<64x1xf32>
    %162 = vector.broadcast %154 : vector<64x1xf32> to vector<64x32xf32>
    %163 = arith.subf %148, %162 : vector<64x32xf32>
    %cst_93 = arith.constant 9.99999974E-6 : f32
    %164 = vector.broadcast %cst_93 : f32 to vector<64x1xf32>
    %165 = arith.addf %161, %164 : vector<64x1xf32>
    %166 = math.rsqrt %165 : vector<64x1xf32>
    %167 = vector.broadcast %166 : vector<64x1xf32> to vector<64x32xf32>
    %168 = arith.mulf %163, %167 : vector<64x32xf32>
    %169 = vector.broadcast %149 : vector<1x32xf32> to vector<64x32xf32>
    %170 = arith.mulf %168, %169 : vector<64x32xf32>
    %171 = vector.broadcast %150 : vector<1x32xf32> to vector<64x32xf32>
    %172 = arith.addf %170, %171 : vector<64x32xf32>
    %173 = arith.truncf %172 : vector<64x32xf32> to vector<64x32xbf16>
    %c0_94 = arith.constant 0 : index
    %c0_95 = arith.constant 0 : index
    %174 = vector.load %arg15[%c0_94, %c0_95] : memref<32x128xbf16, #tpu.memory_space<vmem>>, vector<32x128xbf16>
    %cst_96 = arith.constant dense<0.000000e+00> : vector<64x128xf32>
    %175 = tpu.matmul %173, %174, %cst_96 {dimension_numbers = #tpu.dot_dimension_numbers<[1], [0], [0], [1], [0, 0, 1, 1], [], []>} : vector<64x32xbf16>, vector<32x128xbf16>, vector<64x128xf32> -> vector<64x128xf32>
    %c0_97 = arith.constant 0 : index
    %c0_98 = arith.constant 0 : index
    %176 = vector.load %arg16[%c0_97, %c0_98] : memref<1x128xf32, #tpu.memory_space<vmem>>, vector<1x128xf32>
    %177 = vector.broadcast %176 : vector<1x128xf32> to vector<64x128xf32>
    %178 = arith.addf %175, %177 : vector<64x128xf32>
    %179 = arith.mulf %178, %178 : vector<64x128xf32>
    %180 = arith.mulf %178, %179 : vector<64x128xf32>
    %cst_99 = arith.constant 4.471500e-02 : f32
    %181 = vector.broadcast %cst_99 : f32 to vector<64x128xf32>
    %182 = arith.mulf %181, %180 : vector<64x128xf32>
    %183 = arith.addf %178, %182 : vector<64x128xf32>
    %cst_100 = arith.constant 0.797884583 : f32
    %184 = vector.broadcast %cst_100 : f32 to vector<64x128xf32>
    %185 = arith.mulf %184, %183 : vector<64x128xf32>
    %186 = math.tanh %185 : vector<64x128xf32>
    %cst_101 = arith.constant 1.000000e+00 : f32
    %187 = vector.broadcast %cst_101 : f32 to vector<64x128xf32>
    %188 = arith.addf %187, %186 : vector<64x128xf32>
    %cst_102 = arith.constant 5.000000e-01 : f32
    %189 = vector.broadcast %cst_102 : f32 to vector<64x128xf32>
    %190 = arith.mulf %189, %188 : vector<64x128xf32>
    %191 = arith.mulf %178, %190 : vector<64x128xf32>
    %192 = arith.truncf %191 : vector<64x128xf32> to vector<64x128xbf16>
    %c0_103 = arith.constant 0 : index
    %c0_104 = arith.constant 0 : index
    %193 = vector.load %arg17[%c0_103, %c0_104] : memref<128x32xbf16, #tpu.memory_space<vmem>>, vector<128x32xbf16>
    %cst_105 = arith.constant dense<0.000000e+00> : vector<64x32xf32>
    %194 = tpu.matmul %192, %193, %cst_105 {dimension_numbers = #tpu.dot_dimension_numbers<[1], [0], [0], [1], [0, 0, 1, 1], [], []>} : vector<64x128xbf16>, vector<128x32xbf16>, vector<64x32xf32> -> vector<64x32xf32>
    %c0_106 = arith.constant 0 : index
    %c0_107 = arith.constant 0 : index
    %195 = vector.load %arg18[%c0_106, %c0_107] : memref<1x32xf32, #tpu.memory_space<vmem>>, vector<1x32xf32>
    %196 = vector.broadcast %195 : vector<1x32xf32> to vector<64x32xf32>
    %197 = arith.addf %194, %196 : vector<64x32xf32>
    %198 = arith.addf %148, %197 : vector<64x32xf32>
    %c0_108 = arith.constant 0 : index
    %c0_109 = arith.constant 0 : index
    %199 = vector.load %arg19[%c0_108, %c0_109] : memref<1x32xf32, #tpu.memory_space<vmem>>, vector<1x32xf32>
    %c0_110 = arith.constant 0 : index
    %c0_111 = arith.constant 0 : index
    %200 = vector.load %arg20[%c0_110, %c0_111] : memref<1x32xf32, #tpu.memory_space<vmem>>, vector<1x32xf32>
    %cst_112 = arith.constant dense<0.000000e+00> : vector<64xf32>
    %201 = vector.multi_reduction <add>, %198, %cst_112 [1] : vector<64x32xf32> to vector<64xf32>
    %202 = vector.shape_cast %201 : vector<64xf32> to vector<64x1xf32>
    %cst_113 = arith.constant 3.200000e+01 : f32
    %203 = vector.broadcast %cst_113 : f32 to vector<64x1xf32>
    %204 = arith.divf %202, %203 : vector<64x1xf32>
    %205 = vector.broadcast %204 : vector<64x1xf32> to vector<64x32xf32>
    %206 = arith.subf %198, %205 : vector<64x32xf32>
    %207 = arith.mulf %206, %206 : vector<64x32xf32>
    %cst_114 = arith.constant dense<0.000000e+00> : vector<64xf32>
    %208 = vector.multi_reduction <add>, %207, %cst_114 [1] : vector<64x32xf32> to vector<64xf32>
    %209 = vector.shape_cast %208 : vector<64xf32> to vector<64x1xf32>
    %cst_115 = arith.constant 3.200000e+01 : f32
    %210 = vector.broadcast %cst_115 : f32 to vector<64x1xf32>
    %211 = arith.divf %209, %210 : vector<64x1xf32>
    %212 = vector.broadcast %204 : vector<64x1xf32> to vector<64x32xf32>
    %213 = arith.subf %198, %212 : vector<64x32xf32>
    %cst_116 = arith.constant 9.99999974E-6 : f32
    %214 = vector.broadcast %cst_116 : f32 to vector<64x1xf32>
    %215 = arith.addf %211, %214 : vector<64x1xf32>
    %216 = math.rsqrt %215 : vector<64x1xf32>
    %217 = vector.broadcast %216 : vector<64x1xf32> to vector<64x32xf32>
    %218 = arith.mulf %213, %217 : vector<64x32xf32>
    %219 = vector.broadcast %199 : vector<1x32xf32> to vector<64x32xf32>
    %220 = arith.mulf %218, %219 : vector<64x32xf32>
    %221 = vector.broadcast %200 : vector<1x32xf32> to vector<64x32xf32>
    %222 = arith.addf %220, %221 : vector<64x32xf32>
    %223 = arith.truncf %222 : vector<64x32xf32> to vector<64x32xbf16>
    %c0_117 = arith.constant 0 : index
    %c0_118 = arith.constant 0 : index
    %224 = vector.load %arg25[%c0_117, %c0_118] : memref<1x32xf32, #tpu.memory_space<vmem>>, vector<1x32xf32>
    %225 = vector.broadcast %224 : vector<1x32xf32> to vector<64x32xf32>
    %226 = arith.addf %198, %225 : vector<64x32xf32>
    %c0_119 = arith.constant 0 : index
    %c0_120 = arith.constant 0 : index
    %c0_121 = arith.constant 0 : index
    %227 = vector.load %arg21[%c0_119, %c0_120, %c0_121] : memref<6x32x16xbf16, #tpu.memory_space<vmem>>, vector<1x32x16xbf16>
    %228 = vector.shape_cast %227 : vector<1x32x16xbf16> to vector<32x16xbf16>
    %cst_122 = arith.constant dense<0.000000e+00> : vector<64x16xf32>
    %229 = tpu.matmul %223, %228, %cst_122 {dimension_numbers = #tpu.dot_dimension_numbers<[1], [0], [0], [1], [0, 0, 1, 1], [], []>} : vector<64x32xbf16>, vector<32x16xbf16>, vector<64x16xf32> -> vector<64x16xf32>
    %c0_123 = arith.constant 0 : index
    %c0_124 = arith.constant 0 : index
    %c0_125 = arith.constant 0 : index
    %230 = vector.load %arg22[%c0_123, %c0_124, %c0_125] : memref<6x1x16xf32, #tpu.memory_space<vmem>>, vector<1x1x16xf32>
    %231 = vector.shape_cast %230 : vector<1x1x16xf32> to vector<1x16xf32>
    %232 = vector.broadcast %231 : vector<1x16xf32> to vector<64x16xf32>
    %233 = arith.addf %229, %232 : vector<64x16xf32>
    %c2_126 = arith.constant 2 : index
    %c0_127 = arith.constant 0 : index
    %c0_128 = arith.constant 0 : index
    %234 = vector.load %arg21[%c2_126, %c0_127, %c0_128] : memref<6x32x16xbf16, #tpu.memory_space<vmem>>, vector<1x32x16xbf16>
    %235 = vector.shape_cast %234 : vector<1x32x16xbf16> to vector<32x16xbf16>
    %cst_129 = arith.constant dense<0.000000e+00> : vector<64x16xf32>
    %236 = tpu.matmul %223, %235, %cst_129 {dimension_numbers = #tpu.dot_dimension_numbers<[1], [0], [0], [1], [0, 0, 1, 1], [], []>} : vector<64x32xbf16>, vector<32x16xbf16>, vector<64x16xf32> -> vector<64x16xf32>
    %c2_130 = arith.constant 2 : index
    %c0_131 = arith.constant 0 : index
    %c0_132 = arith.constant 0 : index
    %237 = vector.load %arg22[%c2_130, %c0_131, %c0_132] : memref<6x1x16xf32, #tpu.memory_space<vmem>>, vector<1x1x16xf32>
    %238 = vector.shape_cast %237 : vector<1x1x16xf32> to vector<1x16xf32>
    %239 = vector.broadcast %238 : vector<1x16xf32> to vector<64x16xf32>
    %240 = arith.addf %236, %239 : vector<64x16xf32>
    %c4_133 = arith.constant 4 : index
    %c0_134 = arith.constant 0 : index
    %c0_135 = arith.constant 0 : index
    %241 = vector.load %arg21[%c4_133, %c0_134, %c0_135] : memref<6x32x16xbf16, #tpu.memory_space<vmem>>, vector<1x32x16xbf16>
    %242 = vector.shape_cast %241 : vector<1x32x16xbf16> to vector<32x16xbf16>
    %cst_136 = arith.constant dense<0.000000e+00> : vector<64x16xf32>
    %243 = tpu.matmul %223, %242, %cst_136 {dimension_numbers = #tpu.dot_dimension_numbers<[1], [0], [0], [1], [0, 0, 1, 1], [], []>} : vector<64x32xbf16>, vector<32x16xbf16>, vector<64x16xf32> -> vector<64x16xf32>
    %c4_137 = arith.constant 4 : index
    %c0_138 = arith.constant 0 : index
    %c0_139 = arith.constant 0 : index
    %244 = vector.load %arg22[%c4_137, %c0_138, %c0_139] : memref<6x1x16xf32, #tpu.memory_space<vmem>>, vector<1x1x16xf32>
    %245 = vector.shape_cast %244 : vector<1x1x16xf32> to vector<1x16xf32>
    %246 = vector.broadcast %245 : vector<1x16xf32> to vector<64x16xf32>
    %247 = arith.addf %243, %246 : vector<64x16xf32>
    %248 = arith.truncf %233 : vector<64x16xf32> to vector<64x16xbf16>
    %249 = arith.truncf %240 : vector<64x16xf32> to vector<64x16xbf16>
    %cst_140 = arith.constant dense<0.000000e+00> : vector<64x64xf32>
    %250 = tpu.matmul %248, %249, %cst_140 {dimension_numbers = #tpu.dot_dimension_numbers<[1], [1], [0], [0], [0, 0, 1, 0], [], []>} : vector<64x16xbf16>, vector<64x16xbf16>, vector<64x64xf32> -> vector<64x64xf32>
    %c0_141 = arith.constant 0 : index
    %c0_142 = arith.constant 0 : index
    %c0_143 = arith.constant 0 : index
    %251 = vector.load %arg23[%c0_141, %c0_142, %c0_143] : memref<2x64x64xf32, #tpu.memory_space<vmem>>, vector<1x64x64xf32>
    %252 = vector.shape_cast %251 : vector<1x64x64xf32> to vector<64x64xf32>
    %253 = arith.addf %250, %252 : vector<64x64xf32>
    %cst_144 = arith.constant dense<0xFF800000> : vector<64xf32>
    %254 = vector.multi_reduction <maximumf>, %253, %cst_144 [1] : vector<64x64xf32> to vector<64xf32>
    %255 = vector.shape_cast %254 : vector<64xf32> to vector<64x1xf32>
    %256 = vector.broadcast %255 : vector<64x1xf32> to vector<64x64xf32>
    %257 = arith.subf %253, %256 : vector<64x64xf32>
    %258 = math.exp %257 : vector<64x64xf32>
    %cst_145 = arith.constant dense<0.000000e+00> : vector<64xf32>
    %259 = vector.multi_reduction <add>, %258, %cst_145 [1] : vector<64x64xf32> to vector<64xf32>
    %260 = vector.shape_cast %259 : vector<64xf32> to vector<64x1xf32>
    %261 = tpu.reciprocal %260 {approx = true} : vector<64x1xf32> -> vector<64x1xf32>
    %262 = vector.broadcast %261 : vector<64x1xf32> to vector<64x64xf32>
    %263 = arith.mulf %258, %262 : vector<64x64xf32>
    %264 = arith.truncf %263 : vector<64x64xf32> to vector<64x64xbf16>
    %265 = arith.truncf %247 : vector<64x16xf32> to vector<64x16xbf16>
    %cst_146 = arith.constant dense<0.000000e+00> : vector<64x16xf32>
    %266 = tpu.matmul %264, %265, %cst_146 {dimension_numbers = #tpu.dot_dimension_numbers<[1], [0], [0], [1], [0, 0, 1, 1], [], []>} : vector<64x64xbf16>, vector<64x16xbf16>, vector<64x16xf32> -> vector<64x16xf32>
    %267 = arith.truncf %266 : vector<64x16xf32> to vector<64x16xbf16>
    %c0_147 = arith.constant 0 : index
    %c0_148 = arith.constant 0 : index
    %c0_149 = arith.constant 0 : index
    %268 = vector.load %arg24[%c0_147, %c0_148, %c0_149] : memref<2x16x32xbf16, #tpu.memory_space<vmem>>, vector<1x16x32xbf16>
    %269 = vector.shape_cast %268 : vector<1x16x32xbf16> to vector<16x32xbf16>
    %cst_150 = arith.constant dense<0.000000e+00> : vector<64x32xf32>
    %270 = tpu.matmul %267, %269, %cst_150 {dimension_numbers = #tpu.dot_dimension_numbers<[1], [0], [0], [1], [0, 0, 1, 1], [], []>} : vector<64x16xbf16>, vector<16x32xbf16>, vector<64x32xf32> -> vector<64x32xf32>
    %271 = arith.addf %226, %270 : vector<64x32xf32>
    %c1_151 = arith.constant 1 : index
    %c0_152 = arith.constant 0 : index
    %c0_153 = arith.constant 0 : index
    %272 = vector.load %arg21[%c1_151, %c0_152, %c0_153] : memref<6x32x16xbf16, #tpu.memory_space<vmem>>, vector<1x32x16xbf16>
    %273 = vector.shape_cast %272 : vector<1x32x16xbf16> to vector<32x16xbf16>
    %cst_154 = arith.constant dense<0.000000e+00> : vector<64x16xf32>
    %274 = tpu.matmul %223, %273, %cst_154 {dimension_numbers = #tpu.dot_dimension_numbers<[1], [0], [0], [1], [0, 0, 1, 1], [], []>} : vector<64x32xbf16>, vector<32x16xbf16>, vector<64x16xf32> -> vector<64x16xf32>
    %c1_155 = arith.constant 1 : index
    %c0_156 = arith.constant 0 : index
    %c0_157 = arith.constant 0 : index
    %275 = vector.load %arg22[%c1_155, %c0_156, %c0_157] : memref<6x1x16xf32, #tpu.memory_space<vmem>>, vector<1x1x16xf32>
    %276 = vector.shape_cast %275 : vector<1x1x16xf32> to vector<1x16xf32>
    %277 = vector.broadcast %276 : vector<1x16xf32> to vector<64x16xf32>
    %278 = arith.addf %274, %277 : vector<64x16xf32>
    %c3_158 = arith.constant 3 : index
    %c0_159 = arith.constant 0 : index
    %c0_160 = arith.constant 0 : index
    %279 = vector.load %arg21[%c3_158, %c0_159, %c0_160] : memref<6x32x16xbf16, #tpu.memory_space<vmem>>, vector<1x32x16xbf16>
    %280 = vector.shape_cast %279 : vector<1x32x16xbf16> to vector<32x16xbf16>
    %cst_161 = arith.constant dense<0.000000e+00> : vector<64x16xf32>
    %281 = tpu.matmul %223, %280, %cst_161 {dimension_numbers = #tpu.dot_dimension_numbers<[1], [0], [0], [1], [0, 0, 1, 1], [], []>} : vector<64x32xbf16>, vector<32x16xbf16>, vector<64x16xf32> -> vector<64x16xf32>
    %c3_162 = arith.constant 3 : index
    %c0_163 = arith.constant 0 : index
    %c0_164 = arith.constant 0 : index
    %282 = vector.load %arg22[%c3_162, %c0_163, %c0_164] : memref<6x1x16xf32, #tpu.memory_space<vmem>>, vector<1x1x16xf32>
    %283 = vector.shape_cast %282 : vector<1x1x16xf32> to vector<1x16xf32>
    %284 = vector.broadcast %283 : vector<1x16xf32> to vector<64x16xf32>
    %285 = arith.addf %281, %284 : vector<64x16xf32>
    %c5_165 = arith.constant 5 : index
    %c0_166 = arith.constant 0 : index
    %c0_167 = arith.constant 0 : index
    %286 = vector.load %arg21[%c5_165, %c0_166, %c0_167] : memref<6x32x16xbf16, #tpu.memory_space<vmem>>, vector<1x32x16xbf16>
    %287 = vector.shape_cast %286 : vector<1x32x16xbf16> to vector<32x16xbf16>
    %cst_168 = arith.constant dense<0.000000e+00> : vector<64x16xf32>
    %288 = tpu.matmul %223, %287, %cst_168 {dimension_numbers = #tpu.dot_dimension_numbers<[1], [0], [0], [1], [0, 0, 1, 1], [], []>} : vector<64x32xbf16>, vector<32x16xbf16>, vector<64x16xf32> -> vector<64x16xf32>
    %c5_169 = arith.constant 5 : index
    %c0_170 = arith.constant 0 : index
    %c0_171 = arith.constant 0 : index
    %289 = vector.load %arg22[%c5_169, %c0_170, %c0_171] : memref<6x1x16xf32, #tpu.memory_space<vmem>>, vector<1x1x16xf32>
    %290 = vector.shape_cast %289 : vector<1x1x16xf32> to vector<1x16xf32>
    %291 = vector.broadcast %290 : vector<1x16xf32> to vector<64x16xf32>
    %292 = arith.addf %288, %291 : vector<64x16xf32>
    %293 = arith.truncf %278 : vector<64x16xf32> to vector<64x16xbf16>
    %294 = arith.truncf %285 : vector<64x16xf32> to vector<64x16xbf16>
    %cst_172 = arith.constant dense<0.000000e+00> : vector<64x64xf32>
    %295 = tpu.matmul %293, %294, %cst_172 {dimension_numbers = #tpu.dot_dimension_numbers<[1], [1], [0], [0], [0, 0, 1, 0], [], []>} : vector<64x16xbf16>, vector<64x16xbf16>, vector<64x64xf32> -> vector<64x64xf32>
    %c1_173 = arith.constant 1 : index
    %c0_174 = arith.constant 0 : index
    %c0_175 = arith.constant 0 : index
    %296 = vector.load %arg23[%c1_173, %c0_174, %c0_175] : memref<2x64x64xf32, #tpu.memory_space<vmem>>, vector<1x64x64xf32>
    %297 = vector.shape_cast %296 : vector<1x64x64xf32> to vector<64x64xf32>
    %298 = arith.addf %295, %297 : vector<64x64xf32>
    %cst_176 = arith.constant dense<0xFF800000> : vector<64xf32>
    %299 = vector.multi_reduction <maximumf>, %298, %cst_176 [1] : vector<64x64xf32> to vector<64xf32>
    %300 = vector.shape_cast %299 : vector<64xf32> to vector<64x1xf32>
    %301 = vector.broadcast %300 : vector<64x1xf32> to vector<64x64xf32>
    %302 = arith.subf %298, %301 : vector<64x64xf32>
    %303 = math.exp %302 : vector<64x64xf32>
    %cst_177 = arith.constant dense<0.000000e+00> : vector<64xf32>
    %304 = vector.multi_reduction <add>, %303, %cst_177 [1] : vector<64x64xf32> to vector<64xf32>
    %305 = vector.shape_cast %304 : vector<64xf32> to vector<64x1xf32>
    %306 = tpu.reciprocal %305 {approx = true} : vector<64x1xf32> -> vector<64x1xf32>
    %307 = vector.broadcast %306 : vector<64x1xf32> to vector<64x64xf32>
    %308 = arith.mulf %303, %307 : vector<64x64xf32>
    %309 = arith.truncf %308 : vector<64x64xf32> to vector<64x64xbf16>
    %310 = arith.truncf %292 : vector<64x16xf32> to vector<64x16xbf16>
    %cst_178 = arith.constant dense<0.000000e+00> : vector<64x16xf32>
    %311 = tpu.matmul %309, %310, %cst_178 {dimension_numbers = #tpu.dot_dimension_numbers<[1], [0], [0], [1], [0, 0, 1, 1], [], []>} : vector<64x64xbf16>, vector<64x16xbf16>, vector<64x16xf32> -> vector<64x16xf32>
    %312 = arith.truncf %311 : vector<64x16xf32> to vector<64x16xbf16>
    %c1_179 = arith.constant 1 : index
    %c0_180 = arith.constant 0 : index
    %c0_181 = arith.constant 0 : index
    %313 = vector.load %arg24[%c1_179, %c0_180, %c0_181] : memref<2x16x32xbf16, #tpu.memory_space<vmem>>, vector<1x16x32xbf16>
    %314 = vector.shape_cast %313 : vector<1x16x32xbf16> to vector<16x32xbf16>
    %cst_182 = arith.constant dense<0.000000e+00> : vector<64x32xf32>
    %315 = tpu.matmul %312, %314, %cst_182 {dimension_numbers = #tpu.dot_dimension_numbers<[1], [0], [0], [1], [0, 0, 1, 1], [], []>} : vector<64x16xbf16>, vector<16x32xbf16>, vector<64x32xf32> -> vector<64x32xf32>
    %316 = arith.addf %271, %315 : vector<64x32xf32>
    %c0_183 = arith.constant 0 : index
    %c0_184 = arith.constant 0 : index
    %317 = vector.load %arg26[%c0_183, %c0_184] : memref<1x32xf32, #tpu.memory_space<vmem>>, vector<1x32xf32>
    %c0_185 = arith.constant 0 : index
    %c0_186 = arith.constant 0 : index
    %318 = vector.load %arg27[%c0_185, %c0_186] : memref<1x32xf32, #tpu.memory_space<vmem>>, vector<1x32xf32>
    %cst_187 = arith.constant dense<0.000000e+00> : vector<64xf32>
    %319 = vector.multi_reduction <add>, %316, %cst_187 [1] : vector<64x32xf32> to vector<64xf32>
    %320 = vector.shape_cast %319 : vector<64xf32> to vector<64x1xf32>
    %cst_188 = arith.constant 3.200000e+01 : f32
    %321 = vector.broadcast %cst_188 : f32 to vector<64x1xf32>
    %322 = arith.divf %320, %321 : vector<64x1xf32>
    %323 = vector.broadcast %322 : vector<64x1xf32> to vector<64x32xf32>
    %324 = arith.subf %316, %323 : vector<64x32xf32>
    %325 = arith.mulf %324, %324 : vector<64x32xf32>
    %cst_189 = arith.constant dense<0.000000e+00> : vector<64xf32>
    %326 = vector.multi_reduction <add>, %325, %cst_189 [1] : vector<64x32xf32> to vector<64xf32>
    %327 = vector.shape_cast %326 : vector<64xf32> to vector<64x1xf32>
    %cst_190 = arith.constant 3.200000e+01 : f32
    %328 = vector.broadcast %cst_190 : f32 to vector<64x1xf32>
    %329 = arith.divf %327, %328 : vector<64x1xf32>
    %330 = vector.broadcast %322 : vector<64x1xf32> to vector<64x32xf32>
    %331 = arith.subf %316, %330 : vector<64x32xf32>
    %cst_191 = arith.constant 9.99999974E-6 : f32
    %332 = vector.broadcast %cst_191 : f32 to vector<64x1xf32>
    %333 = arith.addf %329, %332 : vector<64x1xf32>
    %334 = math.rsqrt %333 : vector<64x1xf32>
    %335 = vector.broadcast %334 : vector<64x1xf32> to vector<64x32xf32>
    %336 = arith.mulf %331, %335 : vector<64x32xf32>
    %337 = vector.broadcast %317 : vector<1x32xf32> to vector<64x32xf32>
    %338 = arith.mulf %336, %337 : vector<64x32xf32>
    %339 = vector.broadcast %318 : vector<1x32xf32> to vector<64x32xf32>
    %340 = arith.addf %338, %339 : vector<64x32xf32>
    %341 = arith.truncf %340 : vector<64x32xf32> to vector<64x32xbf16>
    %c0_192 = arith.constant 0 : index
    %c0_193 = arith.constant 0 : index
    %342 = vector.load %arg28[%c0_192, %c0_193] : memref<32x128xbf16, #tpu.memory_space<vmem>>, vector<32x128xbf16>
    %cst_194 = arith.constant dense<0.000000e+00> : vector<64x128xf32>
    %343 = tpu.matmul %341, %342, %cst_194 {dimension_numbers = #tpu.dot_dimension_numbers<[1], [0], [0], [1], [0, 0, 1, 1], [], []>} : vector<64x32xbf16>, vector<32x128xbf16>, vector<64x128xf32> -> vector<64x128xf32>
    %c0_195 = arith.constant 0 : index
    %c0_196 = arith.constant 0 : index
    %344 = vector.load %arg29[%c0_195, %c0_196] : memref<1x128xf32, #tpu.memory_space<vmem>>, vector<1x128xf32>
    %345 = vector.broadcast %344 : vector<1x128xf32> to vector<64x128xf32>
    %346 = arith.addf %343, %345 : vector<64x128xf32>
    %347 = arith.mulf %346, %346 : vector<64x128xf32>
    %348 = arith.mulf %346, %347 : vector<64x128xf32>
    %cst_197 = arith.constant 4.471500e-02 : f32
    %349 = vector.broadcast %cst_197 : f32 to vector<64x128xf32>
    %350 = arith.mulf %349, %348 : vector<64x128xf32>
    %351 = arith.addf %346, %350 : vector<64x128xf32>
    %cst_198 = arith.constant 0.797884583 : f32
    %352 = vector.broadcast %cst_198 : f32 to vector<64x128xf32>
    %353 = arith.mulf %352, %351 : vector<64x128xf32>
    %354 = math.tanh %353 : vector<64x128xf32>
    %cst_199 = arith.constant 1.000000e+00 : f32
    %355 = vector.broadcast %cst_199 : f32 to vector<64x128xf32>
    %356 = arith.addf %355, %354 : vector<64x128xf32>
    %cst_200 = arith.constant 5.000000e-01 : f32
    %357 = vector.broadcast %cst_200 : f32 to vector<64x128xf32>
    %358 = arith.mulf %357, %356 : vector<64x128xf32>
    %359 = arith.mulf %346, %358 : vector<64x128xf32>
    %360 = arith.truncf %359 : vector<64x128xf32> to vector<64x128xbf16>
    %c0_201 = arith.constant 0 : index
    %c0_202 = arith.constant 0 : index
    %361 = vector.load %arg30[%c0_201, %c0_202] : memref<128x32xbf16, #tpu.memory_space<vmem>>, vector<128x32xbf16>
    %cst_203 = arith.constant dense<0.000000e+00> : vector<64x32xf32>
    %362 = tpu.matmul %360, %361, %cst_203 {dimension_numbers = #tpu.dot_dimension_numbers<[1], [0], [0], [1], [0, 0, 1, 1], [], []>} : vector<64x128xbf16>, vector<128x32xbf16>, vector<64x32xf32> -> vector<64x32xf32>
    %c0_204 = arith.constant 0 : index
    %c0_205 = arith.constant 0 : index
    %363 = vector.load %arg31[%c0_204, %c0_205] : memref<1x32xf32, #tpu.memory_space<vmem>>, vector<1x32xf32>
    %364 = vector.broadcast %363 : vector<1x32xf32> to vector<64x32xf32>
    %365 = arith.addf %362, %364 : vector<64x32xf32>
    %366 = arith.addf %316, %365 : vector<64x32xf32>
    %c0_206 = arith.constant 0 : index
    %c0_207 = arith.constant 0 : index
    %c0_208 = arith.constant 0 : index
    %367 = vector.load %arg32[%c0_206, %c0_207, %c0_208] : memref<4x16x64xf32, #tpu.memory_space<vmem>>, vector<1x16x64xf32>
    %368 = vector.shape_cast %367 : vector<1x16x64xf32> to vector<16x64xf32>
    %cst_209 = arith.constant dense<0.000000e+00> : vector<16x32xf32>
    %369 = tpu.matmul %368, %366, %cst_209 {dimension_numbers = #tpu.dot_dimension_numbers<[1], [0], [0], [1], [0, 0, 1, 1], [], []>} : vector<16x64xf32>, vector<64x32xf32>, vector<16x32xf32> -> vector<16x32xf32>
    %c1_210 = arith.constant 1 : index
    %c0_211 = arith.constant 0 : index
    %c0_212 = arith.constant 0 : index
    %370 = vector.load %arg32[%c1_210, %c0_211, %c0_212] : memref<4x16x64xf32, #tpu.memory_space<vmem>>, vector<1x16x64xf32>
    %371 = vector.shape_cast %370 : vector<1x16x64xf32> to vector<16x64xf32>
    %cst_213 = arith.constant dense<0.000000e+00> : vector<16x32xf32>
    %372 = tpu.matmul %371, %366, %cst_213 {dimension_numbers = #tpu.dot_dimension_numbers<[1], [0], [0], [1], [0, 0, 1, 1], [], []>} : vector<16x64xf32>, vector<64x32xf32>, vector<16x32xf32> -> vector<16x32xf32>
    %c2_214 = arith.constant 2 : index
    %c0_215 = arith.constant 0 : index
    %c0_216 = arith.constant 0 : index
    %373 = vector.load %arg32[%c2_214, %c0_215, %c0_216] : memref<4x16x64xf32, #tpu.memory_space<vmem>>, vector<1x16x64xf32>
    %374 = vector.shape_cast %373 : vector<1x16x64xf32> to vector<16x64xf32>
    %cst_217 = arith.constant dense<0.000000e+00> : vector<16x32xf32>
    %375 = tpu.matmul %374, %366, %cst_217 {dimension_numbers = #tpu.dot_dimension_numbers<[1], [0], [0], [1], [0, 0, 1, 1], [], []>} : vector<16x64xf32>, vector<64x32xf32>, vector<16x32xf32> -> vector<16x32xf32>
    %c3_218 = arith.constant 3 : index
    %c0_219 = arith.constant 0 : index
    %c0_220 = arith.constant 0 : index
    %376 = vector.load %arg32[%c3_218, %c0_219, %c0_220] : memref<4x16x64xf32, #tpu.memory_space<vmem>>, vector<1x16x64xf32>
    %377 = vector.shape_cast %376 : vector<1x16x64xf32> to vector<16x64xf32>
    %cst_221 = arith.constant dense<0.000000e+00> : vector<16x32xf32>
    %378 = tpu.matmul %377, %366, %cst_221 {dimension_numbers = #tpu.dot_dimension_numbers<[1], [0], [0], [1], [0, 0, 1, 1], [], []>} : vector<16x64xf32>, vector<64x32xf32>, vector<16x32xf32> -> vector<16x32xf32>
    %cst_222 = arith.constant dense<0.000000e+00> : vector<16xf32>
    %379 = vector.multi_reduction <add>, %369, %cst_222 [1] : vector<16x32xf32> to vector<16xf32>
    %380 = vector.shape_cast %379 : vector<16xf32> to vector<16x1xf32>
    %cst_223 = arith.constant 0.000000e+00 : f32
    %381 = vector.broadcast %cst_223 : f32 to vector<16x1xf32>
    %382 = arith.addf %381, %380 : vector<16x1xf32>
    %cst_224 = arith.constant dense<0.000000e+00> : vector<16xf32>
    %383 = vector.multi_reduction <add>, %372, %cst_224 [1] : vector<16x32xf32> to vector<16xf32>
    %384 = vector.shape_cast %383 : vector<16xf32> to vector<16x1xf32>
    %385 = arith.addf %382, %384 : vector<16x1xf32>
    %cst_225 = arith.constant dense<0.000000e+00> : vector<16xf32>
    %386 = vector.multi_reduction <add>, %375, %cst_225 [1] : vector<16x32xf32> to vector<16xf32>
    %387 = vector.shape_cast %386 : vector<16xf32> to vector<16x1xf32>
    %388 = arith.addf %385, %387 : vector<16x1xf32>
    %cst_226 = arith.constant dense<0.000000e+00> : vector<16xf32>
    %389 = vector.multi_reduction <add>, %378, %cst_226 [1] : vector<16x32xf32> to vector<16xf32>
    %390 = vector.shape_cast %389 : vector<16xf32> to vector<16x1xf32>
    %391 = arith.addf %388, %390 : vector<16x1xf32>
    %cst_227 = arith.constant 1.280000e+02 : f32
    %392 = vector.broadcast %cst_227 : f32 to vector<16x1xf32>
    %393 = arith.divf %391, %392 : vector<16x1xf32>
    %394 = vector.broadcast %393 : vector<16x1xf32> to vector<16x32xf32>
    %395 = arith.subf %369, %394 : vector<16x32xf32>
    %396 = arith.mulf %395, %395 : vector<16x32xf32>
    %cst_228 = arith.constant dense<0.000000e+00> : vector<16xf32>
    %397 = vector.multi_reduction <add>, %396, %cst_228 [1] : vector<16x32xf32> to vector<16xf32>
    %398 = vector.shape_cast %397 : vector<16xf32> to vector<16x1xf32>
    %cst_229 = arith.constant 0.000000e+00 : f32
    %399 = vector.broadcast %cst_229 : f32 to vector<16x1xf32>
    %400 = arith.addf %399, %398 : vector<16x1xf32>
    %401 = vector.broadcast %393 : vector<16x1xf32> to vector<16x32xf32>
    %402 = arith.subf %372, %401 : vector<16x32xf32>
    %403 = arith.mulf %402, %402 : vector<16x32xf32>
    %cst_230 = arith.constant dense<0.000000e+00> : vector<16xf32>
    %404 = vector.multi_reduction <add>, %403, %cst_230 [1] : vector<16x32xf32> to vector<16xf32>
    %405 = vector.shape_cast %404 : vector<16xf32> to vector<16x1xf32>
    %406 = arith.addf %400, %405 : vector<16x1xf32>
    %407 = vector.broadcast %393 : vector<16x1xf32> to vector<16x32xf32>
    %408 = arith.subf %375, %407 : vector<16x32xf32>
    %409 = arith.mulf %408, %408 : vector<16x32xf32>
    %cst_231 = arith.constant dense<0.000000e+00> : vector<16xf32>
    %410 = vector.multi_reduction <add>, %409, %cst_231 [1] : vector<16x32xf32> to vector<16xf32>
    %411 = vector.shape_cast %410 : vector<16xf32> to vector<16x1xf32>
    %412 = arith.addf %406, %411 : vector<16x1xf32>
    %413 = vector.broadcast %393 : vector<16x1xf32> to vector<16x32xf32>
    %414 = arith.subf %378, %413 : vector<16x32xf32>
    %415 = arith.mulf %414, %414 : vector<16x32xf32>
    %cst_232 = arith.constant dense<0.000000e+00> : vector<16xf32>
    %416 = vector.multi_reduction <add>, %415, %cst_232 [1] : vector<16x32xf32> to vector<16xf32>
    %417 = vector.shape_cast %416 : vector<16xf32> to vector<16x1xf32>
    %418 = arith.addf %412, %417 : vector<16x1xf32>
    %cst_233 = arith.constant 1.280000e+02 : f32
    %419 = vector.broadcast %cst_233 : f32 to vector<16x1xf32>
    %420 = arith.divf %418, %419 : vector<16x1xf32>
    %cst_234 = arith.constant 9.99999974E-6 : f32
    %421 = vector.broadcast %cst_234 : f32 to vector<16x1xf32>
    %422 = arith.addf %420, %421 : vector<16x1xf32>
    %423 = math.rsqrt %422 : vector<16x1xf32>
    %424 = vector.broadcast %393 : vector<16x1xf32> to vector<16x32xf32>
    %425 = arith.subf %369, %424 : vector<16x32xf32>
    %426 = vector.broadcast %423 : vector<16x1xf32> to vector<16x32xf32>
    %427 = arith.mulf %425, %426 : vector<16x32xf32>
    %c0_235 = arith.constant 0 : index
    %c0_236 = arith.constant 0 : index
    %c0_237 = arith.constant 0 : index
    %428 = vector.load %arg33[%c0_235, %c0_236, %c0_237] : memref<4x1x32xf32, #tpu.memory_space<vmem>>, vector<1x1x32xf32>
    %429 = vector.shape_cast %428 : vector<1x1x32xf32> to vector<1x32xf32>
    %430 = vector.broadcast %429 : vector<1x32xf32> to vector<16x32xf32>
    %431 = arith.mulf %427, %430 : vector<16x32xf32>
    %c0_238 = arith.constant 0 : index
    %c0_239 = arith.constant 0 : index
    %c0_240 = arith.constant 0 : index
    %432 = vector.load %arg34[%c0_238, %c0_239, %c0_240] : memref<4x1x32xf32, #tpu.memory_space<vmem>>, vector<1x1x32xf32>
    %433 = vector.shape_cast %432 : vector<1x1x32xf32> to vector<1x32xf32>
    %434 = vector.broadcast %433 : vector<1x32xf32> to vector<16x32xf32>
    %435 = arith.addf %431, %434 : vector<16x32xf32>
    %436 = arith.truncf %435 : vector<16x32xf32> to vector<16x32xbf16>
    %c0_241 = arith.constant 0 : index
    %c0_242 = arith.constant 0 : index
    %c0_243 = arith.constant 0 : index
    %437 = vector.load %arg35[%c0_241, %c0_242, %c0_243] : memref<4x32x64xbf16, #tpu.memory_space<vmem>>, vector<1x32x64xbf16>
    %438 = vector.shape_cast %437 : vector<1x32x64xbf16> to vector<32x64xbf16>
    %cst_244 = arith.constant dense<0.000000e+00> : vector<16x64xf32>
    %439 = tpu.matmul %436, %438, %cst_244 {dimension_numbers = #tpu.dot_dimension_numbers<[1], [0], [0], [1], [0, 0, 1, 1], [], []>} : vector<16x32xbf16>, vector<32x64xbf16>, vector<16x64xf32> -> vector<16x64xf32>
    %440 = vector.broadcast %393 : vector<16x1xf32> to vector<16x32xf32>
    %441 = arith.subf %372, %440 : vector<16x32xf32>
    %442 = vector.broadcast %423 : vector<16x1xf32> to vector<16x32xf32>
    %443 = arith.mulf %441, %442 : vector<16x32xf32>
    %c1_245 = arith.constant 1 : index
    %c0_246 = arith.constant 0 : index
    %c0_247 = arith.constant 0 : index
    %444 = vector.load %arg33[%c1_245, %c0_246, %c0_247] : memref<4x1x32xf32, #tpu.memory_space<vmem>>, vector<1x1x32xf32>
    %445 = vector.shape_cast %444 : vector<1x1x32xf32> to vector<1x32xf32>
    %446 = vector.broadcast %445 : vector<1x32xf32> to vector<16x32xf32>
    %447 = arith.mulf %443, %446 : vector<16x32xf32>
    %c1_248 = arith.constant 1 : index
    %c0_249 = arith.constant 0 : index
    %c0_250 = arith.constant 0 : index
    %448 = vector.load %arg34[%c1_248, %c0_249, %c0_250] : memref<4x1x32xf32, #tpu.memory_space<vmem>>, vector<1x1x32xf32>
    %449 = vector.shape_cast %448 : vector<1x1x32xf32> to vector<1x32xf32>
    %450 = vector.broadcast %449 : vector<1x32xf32> to vector<16x32xf32>
    %451 = arith.addf %447, %450 : vector<16x32xf32>
    %452 = arith.truncf %451 : vector<16x32xf32> to vector<16x32xbf16>
    %c1_251 = arith.constant 1 : index
    %c0_252 = arith.constant 0 : index
    %c0_253 = arith.constant 0 : index
    %453 = vector.load %arg35[%c1_251, %c0_252, %c0_253] : memref<4x32x64xbf16, #tpu.memory_space<vmem>>, vector<1x32x64xbf16>
    %454 = vector.shape_cast %453 : vector<1x32x64xbf16> to vector<32x64xbf16>
    %cst_254 = arith.constant dense<0.000000e+00> : vector<16x64xf32>
    %455 = tpu.matmul %452, %454, %cst_254 {dimension_numbers = #tpu.dot_dimension_numbers<[1], [0], [0], [1], [0, 0, 1, 1], [], []>} : vector<16x32xbf16>, vector<32x64xbf16>, vector<16x64xf32> -> vector<16x64xf32>
    %456 = arith.addf %439, %455 : vector<16x64xf32>
    %457 = vector.broadcast %393 : vector<16x1xf32> to vector<16x32xf32>
    %458 = arith.subf %375, %457 : vector<16x32xf32>
    %459 = vector.broadcast %423 : vector<16x1xf32> to vector<16x32xf32>
    %460 = arith.mulf %458, %459 : vector<16x32xf32>
    %c2_255 = arith.constant 2 : index
    %c0_256 = arith.constant 0 : index
    %c0_257 = arith.constant 0 : index
    %461 = vector.load %arg33[%c2_255, %c0_256, %c0_257] : memref<4x1x32xf32, #tpu.memory_space<vmem>>, vector<1x1x32xf32>
    %462 = vector.shape_cast %461 : vector<1x1x32xf32> to vector<1x32xf32>
    %463 = vector.broadcast %462 : vector<1x32xf32> to vector<16x32xf32>
    %464 = arith.mulf %460, %463 : vector<16x32xf32>
    %c2_258 = arith.constant 2 : index
    %c0_259 = arith.constant 0 : index
    %c0_260 = arith.constant 0 : index
    %465 = vector.load %arg34[%c2_258, %c0_259, %c0_260] : memref<4x1x32xf32, #tpu.memory_space<vmem>>, vector<1x1x32xf32>
    %466 = vector.shape_cast %465 : vector<1x1x32xf32> to vector<1x32xf32>
    %467 = vector.broadcast %466 : vector<1x32xf32> to vector<16x32xf32>
    %468 = arith.addf %464, %467 : vector<16x32xf32>
    %469 = arith.truncf %468 : vector<16x32xf32> to vector<16x32xbf16>
    %c2_261 = arith.constant 2 : index
    %c0_262 = arith.constant 0 : index
    %c0_263 = arith.constant 0 : index
    %470 = vector.load %arg35[%c2_261, %c0_262, %c0_263] : memref<4x32x64xbf16, #tpu.memory_space<vmem>>, vector<1x32x64xbf16>
    %471 = vector.shape_cast %470 : vector<1x32x64xbf16> to vector<32x64xbf16>
    %cst_264 = arith.constant dense<0.000000e+00> : vector<16x64xf32>
    %472 = tpu.matmul %469, %471, %cst_264 {dimension_numbers = #tpu.dot_dimension_numbers<[1], [0], [0], [1], [0, 0, 1, 1], [], []>} : vector<16x32xbf16>, vector<32x64xbf16>, vector<16x64xf32> -> vector<16x64xf32>
    %473 = arith.addf %456, %472 : vector<16x64xf32>
    %474 = vector.broadcast %393 : vector<16x1xf32> to vector<16x32xf32>
    %475 = arith.subf %378, %474 : vector<16x32xf32>
    %476 = vector.broadcast %423 : vector<16x1xf32> to vector<16x32xf32>
    %477 = arith.mulf %475, %476 : vector<16x32xf32>
    %c3_265 = arith.constant 3 : index
    %c0_266 = arith.constant 0 : index
    %c0_267 = arith.constant 0 : index
    %478 = vector.load %arg33[%c3_265, %c0_266, %c0_267] : memref<4x1x32xf32, #tpu.memory_space<vmem>>, vector<1x1x32xf32>
    %479 = vector.shape_cast %478 : vector<1x1x32xf32> to vector<1x32xf32>
    %480 = vector.broadcast %479 : vector<1x32xf32> to vector<16x32xf32>
    %481 = arith.mulf %477, %480 : vector<16x32xf32>
    %c3_268 = arith.constant 3 : index
    %c0_269 = arith.constant 0 : index
    %c0_270 = arith.constant 0 : index
    %482 = vector.load %arg34[%c3_268, %c0_269, %c0_270] : memref<4x1x32xf32, #tpu.memory_space<vmem>>, vector<1x1x32xf32>
    %483 = vector.shape_cast %482 : vector<1x1x32xf32> to vector<1x32xf32>
    %484 = vector.broadcast %483 : vector<1x32xf32> to vector<16x32xf32>
    %485 = arith.addf %481, %484 : vector<16x32xf32>
    %486 = arith.truncf %485 : vector<16x32xf32> to vector<16x32xbf16>
    %c3_271 = arith.constant 3 : index
    %c0_272 = arith.constant 0 : index
    %c0_273 = arith.constant 0 : index
    %487 = vector.load %arg35[%c3_271, %c0_272, %c0_273] : memref<4x32x64xbf16, #tpu.memory_space<vmem>>, vector<1x32x64xbf16>
    %488 = vector.shape_cast %487 : vector<1x32x64xbf16> to vector<32x64xbf16>
    %cst_274 = arith.constant dense<0.000000e+00> : vector<16x64xf32>
    %489 = tpu.matmul %486, %488, %cst_274 {dimension_numbers = #tpu.dot_dimension_numbers<[1], [0], [0], [1], [0, 0, 1, 1], [], []>} : vector<16x32xbf16>, vector<32x64xbf16>, vector<16x64xf32> -> vector<16x64xf32>
    %490 = arith.addf %473, %489 : vector<16x64xf32>
    %c0_275 = arith.constant 0 : index
    %c0_276 = arith.constant 0 : index
    %491 = vector.load %arg36[%c0_275, %c0_276] : memref<1x64xf32, #tpu.memory_space<vmem>>, vector<1x64xf32>
    %c0_277 = arith.constant 0 : index
    %c0_278 = arith.constant 0 : index
    %492 = vector.load %arg37[%c0_277, %c0_278] : memref<1x64xf32, #tpu.memory_space<vmem>>, vector<1x64xf32>
    %cst_279 = arith.constant dense<0.000000e+00> : vector<16xf32>
    %493 = vector.multi_reduction <add>, %490, %cst_279 [1] : vector<16x64xf32> to vector<16xf32>
    %494 = vector.shape_cast %493 : vector<16xf32> to vector<16x1xf32>
    %cst_280 = arith.constant 6.400000e+01 : f32
    %495 = vector.broadcast %cst_280 : f32 to vector<16x1xf32>
    %496 = arith.divf %494, %495 : vector<16x1xf32>
    %497 = vector.broadcast %496 : vector<16x1xf32> to vector<16x64xf32>
    %498 = arith.subf %490, %497 : vector<16x64xf32>
    %499 = arith.mulf %498, %498 : vector<16x64xf32>
    %cst_281 = arith.constant dense<0.000000e+00> : vector<16xf32>
    %500 = vector.multi_reduction <add>, %499, %cst_281 [1] : vector<16x64xf32> to vector<16xf32>
    %501 = vector.shape_cast %500 : vector<16xf32> to vector<16x1xf32>
    %cst_282 = arith.constant 6.400000e+01 : f32
    %502 = vector.broadcast %cst_282 : f32 to vector<16x1xf32>
    %503 = arith.divf %501, %502 : vector<16x1xf32>
    %504 = vector.broadcast %496 : vector<16x1xf32> to vector<16x64xf32>
    %505 = arith.subf %490, %504 : vector<16x64xf32>
    %cst_283 = arith.constant 9.99999974E-6 : f32
    %506 = vector.broadcast %cst_283 : f32 to vector<16x1xf32>
    %507 = arith.addf %503, %506 : vector<16x1xf32>
    %508 = math.rsqrt %507 : vector<16x1xf32>
    %509 = vector.broadcast %508 : vector<16x1xf32> to vector<16x64xf32>
    %510 = arith.mulf %505, %509 : vector<16x64xf32>
    %511 = vector.broadcast %491 : vector<1x64xf32> to vector<16x64xf32>
    %512 = arith.mulf %510, %511 : vector<16x64xf32>
    %513 = vector.broadcast %492 : vector<1x64xf32> to vector<16x64xf32>
    %514 = arith.addf %512, %513 : vector<16x64xf32>
    %515 = arith.truncf %514 : vector<16x64xf32> to vector<16x64xbf16>
    %c0_284 = arith.constant 0 : index
    %c0_285 = arith.constant 0 : index
    %516 = vector.load %arg42[%c0_284, %c0_285] : memref<1x64xf32, #tpu.memory_space<vmem>>, vector<1x64xf32>
    %517 = vector.broadcast %516 : vector<1x64xf32> to vector<16x64xf32>
    %518 = arith.addf %490, %517 : vector<16x64xf32>
    %c0_286 = arith.constant 0 : index
    %c0_287 = arith.constant 0 : index
    %c0_288 = arith.constant 0 : index
    %519 = vector.load %arg38[%c0_286, %c0_287, %c0_288] : memref<12x64x16xbf16, #tpu.memory_space<vmem>>, vector<1x64x16xbf16>
    %520 = vector.shape_cast %519 : vector<1x64x16xbf16> to vector<64x16xbf16>
    %cst_289 = arith.constant dense<0.000000e+00> : vector<16x16xf32>
    %521 = tpu.matmul %515, %520, %cst_289 {dimension_numbers = #tpu.dot_dimension_numbers<[1], [0], [0], [1], [0, 0, 1, 1], [], []>} : vector<16x64xbf16>, vector<64x16xbf16>, vector<16x16xf32> -> vector<16x16xf32>
    %c0_290 = arith.constant 0 : index
    %c0_291 = arith.constant 0 : index
    %c0_292 = arith.constant 0 : index
    %522 = vector.load %arg39[%c0_290, %c0_291, %c0_292] : memref<12x1x16xf32, #tpu.memory_space<vmem>>, vector<1x1x16xf32>
    %523 = vector.shape_cast %522 : vector<1x1x16xf32> to vector<1x16xf32>
    %524 = vector.broadcast %523 : vector<1x16xf32> to vector<16x16xf32>
    %525 = arith.addf %521, %524 : vector<16x16xf32>
    %c4_293 = arith.constant 4 : index
    %c0_294 = arith.constant 0 : index
    %c0_295 = arith.constant 0 : index
    %526 = vector.load %arg38[%c4_293, %c0_294, %c0_295] : memref<12x64x16xbf16, #tpu.memory_space<vmem>>, vector<1x64x16xbf16>
    %527 = vector.shape_cast %526 : vector<1x64x16xbf16> to vector<64x16xbf16>
    %cst_296 = arith.constant dense<0.000000e+00> : vector<16x16xf32>
    %528 = tpu.matmul %515, %527, %cst_296 {dimension_numbers = #tpu.dot_dimension_numbers<[1], [0], [0], [1], [0, 0, 1, 1], [], []>} : vector<16x64xbf16>, vector<64x16xbf16>, vector<16x16xf32> -> vector<16x16xf32>
    %c4_297 = arith.constant 4 : index
    %c0_298 = arith.constant 0 : index
    %c0_299 = arith.constant 0 : index
    %529 = vector.load %arg39[%c4_297, %c0_298, %c0_299] : memref<12x1x16xf32, #tpu.memory_space<vmem>>, vector<1x1x16xf32>
    %530 = vector.shape_cast %529 : vector<1x1x16xf32> to vector<1x16xf32>
    %531 = vector.broadcast %530 : vector<1x16xf32> to vector<16x16xf32>
    %532 = arith.addf %528, %531 : vector<16x16xf32>
    %c8 = arith.constant 8 : index
    %c0_300 = arith.constant 0 : index
    %c0_301 = arith.constant 0 : index
    %533 = vector.load %arg38[%c8, %c0_300, %c0_301] : memref<12x64x16xbf16, #tpu.memory_space<vmem>>, vector<1x64x16xbf16>
    %534 = vector.shape_cast %533 : vector<1x64x16xbf16> to vector<64x16xbf16>
    %cst_302 = arith.constant dense<0.000000e+00> : vector<16x16xf32>
    %535 = tpu.matmul %515, %534, %cst_302 {dimension_numbers = #tpu.dot_dimension_numbers<[1], [0], [0], [1], [0, 0, 1, 1], [], []>} : vector<16x64xbf16>, vector<64x16xbf16>, vector<16x16xf32> -> vector<16x16xf32>
    %c8_303 = arith.constant 8 : index
    %c0_304 = arith.constant 0 : index
    %c0_305 = arith.constant 0 : index
    %536 = vector.load %arg39[%c8_303, %c0_304, %c0_305] : memref<12x1x16xf32, #tpu.memory_space<vmem>>, vector<1x1x16xf32>
    %537 = vector.shape_cast %536 : vector<1x1x16xf32> to vector<1x16xf32>
    %538 = vector.broadcast %537 : vector<1x16xf32> to vector<16x16xf32>
    %539 = arith.addf %535, %538 : vector<16x16xf32>
    %540 = arith.truncf %525 : vector<16x16xf32> to vector<16x16xbf16>
    %541 = arith.truncf %532 : vector<16x16xf32> to vector<16x16xbf16>
    %cst_306 = arith.constant dense<0.000000e+00> : vector<16x16xf32>
    %542 = tpu.matmul %540, %541, %cst_306 {dimension_numbers = #tpu.dot_dimension_numbers<[1], [1], [0], [0], [0, 0, 1, 0], [], []>} : vector<16x16xbf16>, vector<16x16xbf16>, vector<16x16xf32> -> vector<16x16xf32>
    %c0_307 = arith.constant 0 : index
    %c0_308 = arith.constant 0 : index
    %c0_309 = arith.constant 0 : index
    %543 = vector.load %arg40[%c0_307, %c0_308, %c0_309] : memref<4x16x16xf32, #tpu.memory_space<vmem>>, vector<1x16x16xf32>
    %544 = vector.shape_cast %543 : vector<1x16x16xf32> to vector<16x16xf32>
    %545 = arith.addf %542, %544 : vector<16x16xf32>
    %cst_310 = arith.constant dense<0xFF800000> : vector<16xf32>
    %546 = vector.multi_reduction <maximumf>, %545, %cst_310 [1] : vector<16x16xf32> to vector<16xf32>
    %547 = vector.shape_cast %546 : vector<16xf32> to vector<16x1xf32>
    %548 = vector.broadcast %547 : vector<16x1xf32> to vector<16x16xf32>
    %549 = arith.subf %545, %548 : vector<16x16xf32>
    %550 = math.exp %549 : vector<16x16xf32>
    %cst_311 = arith.constant dense<0.000000e+00> : vector<16xf32>
    %551 = vector.multi_reduction <add>, %550, %cst_311 [1] : vector<16x16xf32> to vector<16xf32>
    %552 = vector.shape_cast %551 : vector<16xf32> to vector<16x1xf32>
    %553 = tpu.reciprocal %552 {approx = true} : vector<16x1xf32> -> vector<16x1xf32>
    %554 = vector.broadcast %553 : vector<16x1xf32> to vector<16x16xf32>
    %555 = arith.mulf %550, %554 : vector<16x16xf32>
    %556 = arith.truncf %555 : vector<16x16xf32> to vector<16x16xbf16>
    %557 = arith.truncf %539 : vector<16x16xf32> to vector<16x16xbf16>
    %cst_312 = arith.constant dense<0.000000e+00> : vector<16x16xf32>
    %558 = tpu.matmul %556, %557, %cst_312 {dimension_numbers = #tpu.dot_dimension_numbers<[1], [0], [0], [1], [0, 0, 1, 1], [], []>} : vector<16x16xbf16>, vector<16x16xbf16>, vector<16x16xf32> -> vector<16x16xf32>
    %559 = arith.truncf %558 : vector<16x16xf32> to vector<16x16xbf16>
    %c0_313 = arith.constant 0 : index
    %c0_314 = arith.constant 0 : index
    %c0_315 = arith.constant 0 : index
    %560 = vector.load %arg41[%c0_313, %c0_314, %c0_315] : memref<4x16x64xbf16, #tpu.memory_space<vmem>>, vector<1x16x64xbf16>
    %561 = vector.shape_cast %560 : vector<1x16x64xbf16> to vector<16x64xbf16>
    %cst_316 = arith.constant dense<0.000000e+00> : vector<16x64xf32>
    %562 = tpu.matmul %559, %561, %cst_316 {dimension_numbers = #tpu.dot_dimension_numbers<[1], [0], [0], [1], [0, 0, 1, 1], [], []>} : vector<16x16xbf16>, vector<16x64xbf16>, vector<16x64xf32> -> vector<16x64xf32>
    %563 = arith.addf %518, %562 : vector<16x64xf32>
    %c1_317 = arith.constant 1 : index
    %c0_318 = arith.constant 0 : index
    %c0_319 = arith.constant 0 : index
    %564 = vector.load %arg38[%c1_317, %c0_318, %c0_319] : memref<12x64x16xbf16, #tpu.memory_space<vmem>>, vector<1x64x16xbf16>
    %565 = vector.shape_cast %564 : vector<1x64x16xbf16> to vector<64x16xbf16>
    %cst_320 = arith.constant dense<0.000000e+00> : vector<16x16xf32>
    %566 = tpu.matmul %515, %565, %cst_320 {dimension_numbers = #tpu.dot_dimension_numbers<[1], [0], [0], [1], [0, 0, 1, 1], [], []>} : vector<16x64xbf16>, vector<64x16xbf16>, vector<16x16xf32> -> vector<16x16xf32>
    %c1_321 = arith.constant 1 : index
    %c0_322 = arith.constant 0 : index
    %c0_323 = arith.constant 0 : index
    %567 = vector.load %arg39[%c1_321, %c0_322, %c0_323] : memref<12x1x16xf32, #tpu.memory_space<vmem>>, vector<1x1x16xf32>
    %568 = vector.shape_cast %567 : vector<1x1x16xf32> to vector<1x16xf32>
    %569 = vector.broadcast %568 : vector<1x16xf32> to vector<16x16xf32>
    %570 = arith.addf %566, %569 : vector<16x16xf32>
    %c5_324 = arith.constant 5 : index
    %c0_325 = arith.constant 0 : index
    %c0_326 = arith.constant 0 : index
    %571 = vector.load %arg38[%c5_324, %c0_325, %c0_326] : memref<12x64x16xbf16, #tpu.memory_space<vmem>>, vector<1x64x16xbf16>
    %572 = vector.shape_cast %571 : vector<1x64x16xbf16> to vector<64x16xbf16>
    %cst_327 = arith.constant dense<0.000000e+00> : vector<16x16xf32>
    %573 = tpu.matmul %515, %572, %cst_327 {dimension_numbers = #tpu.dot_dimension_numbers<[1], [0], [0], [1], [0, 0, 1, 1], [], []>} : vector<16x64xbf16>, vector<64x16xbf16>, vector<16x16xf32> -> vector<16x16xf32>
    %c5_328 = arith.constant 5 : index
    %c0_329 = arith.constant 0 : index
    %c0_330 = arith.constant 0 : index
    %574 = vector.load %arg39[%c5_328, %c0_329, %c0_330] : memref<12x1x16xf32, #tpu.memory_space<vmem>>, vector<1x1x16xf32>
    %575 = vector.shape_cast %574 : vector<1x1x16xf32> to vector<1x16xf32>
    %576 = vector.broadcast %575 : vector<1x16xf32> to vector<16x16xf32>
    %577 = arith.addf %573, %576 : vector<16x16xf32>
    %c9 = arith.constant 9 : index
    %c0_331 = arith.constant 0 : index
    %c0_332 = arith.constant 0 : index
    %578 = vector.load %arg38[%c9, %c0_331, %c0_332] : memref<12x64x16xbf16, #tpu.memory_space<vmem>>, vector<1x64x16xbf16>
    %579 = vector.shape_cast %578 : vector<1x64x16xbf16> to vector<64x16xbf16>
    %cst_333 = arith.constant dense<0.000000e+00> : vector<16x16xf32>
    %580 = tpu.matmul %515, %579, %cst_333 {dimension_numbers = #tpu.dot_dimension_numbers<[1], [0], [0], [1], [0, 0, 1, 1], [], []>} : vector<16x64xbf16>, vector<64x16xbf16>, vector<16x16xf32> -> vector<16x16xf32>
    %c9_334 = arith.constant 9 : index
    %c0_335 = arith.constant 0 : index
    %c0_336 = arith.constant 0 : index
    %581 = vector.load %arg39[%c9_334, %c0_335, %c0_336] : memref<12x1x16xf32, #tpu.memory_space<vmem>>, vector<1x1x16xf32>
    %582 = vector.shape_cast %581 : vector<1x1x16xf32> to vector<1x16xf32>
    %583 = vector.broadcast %582 : vector<1x16xf32> to vector<16x16xf32>
    %584 = arith.addf %580, %583 : vector<16x16xf32>
    %585 = arith.truncf %570 : vector<16x16xf32> to vector<16x16xbf16>
    %586 = arith.truncf %577 : vector<16x16xf32> to vector<16x16xbf16>
    %cst_337 = arith.constant dense<0.000000e+00> : vector<16x16xf32>
    %587 = tpu.matmul %585, %586, %cst_337 {dimension_numbers = #tpu.dot_dimension_numbers<[1], [1], [0], [0], [0, 0, 1, 0], [], []>} : vector<16x16xbf16>, vector<16x16xbf16>, vector<16x16xf32> -> vector<16x16xf32>
    %c1_338 = arith.constant 1 : index
    %c0_339 = arith.constant 0 : index
    %c0_340 = arith.constant 0 : index
    %588 = vector.load %arg40[%c1_338, %c0_339, %c0_340] : memref<4x16x16xf32, #tpu.memory_space<vmem>>, vector<1x16x16xf32>
    %589 = vector.shape_cast %588 : vector<1x16x16xf32> to vector<16x16xf32>
    %590 = arith.addf %587, %589 : vector<16x16xf32>
    %cst_341 = arith.constant dense<0xFF800000> : vector<16xf32>
    %591 = vector.multi_reduction <maximumf>, %590, %cst_341 [1] : vector<16x16xf32> to vector<16xf32>
    %592 = vector.shape_cast %591 : vector<16xf32> to vector<16x1xf32>
    %593 = vector.broadcast %592 : vector<16x1xf32> to vector<16x16xf32>
    %594 = arith.subf %590, %593 : vector<16x16xf32>
    %595 = math.exp %594 : vector<16x16xf32>
    %cst_342 = arith.constant dense<0.000000e+00> : vector<16xf32>
    %596 = vector.multi_reduction <add>, %595, %cst_342 [1] : vector<16x16xf32> to vector<16xf32>
    %597 = vector.shape_cast %596 : vector<16xf32> to vector<16x1xf32>
    %598 = tpu.reciprocal %597 {approx = true} : vector<16x1xf32> -> vector<16x1xf32>
    %599 = vector.broadcast %598 : vector<16x1xf32> to vector<16x16xf32>
    %600 = arith.mulf %595, %599 : vector<16x16xf32>
    %601 = arith.truncf %600 : vector<16x16xf32> to vector<16x16xbf16>
    %602 = arith.truncf %584 : vector<16x16xf32> to vector<16x16xbf16>
    %cst_343 = arith.constant dense<0.000000e+00> : vector<16x16xf32>
    %603 = tpu.matmul %601, %602, %cst_343 {dimension_numbers = #tpu.dot_dimension_numbers<[1], [0], [0], [1], [0, 0, 1, 1], [], []>} : vector<16x16xbf16>, vector<16x16xbf16>, vector<16x16xf32> -> vector<16x16xf32>
    %604 = arith.truncf %603 : vector<16x16xf32> to vector<16x16xbf16>
    %c1_344 = arith.constant 1 : index
    %c0_345 = arith.constant 0 : index
    %c0_346 = arith.constant 0 : index
    %605 = vector.load %arg41[%c1_344, %c0_345, %c0_346] : memref<4x16x64xbf16, #tpu.memory_space<vmem>>, vector<1x16x64xbf16>
    %606 = vector.shape_cast %605 : vector<1x16x64xbf16> to vector<16x64xbf16>
    %cst_347 = arith.constant dense<0.000000e+00> : vector<16x64xf32>
    %607 = tpu.matmul %604, %606, %cst_347 {dimension_numbers = #tpu.dot_dimension_numbers<[1], [0], [0], [1], [0, 0, 1, 1], [], []>} : vector<16x16xbf16>, vector<16x64xbf16>, vector<16x64xf32> -> vector<16x64xf32>
    %608 = arith.addf %563, %607 : vector<16x64xf32>
    %c2_348 = arith.constant 2 : index
    %c0_349 = arith.constant 0 : index
    %c0_350 = arith.constant 0 : index
    %609 = vector.load %arg38[%c2_348, %c0_349, %c0_350] : memref<12x64x16xbf16, #tpu.memory_space<vmem>>, vector<1x64x16xbf16>
    %610 = vector.shape_cast %609 : vector<1x64x16xbf16> to vector<64x16xbf16>
    %cst_351 = arith.constant dense<0.000000e+00> : vector<16x16xf32>
    %611 = tpu.matmul %515, %610, %cst_351 {dimension_numbers = #tpu.dot_dimension_numbers<[1], [0], [0], [1], [0, 0, 1, 1], [], []>} : vector<16x64xbf16>, vector<64x16xbf16>, vector<16x16xf32> -> vector<16x16xf32>
    %c2_352 = arith.constant 2 : index
    %c0_353 = arith.constant 0 : index
    %c0_354 = arith.constant 0 : index
    %612 = vector.load %arg39[%c2_352, %c0_353, %c0_354] : memref<12x1x16xf32, #tpu.memory_space<vmem>>, vector<1x1x16xf32>
    %613 = vector.shape_cast %612 : vector<1x1x16xf32> to vector<1x16xf32>
    %614 = vector.broadcast %613 : vector<1x16xf32> to vector<16x16xf32>
    %615 = arith.addf %611, %614 : vector<16x16xf32>
    %c6 = arith.constant 6 : index
    %c0_355 = arith.constant 0 : index
    %c0_356 = arith.constant 0 : index
    %616 = vector.load %arg38[%c6, %c0_355, %c0_356] : memref<12x64x16xbf16, #tpu.memory_space<vmem>>, vector<1x64x16xbf16>
    %617 = vector.shape_cast %616 : vector<1x64x16xbf16> to vector<64x16xbf16>
    %cst_357 = arith.constant dense<0.000000e+00> : vector<16x16xf32>
    %618 = tpu.matmul %515, %617, %cst_357 {dimension_numbers = #tpu.dot_dimension_numbers<[1], [0], [0], [1], [0, 0, 1, 1], [], []>} : vector<16x64xbf16>, vector<64x16xbf16>, vector<16x16xf32> -> vector<16x16xf32>
    %c6_358 = arith.constant 6 : index
    %c0_359 = arith.constant 0 : index
    %c0_360 = arith.constant 0 : index
    %619 = vector.load %arg39[%c6_358, %c0_359, %c0_360] : memref<12x1x16xf32, #tpu.memory_space<vmem>>, vector<1x1x16xf32>
    %620 = vector.shape_cast %619 : vector<1x1x16xf32> to vector<1x16xf32>
    %621 = vector.broadcast %620 : vector<1x16xf32> to vector<16x16xf32>
    %622 = arith.addf %618, %621 : vector<16x16xf32>
    %c10 = arith.constant 10 : index
    %c0_361 = arith.constant 0 : index
    %c0_362 = arith.constant 0 : index
    %623 = vector.load %arg38[%c10, %c0_361, %c0_362] : memref<12x64x16xbf16, #tpu.memory_space<vmem>>, vector<1x64x16xbf16>
    %624 = vector.shape_cast %623 : vector<1x64x16xbf16> to vector<64x16xbf16>
    %cst_363 = arith.constant dense<0.000000e+00> : vector<16x16xf32>
    %625 = tpu.matmul %515, %624, %cst_363 {dimension_numbers = #tpu.dot_dimension_numbers<[1], [0], [0], [1], [0, 0, 1, 1], [], []>} : vector<16x64xbf16>, vector<64x16xbf16>, vector<16x16xf32> -> vector<16x16xf32>
    %c10_364 = arith.constant 10 : index
    %c0_365 = arith.constant 0 : index
    %c0_366 = arith.constant 0 : index
    %626 = vector.load %arg39[%c10_364, %c0_365, %c0_366] : memref<12x1x16xf32, #tpu.memory_space<vmem>>, vector<1x1x16xf32>
    %627 = vector.shape_cast %626 : vector<1x1x16xf32> to vector<1x16xf32>
    %628 = vector.broadcast %627 : vector<1x16xf32> to vector<16x16xf32>
    %629 = arith.addf %625, %628 : vector<16x16xf32>
    %630 = arith.truncf %615 : vector<16x16xf32> to vector<16x16xbf16>
    %631 = arith.truncf %622 : vector<16x16xf32> to vector<16x16xbf16>
    %cst_367 = arith.constant dense<0.000000e+00> : vector<16x16xf32>
    %632 = tpu.matmul %630, %631, %cst_367 {dimension_numbers = #tpu.dot_dimension_numbers<[1], [1], [0], [0], [0, 0, 1, 0], [], []>} : vector<16x16xbf16>, vector<16x16xbf16>, vector<16x16xf32> -> vector<16x16xf32>
    %c2_368 = arith.constant 2 : index
    %c0_369 = arith.constant 0 : index
    %c0_370 = arith.constant 0 : index
    %633 = vector.load %arg40[%c2_368, %c0_369, %c0_370] : memref<4x16x16xf32, #tpu.memory_space<vmem>>, vector<1x16x16xf32>
    %634 = vector.shape_cast %633 : vector<1x16x16xf32> to vector<16x16xf32>
    %635 = arith.addf %632, %634 : vector<16x16xf32>
    %cst_371 = arith.constant dense<0xFF800000> : vector<16xf32>
    %636 = vector.multi_reduction <maximumf>, %635, %cst_371 [1] : vector<16x16xf32> to vector<16xf32>
    %637 = vector.shape_cast %636 : vector<16xf32> to vector<16x1xf32>
    %638 = vector.broadcast %637 : vector<16x1xf32> to vector<16x16xf32>
    %639 = arith.subf %635, %638 : vector<16x16xf32>
    %640 = math.exp %639 : vector<16x16xf32>
    %cst_372 = arith.constant dense<0.000000e+00> : vector<16xf32>
    %641 = vector.multi_reduction <add>, %640, %cst_372 [1] : vector<16x16xf32> to vector<16xf32>
    %642 = vector.shape_cast %641 : vector<16xf32> to vector<16x1xf32>
    %643 = tpu.reciprocal %642 {approx = true} : vector<16x1xf32> -> vector<16x1xf32>
    %644 = vector.broadcast %643 : vector<16x1xf32> to vector<16x16xf32>
    %645 = arith.mulf %640, %644 : vector<16x16xf32>
    %646 = arith.truncf %645 : vector<16x16xf32> to vector<16x16xbf16>
    %647 = arith.truncf %629 : vector<16x16xf32> to vector<16x16xbf16>
    %cst_373 = arith.constant dense<0.000000e+00> : vector<16x16xf32>
    %648 = tpu.matmul %646, %647, %cst_373 {dimension_numbers = #tpu.dot_dimension_numbers<[1], [0], [0], [1], [0, 0, 1, 1], [], []>} : vector<16x16xbf16>, vector<16x16xbf16>, vector<16x16xf32> -> vector<16x16xf32>
    %649 = arith.truncf %648 : vector<16x16xf32> to vector<16x16xbf16>
    %c2_374 = arith.constant 2 : index
    %c0_375 = arith.constant 0 : index
    %c0_376 = arith.constant 0 : index
    %650 = vector.load %arg41[%c2_374, %c0_375, %c0_376] : memref<4x16x64xbf16, #tpu.memory_space<vmem>>, vector<1x16x64xbf16>
    %651 = vector.shape_cast %650 : vector<1x16x64xbf16> to vector<16x64xbf16>
    %cst_377 = arith.constant dense<0.000000e+00> : vector<16x64xf32>
    %652 = tpu.matmul %649, %651, %cst_377 {dimension_numbers = #tpu.dot_dimension_numbers<[1], [0], [0], [1], [0, 0, 1, 1], [], []>} : vector<16x16xbf16>, vector<16x64xbf16>, vector<16x64xf32> -> vector<16x64xf32>
    %653 = arith.addf %608, %652 : vector<16x64xf32>
    %c3_378 = arith.constant 3 : index
    %c0_379 = arith.constant 0 : index
    %c0_380 = arith.constant 0 : index
    %654 = vector.load %arg38[%c3_378, %c0_379, %c0_380] : memref<12x64x16xbf16, #tpu.memory_space<vmem>>, vector<1x64x16xbf16>
    %655 = vector.shape_cast %654 : vector<1x64x16xbf16> to vector<64x16xbf16>
    %cst_381 = arith.constant dense<0.000000e+00> : vector<16x16xf32>
    %656 = tpu.matmul %515, %655, %cst_381 {dimension_numbers = #tpu.dot_dimension_numbers<[1], [0], [0], [1], [0, 0, 1, 1], [], []>} : vector<16x64xbf16>, vector<64x16xbf16>, vector<16x16xf32> -> vector<16x16xf32>
    %c3_382 = arith.constant 3 : index
    %c0_383 = arith.constant 0 : index
    %c0_384 = arith.constant 0 : index
    %657 = vector.load %arg39[%c3_382, %c0_383, %c0_384] : memref<12x1x16xf32, #tpu.memory_space<vmem>>, vector<1x1x16xf32>
    %658 = vector.shape_cast %657 : vector<1x1x16xf32> to vector<1x16xf32>
    %659 = vector.broadcast %658 : vector<1x16xf32> to vector<16x16xf32>
    %660 = arith.addf %656, %659 : vector<16x16xf32>
    %c7 = arith.constant 7 : index
    %c0_385 = arith.constant 0 : index
    %c0_386 = arith.constant 0 : index
    %661 = vector.load %arg38[%c7, %c0_385, %c0_386] : memref<12x64x16xbf16, #tpu.memory_space<vmem>>, vector<1x64x16xbf16>
    %662 = vector.shape_cast %661 : vector<1x64x16xbf16> to vector<64x16xbf16>
    %cst_387 = arith.constant dense<0.000000e+00> : vector<16x16xf32>
    %663 = tpu.matmul %515, %662, %cst_387 {dimension_numbers = #tpu.dot_dimension_numbers<[1], [0], [0], [1], [0, 0, 1, 1], [], []>} : vector<16x64xbf16>, vector<64x16xbf16>, vector<16x16xf32> -> vector<16x16xf32>
    %c7_388 = arith.constant 7 : index
    %c0_389 = arith.constant 0 : index
    %c0_390 = arith.constant 0 : index
    %664 = vector.load %arg39[%c7_388, %c0_389, %c0_390] : memref<12x1x16xf32, #tpu.memory_space<vmem>>, vector<1x1x16xf32>
    %665 = vector.shape_cast %664 : vector<1x1x16xf32> to vector<1x16xf32>
    %666 = vector.broadcast %665 : vector<1x16xf32> to vector<16x16xf32>
    %667 = arith.addf %663, %666 : vector<16x16xf32>
    %c11 = arith.constant 11 : index
    %c0_391 = arith.constant 0 : index
    %c0_392 = arith.constant 0 : index
    %668 = vector.load %arg38[%c11, %c0_391, %c0_392] : memref<12x64x16xbf16, #tpu.memory_space<vmem>>, vector<1x64x16xbf16>
    %669 = vector.shape_cast %668 : vector<1x64x16xbf16> to vector<64x16xbf16>
    %cst_393 = arith.constant dense<0.000000e+00> : vector<16x16xf32>
    %670 = tpu.matmul %515, %669, %cst_393 {dimension_numbers = #tpu.dot_dimension_numbers<[1], [0], [0], [1], [0, 0, 1, 1], [], []>} : vector<16x64xbf16>, vector<64x16xbf16>, vector<16x16xf32> -> vector<16x16xf32>
    %c11_394 = arith.constant 11 : index
    %c0_395 = arith.constant 0 : index
    %c0_396 = arith.constant 0 : index
    %671 = vector.load %arg39[%c11_394, %c0_395, %c0_396] : memref<12x1x16xf32, #tpu.memory_space<vmem>>, vector<1x1x16xf32>
    %672 = vector.shape_cast %671 : vector<1x1x16xf32> to vector<1x16xf32>
    %673 = vector.broadcast %672 : vector<1x16xf32> to vector<16x16xf32>
    %674 = arith.addf %670, %673 : vector<16x16xf32>
    %675 = arith.truncf %660 : vector<16x16xf32> to vector<16x16xbf16>
    %676 = arith.truncf %667 : vector<16x16xf32> to vector<16x16xbf16>
    %cst_397 = arith.constant dense<0.000000e+00> : vector<16x16xf32>
    %677 = tpu.matmul %675, %676, %cst_397 {dimension_numbers = #tpu.dot_dimension_numbers<[1], [1], [0], [0], [0, 0, 1, 0], [], []>} : vector<16x16xbf16>, vector<16x16xbf16>, vector<16x16xf32> -> vector<16x16xf32>
    %c3_398 = arith.constant 3 : index
    %c0_399 = arith.constant 0 : index
    %c0_400 = arith.constant 0 : index
    %678 = vector.load %arg40[%c3_398, %c0_399, %c0_400] : memref<4x16x16xf32, #tpu.memory_space<vmem>>, vector<1x16x16xf32>
    %679 = vector.shape_cast %678 : vector<1x16x16xf32> to vector<16x16xf32>
    %680 = arith.addf %677, %679 : vector<16x16xf32>
    %cst_401 = arith.constant dense<0xFF800000> : vector<16xf32>
    %681 = vector.multi_reduction <maximumf>, %680, %cst_401 [1] : vector<16x16xf32> to vector<16xf32>
    %682 = vector.shape_cast %681 : vector<16xf32> to vector<16x1xf32>
    %683 = vector.broadcast %682 : vector<16x1xf32> to vector<16x16xf32>
    %684 = arith.subf %680, %683 : vector<16x16xf32>
    %685 = math.exp %684 : vector<16x16xf32>
    %cst_402 = arith.constant dense<0.000000e+00> : vector<16xf32>
    %686 = vector.multi_reduction <add>, %685, %cst_402 [1] : vector<16x16xf32> to vector<16xf32>
    %687 = vector.shape_cast %686 : vector<16xf32> to vector<16x1xf32>
    %688 = tpu.reciprocal %687 {approx = true} : vector<16x1xf32> -> vector<16x1xf32>
    %689 = vector.broadcast %688 : vector<16x1xf32> to vector<16x16xf32>
    %690 = arith.mulf %685, %689 : vector<16x16xf32>
    %691 = arith.truncf %690 : vector<16x16xf32> to vector<16x16xbf16>
    %692 = arith.truncf %674 : vector<16x16xf32> to vector<16x16xbf16>
    %cst_403 = arith.constant dense<0.000000e+00> : vector<16x16xf32>
    %693 = tpu.matmul %691, %692, %cst_403 {dimension_numbers = #tpu.dot_dimension_numbers<[1], [0], [0], [1], [0, 0, 1, 1], [], []>} : vector<16x16xbf16>, vector<16x16xbf16>, vector<16x16xf32> -> vector<16x16xf32>
    %694 = arith.truncf %693 : vector<16x16xf32> to vector<16x16xbf16>
    %c3_404 = arith.constant 3 : index
    %c0_405 = arith.constant 0 : index
    %c0_406 = arith.constant 0 : index
    %695 = vector.load %arg41[%c3_404, %c0_405, %c0_406] : memref<4x16x64xbf16, #tpu.memory_space<vmem>>, vector<1x16x64xbf16>
    %696 = vector.shape_cast %695 : vector<1x16x64xbf16> to vector<16x64xbf16>
    %cst_407 = arith.constant dense<0.000000e+00> : vector<16x64xf32>
    %697 = tpu.matmul %694, %696, %cst_407 {dimension_numbers = #tpu.dot_dimension_numbers<[1], [0], [0], [1], [0, 0, 1, 1], [], []>} : vector<16x16xbf16>, vector<16x64xbf16>, vector<16x64xf32> -> vector<16x64xf32>
    %698 = arith.addf %653, %697 : vector<16x64xf32>
    %c0_408 = arith.constant 0 : index
    %c0_409 = arith.constant 0 : index
    %699 = vector.load %arg43[%c0_408, %c0_409] : memref<1x64xf32, #tpu.memory_space<vmem>>, vector<1x64xf32>
    %c0_410 = arith.constant 0 : index
    %c0_411 = arith.constant 0 : index
    %700 = vector.load %arg44[%c0_410, %c0_411] : memref<1x64xf32, #tpu.memory_space<vmem>>, vector<1x64xf32>
    %cst_412 = arith.constant dense<0.000000e+00> : vector<16xf32>
    %701 = vector.multi_reduction <add>, %698, %cst_412 [1] : vector<16x64xf32> to vector<16xf32>
    %702 = vector.shape_cast %701 : vector<16xf32> to vector<16x1xf32>
    %cst_413 = arith.constant 6.400000e+01 : f32
    %703 = vector.broadcast %cst_413 : f32 to vector<16x1xf32>
    %704 = arith.divf %702, %703 : vector<16x1xf32>
    %705 = vector.broadcast %704 : vector<16x1xf32> to vector<16x64xf32>
    %706 = arith.subf %698, %705 : vector<16x64xf32>
    %707 = arith.mulf %706, %706 : vector<16x64xf32>
    %cst_414 = arith.constant dense<0.000000e+00> : vector<16xf32>
    %708 = vector.multi_reduction <add>, %707, %cst_414 [1] : vector<16x64xf32> to vector<16xf32>
    %709 = vector.shape_cast %708 : vector<16xf32> to vector<16x1xf32>
    %cst_415 = arith.constant 6.400000e+01 : f32
    %710 = vector.broadcast %cst_415 : f32 to vector<16x1xf32>
    %711 = arith.divf %709, %710 : vector<16x1xf32>
    %712 = vector.broadcast %704 : vector<16x1xf32> to vector<16x64xf32>
    %713 = arith.subf %698, %712 : vector<16x64xf32>
    %cst_416 = arith.constant 9.99999974E-6 : f32
    %714 = vector.broadcast %cst_416 : f32 to vector<16x1xf32>
    %715 = arith.addf %711, %714 : vector<16x1xf32>
    %716 = math.rsqrt %715 : vector<16x1xf32>
    %717 = vector.broadcast %716 : vector<16x1xf32> to vector<16x64xf32>
    %718 = arith.mulf %713, %717 : vector<16x64xf32>
    %719 = vector.broadcast %699 : vector<1x64xf32> to vector<16x64xf32>
    %720 = arith.mulf %718, %719 : vector<16x64xf32>
    %721 = vector.broadcast %700 : vector<1x64xf32> to vector<16x64xf32>
    %722 = arith.addf %720, %721 : vector<16x64xf32>
    %723 = arith.truncf %722 : vector<16x64xf32> to vector<16x64xbf16>
    %c0_417 = arith.constant 0 : index
    %c0_418 = arith.constant 0 : index
    %724 = vector.load %arg45[%c0_417, %c0_418] : memref<64x256xbf16, #tpu.memory_space<vmem>>, vector<64x256xbf16>
    %cst_419 = arith.constant dense<0.000000e+00> : vector<16x256xf32>
    %725 = tpu.matmul %723, %724, %cst_419 {dimension_numbers = #tpu.dot_dimension_numbers<[1], [0], [0], [1], [0, 0, 1, 1], [], []>} : vector<16x64xbf16>, vector<64x256xbf16>, vector<16x256xf32> -> vector<16x256xf32>
    %c0_420 = arith.constant 0 : index
    %c0_421 = arith.constant 0 : index
    %726 = vector.load %arg46[%c0_420, %c0_421] : memref<1x256xf32, #tpu.memory_space<vmem>>, vector<1x256xf32>
    %727 = vector.broadcast %726 : vector<1x256xf32> to vector<16x256xf32>
    %728 = arith.addf %725, %727 : vector<16x256xf32>
    %729 = arith.mulf %728, %728 : vector<16x256xf32>
    %730 = arith.mulf %728, %729 : vector<16x256xf32>
    %cst_422 = arith.constant 4.471500e-02 : f32
    %731 = vector.broadcast %cst_422 : f32 to vector<16x256xf32>
    %732 = arith.mulf %731, %730 : vector<16x256xf32>
    %733 = arith.addf %728, %732 : vector<16x256xf32>
    %cst_423 = arith.constant 0.797884583 : f32
    %734 = vector.broadcast %cst_423 : f32 to vector<16x256xf32>
    %735 = arith.mulf %734, %733 : vector<16x256xf32>
    %736 = math.tanh %735 : vector<16x256xf32>
    %cst_424 = arith.constant 1.000000e+00 : f32
    %737 = vector.broadcast %cst_424 : f32 to vector<16x256xf32>
    %738 = arith.addf %737, %736 : vector<16x256xf32>
    %cst_425 = arith.constant 5.000000e-01 : f32
    %739 = vector.broadcast %cst_425 : f32 to vector<16x256xf32>
    %740 = arith.mulf %739, %738 : vector<16x256xf32>
    %741 = arith.mulf %728, %740 : vector<16x256xf32>
    %742 = arith.truncf %741 : vector<16x256xf32> to vector<16x256xbf16>
    %c0_426 = arith.constant 0 : index
    %c0_427 = arith.constant 0 : index
    %743 = vector.load %arg47[%c0_426, %c0_427] : memref<256x64xbf16, #tpu.memory_space<vmem>>, vector<256x64xbf16>
    %cst_428 = arith.constant dense<0.000000e+00> : vector<16x64xf32>
    %744 = tpu.matmul %742, %743, %cst_428 {dimension_numbers = #tpu.dot_dimension_numbers<[1], [0], [0], [1], [0, 0, 1, 1], [], []>} : vector<16x256xbf16>, vector<256x64xbf16>, vector<16x64xf32> -> vector<16x64xf32>
    %c0_429 = arith.constant 0 : index
    %c0_430 = arith.constant 0 : index
    %745 = vector.load %arg48[%c0_429, %c0_430] : memref<1x64xf32, #tpu.memory_space<vmem>>, vector<1x64xf32>
    %746 = vector.broadcast %745 : vector<1x64xf32> to vector<16x64xf32>
    %747 = arith.addf %744, %746 : vector<16x64xf32>
    %748 = arith.addf %698, %747 : vector<16x64xf32>
    %c0_431 = arith.constant 0 : index
    %c0_432 = arith.constant 0 : index
    %749 = vector.load %arg49[%c0_431, %c0_432] : memref<1x64xf32, #tpu.memory_space<vmem>>, vector<1x64xf32>
    %c0_433 = arith.constant 0 : index
    %c0_434 = arith.constant 0 : index
    %750 = vector.load %arg50[%c0_433, %c0_434] : memref<1x64xf32, #tpu.memory_space<vmem>>, vector<1x64xf32>
    %cst_435 = arith.constant dense<0.000000e+00> : vector<16xf32>
    %751 = vector.multi_reduction <add>, %748, %cst_435 [1] : vector<16x64xf32> to vector<16xf32>
    %752 = vector.shape_cast %751 : vector<16xf32> to vector<16x1xf32>
    %cst_436 = arith.constant 6.400000e+01 : f32
    %753 = vector.broadcast %cst_436 : f32 to vector<16x1xf32>
    %754 = arith.divf %752, %753 : vector<16x1xf32>
    %755 = vector.broadcast %754 : vector<16x1xf32> to vector<16x64xf32>
    %756 = arith.subf %748, %755 : vector<16x64xf32>
    %757 = arith.mulf %756, %756 : vector<16x64xf32>
    %cst_437 = arith.constant dense<0.000000e+00> : vector<16xf32>
    %758 = vector.multi_reduction <add>, %757, %cst_437 [1] : vector<16x64xf32> to vector<16xf32>
    %759 = vector.shape_cast %758 : vector<16xf32> to vector<16x1xf32>
    %cst_438 = arith.constant 6.400000e+01 : f32
    %760 = vector.broadcast %cst_438 : f32 to vector<16x1xf32>
    %761 = arith.divf %759, %760 : vector<16x1xf32>
    %762 = vector.broadcast %754 : vector<16x1xf32> to vector<16x64xf32>
    %763 = arith.subf %748, %762 : vector<16x64xf32>
    %cst_439 = arith.constant 9.99999974E-6 : f32
    %764 = vector.broadcast %cst_439 : f32 to vector<16x1xf32>
    %765 = arith.addf %761, %764 : vector<16x1xf32>
    %766 = math.rsqrt %765 : vector<16x1xf32>
    %767 = vector.broadcast %766 : vector<16x1xf32> to vector<16x64xf32>
    %768 = arith.mulf %763, %767 : vector<16x64xf32>
    %769 = vector.broadcast %749 : vector<1x64xf32> to vector<16x64xf32>
    %770 = arith.mulf %768, %769 : vector<16x64xf32>
    %771 = vector.broadcast %750 : vector<1x64xf32> to vector<16x64xf32>
    %772 = arith.addf %770, %771 : vector<16x64xf32>
    %773 = arith.truncf %772 : vector<16x64xf32> to vector<16x64xbf16>
    %c0_440 = arith.constant 0 : index
    %c0_441 = arith.constant 0 : index
    %774 = vector.load %arg51[%c0_440, %c0_441] : memref<8x64xbf16, #tpu.memory_space<vmem>>, vector<8x64xbf16>
    %cst_442 = arith.constant dense<0.000000e+00> : vector<8x16xf32>
    %775 = tpu.matmul %774, %773, %cst_442 {dimension_numbers = #tpu.dot_dimension_numbers<[1], [1], [0], [0], [0, 0, 1, 0], [], []>} : vector<8x64xbf16>, vector<16x64xbf16>, vector<8x16xf32> -> vector<8x16xf32>
    %c0_443 = arith.constant 0 : index
    %c0_444 = arith.constant 0 : index
    %776 = vector.load %arg52[%c0_443, %c0_444] : memref<8x1xf32, #tpu.memory_space<vmem>>, vector<8x1xf32>
    %777 = vector.broadcast %776 : vector<8x1xf32> to vector<8x16xf32>
    %778 = arith.addf %775, %777 : vector<8x16xf32>
    %c0_445 = arith.constant 0 : index
    %c0_446 = arith.constant 0 : index
    %779 = vector.load %arg53[%c0_445, %c0_446] : memref<16x1024xf32, #tpu.memory_space<vmem>>, vector<16x1024xf32>
    %cst_447 = arith.constant dense<0.000000e+00> : vector<8x1024xf32>
    %780 = tpu.matmul %778, %779, %cst_447 {dimension_numbers = #tpu.dot_dimension_numbers<[1], [0], [0], [1], [0, 0, 1, 1], [], []>} : vector<8x16xf32>, vector<16x1024xf32>, vector<8x1024xf32> -> vector<8x1024xf32>
    %c0_448 = arith.constant 0 : index
    %c0_449 = arith.constant 0 : index
    %c0_450 = arith.constant 0 : index
    %781 = vector.load %arg54[%c0_448, %c0_449, %c0_450] : memref<1x8x1024xf32, #tpu.memory_space<vmem>>, vector<1x8x1024xf32>
    %782 = vector.shape_cast %781 : vector<1x8x1024xf32> to vector<8x1024xf32>
    %783 = vector.shape_cast %780 : vector<8x1024xf32> to vector<1x8x1024xf32>
    tpu.vector_store %arg54[%c0_448, %c0_449, %c0_450], %783 {strides = array<i32>} : memref<1x8x1024xf32, #tpu.memory_space<vmem>>, vector<1x8x1024xf32>,
    return
  }
  func.func @transform_0(%arg0: i32) -> (i32, i32, i32) {
    %c0_i32 = arith.constant 0 : i32
    %c0_i32_0 = arith.constant 0 : i32
    %c0_i32_1 = arith.constant 0 : i32
    return %arg0, %c0_i32, %c0_i32_0 : i32, i32, i32
  }
  func.func @transform_1(%arg0: i32) -> (i32, i32) {
    %c0_i32 = arith.constant 0 : i32
    %c0_i32_0 = arith.constant 0 : i32
    %c0_i32_1 = arith.constant 0 : i32
    return %c0_i32, %c0_i32_0 : i32, i32
  }
  func.func @transform_2(%arg0: i32) -> (i32, i32) {
    %c0_i32 = arith.constant 0 : i32
    %c0_i32_0 = arith.constant 0 : i32
    %c0_i32_1 = arith.constant 0 : i32
    return %c0_i32, %c0_i32_0 : i32, i32
  }
  func.func @transform_3(%arg0: i32) -> (i32, i32) {
    %c0_i32 = arith.constant 0 : i32
    %c0_i32_0 = arith.constant 0 : i32
    %c0_i32_1 = arith.constant 0 : i32
    return %c0_i32, %c0_i32_0 : i32, i32
  }
  func.func @transform_4(%arg0: i32) -> (i32, i32) {
    %c0_i32 = arith.constant 0 : i32
    %c0_i32_0 = arith.constant 0 : i32
    %c0_i32_1 = arith.constant 0 : i32
    return %c0_i32, %c0_i32_0 : i32, i32
  }
  func.func @transform_5(%arg0: i32) -> (i32, i32) {
    %c0_i32 = arith.constant 0 : i32
    %c0_i32_0 = arith.constant 0 : i32
    %c0_i32_1 = arith.constant 0 : i32
    return %c0_i32, %c0_i32_0 : i32, i32
  }
  func.func @transform_6(%arg0: i32) -> (i32, i32) {
    %c0_i32 = arith.constant 0 : i32
    %c0_i32_0 = arith.constant 0 : i32
    %c0_i32_1 = arith.constant 0 : i32
    return %c0_i32, %c0_i32_0 : i32, i32
  }
  func.func @transform_7(%arg0: i32) -> (i32, i32, i32) {
    %c0_i32 = arith.constant 0 : i32
    %c0_i32_0 = arith.constant 0 : i32
    %c0_i32_1 = arith.constant 0 : i32
    %c0_i32_2 = arith.constant 0 : i32
    return %c0_i32, %c0_i32_0, %c0_i32_1 : i32, i32, i32
  }
  func.func @transform_8(%arg0: i32) -> (i32, i32, i32) {
    %c0_i32 = arith.constant 0 : i32
    %c0_i32_0 = arith.constant 0 : i32
    %c0_i32_1 = arith.constant 0 : i32
    %c0_i32_2 = arith.constant 0 : i32
    return %c0_i32, %c0_i32_0, %c0_i32_1 : i32, i32, i32
  }
  func.func @transform_9(%arg0: i32) -> (i32, i32, i32) {
    %c0_i32 = arith.constant 0 : i32
    %c0_i32_0 = arith.constant 0 : i32
    %c0_i32_1 = arith.constant 0 : i32
    %c0_i32_2 = arith.constant 0 : i32
    return %c0_i32, %c0_i32_0, %c0_i32_1 : i32, i32, i32
  }
  func.func @transform_10(%arg0: i32) -> (i32, i32, i32) {
    %c0_i32 = arith.constant 0 : i32
    %c0_i32_0 = arith.constant 0 : i32
    %c0_i32_1 = arith.constant 0 : i32
    %c0_i32_2 = arith.constant 0 : i32
    return %c0_i32, %c0_i32_0, %c0_i32_1 : i32, i32, i32
  }
  func.func @transform_11(%arg0: i32) -> (i32, i32) {
    %c0_i32 = arith.constant 0 : i32
    %c0_i32_0 = arith.constant 0 : i32
    %c0_i32_1 = arith.constant 0 : i32
    return %c0_i32, %c0_i32_0 : i32, i32
  }
  func.func @transform_12(%arg0: i32) -> (i32, i32) {
    %c0_i32 = arith.constant 0 : i32
    %c0_i32_0 = arith.constant 0 : i32
    %c0_i32_1 = arith.constant 0 : i32
    return %c0_i32, %c0_i32_0 : i32, i32
  }
  func.func @transform_13(%arg0: i32) -> (i32, i32) {
    %c0_i32 = arith.constant 0 : i32
    %c0_i32_0 = arith.constant 0 : i32
    %c0_i32_1 = arith.constant 0 : i32
    return %c0_i32, %c0_i32_0 : i32, i32
  }
  func.func @transform_14(%arg0: i32) -> (i32, i32) {
    %c0_i32 = arith.constant 0 : i32
    %c0_i32_0 = arith.constant 0 : i32
    %c0_i32_1 = arith.constant 0 : i32
    return %c0_i32, %c0_i32_0 : i32, i32
  }
  func.func @transform_15(%arg0: i32) -> (i32, i32) {
    %c0_i32 = arith.constant 0 : i32
    %c0_i32_0 = arith.constant 0 : i32
    %c0_i32_1 = arith.constant 0 : i32
    return %c0_i32, %c0_i32_0 : i32, i32
  }
  func.func @transform_16(%arg0: i32) -> (i32, i32) {
    %c0_i32 = arith.constant 0 : i32
    %c0_i32_0 = arith.constant 0 : i32
    %c0_i32_1 = arith.constant 0 : i32
    return %c0_i32, %c0_i32_0 : i32, i32
  }
  func.func @transform_17(%arg0: i32) -> (i32, i32) {
    %c0_i32 = arith.constant 0 : i32
    %c0_i32_0 = arith.constant 0 : i32
    %c0_i32_1 = arith.constant 0 : i32
    return %c0_i32, %c0_i32_0 : i32, i32
  }
  func.func @transform_18(%arg0: i32) -> (i32, i32) {
    %c0_i32 = arith.constant 0 : i32
    %c0_i32_0 = arith.constant 0 : i32
    %c0_i32_1 = arith.constant 0 : i32
    return %c0_i32, %c0_i32_0 : i32, i32
  }
  func.func @transform_19(%arg0: i32) -> (i32, i32) {
    %c0_i32 = arith.constant 0 : i32
    %c0_i32_0 = arith.constant 0 : i32
    %c0_i32_1 = arith.constant 0 : i32
    return %c0_i32, %c0_i32_0 : i32, i32
  }
  func.func @transform_20(%arg0: i32) -> (i32, i32, i32) {
    %c0_i32 = arith.constant 0 : i32
    %c0_i32_0 = arith.constant 0 : i32
    %c0_i32_1 = arith.constant 0 : i32
    %c0_i32_2 = arith.constant 0 : i32
    return %c0_i32, %c0_i32_0, %c0_i32_1 : i32, i32, i32
  }
  func.func @transform_21(%arg0: i32) -> (i32, i32, i32) {
    %c0_i32 = arith.constant 0 : i32
    %c0_i32_0 = arith.constant 0 : i32
    %c0_i32_1 = arith.constant 0 : i32
    %c0_i32_2 = arith.constant 0 : i32
    return %c0_i32, %c0_i32_0, %c0_i32_1 : i32, i32, i32
  }
  func.func @transform_22(%arg0: i32) -> (i32, i32, i32) {
    %c0_i32 = arith.constant 0 : i32
    %c0_i32_0 = arith.constant 0 : i32
    %c0_i32_1 = arith.constant 0 : i32
    %c0_i32_2 = arith.constant 0 : i32
    return %c0_i32, %c0_i32_0, %c0_i32_1 : i32, i32, i32
  }
  func.func @transform_23(%arg0: i32) -> (i32, i32, i32) {
    %c0_i32 = arith.constant 0 : i32
    %c0_i32_0 = arith.constant 0 : i32
    %c0_i32_1 = arith.constant 0 : i32
    %c0_i32_2 = arith.constant 0 : i32
    return %c0_i32, %c0_i32_0, %c0_i32_1 : i32, i32, i32
  }
  func.func @transform_24(%arg0: i32) -> (i32, i32) {
    %c0_i32 = arith.constant 0 : i32
    %c0_i32_0 = arith.constant 0 : i32
    %c0_i32_1 = arith.constant 0 : i32
    return %c0_i32, %c0_i32_0 : i32, i32
  }
  func.func @transform_25(%arg0: i32) -> (i32, i32) {
    %c0_i32 = arith.constant 0 : i32
    %c0_i32_0 = arith.constant 0 : i32
    %c0_i32_1 = arith.constant 0 : i32
    return %c0_i32, %c0_i32_0 : i32, i32
  }
  func.func @transform_26(%arg0: i32) -> (i32, i32) {
    %c0_i32 = arith.constant 0 : i32
    %c0_i32_0 = arith.constant 0 : i32
    %c0_i32_1 = arith.constant 0 : i32
    return %c0_i32, %c0_i32_0 : i32, i32
  }
  func.func @transform_27(%arg0: i32) -> (i32, i32) {
    %c0_i32 = arith.constant 0 : i32
    %c0_i32_0 = arith.constant 0 : i32
    %c0_i32_1 = arith.constant 0 : i32
    return %c0_i32, %c0_i32_0 : i32, i32
  }
  func.func @transform_28(%arg0: i32) -> (i32, i32) {
    %c0_i32 = arith.constant 0 : i32
    %c0_i32_0 = arith.constant 0 : i32
    %c0_i32_1 = arith.constant 0 : i32
    return %c0_i32, %c0_i32_0 : i32, i32
  }
  func.func @transform_29(%arg0: i32) -> (i32, i32) {
    %c0_i32 = arith.constant 0 : i32
    %c0_i32_0 = arith.constant 0 : i32
    %c0_i32_1 = arith.constant 0 : i32
    return %c0_i32, %c0_i32_0 : i32, i32
  }
  func.func @transform_30(%arg0: i32) -> (i32, i32) {
    %c0_i32 = arith.constant 0 : i32
    %c0_i32_0 = arith.constant 0 : i32
    %c0_i32_1 = arith.constant 0 : i32
    return %c0_i32, %c0_i32_0 : i32, i32
  }
  func.func @transform_31(%arg0: i32) -> (i32, i32, i32) {
    %c0_i32 = arith.constant 0 : i32
    %c0_i32_0 = arith.constant 0 : i32
    %c0_i32_1 = arith.constant 0 : i32
    %c0_i32_2 = arith.constant 0 : i32
    return %c0_i32, %c0_i32_0, %c0_i32_1 : i32, i32, i32
  }
  func.func @transform_32(%arg0: i32) -> (i32, i32, i32) {
    %c0_i32 = arith.constant 0 : i32
    %c0_i32_0 = arith.constant 0 : i32
    %c0_i32_1 = arith.constant 0 : i32
    %c0_i32_2 = arith.constant 0 : i32
    return %c0_i32, %c0_i32_0, %c0_i32_1 : i32, i32, i32
  }
  func.func @transform_33(%arg0: i32) -> (i32, i32, i32) {
    %c0_i32 = arith.constant 0 : i32
    %c0_i32_0 = arith.constant 0 : i32
    %c0_i32_1 = arith.constant 0 : i32
    %c0_i32_2 = arith.constant 0 : i32
    return %c0_i32, %c0_i32_0, %c0_i32_1 : i32, i32, i32
  }
  func.func @transform_34(%arg0: i32) -> (i32, i32, i32) {
    %c0_i32 = arith.constant 0 : i32
    %c0_i32_0 = arith.constant 0 : i32
    %c0_i32_1 = arith.constant 0 : i32
    %c0_i32_2 = arith.constant 0 : i32
    return %c0_i32, %c0_i32_0, %c0_i32_1 : i32, i32, i32
  }
  func.func @transform_35(%arg0: i32) -> (i32, i32) {
    %c0_i32 = arith.constant 0 : i32
    %c0_i32_0 = arith.constant 0 : i32
    %c0_i32_1 = arith.constant 0 : i32
    return %c0_i32, %c0_i32_0 : i32, i32
  }
  func.func @transform_36(%arg0: i32) -> (i32, i32) {
    %c0_i32 = arith.constant 0 : i32
    %c0_i32_0 = arith.constant 0 : i32
    %c0_i32_1 = arith.constant 0 : i32
    return %c0_i32, %c0_i32_0 : i32, i32
  }
  func.func @transform_37(%arg0: i32) -> (i32, i32, i32) {
    %c0_i32 = arith.constant 0 : i32
    %c0_i32_0 = arith.constant 0 : i32
    %c0_i32_1 = arith.constant 0 : i32
    %c0_i32_2 = arith.constant 0 : i32
    return %c0_i32, %c0_i32_0, %c0_i32_1 : i32, i32, i32
  }
  func.func @transform_38(%arg0: i32) -> (i32, i32, i32) {
    %c0_i32 = arith.constant 0 : i32
    %c0_i32_0 = arith.constant 0 : i32
    %c0_i32_1 = arith.constant 0 : i32
    %c0_i32_2 = arith.constant 0 : i32
    return %c0_i32, %c0_i32_0, %c0_i32_1 : i32, i32, i32
  }
  func.func @transform_39(%arg0: i32) -> (i32, i32, i32) {
    %c0_i32 = arith.constant 0 : i32
    %c0_i32_0 = arith.constant 0 : i32
    %c0_i32_1 = arith.constant 0 : i32
    %c0_i32_2 = arith.constant 0 : i32
    return %c0_i32, %c0_i32_0, %c0_i32_1 : i32, i32, i32
  }
  func.func @transform_40(%arg0: i32) -> (i32, i32, i32) {
    %c0_i32 = arith.constant 0 : i32
    %c0_i32_0 = arith.constant 0 : i32
    %c0_i32_1 = arith.constant 0 : i32
    %c0_i32_2 = arith.constant 0 : i32
    return %c0_i32, %c0_i32_0, %c0_i32_1 : i32, i32, i32
  }
  func.func @transform_41(%arg0: i32) -> (i32, i32) {
    %c0_i32 = arith.constant 0 : i32
    %c0_i32_0 = arith.constant 0 : i32
    %c0_i32_1 = arith.constant 0 : i32
    return %c0_i32, %c0_i32_0 : i32, i32
  }
  func.func @transform_42(%arg0: i32) -> (i32, i32) {
    %c0_i32 = arith.constant 0 : i32
    %c0_i32_0 = arith.constant 0 : i32
    %c0_i32_1 = arith.constant 0 : i32
    return %c0_i32, %c0_i32_0 : i32, i32
  }
  func.func @transform_43(%arg0: i32) -> (i32, i32) {
    %c0_i32 = arith.constant 0 : i32
    %c0_i32_0 = arith.constant 0 : i32
    %c0_i32_1 = arith.constant 0 : i32
    return %c0_i32, %c0_i32_0 : i32, i32
  }
  func.func @transform_44(%arg0: i32) -> (i32, i32) {
    %c0_i32 = arith.constant 0 : i32
    %c0_i32_0 = arith.constant 0 : i32
    %c0_i32_1 = arith.constant 0 : i32
    return %c0_i32, %c0_i32_0 : i32, i32
  }
  func.func @transform_45(%arg0: i32) -> (i32, i32) {
    %c0_i32 = arith.constant 0 : i32
    %c0_i32_0 = arith.constant 0 : i32
    %c0_i32_1 = arith.constant 0 : i32
    return %c0_i32, %c0_i32_0 : i32, i32
  }
  func.func @transform_46(%arg0: i32) -> (i32, i32) {
    %c0_i32 = arith.constant 0 : i32
    %c0_i32_0 = arith.constant 0 : i32
    %c0_i32_1 = arith.constant 0 : i32
    return %c0_i32, %c0_i32_0 : i32, i32
  }
  func.func @transform_47(%arg0: i32) -> (i32, i32) {
    %c0_i32 = arith.constant 0 : i32
    %c0_i32_0 = arith.constant 0 : i32
    %c0_i32_1 = arith.constant 0 : i32
    return %c0_i32, %c0_i32_0 : i32, i32
  }
  func.func @transform_48(%arg0: i32) -> (i32, i32) {
    %c0_i32 = arith.constant 0 : i32
    %c0_i32_0 = arith.constant 0 : i32
    %c0_i32_1 = arith.constant 0 : i32
    return %c0_i32, %c0_i32_0 : i32, i32
  }
  func.func @transform_49(%arg0: i32) -> (i32, i32) {
    %c0_i32 = arith.constant 0 : i32
    %c0_i32_0 = arith.constant 0 : i32
    %c0_i32_1 = arith.constant 0 : i32
    return %c0_i32, %c0_i32_0 : i32, i32
  }
  func.func @transform_50(%arg0: i32) -> (i32, i32) {
    %c0_i32 = arith.constant 0 : i32
    %c0_i32_0 = arith.constant 0 : i32
    %c0_i32_1 = arith.constant 0 : i32
    return %c0_i32, %c0_i32_0 : i32, i32
  }
  func.func @transform_51(%arg0: i32) -> (i32, i32) {
    %c0_i32 = arith.constant 0 : i32
    %c0_i32_0 = arith.constant 0 : i32
    %c0_i32_1 = arith.constant 0 : i32
    return %c0_i32, %c0_i32_0 : i32, i32
  }
  func.func @transform_52(%arg0: i32) -> (i32, i32) {
    %c0_i32 = arith.constant 0 : i32
    %c0_i32_0 = arith.constant 0 : i32
    %c0_i32_1 = arith.constant 0 : i32
    return %c0_i32, %c0_i32_0 : i32, i32
  }
  func.func @transform_53(%arg0: i32) -> (i32, i32, i32) {
    %c0_i32 = arith.constant 0 : i32
    %c0_i32_0 = arith.constant 0 : i32
    %c0_i32_1 = arith.constant 0 : i32
    return %arg0, %c0_i32, %c0_i32_0 : i32, i32, i32
  }
}

</mosaic_0001>

<bundles_post_ra>
// kernel: swin_segmentation_forward.1
= control target key start
LH: loop header
LB: loop body
LE: loop exit
PB: predicated region body
PF: predicated region fallthrough
CT: control target
= control target key end

     0   :  { %s12091_s6 = smov 1   ;;  %s12092_s10 = smov 2   ;;  %s14178_s0 = inlined_call_operand.smem [shape: u32[54], index: -1, kind: input, shape index: {}] }
   0x1   :  { %s12166_s5 = sld [smem:[%s14178_s0]]   ;;  %s12093_s14 = smov 3  }
   0x2   :  { %s12171_s9 = sld [smem:[%s14178_s0 + %s12091_s6]]   ;;  %s12094_s18 = smov 4  }
   0x3   :  { %s12176_s13 = sld [smem:[%s14178_s0 + %s12092_s10]]   ;;  %s12095_s22 = smov 5  }
   0x4   :  { %s12181_s17 = sld [smem:[%s14178_s0 + %s12093_s14]]   ;;  %s12096_s26 = smov 6  }
   0x5   :  { %s12186_s21 = sld [smem:[%s14178_s0 + %s12094_s18]]   ;;  %s12097_s30 = smov 7  }
   0x6   :  { %s12191_s25 = sld [smem:[%s14178_s0 + %s12095_s22]]   ;;  %s12098_s4 = smov 8  }
   0x7   :  { %14215 = sst [smem:[#allocation25_spill]] %s12166_s5  ;;  %s12099_s10 = smov 9  }
   0x8   :  { %s12196_s29 = sld [smem:[%s14178_s0 + %s12096_s26]]   ;;  %s12100_s15 = smov 10  }
   0x9   :  { %s12201_s3 = sld [smem:[%s14178_s0 + %s12097_s30]]   ;;  %s12101_s20 = smov 11  }
   0xa   :  { %14216 = sst [smem:[#allocation26_spill]] %s12181_s17  ;;  %s12102_s26 = smov 12  }
   0xb   :  { %14217 = sst [smem:[#allocation27_spill]] %s12186_s21  ;;  %s12103_s1 = smov 13  }
   0xc   :  { %14218 = sst [smem:[#allocation28_spill]] %s12191_s25  ;;  %s12104_s7 = smov 14  }
   0xd   :  { %s12206_s8 = sld [smem:[%s14178_s0 + %s12098_s4]]   ;;  %s12106_s22 = smov 16  }
   0xe   :  { %14219 = sst [smem:[#allocation29_spill]] %s12196_s29  ;;  %s12107_s28 = smov 17  }
   0xf   :  { %14220 = sst [smem:[#allocation30_spill]] %s12201_s3 }
  0x10   :  { %s12211_s14 = sld [smem:[%s14178_s0 + %s12099_s10]]  }
  0x11   :  { %s12216_s19 = sld [smem:[%s14178_s0 + %s12100_s15]]   ;;  %s12105_s15 = smov 15  }
  0x12   :  { %s12221_s24 = sld [smem:[%s14178_s0 + %s12101_s20]]  }
  0x13   :  { %14221 = sst [smem:[#allocation31_spill]] %s12206_s8 }
  0x14   :  { %s12226_s30 = sld [smem:[%s14178_s0 + %s12102_s26]]  }
  0x15   :  { %s12231_s6 = sld [smem:[%s14178_s0 + %s12103_s1]]  }
  0x16   :  { %14222 = sst [smem:[#allocation32_spill]] %s12211_s14 }
  0x17   :  { %14223 = sst [smem:[#allocation33_spill]] %s12216_s19 }
  0x18   :  { %14224 = sst [smem:[#allocation34_spill]] %s12221_s24 }
  0x19   :  { %s12236_s12 = sld [smem:[%s14178_s0 + %s12104_s7]]   ;;  %s12108_s7 = smov 18  }
  0x1a   :  { %14225 = sst [smem:[#allocation35_spill]] %s12226_s30 }
  0x1b   :  { %14226 = sst [smem:[#allocation36_spill]] %s12231_s6 }
  0x1c   :  { %s12241_s20 = sld [smem:[%s14178_s0 + %s12105_s15]]   ;;  %s12109_s15 = smov 19  }
  0x1d   :  { %s12246_s27 = sld [smem:[%s14178_s0 + %s12106_s22]]   ;;  %s12110_s22 = smov 20  }
  0x1e   :  { %s12251_s4 = sld [smem:[%s14178_s0 + %s12107_s28]]   ;;  %s12111_s28 = smov 21  }
  0x1f   :  { %14227 = sst [smem:[#allocation37_spill]] %s12236_s12 }
  0x20   :  { %s12256_s6 = sld [smem:[%s14178_s0 + %s12108_s7]]   ;;  %s12112_s7 = smov 22  }
  0x22   :  { %14228 = sst [smem:[#allocation38_spill]] %s12241_s20 }
  0x23   :  { %14229 = sst [smem:[#allocation39_spill]] %s12246_s27 }
  0x24   :  { %14230 = sst [smem:[#allocation40_spill]] %s12251_s4 }
  0x25   :  { %s12261_s20 = sld [smem:[%s14178_s0 + %s12109_s15]]   ;;  %s12113_s15 = smov 23  }
  0x26   :  { %14231 = sst [smem:[#allocation41_spill]] %s12256_s6 }
  0x27   :  { %s12266_s27 = sld [smem:[%s14178_s0 + %s12110_s22]]   ;;  %s12114_s22 = smov 24  }
  0x28   :  { %s12271_s4 = sld [smem:[%s14178_s0 + %s12111_s28]]   ;;  %s12115_s28 = smov 25  }
  0x29   :  { %s12276_s6 = sld [smem:[%s14178_s0 + %s12112_s7]]   ;;  %s12116_s7 = smov 26  }
  0x2b   :  { %14232 = sst [smem:[#allocation42_spill]] %s12261_s20 }
  0x2c   :  { %s12281_s20 = sld [smem:[%s14178_s0 + %s12113_s15]]   ;;  %s12117_s15 = smov 27  }
  0x2d   :  { %14233 = sst [smem:[#allocation43_spill]] %s12266_s27 }
  0x2e   :  { %14234 = sst [smem:[#allocation44_spill]] %s12271_s4 }
  0x2f   :  { %14235 = sst [smem:[#allocation45_spill]] %s12276_s6 }
  0x30   :  { %s12286_s27 = sld [smem:[%s14178_s0 + %s12114_s22]]   ;;  %s12118_s22 = smov 28  }
  0x31   :  { %s12291_s4 = sld [smem:[%s14178_s0 + %s12115_s28]]   ;;  %s12119_s28 = smov 29  }
  0x32   :  { %14236 = sst [smem:[#allocation46_spill]] %s12281_s20 }
  0x33   :  { %s12296_s6 = sld [smem:[%s14178_s0 + %s12116_s7]]   ;;  %s12120_s7 = smov 30  }
  0x34   :  { %s12301_s20 = sld [smem:[%s14178_s0 + %s12117_s15]]   ;;  %s12121_s15 = smov 31  }
  0x35   :  { %s12316_s30 = sld [smem:[%s14178_s0 + %s12120_s7]]   ;;  %s12124_s7 = smov 34  }
  0x36   :  { %14237 = sst [smem:[#allocation47_spill]] %s12286_s27 }
  0x37   :  { %14238 = sst [smem:[#allocation48_spill]] %s12291_s4 }
  0x38   :  { %s12306_s27 = sld [smem:[%s14178_s0 + %s12118_s22]]   ;;  %s12122_s22 = smov 32  }
  0x39   :  { %s12311_s4 = sld [smem:[%s14178_s0 + %s12119_s28]]   ;;  %s12123_s28 = smov 33  }
  0x3a   :  { %14239 = sst [smem:[#allocation49_spill]] %s12301_s20 }
  0x3b   :  { %s12321_s20 = sld [smem:[%s14178_s0 + %s12121_s15]]   ;;  %s12125_s15 = smov 35  }
  0x3c   :  { %s12326_s12 = sld [smem:[%s14178_s0 + %s12122_s22]]   ;;  %s12126_s22 = smov 36  }
  0x3d   :  { %s12336_s24 = sld [smem:[%s14178_s0 + %s12124_s7]]   ;;  %s12128_s7 = smov 38  }
  0x3f   :  { %14240 = sst [smem:[#allocation50_spill]] %s12311_s4 }
  0x40   :  { %s12331_s4 = sld [smem:[%s14178_s0 + %s12123_s28]]   ;;  %s12127_s28 = smov 37  }
  0x41   :  { %14241 = sst [smem:[#allocation51_spill]] %s12321_s20 }
  0x42   :  { %14242 = sst [smem:[#allocation52_spill]] %s12326_s12 }
  0x43   :  { %14244 = sst [smem:[#allocation54_spill]] %s12336_s24 }
  0x44   :  { %s12341_s20 = sld [smem:[%s14178_s0 + %s12125_s15]]   ;;  %s12129_s15 = smov 39  }
  0x45   :  { %s12346_s12 = sld [smem:[%s14178_s0 + %s12126_s22]]   ;;  %s12130_s22 = smov 40  }
  0x46   :  { %14243 = sst [smem:[#allocation53_spill]] %s12331_s4 }
  0x47   :  { %s12351_s4 = sld [smem:[%s14178_s0 + %s12127_s28]]   ;;  %s12131_s28 = smov 41  }
  0x48   :  { %s12356_s24 = sld [smem:[%s14178_s0 + %s12128_s7]]   ;;  %s12132_s7 = smov 42  }
  0x49   :  { %s12361_s19 = sld [smem:[%s14178_s0 + %s12129_s15]]   ;;  %s12133_s15 = smov 43  }
  0x4a   :  { %s12366_s14 = sld [smem:[%s14178_s0 + %s12130_s22]]   ;;  %s12134_s22 = smov 44  }
  0x4d   :  { %14245 = sst [smem:[#allocation55_spill]] %s12351_s4 }
  0x4e   :  { %14246 = sst [smem:[#allocation56_spill]] %s12356_s24 }
  0x4f   :  { %14247 = sst [smem:[#allocation57_spill]] %s12361_s19 }
  0x50   :  { %14248 = sst [smem:[#allocation58_spill]] %s12366_s14 }
  0x51   :  { %s12371_s4 = sld [smem:[%s14178_s0 + %s12131_s28]]   ;;  %s12135_s28 = smov 45  }
  0x52   :  { %s12376_s24 = sld [smem:[%s14178_s0 + %s12132_s7]]   ;;  %s12136_s7 = smov 46  }
  0x53   :  { %s12381_s19 = sld [smem:[%s14178_s0 + %s12133_s15]]   ;;  %s12137_s15 = smov 47  }
  0x54   :  { %s12386_s14 = sld [smem:[%s14178_s0 + %s12134_s22]]   ;;  %s12138_s22 = smov 48  }
  0x55   :  { %s12391_s8 = sld [smem:[%s14178_s0 + %s12135_s28]]   ;;  %s12139_s28 = smov 49  }
  0x56   :  { %s12396_s29 = sld [smem:[%s14178_s0 + %s12136_s7]]   ;;  %s12140_s7 = smov 50  }
  0x57   :  { %14249 = sst [smem:[#allocation59_spill]] %s12371_s4 }
  0x58   :  { %s12401_s25 = sld [smem:[%s14178_s0 + %s12137_s15]]   ;;  %s12141_s15 = smov 51  }
  0x59   :  { %s12421_s3 = sld [smem:[%s14178_s0 + %s12141_s15]]  }
  0x5a   :  { %14250 = sst [smem:[#allocation60_spill]] %s12386_s14 }
  0x5b   :  { %14251 = sst [smem:[#allocation61_spill]] %s12391_s8 }
  0x5c   :  { %14252 = sst [smem:[#allocation62_spill]] %s12396_s29 }
  0x5d   :  { %s12406_s14 = sld [smem:[%s14178_s0 + %s12138_s22]]   ;;  %s12142_s22 = smov 52  }
  0x5e   :  { %s12411_s8 = sld [smem:[%s14178_s0 + %s12139_s28]]   ;;  %s12143_s28 = smov 53  }
  0x5f   :  { %s12416_s29 = sld [smem:[%s14178_s0 + %s12140_s7]]  }
  0x60   :  { %s12426_s21 = sld [smem:[%s14178_s0 + %s12142_s22]]  }
  0x61   :  { %s12431_s17 = sld [smem:[%s14178_s0 + %s12143_s28]]  }
  0x62   :  { %112 = vsyncpa [#allocation3], 0 }
  0x63   :  { %113 = vsyncpa [#allocation5], 0 }
  0x64   :  { %114 = vsyncpa [#allocation8], 0 }
  0x65   :  { %115 = vsyncpa [#allocation11], 0 }
  0x66   :  { %116 = vsyncpa [#allocation14], 0 }
  0x67   :  { %117 = vsyncpa [#allocation17], 0  ;;  %s12433_s7 = smov 0  }
  0x68 LB: > { %s14253_s4 = sld [smem:[#allocation59_spill]]  ;;  %s12144_s10 = smov [#allocation4]   ;;  %s12089_s7 = sphi %s12433_s7, %s123_s7  }
  0x69   : > { %s1374_s11 = sshll.u32 %s12144_s10, 4  ;;  %s12439_s0 = sadd.s32 4294967295, %s12089_s7   ;;  %s12444_s11 = int_to_ptr.vmem [resolvable:$true] %s1374_s11 }
  0x6a   : > { %p9311_p0 = scmp.ge.s32.totalorder %s12089_s7, 1  ;;  %p1272_p1 = scmp.lt.s32.totalorder %s12089_s7, 3 }
  0x6b   : > { %p14201_p2 = scmp.eq.s32.totalorder %s12439_s0, 0  ;;  %s12145_s16 = smov [#allocation7]  }
  0x6c   : > { %p12446_p3 = pnand %p9311_p0, %p1272_p1  ;;  %s1411_s18 = sshll.u32 %s12145_s16, 4  ;;  %s12452_s18 = int_to_ptr.vmem [resolvable:$true] %s1411_s18 }
  0x6d   : > { %s12146_s22 = smov [#allocation10]   ;;  %s12147_s28 = smov [#allocation13]  }
  0x6e   : > { %s14254_s15 = scalar_select %p12446_p3, 1, 0 }
  0x6f   : > { %p11180_p4 = pneg %p12446_p3  ;;  %s1445_s23 = sshll.u32 %s12146_s22, 4  ;;  %s12460_s23 = int_to_ptr.vmem [resolvable:$true] %s1445_s23 }
  0x70   : > { %s1467_s1 = sshll.u32 %s12147_s28, 4  ;;  %s11751_s2 = scalar_lea.hbm %s12306_s27, 16  ;;  %s12462_s1 = int_to_ptr.vmem [resolvable:$true] %s1467_s1 }
  0x71   : > { %p12456_p5 = pnand %p14201_p2, %p11180_p4  ;;  %p11752_p6 = scmp.ne.s32.totalorder %s12306_s27, %s11751_s2 }
  0x72   : > { %p11758_p10 = scmp.lt.u32.totalorder %s11751_s2, %s12306_s27 }
  0x73   : > { %p12468_p7 = pneg %p12456_p5 }
  0x75   : > { %p11754_p8 = pnand %p12468_p7, %p11752_p6 }
  0x77   : > { %p11755_p9 = pneg %p11754_p8 }
  0x79   : > { %p11760_p11 = pnand %p11758_p10, %p11755_p9 }
  0x7b   : > { %11763 = shalt.err (!%p11760_p11)
}
  0x7c   : > { %s11764_s16 = scalar_lea.vmem %s12444_s11, 16  ;;  %s11771_s22 = scalar_lea.vmem %s12444_s11, 32 }
  0x7d   : > { %p11765_p12 = scmp.ne.s32.totalorder %s12444_s11, %s11764_s16  ;;  %p11772_p1 = scmp.lt.s32.totalorder %s12444_s11, %s12444_s11 }
  0x7e   : > { %p11773_p4 = scmp.lt.s32.totalorder %s11771_s22, %s11764_s16 }
  0x7f   : > { %p11767_p13 = pnand %p11765_p12, %p12468_p7 }
  0x80   : > { %p11774_p2 = por %p11773_p4, %p11772_p1 }
  0x81   : > { %p11768_p0 = pneg %p11767_p13 }
  0x83   : > { %p11775_p6 = pnand %p11774_p2, %p11768_p0 }
  0x85   : > { %11778 = shalt.err (!%p11775_p6)
}
  0x86   : > { %11186 = dma.hbm_to_vmem [thread:$0]  (!%p12456_p5), %s12306_s27, 16, %s12444_s11, [#allocation5]  }
  0x87   : > { %s11779_s28 = scalar_lea.hbm %s12341_s20, 16 }
  0x88   : > { %p11780_p8 = scmp.ne.s32.totalorder %s12341_s20, %s11779_s28  ;;  %p11786_p11 = scmp.lt.u32.totalorder %s11779_s28, %s12341_s20 }
  0x8a   : > { %p11782_p9 = pnand %p11780_p8, %p12468_p7 }
  0x8c   : > { %p11783_p10 = pneg %p11782_p9 }
  0x8e   : > { %p11788_p12 = pnand %p11786_p11, %p11783_p10 }
  0x90   : > { %11791 = shalt.err (!%p11788_p12)
}
  0x91   : > { %s11792_s2 = scalar_lea.vmem %s12452_s18, 16  ;;  %s11799_s16 = scalar_lea.vmem %s12452_s18, 32 }
  0x92   : > { %p11793_p2 = scmp.ne.s32.totalorder %s12452_s18, %s11792_s2  ;;  %p11800_p1 = scmp.lt.s32.totalorder %s12452_s18, %s12452_s18 }
  0x93   : > { %p11801_p4 = scmp.lt.s32.totalorder %s11799_s16, %s11792_s2 }
  0x94   : > { %p11795_p13 = pnand %p11793_p2, %p12468_p7 }
  0x95   : > { %p11802_p6 = por %p11801_p4, %p11800_p1 }
  0x96   : > { %p11796_p0 = pneg %p11795_p13 }
  0x98   : > { %p11803_p8 = pnand %p11802_p6, %p11796_p0 }
  0x9a   : > { %11806 = shalt.err (!%p11803_p8)
}
  0x9b   : > { %11192 = dma.hbm_to_vmem [thread:$0]  (!%p12456_p5), %s12341_s20, 16, %s12452_s18, [#allocation8]  }
  0x9c   : > { %s11807_s11 = scalar_lea.hbm %s14253_s4, 16 }
  0x9d   : > { %p11808_p9 = scmp.ne.s32.totalorder %s14253_s4, %s11807_s11  ;;  %p11814_p12 = scmp.lt.u32.totalorder %s11807_s11, %s14253_s4 }
  0x9f   : > { %p11810_p10 = pnand %p11808_p9, %p12468_p7 }
  0xa1   : > { %p11811_p11 = pneg %p11810_p10 }
  0xa3   : > { %p11816_p2 = pnand %p11814_p12, %p11811_p11 }
  0xa5   : > { %11819 = shalt.err (!%p11816_p2)
}
  0xa6   : > { %s11820_s22 = scalar_lea.vmem %s12460_s23, 16  ;;  %s11827_s28 = scalar_lea.vmem %s12460_s23, 32 }
  0xa7   : > { %p11821_p13 = scmp.ne.s32.totalorder %s12460_s23, %s11820_s22  ;;  %p11828_p4 = scmp.lt.s32.totalorder %s12460_s23, %s12460_s23 }
  0xa8   : > { %p11829_p6 = scmp.lt.s32.totalorder %s11827_s28, %s11820_s22 }
  0xa9   : > { %p11823_p0 = pnand %p11821_p13, %p12468_p7 }
  0xaa   : > { %p11830_p8 = por %p11829_p6, %p11828_p4 }
  0xab   : > { %p11824_p1 = pneg %p11823_p0 }
  0xad   : > { %p11831_p9 = pnand %p11830_p8, %p11824_p1 }
  0xaf   : > { %11834 = shalt.err (!%p11831_p9)
}
  0xb0   : > { %11198 = dma.hbm_to_vmem [thread:$0]  (!%p12456_p5), %s14253_s4, 16, %s12460_s23, [#allocation11]  }
  0xb1   : > { %s11835_s18 = scalar_lea.hbm %s12381_s19, 16 }
  0xb2   : > { %p11836_p10 = scmp.ne.s32.totalorder %s12381_s19, %s11835_s18  ;;  %p11842_p2 = scmp.lt.u32.totalorder %s11835_s18, %s12381_s19 }
  0xb4   : > { %p11838_p11 = pnand %p11836_p10, %p12468_p7 }
  0xb6   : > { %p11839_p12 = pneg %p11838_p11 }
  0xb8   : > { %p11844_p13 = pnand %p11842_p2, %p11839_p12 }
  0xba   : > { %11847 = shalt.err (!%p11844_p13)
}
  0xbb   : > { %s11848_s2 = scalar_lea.vmem %s12462_s1, 16  ;;  %s11855_s16 = scalar_lea.vmem %s12462_s1, 32 }
  0xbc   : > { %p11849_p0 = scmp.ne.s32.totalorder %s12462_s1, %s11848_s2  ;;  %p11856_p6 = scmp.lt.s32.totalorder %s12462_s1, %s12462_s1 }
  0xbd   : > { %p11857_p8 = scmp.lt.s32.totalorder %s11855_s16, %s11848_s2 }
  0xbe   : > { %p11851_p1 = pnand %p11849_p0, %p12468_p7 }
  0xbf   : > { %p11858_p9 = por %p11857_p8, %p11856_p6 }
  0xc0   : > { %p11852_p4 = pneg %p11851_p1 }
  0xc2   : > { %p11859_p10 = pnand %p11858_p9, %p11852_p4 }
  0xc4   : > { %11862 = shalt.err (!%p11859_p10)
}
  0xc5   : > { %11204 = dma.hbm_to_vmem [thread:$0]  (!%p12456_p5), %s12381_s19, 16, %s12462_s1, [#allocation14]  }
  0xc6   : > { %s12148_s23 = smov [#allocation16]   ;;  %s12149_s22 = smov [#allocation2]  }
  0xc7   : > { %s1498_s11 = sshll.u32 %s12148_s23, 4  ;;  %s1360_s28 = sshll.u32 %s12149_s22, 4  ;;  %s1499_s11 = int_to_ptr.vmem [resolvable:$true] %s1498_s11  ;;  %s1361_s28 = int_to_ptr.vmem [resolvable:$true] %s1360_s28 }
  0xc8   : > { %s11863_s18 = scalar_lea.hbm %s12406_s14, 16 }
  0xc9   : > { %p11864_p11 = scmp.ne.s32.totalorder %s12406_s14, %s11863_s18  ;;  %p11870_p13 = scmp.lt.u32.totalorder %s11863_s18, %s12406_s14 }
  0xcb   : > { %p11866_p12 = pnand %p11864_p11, %p12468_p7 }
  0xcd   : > { %p11867_p2 = pneg %p11866_p12 }
  0xcf   : > { %p11872_p0 = pnand %p11870_p13, %p11867_p2 }
  0xd1   : > { %11875 = shalt.err (!%p11872_p0)
}
  0xd2   : > { %s11876_s2 = scalar_lea.vmem %s1499_s11, 16  ;;  %s11883_s1 = scalar_lea.vmem %s1499_s11, 32 }
  0xd3   : > { %p11877_p1 = scmp.ne.s32.totalorder %s1499_s11, %s11876_s2  ;;  %p11884_p8 = scmp.lt.s32.totalorder %s1499_s11, %s1499_s11 }
  0xd4   : > { %p11885_p9 = scmp.lt.s32.totalorder %s11883_s1, %s11876_s2 }
  0xd5   : > { %p11879_p4 = pnand %p11877_p1, %p12468_p7 }
  0xd6   : > { %p11886_p10 = por %p11885_p9, %p11884_p8 }
  0xd7   : > { %p11880_p6 = pneg %p11879_p4 }
  0xd9   : > { %p11887_p3 = pnand %p11886_p10, %p11880_p6 }
  0xdb   : > { %11890 = shalt.err (!%p11887_p3)
}
  0xdc   : > { %11210 = dma.hbm_to_vmem [thread:$0]  (!%p12456_p5), %s12406_s14, 16, %s1499_s11, [#allocation17]  }
  0xdd   : > { %s11891_s16 = scalar_lea.hbm %s12296_s6, 16 }
  0xde   : > { %p11892_p11 = scmp.ne.s32.totalorder %s12296_s6, %s11891_s16  ;;  %p11898_p13 = scmp.lt.u32.totalorder %s11891_s16, %s12296_s6 }
  0xe0   : > { %p11894_p12 = pnand %p11892_p11, %p12468_p7 }
  0xe2   : > { %p11895_p2 = pneg %p11894_p12 }
  0xe4   : > { %p11900_p0 = pnand %p11898_p13, %p11895_p2 }
  0xe6   : > { %11903 = shalt.err (!%p11900_p0)
}
  0xe7   : > { %s11904_s23 = scalar_lea.vmem %s1361_s28, 16  ;;  %s11911_s22 = scalar_lea.vmem %s1361_s28, 32 }
  0xe8   : > { %p11905_p3 = scmp.ne.s32.totalorder %s1361_s28, %s11904_s23  ;;  %p11912_p6 = scmp.lt.s32.totalorder %s1361_s28, %s1361_s28 }
  0xe9   : > { %p11913_p8 = scmp.lt.s32.totalorder %s11911_s22, %s11904_s23 }
  0xea   : > { %p11907_p1 = pnand %p11905_p3, %p12468_p7 }
  0xeb   : > { %p11914_p9 = por %p11913_p8, %p11912_p6 }
  0xec   : > { %p11908_p4 = pneg %p11907_p1 }
  0xee   : > { %p11915_p10 = pnand %p11914_p9, %p11908_p4 }
  0xf0   : > { %11918 = shalt.err (!%p11915_p10)
}
  0xf1   : > { %11183 = dma.hbm_to_vmem [thread:$0]  (!%p12456_p5), %s12296_s6, 16, %s1361_s28, [#allocation3]  }
  0xf2   : > { %s12150_s11 = smov [#allocation6]   ;;  %s12151_s2 = smov [#allocation9]  }
  0xf3   : > { %s1388_s18 = sshll.u32 %s12150_s11, 4  ;;  %s1422_s1 = sshll.u32 %s12151_s2, 4  ;;  %s1389_s18 = int_to_ptr.vmem [resolvable:$true] %s1388_s18  ;;  %s1423_s1 = int_to_ptr.vmem [resolvable:$true] %s1422_s1 }
  0xf4   : > { %s11919_s16 = scalar_lea.hbm %s12316_s30, 16 }
  0xf5   : > { %p11920_p11 = scmp.ne.s32.totalorder %s12316_s30, %s11919_s16  ;;  %p11926_p13 = scmp.lt.u32.totalorder %s11919_s16, %s12316_s30 }
  0xf7   : > { %p11922_p12 = pnand %p11920_p11, %p12468_p7 }
  0xf9   : > { %p11923_p2 = pneg %p11922_p12 }
  0xfb   : > { %p11928_p0 = pnand %p11926_p13, %p11923_p2 }
  0xfd   : > { %11931 = shalt.err (!%p11928_p0)
}
  0xfe   : > { %s11932_s23 = scalar_lea.vmem %s1389_s18, 16  ;;  %s11939_s28 = scalar_lea.vmem %s1389_s18, 32 }
  0xff   : > { %p11933_p3 = scmp.ne.s32.totalorder %s1389_s18, %s11932_s23  ;;  %p11940_p6 = scmp.lt.s32.totalorder %s1389_s18, %s1389_s18 }
 0x100   : > { %p11941_p8 = scmp.lt.s32.totalorder %s11939_s28, %s11932_s23 }
 0x101   : > { %p11935_p1 = pnand %p11933_p3, %p12468_p7 }
 0x102   : > { %p11942_p9 = por %p11941_p8, %p11940_p6 }
 0x103   : > { %p11936_p4 = pneg %p11935_p1 }
 0x105   : > { %p11943_p10 = pnand %p11942_p9, %p11936_p4 }
 0x107   : > { %11946 = shalt.err (!%p11943_p10)
}
 0x108   : > { %11189 = dma.hbm_to_vmem [thread:$0]  (!%p12456_p5), %s12316_s30, 16, %s1389_s18, [#allocation5]  }
 0x109   : > { %s11947_s22 = scalar_lea.hbm %s12346_s12, 16 }
 0x10a   : > { %p11948_p11 = scmp.ne.s32.totalorder %s12346_s12, %s11947_s22  ;;  %p11954_p13 = scmp.lt.u32.totalorder %s11947_s22, %s12346_s12 }
 0x10c   : > { %p11950_p12 = pnand %p11948_p11, %p12468_p7 }
 0x10e   : > { %p11951_p2 = pneg %p11950_p12 }
 0x110   : > { %p11956_p0 = pnand %p11954_p13, %p11951_p2 }
 0x112   : > { %11959 = shalt.err (!%p11956_p0)
}
 0x113   : > { %s11960_s11 = scalar_lea.vmem %s1423_s1, 16  ;;  %s11967_s2 = scalar_lea.vmem %s1423_s1, 32 }
 0x114   : > { %p11961_p3 = scmp.ne.s32.totalorder %s1423_s1, %s11960_s11  ;;  %p11968_p6 = scmp.lt.s32.totalorder %s1423_s1, %s1423_s1 }
 0x115   : > { %p11969_p8 = scmp.lt.s32.totalorder %s11967_s2, %s11960_s11 }
 0x116   : > { %p11963_p1 = pnand %p11961_p3, %p12468_p7 }
 0x117   : > { %p11970_p9 = por %p11969_p8, %p11968_p6 }
 0x118   : > { %p11964_p4 = pneg %p11963_p1 }
 0x11a   : > { %p11971_p10 = pnand %p11970_p9, %p11964_p4 }
 0x11c   : > { %11974 = shalt.err (!%p11971_p10)
}
 0x11d   : > { %11195 = dma.hbm_to_vmem [thread:$0]  (!%p12456_p5), %s12346_s12, 16, %s1423_s1, [#allocation8]  }
 0x11e   : > { %s12152_s18 = smov [#allocation12]   ;;  %s12153_s23 = smov [#allocation15]  }
 0x11f   : > { %s1456_s16 = sshll.u32 %s12152_s18, 4  ;;  %s1487_s28 = sshll.u32 %s12153_s23, 4  ;;  %s1457_s16 = int_to_ptr.vmem [resolvable:$true] %s1456_s16  ;;  %s1488_s28 = int_to_ptr.vmem [resolvable:$true] %s1487_s28 }
 0x120   : > { %s11975_s22 = scalar_lea.hbm %s12376_s24, 16 }
 0x121   : > { %p11976_p11 = scmp.ne.s32.totalorder %s12376_s24, %s11975_s22  ;;  %p11982_p13 = scmp.lt.u32.totalorder %s11975_s22, %s12376_s24 }
 0x123   : > { %p11978_p12 = pnand %p11976_p11, %p12468_p7 }
 0x125   : > { %p11979_p2 = pneg %p11978_p12 }
 0x127   : > { %p11984_p0 = pnand %p11982_p13, %p11979_p2 }
 0x129   : > { %11987 = shalt.err (!%p11984_p0)
}
 0x12a   : > { %s11988_s11 = scalar_lea.vmem %s1457_s16, 16  ;;  %s11995_s1 = scalar_lea.vmem %s1457_s16, 32 }
 0x12b   : > { %p11989_p3 = scmp.ne.s32.totalorder %s1457_s16, %s11988_s11  ;;  %p11996_p6 = scmp.lt.s32.totalorder %s1457_s16, %s1457_s16 }
 0x12c   : > { %p11997_p8 = scmp.lt.s32.totalorder %s11995_s1, %s11988_s11 }
 0x12d   : > { %p11991_p1 = pnand %p11989_p3, %p12468_p7 }
 0x12e   : > { %p11998_p9 = por %p11997_p8, %p11996_p6 }
 0x12f   : > { %p11992_p4 = pneg %p11991_p1 }
 0x131   : > { %p11999_p10 = pnand %p11998_p9, %p11992_p4 }
 0x133   : > { %12002 = shalt.err (!%p11999_p10)
}
 0x134   : > { %11201 = dma.hbm_to_vmem [thread:$0]  (!%p12456_p5), %s12376_s24, 16, %s1457_s16, [#allocation11]  }
 0x135   : > { %s12003_s2 = scalar_lea.hbm %s12401_s25, 16 }
 0x136   : > { %p12004_p11 = scmp.ne.s32.totalorder %s12401_s25, %s12003_s2  ;;  %p12010_p13 = scmp.lt.u32.totalorder %s12003_s2, %s12401_s25 }
 0x138   : > { %p12006_p12 = pnand %p12004_p11, %p12468_p7 }
 0x13a   : > { %p12007_p2 = pneg %p12006_p12 }
 0x13c   : > { %p12012_p0 = pnand %p12010_p13, %p12007_p2 }
 0x13e   : > { %12015 = shalt.err (!%p12012_p0)
}
 0x13f   : > { %s12016_s18 = scalar_lea.vmem %s1488_s28, 16  ;;  %s12023_s23 = scalar_lea.vmem %s1488_s28, 32 }
 0x140   : > { %p12017_p3 = scmp.ne.s32.totalorder %s1488_s28, %s12016_s18  ;;  %p12024_p6 = scmp.lt.s32.totalorder %s1488_s28, %s1488_s28 }
 0x141   : > { %p12025_p8 = scmp.lt.s32.totalorder %s12023_s23, %s12016_s18 }
 0x142   : > { %p12019_p1 = pnand %p12017_p3, %p12468_p7 }
 0x143   : > { %p12026_p9 = por %p12025_p8, %p12024_p6 }
 0x144   : > { %p12020_p4 = pneg %p12019_p1 }
 0x146   : > { %p12027_p10 = pnand %p12026_p9, %p12020_p4 }
 0x148   : > { %12030 = shalt.err (!%p12027_p10)
}
 0x149   : > { %11207 = dma.hbm_to_vmem [thread:$0]  (!%p12456_p5), %s12401_s25, 16, %s1488_s28, [#allocation14]  }
 0x14a   : > { %s12154_s16 = smov [#allocation18]   ;;  %s12031_s11 = scalar_lea.hbm %s12411_s8, 16 }
 0x14b   : > { %s1509_s22 = sshll.u32 %s12154_s16, 4  ;;  %p12032_p11 = scmp.ne.s32.totalorder %s12411_s8, %s12031_s11  ;;  %s1510_s22 = int_to_ptr.vmem [resolvable:$true] %s1509_s22 }
 0x14c   : > { %p12038_p13 = scmp.lt.u32.totalorder %s12031_s11, %s12411_s8 }
 0x14d   : > { %p12034_p12 = pnand %p12032_p11, %p12468_p7 }
 0x14f   : > { %p12035_p2 = pneg %p12034_p12 }
 0x151   : > { %p12040_p0 = pnand %p12038_p13, %p12035_p2 }
 0x153   : > { %12043 = shalt.err (!%p12040_p0)
}
 0x154   : > { %s12044_s1 = scalar_lea.vmem %s1510_s22, 16  ;;  %s12051_s2 = scalar_lea.vmem %s1510_s22, 32 }
 0x155   : > { %p12045_p3 = scmp.ne.s32.totalorder %s1510_s22, %s12044_s1  ;;  %p12052_p6 = scmp.lt.s32.totalorder %s1510_s22, %s1510_s22 }
 0x156   : > { %p12053_p8 = scmp.lt.s32.totalorder %s12051_s2, %s12044_s1 }
 0x157   : > { %p12047_p1 = pnand %p12045_p3, %p12468_p7 }
 0x158   : > { %p12054_p9 = por %p12053_p8, %p12052_p6 }
 0x159   : > { %p12048_p4 = pneg %p12047_p1 }
 0x15b   : > { %p12055_p10 = pnand %p12054_p9, %p12048_p4 }
 0x15d   : > { %12058 = shalt.err (!%p12055_p10)
}
 0x15e   : > { %11213 = dma.hbm_to_vmem [thread:$0]  (!%p12456_p5), %s12411_s8, 16, %s1510_s22, [#allocation17]  }
 0x15f   : > { %p14257_p11 = scmp.ne.s32.totalorder %s14254_s15, 0 }
 0x160   : > { %p14258_p12 = scmp.eq.s32.totalorder (!%p14257_p11), %s12439_s0, 0 }
 0x161   : > { %1539 = sbr.rel (%p14257_p11) target bundleno = 14533 (0x38c5), region = 232 }
 0x168   : > { %12064 = dma.done.wait (%p14258_p12), [#allocation3], 16   ;;  %p14259_p2 = pmov %p14258_p12 }
 0x16a   : > { %12066 = vsyncadd (%p14259_p2), [#allocation3], 4294967280  ;;  %p14260_p7 = pmov %p14259_p2 }
 0x16b   : > { %p14261_p13 = pmov %p14259_p2 }
 0x16c   : > { %12068 = dma.done.wait (%p14260_p7), [#allocation5], 32  }
 0x16d   : > { %12070 = vsyncadd (%p14261_p13), [#allocation5], 4294967264  ;;  %p14262_p0 = pmov %p14259_p2 }
 0x16f   : > { %12072 = dma.done.wait (%p14262_p0), [#allocation8], 32   ;;  %p14263_p5 = pmov %p14262_p0 }
 0x170   : > { %p14264_p3 = pmov %p14262_p0 }
 0x171   : > { %12074 = vsyncadd (%p14263_p5), [#allocation8], 4294967264 }
 0x172   : > { %12076 = dma.done.wait (%p14264_p3), [#allocation11], 32   ;;  %p14265_p1 = pmov %p14262_p0 }
 0x173   : > { %p14266_p4 = pmov %p14262_p0 }
 0x174   : > { %12078 = vsyncadd (%p14265_p1), [#allocation11], 4294967264 }
 0x175   : > { %12080 = dma.done.wait (%p14266_p4), [#allocation14], 32   ;;  %p14267_p6 = pmov %p14262_p0 }
 0x176   : > { %p14268_p8 = pmov %p14262_p0 }
 0x177   : > { %12082 = vsyncadd (%p14267_p6), [#allocation14], 4294967264 }
 0x178   : > { %12084 = dma.done.wait (%p14268_p8), [#allocation17], 32   ;;  %p14269_p9 = pmov %p14262_p0 }
 0x179   : > { %s14270_s5 = sld [smem:[#allocation25_spill]]  ;;  %p1703_p10 = scmp.lt.s32.totalorder %s12439_s0, 1  ;;  %v11312_v0 = vld [vmem:[%s12171_s9] sm:$0xff]   ;;  %v11313_v1 = vld [vmem:[%s12171_s9 + $0x8] sm:$0xff]   ;;  %vm1773_vm0 = vcmask 392192   ;;  %v11314_v3 = vld [vmem:[%s12171_s9 + $0x10] sm:$0xff]  }
 0x17a   : > { %12086 = vsyncadd (%p14269_p9), [#allocation17], 4294967264  ;;  %10254 = vmatprep.subr.bf16.mxu0 %v11312_v0  ;;  %v9340_v7 = vld [vmem:[%s12176_s13] ss:$0 sm:$0xff]  ;;  %vm1853_vm1 = vcmask 261120   ;;  %s14271_s10 = sld [smem:[#allocation26_spill]] }
 0x17b   : > { %s14308_s0 = smov (!%p1703_p10, %s12439_s0), 1  ;;  %10255 = vmatpush3.bf16.msra.mxu0 %v11312_v0  ;;  %s14272_s28 = sld [smem:[#allocation27_spill]]  ;;  %vm2436_vm2 = vcmask 130048   ;;  %vm2526_vm3 = vcmask 523264   ;;  %vm12156_vm4 = vmmov 0  }
 0x17c   : > { %s9893_s15 = sshll.u32 %s14308_s0, 5  ;;  %10256 = vmatprep.subr.bf16.mxu0 %v11313_v1  ;;  %s14273_s18 = sld [smem:[#allocation30_spill]] }
 0x17d   : > { %s14274_s23 = sld [smem:[#allocation28_spill]]  ;;  %s14275_s16 = sld [smem:[#allocation29_spill]] }
 0x17e   : > { %s14276_s22 = sld [smem:[#allocation31_spill]]  ;;  %s14277_s11 = sld [smem:[#allocation32_spill]] }
 0x17f   : > { %s1707_s26 = scalar_lea.vmem %s14270_s5, %s9893_s15  ;;  %10257 = vmatpush3.bf16.msra.mxu0 %v11313_v1  ;;  %s14278_s1 = sld [smem:[#allocation33_spill]] }
 0x180   : > { %v11315_v2 = vld [vmem:[%s1707_s26] sm:$0xff]   ;;  %10258 = vmatprep.subr.bf16.mxu0 %v11314_v3  ;;  %v11316_v4 = vld [vmem:[%s1707_s26 + $0x8] sm:$0xff]   ;;  %v11317_v5 = vld [vmem:[%s1707_s26 + $0x10] sm:$0xff]   ;;  %s14279_s2 = sld [smem:[#allocation34_spill]]  ;;  %s14280_s15 = sld [smem:[#allocation37_spill]] }
 0x181   : > { %10260 = vmatprep.mubr.msk.bf16.mxu0 %vm1773_vm0, %v11315_v2  ;;  %v11318_v6 = vld [vmem:[%s1707_s26 + $0x18] sm:$0xff]   ;;  %s14281_s26 = sld [smem:[#allocation35_spill]]  ;;  %s14299_s4 = sld [smem:[#allocation53_spill]] }
 0x182   : > { %s14303_s5 = sld [smem:[#allocation58_spill]] }
 0x183   : > { %10259 = vmatpush3.bf16.msra.mxu0 %v11314_v3 }
 0x186   : > { %10261 = vmatmul.mubr.msk.bf16.vlgmr.msra.gmra.mrb[0].mxu0 %vm1773_vm0, %v11316_v4 }
 0x187   : > { %10264 = vmatprep.mubr.msk.bf16.mxu0 %vm1773_vm0, %v11317_v5 }
 0x18e   : > { %10265 = vmatmul.mubr.msk.bf16.gmra.mrb[4].mxu0 %vm1773_vm0, %v11318_v6 }
 0x259   : > { %v10262_v8 = vpop.f32.mrb[0].mxu0 }
 0x25a   : > { %v1829_v9 = vadd.f32 %v10262_v8, %v9340_v7  ;;  %v1820_v10 = vpop.f32.mrb[1].mxu0 }
 0x25b   : > { %v1821_v11 = vadd.f32 %v9340_v7, %v1820_v10  ;;  %v10263_v12 = vpop.f32.mrb[2].mxu0 }
 0x25c   : > { %v1832_v13 = vadd.f32 %v10263_v12, %v9340_v7  ;;  %v1823_v14 = vpop.f32.mrb[3].mxu0  ;;  %v1860_v15 = vsel %vm1853_vm1, %v1829_v9, 0.0 }
 0x25d   : > { %v1824_v16 = vadd.f32 %v9340_v7, %v1823_v14  ;;  %1861 = vadd.xlane.f32.xlu1 %v1860_v15  ;;  %v1854_v17 = vsel %vm1853_vm1, %v1821_v11, 0.0 }
 0x25e   : > { %1855 = vadd.xlane.f32.xlu0 %v1854_v17  ;;  %v1863_v18 = vsel %vm1853_vm1, %v1832_v13, 0.0 }
 0x25f   : > { %v1857_v20 = vsel %vm1853_vm1, %v1824_v16, 0.0 }
 0x261   : > { %1864 = vadd.xlane.f32.xlu1 %v1863_v18  ;;  %v10266_v19 = vpop.f32.mrb[4].mxu0 }
 0x262   : > { %v1836_v21 = vpop.f32.mrb[5].mxu0  ;;  %1858 = vadd.xlane.f32.xlu0 %v1857_v20  ;;  %v1845_v25 = vadd.f32 %v10266_v19, %v9340_v7 }
 0x263   : > { %v1837_v22 = vadd.f32 %v9340_v7, %v1836_v21  ;;  %v10267_v23 = vpop.f32.mrb[6].mxu0 }
 0x264   : > { %v1839_v24 = vpop.f32.mrb[7].mxu0  ;;  %v1848_v28 = vadd.f32 %v10267_v23, %v9340_v7  ;;  %v1872_v30 = vsel %vm1853_vm1, %v1845_v25, 0.0 }
 0x265   : > { %v1840_v26 = vadd.f32 %v9340_v7, %v1839_v24  ;;  %v1866_v27 = vsel %vm1853_vm1, %v1837_v22, 0.0 }
 0x266   : > { %1867 = vadd.xlane.f32.xlu0 %v1866_v27  ;;  %v1875_v31 = vsel %vm1853_vm1, %v1848_v28, 0.0 }
 0x267   : > { %v1869_v29 = vsel %vm1853_vm1, %v1840_v26, 0.0 }
 0x268   : > { %1870 = vadd.xlane.f32.xlu1 %v1869_v29 }
 0x26a   : > { %1873 = vadd.xlane.f32.xlu0 %v1872_v30  ;;  %v9352_v30 = vld [vmem:[%s14271_s10] ss:$0 sm:$0xff]  ;;  %s14282_s10 = sld [smem:[#allocation36_spill]] }
 0x26c   : > { %1876 = vadd.xlane.f32.xlu1 %v1875_v31 }
 0x2ea   : > { %v1862_v32 = vpop.xlane.xlu1 %1861 }
 0x2eb   : > { %v1881_v33 = vmul.f32 0.03125, %v1862_v32  ;;  %v1856_v34 = vpop.xlane.xlu0 %1855 }
 0x2ec   : > { %v1879_v35 = vmul.f32 0.03125, %v1856_v34  ;;  %v9353_v34 = vld [vmem:[%s14272_s28] ss:$0 sm:$0xff]  ;;  %s14283_s28 = sld [smem:[#allocation39_spill]] }
 0x2ed   : > { %v12648_v36 = vsub.f32 %v1829_v9, %v1881_v33 }
 0x2ee   : > { %v12650_v37 = vsub.f32 %v1821_v11, %v1879_v35  ;;  %v1865_v38 = vpop.xlane.xlu1 %1864 }
 0x2ef   : > { %v1882_v39 = vmul.f32 0.03125, %v1865_v38  ;;  %v1859_v40 = vpop.xlane.xlu0 %1858  ;;  %v1897_v46 = vmul.f32 %v12648_v36, %v12648_v36 }
 0x2f0   : > { %v1880_v41 = vmul.f32 0.03125, %v1859_v40  ;;  %v1895_v42 = vmul.f32 %v12650_v37, %v12650_v37 }
 0x2f1   : > { %v12654_v43 = vsub.f32 %v1832_v13, %v1882_v39  ;;  %v1909_v54 = vsel %vm1853_vm1, %v1897_v46, 0.0 }
 0x2f2   : > { %v12656_v44 = vsub.f32 %v1824_v16, %v1880_v41  ;;  %v1903_v45 = vsel %vm1853_vm1, %v1895_v42, 0.0 }
 0x2f3   : > { %1904 = vadd.xlane.f32.xlu0 %v1903_v45  ;;  %v1868_v47 = vpop.xlane.xlu0 %1867  ;;  %v1898_v51 = vmul.f32 %v12654_v43, %v12654_v43 }
 0x2f4   : > { %v1883_v48 = vmul.f32 0.03125, %v1868_v47  ;;  %v1896_v49 = vmul.f32 %v12656_v44, %v12656_v44 }
 0x2f5   : > { %v1871_v50 = vpop.xlane.xlu1 %1870  ;;  %v1912_v61 = vsel %vm1853_vm1, %v1898_v51, 0.0 }
 0x2f6   : > { %v12665_v52 = vsub.f32 %v1837_v22, %v1883_v48  ;;  %v1884_v53 = vmul.f32 0.03125, %v1871_v50  ;;  %v1906_v55 = vsel %vm1853_vm1, %v1896_v49, 0.0 }
 0x2f7   : > { %1910 = vadd.xlane.f32.xlu0 %v1909_v54  ;;  %1907 = vadd.xlane.f32.xlu1 %v1906_v55  ;;  %v1874_v56 = vpop.xlane.xlu0 %1873 }
 0x2f8   : > { %v12669_v57 = vsub.f32 %v1840_v26, %v1884_v53  ;;  %v1885_v58 = vmul.f32 0.03125, %v1874_v56  ;;  %v1899_v59 = vmul.f32 %v12665_v52, %v12665_v52 }
 0x2f9   : > { %v1877_v60 = vpop.xlane.xlu1 %1876 }
 0x2fa   : > { %v12674_v62 = vsub.f32 %v1845_v25, %v1885_v58  ;;  %v1886_v63 = vmul.f32 0.03125, %v1877_v60  ;;  %v1915_v0 = vsel %vm1853_vm1, %v1899_v59, 0.0  ;;  %v1900_v1 = vmul.f32 %v12669_v57, %v12669_v57 }
 0x2fb   : > { %1913 = vadd.xlane.f32.xlu1 %v1912_v61  ;;  %1916 = vadd.xlane.f32.xlu0 %v1915_v0 }
 0x2fc   : > { %v12679_v2 = vsub.f32 %v1848_v28, %v1886_v63  ;;  %v1901_v3 = vmul.f32 %v12674_v62, %v12674_v62  ;;  %v1918_v4 = vsel %vm1853_vm1, %v1900_v1, 0.0 }
 0x2fe   : > { %v1921_v5 = vsel %vm1853_vm1, %v1901_v3, 0.0  ;;  %v1902_v6 = vmul.f32 %v12679_v2, %v12679_v2 }
 0x2ff   : > { %1919 = vadd.xlane.f32.xlu1 %v1918_v4  ;;  %1922 = vadd.xlane.f32.xlu0 %v1921_v5 }
 0x300   : > { %v1924_v7 = vsel %vm1853_vm1, %v1902_v6, 0.0 }
 0x303   : > { %1925 = vadd.xlane.f32.xlu1 %v1924_v7 }
 0x380   : > { %v1905_v8 = vpop.xlane.xlu0 %1904 }
 0x381   : > { %v1927_v9 = vmul.f32 0.03125, %v1905_v8 }
 0x383   : > { %v1935_v10 = vadd.f32 1e-05, %v1927_v9 }
 0x384   : > { %v1908_v11 = vpop.xlane.xlu1 %1907  ;;  %v1911_v12 = vpop.xlane.xlu0 %1910 }
 0x385   : > { %11455 = vrsqrt.f32 %v1935_v10  ;;  %v1928_v13 = vmul.f32 0.03125, %v1908_v11  ;;  %v1929_v14 = vmul.f32 0.03125, %v1911_v12 }
 0x387   : > { %v1936_v15 = vadd.f32 1e-05, %v1928_v13  ;;  %v1937_v16 = vadd.f32 1e-05, %v1929_v14 }
 0x388   : > { %v1914_v17 = vpop.xlane.xlu1 %1913  ;;  %v1917_v18 = vpop.xlane.xlu0 %1916 }
 0x389   : > { %11457 = vrsqrt.f32 %v1936_v15  ;;  %v1930_v19 = vmul.f32 0.03125, %v1914_v17  ;;  %v1931_v20 = vmul.f32 0.03125, %v1917_v18 }
 0x38a   : > { %11459 = vrsqrt.f32 %v1937_v16 }
 0x38b   : > { %v1938_v21 = vadd.f32 1e-05, %v1930_v19  ;;  %v1939_v22 = vadd.f32 1e-05, %v1931_v20 }
 0x38c   : > { %v1920_v23 = vpop.xlane.xlu1 %1919  ;;  %v1923_v24 = vpop.xlane.xlu0 %1922 }
 0x38d   : > { %11461 = vrsqrt.f32 %v1938_v21  ;;  %v1932_v25 = vmul.f32 0.03125, %v1920_v23  ;;  %v1933_v26 = vmul.f32 0.03125, %v1923_v24 }
 0x38e   : > { %11463 = vrsqrt.f32 %v1939_v22 }
 0x38f   : > { %v11456_v27 = vpop.eup %11455  ;;  %v1940_v28 = vadd.f32 1e-05, %v1932_v25  ;;  %v1941_v29 = vadd.f32 1e-05, %v1933_v26 }
 0x390   : > { %v1926_v31 = vpop.xlane.xlu1 %1925  ;;  %v1951_v32 = vmul.f32 %v11456_v27, %v12650_v37 }
 0x391   : > { %11465 = vrsqrt.f32 %v1940_v28  ;;  %v1934_v33 = vmul.f32 0.03125, %v1926_v31 }
 0x392   : > { %11467 = vrsqrt.f32 %v1941_v29  ;;  %v1965_v35 = vmul.f32 %v9352_v30, %v1951_v32 }
 0x393   : > { %v11458_v38 = vpop.eup %11457  ;;  %v1942_v39 = vadd.f32 1e-05, %v1934_v33 }
 0x394   : > { %v11460_v40 = vpop.eup %11459  ;;  %v12691_v41 = vadd.f32 %v9353_v34, %v1965_v35  ;;  %v1952_v42 = vmul.f32 %v11458_v38, %v12656_v44 }
 0x395   : > { %11469 = vrsqrt.f32 %v1942_v39  ;;  %v1953_v45 = vmul.f32 %v11460_v40, %v12648_v36 }
 0x396   : > { %v1989_v46 = vsel %vm1853_vm1, %v12691_v41, 0.0  ;;  %v1966_v47 = vmul.f32 %v9352_v30, %v1952_v42 }
 0x397   : > { %v11462_v37 = vpop.eup %11461  ;;  %1990 = vadd.xlane.f32.xlu0 %v1989_v46  ;;  %v1967_v48 = vmul.f32 %v9352_v30, %v1953_v45 }
 0x398   : > { %v11464_v49 = vpop.eup %11463  ;;  %v12697_v50 = vadd.f32 %v9353_v34, %v1966_v47  ;;  %v1954_v51 = vmul.f32 %v11462_v37, %v12654_v43 }
 0x399   : > { %v12700_v53 = vadd.f32 %v9353_v34, %v1967_v48  ;;  %v1955_v54 = vmul.f32 %v11464_v49, %v12665_v52 }
 0x39a   : > { %v1992_v44 = vsel %vm1853_vm1, %v12697_v50, 0.0  ;;  %v1968_v36 = vmul.f32 %v9352_v30, %v1954_v51 }
 0x39b   : > { %v11466_v55 = vpop.eup %11465  ;;  %1993 = vadd.xlane.f32.xlu1 %v1992_v44  ;;  %v1995_v56 = vsel %vm1853_vm1, %v12700_v53, 0.0  ;;  %v1969_v58 = vmul.f32 %v9352_v30, %v1955_v54 }
 0x39c   : > { %v11468_v59 = vpop.eup %11467  ;;  %1996 = vadd.xlane.f32.xlu0 %v1995_v56  ;;  %v12707_v60 = vadd.f32 %v9353_v34, %v1968_v36  ;;  %v1956_v43 = vmul.f32 %v11466_v55, %v12669_v57  ;;  %v11319_v55 = vld [vmem:[%s14273_s18] sm:$0xff]  }
 0x39d   : > { %v12710_v61 = vadd.f32 %v9353_v34, %v1969_v58  ;;  %v1957_v52 = vmul.f32 %v11468_v59, %v12674_v62  ;;  %v11320_v56 = vld [vmem:[%s14273_s18 + $0x40] sm:$0xff]   ;;  %10268 = vmatprep.subr.bf16.mxu1 %v11319_v55  ;;  %v11321_v58 = vld [vmem:[%s14273_s18 + $0x8] sm:$0xff]  }
 0x39e   : > { %v1998_v63 = vsel %vm1853_vm1, %v12707_v60, 0.0  ;;  %v1970_v0 = vmul.f32 %v9352_v30, %v1956_v43  ;;  %10292 = vmatprep.subr.bf16.mxu0 %v11320_v56  ;;  %10269 = vmatpush3.bf16.msra.mxu1 %v11319_v55  ;;  %v11322_v59 = vld [vmem:[%s14273_s18 + $0x48] sm:$0xff]   ;;  %v12783_v43 = vld [vmem:[%s14273_s18 + $0x20] sm:$0xff]  }
 0x39f   : > { %v11470_v1 = vpop.eup %11469  ;;  %1999 = vadd.xlane.f32.xlu1 %v1998_v63  ;;  %v2001_v3 = vsel %vm1853_vm1, %v12710_v61, 0.0  ;;  %v1971_v4 = vmul.f32 %v9352_v30, %v1957_v52  ;;  %10293 = vmatpush3.bf16.msra.mxu0 %v11320_v56 }
 0x3a0   : > { %2002 = vadd.xlane.f32.xlu0 %v2001_v3  ;;  %v12717_v5 = vadd.f32 %v9353_v34, %v1970_v0  ;;  %v1958_v6 = vmul.f32 %v11470_v1, %v12679_v2  ;;  %10270 = vmatprep.subr.bf16.mxu1 %v11321_v58 }
 0x3a1   : > { %v12720_v57 = vadd.f32 %v9353_v34, %v1971_v4  ;;  %10294 = vmatprep.subr.bf16.mxu0 %v11322_v59 }
 0x3a2   : > { %v2004_v62 = vsel %vm1853_vm1, %v12717_v5, 0.0  ;;  %v1972_v7 = vmul.f32 %v9352_v30, %v1958_v6  ;;  %10271 = vmatpush3.bf16.msra.mxu1 %v11321_v58 }
 0x3a3   : > { %2005 = vadd.xlane.f32.xlu1 %v2004_v62  ;;  %v2007_v8 = vsel %vm1853_vm1, %v12720_v57, 0.0  ;;  %10295 = vmatpush3.bf16.msra.mxu0 %v11322_v59 }
 0x3a4   : > { %2008 = vadd.xlane.f32.xlu0 %v2007_v8  ;;  %v12726_v9 = vadd.f32 %v9353_v34, %v1972_v7  ;;  %10280 = vmatprep.subr.bf16.mxu1 %v12783_v43 }
 0x3a6   : > { %v2010_v10 = vsel %vm1853_vm1, %v12726_v9, 0.0 }
 0x3a7   : > { %2011 = vadd.xlane.f32.xlu1 %v2010_v10 }
 0x424   : > { %v1991_v11 = vpop.xlane.xlu0 %1990 }
 0x425   : > { %v2013_v12 = vmul.f32 0.03125, %v1991_v11 }
 0x427   : > { %v12731_v2 = vsub.f32 %v12691_v41, %v2013_v12 }
 0x428   : > { %v1994_v13 = vpop.xlane.xlu1 %1993 }
 0x429   : > { %v2014_v14 = vmul.f32 0.03125, %v1994_v13  ;;  %v1997_v15 = vpop.xlane.xlu0 %1996  ;;  %v2029_v16 = vmul.f32 %v12731_v2, %v12731_v2 }
 0x42a   : > { %v2015_v17 = vmul.f32 0.03125, %v1997_v15 }
 0x42b   : > { %v12736_v18 = vsub.f32 %v12697_v50, %v2014_v14  ;;  %v2037_v19 = vsel %vm1853_vm1, %v2029_v16, 0.0 }
 0x42c   : > { %v12740_v20 = vsub.f32 %v12700_v53, %v2015_v17  ;;  %v2000_v21 = vpop.xlane.xlu1 %1999  ;;  %2038 = vadd.xlane.f32.xlu0 %v2037_v19 }
 0x42d   : > { %v2016_v22 = vmul.f32 0.03125, %v2000_v21  ;;  %v2003_v23 = vpop.xlane.xlu0 %2002  ;;  %v2030_v24 = vmul.f32 %v12736_v18, %v12736_v18 }
 0x42e   : > { %v2017_v25 = vmul.f32 0.03125, %v2003_v23  ;;  %v2031_v26 = vmul.f32 %v12740_v20, %v12740_v20 }
 0x42f   : > { %v12747_v27 = vsub.f32 %v12707_v60, %v2016_v22  ;;  %v2040_v28 = vsel %vm1853_vm1, %v2030_v24, 0.0 }
 0x430   : > { %v12751_v29 = vsub.f32 %v12710_v61, %v2017_v25  ;;  %2041 = vadd.xlane.f32.xlu1 %v2040_v28  ;;  %v2006_v30 = vpop.xlane.xlu1 %2005  ;;  %v2043_v31 = vsel %vm1853_vm1, %v2031_v26, 0.0  ;;  %v9354_v26 = vld [vmem:[%s14274_s23] ss:$0 sm:$0xff]  ;;  %s14284_s23 = sld [smem:[#allocation38_spill]] }
 0x431   : > { %v2018_v32 = vmul.f32 0.03125, %v2006_v30  ;;  %2044 = vadd.xlane.f32.xlu0 %v2043_v31  ;;  %v2009_v33 = vpop.xlane.xlu0 %2008  ;;  %v2032_v34 = vmul.f32 %v12747_v27, %v12747_v27 }
 0x432   : > { %v2019_v35 = vmul.f32 0.03125, %v2009_v33  ;;  %v2033_v38 = vmul.f32 %v12751_v29, %v12751_v29 }
 0x433   : > { %v12759_v39 = vsub.f32 %v12717_v5, %v2018_v32  ;;  %v2046_v40 = vsel %vm1853_vm1, %v2032_v34, 0.0 }
 0x434   : > { %v12763_v42 = vsub.f32 %v12720_v57, %v2019_v35  ;;  %2047 = vadd.xlane.f32.xlu1 %v2046_v40  ;;  %v2012_v45 = vpop.xlane.xlu1 %2011  ;;  %v2049_v46 = vsel %vm1853_vm1, %v2033_v38, 0.0  ;;  %v9355_v35 = vld [vmem:[%s14275_s16] ss:$0 sm:$0xff]  ;;  %s14285_s16 = sld [smem:[#allocation40_spill]] }
 0x435   : > { %v2020_v47 = vmul.f32 0.03125, %v2012_v45  ;;  %2050 = vadd.xlane.f32.xlu0 %v2049_v46  ;;  %v2034_v37 = vmul.f32 %v12759_v39, %v12759_v39 }
 0x436   : > { %v2035_v48 = vmul.f32 %v12763_v42, %v12763_v42 }
 0x437   : > { %v12771_v49 = vsub.f32 %v12726_v9, %v2020_v47  ;;  %v2052_v51 = vsel %vm1853_vm1, %v2034_v37, 0.0 }
 0x438   : > { %2053 = vadd.xlane.f32.xlu1 %v2052_v51  ;;  %v2055_v54 = vsel %vm1853_vm1, %v2035_v48, 0.0 }
 0x439   : > { %2056 = vadd.xlane.f32.xlu0 %v2055_v54  ;;  %v2036_v44 = vmul.f32 %v12771_v49, %v12771_v49 }
 0x43b   : > { %v2058_v36 = vsel %vm1853_vm1, %v2036_v44, 0.0 }
 0x43c   : > { %2059 = vadd.xlane.f32.xlu1 %v2058_v36 }
 0x4b9   : > { %v2039_v52 = vpop.xlane.xlu0 %2038 }
 0x4ba   : > { %v2061_v63 = vmul.f32 0.03125, %v2039_v52  ;;  %v11324_v52 = vld [vmem:[%s14273_s18 + $0x28] sm:$0xff]  }
 0x4bc   : > { %v2069_v0 = vadd.f32 1e-05, %v2061_v63 }
 0x4bd   : > { %v2042_v1 = vpop.xlane.xlu1 %2041 }
 0x4be   : > { %11471 = vrsqrt.f32 %v2069_v0  ;;  %v2062_v3 = vmul.f32 0.03125, %v2042_v1  ;;  %v2045_v4 = vpop.xlane.xlu0 %2044 }
 0x4bf   : > { %v2063_v6 = vmul.f32 0.03125, %v2045_v4 }
 0x4c0   : > { %v2070_v62 = vadd.f32 1e-05, %v2062_v3 }
 0x4c1   : > { %v2071_v7 = vadd.f32 1e-05, %v2063_v6  ;;  %v2048_v8 = vpop.xlane.xlu1 %2047 }
 0x4c2   : > { %11473 = vrsqrt.f32 %v2070_v62  ;;  %v2064_v10 = vmul.f32 0.03125, %v2048_v8  ;;  %v2051_v11 = vpop.xlane.xlu0 %2050 }
 0x4c3   : > { %11475 = vrsqrt.f32 %v2071_v7  ;;  %v2065_v12 = vmul.f32 0.03125, %v2051_v11  ;;  %v9357_v7 = vld [vmem:[%s14276_s22] ss:$0 sm:$0xff] }
 0x4c4   : > { %v2072_v13 = vadd.f32 1e-05, %v2064_v10  ;;  %v9381_v10 = vld [vmem:[%s14276_s22 + $0x4] ss:$0 sm:$0xff] }
 0x4c5   : > { %v2073_v14 = vadd.f32 1e-05, %v2065_v12  ;;  %v2054_v15 = vpop.xlane.xlu1 %2053 }
 0x4c6   : > { %11477 = vrsqrt.f32 %v2072_v13  ;;  %v2066_v16 = vmul.f32 0.03125, %v2054_v15  ;;  %v2057_v17 = vpop.xlane.xlu0 %2056 }
 0x4c7   : > { %11479 = vrsqrt.f32 %v2073_v14  ;;  %v2067_v19 = vmul.f32 0.03125, %v2057_v17 }
 0x4c8   : > { %v11472_v21 = vpop.eup %11471  ;;  %v2074_v22 = vadd.f32 1e-05, %v2066_v16 }
 0x4c9   : > { %v2085_v23 = vmul.f32 %v11472_v21, %v12731_v2  ;;  %v2075_v24 = vadd.f32 1e-05, %v2067_v19  ;;  %v2060_v25 = vpop.xlane.xlu1 %2059 }
 0x4ca   : > { %11481 = vrsqrt.f32 %v2074_v22  ;;  %v2068_v28 = vmul.f32 0.03125, %v2060_v25 }
 0x4cb   : > { %11483 = vrsqrt.f32 %v2075_v24  ;;  %v2099_v33 = vmul.f32 %v9354_v26, %v2085_v23 }
 0x4cc   : > { %v11474_v30 = vpop.eup %11473  ;;  %v2076_v31 = vadd.f32 1e-05, %v2068_v28 }
 0x4cd   : > { %v11476_v32 = vpop.eup %11475  ;;  %v2086_v34 = vmul.f32 %v11474_v30, %v12736_v18  ;;  %v2113_v2 = vadd.f32 %v9355_v35, %v2099_v33 }
 0x4ce   : > { %v2087_v38 = vmul.f32 %v11476_v32, %v12740_v20  ;;  %11485 = vrsqrt.f32 %v2076_v31 }
 0x4cf   : > { %v2100_v40 = vmul.f32 %v9354_v26, %v2086_v34 }
 0x4d0   : > { %v11478_v45 = vpop.eup %11477  ;;  %v2101_v37 = vmul.f32 %v9354_v26, %v2087_v38 }
 0x4d1   : > { %v11480_v46 = vpop.eup %11479  ;;  %v2114_v47 = vadd.f32 %v9355_v35, %v2100_v40  ;;  %v2088_v48 = vmul.f32 %v11478_v45, %v12747_v27 }
 0x4d2   : > { %v2089_v51 = vmul.f32 %v11480_v46, %v12751_v29  ;;  %v2115_v56 = vadd.f32 %v9355_v35, %v2101_v37 }
 0x4d3   : > { %v2102_v54 = vmul.f32 %v9354_v26, %v2088_v48  ;;  %v12793_v44 = vpack.c.bf16 %v2114_v47, %v2113_v2 }
 0x4d4   : > { %v11482_v36 = vpop.eup %11481  ;;  %v2103_v18 = vmul.f32 %v9354_v26, %v2089_v51 }
 0x4d5   : > { %v11484_v55 = vpop.eup %11483  ;;  %v2116_v20 = vadd.f32 %v9355_v35, %v2102_v54  ;;  %v2090_v58 = vmul.f32 %v11482_v36, %v12759_v39  ;;  %10272 = vmatprep.mubr.msk.bf16.mxu1 %vm1853_vm1, %v12793_v44  ;;  %10296 = vmatprep.mubr.msk.bf16.mxu0 %vm1853_vm1, %v12793_v44 }
 0x4d6   : > { %v2091_v27 = vmul.f32 %v11484_v55, %v12763_v42  ;;  %v2117_v0 = vadd.f32 %v9355_v35, %v2103_v18 }
 0x4d7   : > { %v2104_v59 = vmul.f32 %v9354_v26, %v2090_v58  ;;  %v12801_v29 = vpack.c.bf16 %v2116_v20, %v2115_v56 }
 0x4d8   : > { %v11486_v63 = vpop.eup %11485  ;;  %v2105_v3 = vmul.f32 %v9354_v26, %v2091_v27 }
 0x4d9   : > { %v2118_v1 = vadd.f32 %v9355_v35, %v2104_v59  ;;  %v2092_v4 = vmul.f32 %v11486_v63, %v12771_v49  ;;  %10273 = vmatmul.mubr.msk.bf16.vlgmr.msra.gmra.mrb[0].mxu1 %vm1853_vm1, %v12801_v29  ;;  %10297 = vmatmul.mubr.msk.bf16.vlgmr.msra.gmra.mrb[8].mxu0 %vm1853_vm1, %v12801_v29 }
 0x4da   : > { %10281 = vmatpush3.bf16.msra.mxu1 %v12783_v43  ;;  %v2119_v6 = vadd.f32 %v9355_v35, %v2105_v3 }
 0x4db   : > { %v2106_v39 = vmul.f32 %v9354_v26, %v2092_v4  ;;  %v12810_v42 = vpack.c.bf16 %v2118_v1, %v2117_v0  ;;  %10282 = vmatprep.subr.bf16.mxu1 %v11324_v52 }
 0x4dd   : > { %v2120_v62 = vadd.f32 %v9355_v35, %v2106_v39  ;;  %10276 = vmatprep.mubr.msk.bf16.mxu1 %vm1853_vm1, %v12810_v42  ;;  %10300 = vmatprep.mubr.msk.bf16.mxu0 %vm1853_vm1, %v12810_v42 }
 0x4de   : > { %10283 = vmatpush3.bf16.msra.mxu1 %v11324_v52  ;;  %v9369_v52 = vld [vmem:[%s14276_s22 + $0x2] ss:$0 sm:$0xff] }
 0x4df   : > { %v12816_v49 = vpack.c.bf16 %v2120_v62, %v2119_v6 }
 0x4e1   : > { %10277 = vmatmul.mubr.msk.bf16.gmra.mrb[4].mxu1 %vm1853_vm1, %v12816_v49  ;;  %10301 = vmatmul.mubr.msk.bf16.gmra.mrb[12].mxu0 %vm1853_vm1, %v12816_v49 }
 0x4e2   : > { %10284 = vmatprep.mubr.msk.bf16.mxu1 %vm1853_vm1, %v12793_v44 }
 0x4e9   : > { %10285 = vmatmul.mubr.msk.bf16.vlgmr.msra.gmra.mrb[8].mxu1 %vm1853_vm1, %v12801_v29 }
 0x4ea   : > { %10288 = vmatprep.mubr.msk.bf16.mxu1 %vm1853_vm1, %v12810_v42 }
 0x4f1   : > { %10289 = vmatmul.mubr.msk.bf16.gmra.mrb[12].mxu1 %vm1853_vm1, %v12816_v49 }
 0x5ac   : > { %v10274_v43 = vpop.f32.mrb[0].mxu1  ;;  %v10298_v8 = vpop.f32.mrb[8].mxu0 }
 0x5ad   : > { %v2209_v11 = vpop.f32.mrb[1].mxu1  ;;  %v2389_v12 = vpop.f32.mrb[9].mxu0  ;;  %v12832_v15 = vadd.f32 %v10274_v43, %v9357_v7  ;;  %v2398_v16 = vadd.f32 %v10298_v8, %v9381_v10 }
 0x5ae   : > { %v10275_v13 = vpop.f32.mrb[2].mxu1  ;;  %v10299_v14 = vpop.f32.mrb[10].mxu0  ;;  %v2210_v23 = vadd.f32 %v9357_v7, %v2209_v11  ;;  %v2390_v24 = vadd.f32 %v9381_v10, %v2389_v12 }
 0x5af   : > { %v12834_v17 = vadd.f32 %v10275_v13, %v9357_v7  ;;  %v2401_v19 = vadd.f32 %v10299_v14, %v9381_v10  ;;  %v2212_v21 = vpop.f32.mrb[3].mxu1  ;;  %v2392_v22 = vpop.f32.mrb[11].mxu0 }
 0x5b0   : > { %v2213_v25 = vadd.f32 %v9357_v7, %v2212_v21  ;;  %v2393_v26 = vadd.f32 %v9381_v10, %v2392_v22 }
 0x5b1   : > { %v2421_v28 = vpack.c.bf16 %v12834_v17, %v12832_v15  ;;  %v2620_v30 = vpack.c.bf16 %v2401_v19, %v2398_v16  ;;  %v2428_v15 = vld [vmem:[%s14277_s11] sm:$0xff] }
 0x5b2   : > { %v2420_v31 = vpack.c.bf16 %v2213_v25, %v2210_v23  ;;  %v2619_v32 = vpack.c.bf16 %v2393_v26, %v2390_v24  ;;  %v11325_v25 = vld [vmem:[%s14273_s18 + $0x10] sm:$0xff]  }
 0x5b4   : > { %v10278_v33 = vpop.f32.mrb[4].mxu1  ;;  %v10302_v34 = vpop.f32.mrb[12].mxu0  ;;  %10312 = vmatprep.mubr.msk.bf16.mxu1 %vm2436_vm2, %v2420_v31  ;;  %10320 = vmatprep.subr.bf16.mxu0 %v2619_v32  ;;  %v11327_v31 = vld [vmem:[%s14273_s18 + $0x50] sm:$0xff]  }
 0x5b5   : > { %v2225_v35 = vpop.f32.mrb[5].mxu1  ;;  %v2405_v38 = vpop.f32.mrb[13].mxu0  ;;  %10321 = vmatpush3.bf16.msra.mxu0 %v2619_v32  ;;  %v12839_v46 = vadd.f32 %v10278_v33, %v9357_v7  ;;  %v2414_v2 = vadd.f32 %v10302_v34, %v9381_v10  ;;  %v11328_v32 = vld [vmem:[%s14273_s18 + $0x58] sm:$0xff]   ;;  %v2429_v34 = vld [vmem:[%s14277_s11 + $0x8] sm:$0xff] }
 0x5b6   : > { %v10279_v40 = vpop.f32.mrb[6].mxu1  ;;  %v10303_v45 = vpop.f32.mrb[14].mxu0  ;;  %10322 = vmatprep.subr.bf16.mxu0 %v2620_v30  ;;  %v2226_v54 = vadd.f32 %v9357_v7, %v2225_v35  ;;  %v2406_v36 = vadd.f32 %v9381_v10, %v2405_v38 }
 0x5b7   : > { %v2237_v47 = vadd.f32 %v10279_v40, %v9357_v7  ;;  %v2417_v37 = vadd.f32 %v10303_v45, %v9381_v10  ;;  %v2228_v48 = vpop.f32.mrb[7].mxu1  ;;  %v2408_v51 = vpop.f32.mrb[15].mxu0  ;;  %v2431_v40 = vld [vmem:[%s14277_s11 + $0x18] sm:$0xff] }
 0x5b8   : > { %v2229_v18 = vadd.f32 %v9357_v7, %v2228_v48  ;;  %v2409_v55 = vadd.f32 %v9381_v10, %v2408_v51  ;;  %v2432_v51 = vld [vmem:[%s14277_s11 + $0x20] sm:$0xff] }
 0x5b9   : > { %v2423_v56 = vpack.c.bf16 %v2237_v47, %v12839_v46  ;;  %v2622_v20 = vpack.c.bf16 %v2417_v37, %v2414_v2  ;;  %10323 = vmatpush3.bf16.msra.mxu0 %v2620_v30  ;;  %v11326_v30 = vld [vmem:[%s14273_s18 + $0x18] sm:$0xff]  }
 0x5ba   : > { %v2422_v58 = vpack.c.bf16 %v2229_v18, %v2226_v54  ;;  %v2621_v27 = vpack.c.bf16 %v2409_v55, %v2406_v36  ;;  %v2434_v18 = vld [vmem:[%s14277_s11 + $0x30] sm:$0xff] }
 0x5bc   : > { %v10286_v59 = vpop.f32.mrb[8].mxu1  ;;  %10324 = vmatprep.subr.bf16.mxu0 %v2621_v27 }
 0x5bd   : > { %v2299_v63 = vpop.f32.mrb[9].mxu1  ;;  %10325 = vmatpush3.bf16.msra.mxu0 %v2621_v27  ;;  %v2308_v1 = vadd.f32 %v10286_v59, %v9369_v52  ;;  %v2435_v59 = vld [vmem:[%s14277_s11 + $0x38] sm:$0xff] }
 0x5be   : > { %v10287_v0 = vpop.f32.mrb[10].mxu1  ;;  %10326 = vmatprep.subr.bf16.mxu0 %v2622_v20  ;;  %v2300_v39 = vadd.f32 %v9369_v52, %v2299_v63 }
 0x5bf   : > { %v2311_v3 = vadd.f32 %v10287_v0, %v9369_v52  ;;  %v2302_v4 = vpop.f32.mrb[11].mxu1 }
 0x5c0   : > { %v2303_v6 = vadd.f32 %v9369_v52, %v2302_v4 }
 0x5c1   : > { %v2425_v62 = vpack.c.bf16 %v2311_v3, %v2308_v1  ;;  %10327 = vmatpush3.bf16.msra.mxu0 %v2622_v20 }
 0x5c2   : > { %v2424_v43 = vpack.c.bf16 %v2303_v6, %v2300_v39  ;;  %v9406_v39 = vld [vmem:[%s14276_s22 + $0x1] ss:$0 sm:$0xff] }
 0x5c3   : > { %v2453_v23 = vsel %vm2436_vm2, %v2425_v62, 0 }
 0x5c4   : > { %v10290_v7 = vpop.f32.mrb[12].mxu1  ;;  %11120 = vmatprep.subr.msk.bf16.mxu1 %vm2436_vm2, %v2424_v43  ;;  %v2450_v8 = vsel %vm2436_vm2, %v2424_v43, 0 }
 0x5c5   : > { %v2315_v10 = vpop.f32.mrb[13].mxu1  ;;  %10305 = vmatpush3.bf16.xpose.msra.mxu1 %v2450_v8  ;;  %v2324_v12 = vadd.f32 %v10290_v7, %v9369_v52 }
 0x5c6   : > { %v10291_v11 = vpop.f32.mrb[14].mxu1  ;;  %11121 = vmatprep.subr.msk.bf16.mxu1 %vm2436_vm2, %v2425_v62  ;;  %v2316_v16 = vadd.f32 %v9369_v52, %v2315_v10 }
 0x5c7   : > { %v2327_v13 = vadd.f32 %v10291_v11, %v9369_v52  ;;  %v2318_v14 = vpop.f32.mrb[15].mxu1 }
 0x5c8   : > { %v2319_v19 = vadd.f32 %v9369_v52, %v2318_v14 }
 0x5c9   : > { %v2427_v21 = vpack.c.bf16 %v2327_v13, %v2324_v12 }
 0x5ca   : > { %v2426_v22 = vpack.c.bf16 %v2319_v19, %v2316_v16 }
 0x5cb   : > { %v2459_v26 = vsel %vm2436_vm2, %v2427_v21, 0 }
 0x5cc   : > { %v2456_v24 = vsel %vm2436_vm2, %v2426_v22, 0 }
 0x5cd   : > { %10307 = vmatpush3.bf16.xpose.msra.mxu1 %v2453_v23 }
 0x5ce   : > { %11122 = vmatprep.subr.msk.bf16.mxu1 %vm2436_vm2, %v2426_v22 }
 0x5d5   : > { %10309 = vmatpush3.bf16.xpose.msra.mxu1 %v2456_v24 }
 0x5d6   : > { %11123 = vmatprep.subr.msk.bf16.mxu1 %vm2436_vm2, %v2427_v21 }
 0x5dd   : > { %10311 = vmatpush3.bf16.xpose.msra.mxu1 %v2459_v26 }
 0x5de   : > { %10346 = vmatprep.subr.bf16.mxu1 %v11325_v25 }
 0x5e4   : > { %10313 = vmatmul.mubr.msk.bf16.vlgmr.msra.gmra.mrb[16].mxu1 %vm2436_vm2, %v2421_v28  ;;  %v2430_v28 = vld [vmem:[%s14277_s11 + $0x10] sm:$0xff] }
 0x5e5   : > { %10316 = vmatprep.mubr.msk.bf16.mxu1 %vm2436_vm2, %v2422_v58  ;;  %10347 = vmatpush3.bf16.msra.mxu1 %v11325_v25 }
 0x5e6   : > { %10348 = vmatprep.subr.bf16.mxu1 %v11326_v30 }
 0x5e9   : > { %10349 = vmatpush3.bf16.msra.mxu1 %v11326_v30 }
 0x5ea   : > { %10370 = vmatprep.subr.bf16.mxu1 %v11327_v31 }
 0x5ec   : > { %10317 = vmatmul.mubr.msk.bf16.gmra.mrb[20].mxu1 %vm2436_vm2, %v2423_v56  ;;  %v2433_v56 = vld [vmem:[%s14277_s11 + $0x28] sm:$0xff] }
 0x5ed   : > { %10350 = vmatprep.mubr.msk.bf16.mxu1 %vm1853_vm1, %v12793_v44 }
 0x5f4   : > { %10351 = vmatmul.mubr.msk.bf16.vlgmr.msra.gmra.mrb[24].mxu1 %vm1853_vm1, %v12801_v29 }
 0x5f5   : > { %10354 = vmatprep.mubr.msk.bf16.mxu1 %vm1853_vm1, %v12810_v42  ;;  %10371 = vmatpush3.bf16.msra.mxu1 %v11327_v31 }
 0x5f6   : > { %10372 = vmatprep.subr.bf16.mxu1 %v11328_v32 }
 0x5f9   : > { %10373 = vmatpush3.bf16.msra.mxu1 %v11328_v32 }
 0x5fc   : > { %10355 = vmatmul.mubr.msk.bf16.gmra.mrb[28].mxu1 %vm1853_vm1, %v12816_v49 }
 0x5fd   : > { %10374 = vmatprep.mubr.msk.bf16.mxu1 %vm1853_vm1, %v12793_v44 }
 0x604   : > { %10375 = vmatmul.mubr.msk.bf16.vlgmr.msra.gmra.mrb[32].mxu1 %vm1853_vm1, %v12801_v29 }
 0x605   : > { %10378 = vmatprep.mubr.msk.bf16.mxu1 %vm1853_vm1, %v12810_v42 }
 0x60c   : > { %10379 = vmatmul.mubr.msk.bf16.gmra.mrb[36].mxu1 %vm1853_vm1, %v12816_v49 }
 0x6b7   : > { %v10314_v17 = vpop.f32.mrb[16].mxu1 }
 0x6b8   : > { %v2495_v33 = vpop.f32.mrb[17].mxu1  ;;  %v12883_v46 = vadd.f32 %v10314_v17, %v2430_v28  ;;  %v9430_v28 = vld [vmem:[%s14276_s22 + $0x5] ss:$0 sm:$0xff] }
 0x6b9   : > { %v12880_v35 = vadd.f32 %v2495_v33, %v2428_v15  ;;  %v10315_v38 = vpop.f32.mrb[18].mxu1 }
 0x6ba   : > { %v2498_v45 = vpop.f32.mrb[19].mxu1  ;;  %v12889_v37 = vadd.f32 %v10315_v38, %v2431_v40  ;;  %v2533_v36 = vsel %vm2526_vm3, %v12883_v46, -inf }
 0x6bb   : > { %v12885_v2 = vadd.f32 %v2498_v45, %v2429_v34  ;;  %v2527_v47 = vsel %vm2526_vm3, %v12880_v35, -inf }
 0x6bc   : > { %2528 = vmax.xlane.f32.xlu0 %v2527_v47  ;;  %v2536_v27 = vsel %vm2526_vm3, %v12889_v37, -inf }
 0x6bd   : > { %v2530_v48 = vsel %vm2526_vm3, %v12885_v2, -inf }
 0x6be   : > { %2531 = vmax.xlane.f32.xlu1 %v2530_v48 }
 0x6bf   : > { %v10318_v54 = vpop.f32.mrb[20].mxu1 }
 0x6c0   : > { %2534 = vmax.xlane.f32.xlu0 %v2533_v36  ;;  %v2511_v55 = vpop.f32.mrb[21].mxu1  ;;  %v12903_v63 = vadd.f32 %v10318_v54, %v2434_v18 }
 0x6c1   : > { %v12898_v20 = vadd.f32 %v2511_v55, %v2432_v51  ;;  %v10319_v58 = vpop.f32.mrb[22].mxu1 }
 0x6c2   : > { %2537 = vmax.xlane.f32.xlu1 %v2536_v27  ;;  %v2514_v52 = vpop.f32.mrb[23].mxu1  ;;  %v12909_v3 = vadd.f32 %v10319_v58, %v2435_v59  ;;  %v2545_v62 = vsel %vm2526_vm3, %v12903_v63, -inf }
 0x6c3   : > { %v12905_v0 = vadd.f32 %v2514_v52, %v2433_v56  ;;  %v2539_v1 = vsel %vm2526_vm3, %v12898_v20, -inf }
 0x6c4   : > { %2540 = vmax.xlane.f32.xlu0 %v2539_v1  ;;  %v2548_v10 = vsel %vm2526_vm3, %v12909_v3, -inf }
 0x6c5   : > { %v2542_v4 = vsel %vm2526_vm3, %v12905_v0, -inf }
 0x6c6   : > { %2543 = vmax.xlane.f32.xlu1 %v2542_v4 }
 0x6c7   : > { %v10352_v6 = vpop.f32.mrb[24].mxu1 }
 0x6c8   : > { %v12916_v43 = vadd.f32 %v10352_v6, %v9406_v39  ;;  %v2856_v7 = vpop.f32.mrb[25].mxu1  ;;  %2546 = vmax.xlane.f32.xlu0 %v2545_v62 }
 0x6c9   : > { %v10353_v8 = vpop.f32.mrb[26].mxu1  ;;  %v12922_v13 = vadd.f32 %v9406_v39, %v2856_v7 }
 0x6ca   : > { %v12920_v11 = vadd.f32 %v10353_v8, %v9406_v39  ;;  %v2859_v12 = vpop.f32.mrb[27].mxu1  ;;  %2549 = vmax.xlane.f32.xlu1 %v2548_v10 }
 0x6cb   : > { %v12924_v14 = vadd.f32 %v9406_v39, %v2859_v12 }
 0x6cc   : > { %v3068_v16 = vpack.c.bf16 %v12920_v11, %v12916_v43 }
 0x6cd   : > { %v3067_v19 = vpack.c.bf16 %v12924_v14, %v12922_v13 }
 0x6cf   : > { %v10356_v21 = vpop.f32.mrb[28].mxu1 }
 0x6d0   : > { %v12930_v22 = vadd.f32 %v10356_v21, %v9406_v39  ;;  %v2872_v23 = vpop.f32.mrb[29].mxu1 }
 0x6d1   : > { %v12932_v24 = vadd.f32 %v9406_v39, %v2872_v23  ;;  %v10357_v25 = vpop.f32.mrb[30].mxu1 }
 0x6d2   : > { %v12934_v26 = vadd.f32 %v10357_v25, %v9406_v39  ;;  %v2875_v30 = vpop.f32.mrb[31].mxu1 }
 0x6d3   : > { %v12936_v31 = vadd.f32 %v9406_v39, %v2875_v30 }
 0x6d4   : > { %v3070_v32 = vpack.c.bf16 %v12934_v26, %v12930_v22 }
 0x6d5   : > { %v3069_v15 = vpack.c.bf16 %v12936_v31, %v12932_v24 }
 0x6d7   : > { %v10376_v17 = vpop.f32.mrb[32].mxu1 }
 0x6d8   : > { %v3036_v33 = vpop.f32.mrb[33].mxu1  ;;  %v3045_v38 = vadd.f32 %v10376_v17, %v9430_v28 }
 0x6d9   : > { %v10377_v34 = vpop.f32.mrb[34].mxu1  ;;  %v3037_v47 = vadd.f32 %v9430_v28, %v3036_v33 }
 0x6da   : > { %v3048_v40 = vadd.f32 %v10377_v34, %v9430_v28  ;;  %v3039_v45 = vpop.f32.mrb[35].mxu1 }
 0x6db   : > { %v3040_v48 = vadd.f32 %v9430_v28, %v3039_v45 }
 0x6dc   : > { %v3266_v51 = vpack.c.bf16 %v3048_v40, %v3045_v38 }
 0x6dd   : > { %v3265_v54 = vpack.c.bf16 %v3040_v48, %v3037_v47 }
 0x6df   : > { %v10380_v36 = vpop.f32.mrb[36].mxu1  ;;  %10398 = vmatprep.subr.bf16.mxu1 %v3265_v54 }
 0x6e0   : > { %v3052_v18 = vpop.f32.mrb[37].mxu1  ;;  %10399 = vmatpush3.bf16.msra.mxu1 %v3265_v54  ;;  %v3061_v56 = vadd.f32 %v10380_v36, %v9430_v28 }
 0x6e1   : > { %v10381_v55 = vpop.f32.mrb[38].mxu1  ;;  %10400 = vmatprep.subr.bf16.mxu1 %v3266_v51  ;;  %v3053_v59 = vadd.f32 %v9430_v28, %v3052_v18 }
 0x6e2   : > { %v3064_v58 = vadd.f32 %v10381_v55, %v9430_v28  ;;  %v3055_v27 = vpop.f32.mrb[39].mxu1 }
 0x6e3   : > { %v3056_v52 = vadd.f32 %v9430_v28, %v3055_v27 }
 0x6e4   : > { %v3268_v1 = vpack.c.bf16 %v3064_v58, %v3061_v56  ;;  %10401 = vmatpush3.bf16.msra.mxu1 %v3266_v51 }
 0x6e5   : > { %v3267_v4 = vpack.c.bf16 %v3056_v52, %v3053_v59 }
 0x6e7   : > { %10402 = vmatprep.subr.bf16.mxu1 %v3267_v4 }
 0x6e8   : > { %10403 = vmatpush3.bf16.msra.mxu1 %v3267_v4 }
 0x6e9   : > { %10404 = vmatprep.subr.bf16.mxu1 %v3268_v1 }
 0x6ec   : > { %10405 = vmatpush3.bf16.msra.mxu1 %v3268_v1 }
 0x749   : > { %v2529_v39 = vpop.xlane.xlu0 %2528 }
 0x74a   : > { %v2551_v6 = vsub.f32 %v12880_v35, %v2529_v39  ;;  %v11329_v39 = vld [vmem:[%s14278_s1] sm:$0xff]  }
 0x74b   : > { %v2532_v62 = vpop.xlane.xlu1 %2531  ;;  %10336 = vmatprep.subr.bf16.mxu0 %v11329_v39 }
 0x74c   : > { %v2559_v7 = vmul.f32 1.442695, %v2551_v6  ;;  %v2552_v8 = vsub.f32 %v12885_v2, %v2532_v62 }
 0x74d   : > { %v2535_v10 = vpop.xlane.xlu0 %2534 }
 0x74e   : > { %11487 = vpow2.f32 %v2559_v7  ;;  %v2561_v12 = vmul.f32 1.442695, %v2552_v8  ;;  %v2553_v21 = vsub.f32 %v12883_v46, %v2535_v10 }
 0x74f   : > { %v2538_v23 = vpop.xlane.xlu1 %2537 }
 0x750   : > { %11489 = vpow2.f32 %v2561_v12  ;;  %v2563_v25 = vmul.f32 1.442695, %v2553_v21  ;;  %v2554_v30 = vsub.f32 %v12889_v37, %v2538_v23 }
 0x751   : > { %v2541_v17 = vpop.xlane.xlu0 %2540 }
 0x752   : > { %11491 = vpow2.f32 %v2563_v25  ;;  %v2565_v28 = vmul.f32 1.442695, %v2554_v30  ;;  %v2555_v33 = vsub.f32 %v12898_v20, %v2541_v17 }
 0x753   : > { %v2544_v35 = vpop.xlane.xlu1 %2543 }
 0x754   : > { %11493 = vpow2.f32 %v2565_v28  ;;  %v2567_v34 = vmul.f32 1.442695, %v2555_v33  ;;  %v2556_v2 = vsub.f32 %v12905_v0, %v2544_v35 }
 0x755   : > { %v2547_v38 = vpop.xlane.xlu0 %2546 }
 0x756   : > { %11495 = vpow2.f32 %v2567_v34  ;;  %v2569_v40 = vmul.f32 1.442695, %v2556_v2  ;;  %v2557_v46 = vsub.f32 %v12903_v63, %v2547_v38 }
 0x757   : > { %v2550_v45 = vpop.xlane.xlu1 %2549 }
 0x758   : > { %v11488_v47 = vpop.eup %11487  ;;  %11497 = vpow2.f32 %v2569_v40  ;;  %v2571_v48 = vmul.f32 1.442695, %v2557_v46  ;;  %v2558_v37 = vsub.f32 %v12909_v3, %v2550_v45 }
 0x759   : > { %v2575_v51 = vsel %vm2526_vm3, %v11488_v47, 0.0 }
 0x75a   : > { %v11490_v54 = vpop.eup %11489  ;;  %11499 = vpow2.f32 %v2571_v48  ;;  %v2573_v20 = vmul.f32 1.442695, %v2558_v37  ;;  %2576 = vadd.xlane.f32.xlu0 %v2575_v51 }
 0x75b   : > { %v2578_v36 = vsel %vm2526_vm3, %v11490_v54, 0.0 }
 0x75c   : > { %v11492_v0 = vpop.eup %11491  ;;  %11501 = vpow2.f32 %v2573_v20  ;;  %2579 = vadd.xlane.f32.xlu1 %v2578_v36 }
 0x75d   : > { %v2581_v18 = vsel %vm2526_vm3, %v11492_v0, 0.0 }
 0x75e   : > { %v11494_v63 = vpop.eup %11493  ;;  %2582 = vadd.xlane.f32.xlu0 %v2581_v18  ;;  %v11330_v18 = vld [vmem:[%s14273_s18 + $0x30] sm:$0xff]  }
 0x75f   : > { %v2584_v55 = vsel %vm2526_vm3, %v11494_v63, 0.0 }
 0x760   : > { %v11496_v56 = vpop.eup %11495  ;;  %2585 = vadd.xlane.f32.xlu1 %v2584_v55 }
 0x761   : > { %v2587_v3 = vsel %vm2526_vm3, %v11496_v56, 0.0 }
 0x762   : > { %v11498_v58 = vpop.eup %11497  ;;  %2588 = vadd.xlane.f32.xlu0 %v2587_v3 }
 0x763   : > { %v2590_v27 = vsel %vm2526_vm3, %v11498_v58, 0.0 }
 0x764   : > { %v11500_v59 = vpop.eup %11499  ;;  %2591 = vadd.xlane.f32.xlu1 %v2590_v27 }
 0x765   : > { %v2593_v52 = vsel %vm2526_vm3, %v11500_v59, 0.0 }
 0x766   : > { %v11502_v1 = vpop.eup %11501  ;;  %2594 = vadd.xlane.f32.xlu0 %v2593_v52  ;;  %v11331_v52 = vld [vmem:[%s14273_s18 + $0x38] sm:$0xff]  }
 0x767   : > { %v2596_v4 = vsel %vm2526_vm3, %v11502_v1, 0.0 }
 0x768   : > { %2597 = vadd.xlane.f32.xlu1 %v2596_v4 }
 0x7e7   : > { %v2577_v6 = vpop.xlane.xlu0 %2576 }
 0x7e8   : > { %11503 = vrcp.f32 %v2577_v6 }
 0x7e9   : > { %v2580_v62 = vpop.xlane.xlu1 %2579 }
 0x7ea   : > { %11505 = vrcp.f32 %v2580_v62 }
 0x7eb   : > { %v2583_v7 = vpop.xlane.xlu0 %2582 }
 0x7ec   : > { %11507 = vrcp.f32 %v2583_v7 }
 0x7ed   : > { %v2586_v8 = vpop.xlane.xlu1 %2585 }
 0x7ee   : > { %11509 = vrcp.f32 %v2586_v8  ;;  %v9418_v8 = vld [vmem:[%s14276_s22 + $0x3] ss:$0 sm:$0xff] }
 0x7ef   : > { %v2589_v10 = vpop.xlane.xlu0 %2588 }
 0x7f0   : > { %11511 = vrcp.f32 %v2589_v10 }
 0x7f1   : > { %v2592_v12 = vpop.xlane.xlu1 %2591 }
 0x7f2   : > { %v11504_v21 = vpop.eup %11503  ;;  %11513 = vrcp.f32 %v2592_v12 }
 0x7f3   : > { %v2595_v23 = vpop.xlane.xlu0 %2594  ;;  %v2607_v17 = vmul.f32 %v11504_v21, %v11488_v47 }
 0x7f4   : > { %v11506_v25 = vpop.eup %11505  ;;  %11515 = vrcp.f32 %v2595_v23 }
 0x7f5   : > { %v2598_v30 = vpop.xlane.xlu1 %2597  ;;  %v2608_v28 = vmul.f32 %v11506_v25, %v11490_v54 }
 0x7f6   : > { %v11508_v33 = vpop.eup %11507  ;;  %11517 = vrcp.f32 %v2598_v30 }
 0x7f7   : > { %v2615_v35 = vpack.c.bf16 %v2608_v28, %v2607_v17  ;;  %v2609_v2 = vmul.f32 %v11508_v33, %v11492_v0 }
 0x7f8   : > { %v11510_v34 = vpop.eup %11509 }
 0x7f9   : > { %v2610_v38 = vmul.f32 %v11510_v34, %v11494_v63  ;;  %10328 = vmatprep.mubr.msk.bf16.mxu0 %vm2526_vm3, %v2615_v35 }
 0x7fa   : > { %v11512_v40 = vpop.eup %11511 }
 0x7fb   : > { %v2616_v46 = vpack.c.bf16 %v2610_v38, %v2609_v2  ;;  %v2611_v48 = vmul.f32 %v11512_v40, %v11496_v56 }
 0x7fc   : > { %v11514_v45 = vpop.eup %11513 }
 0x7fd   : > { %10329 = vmatmul.mubr.msk.bf16.vlgmr.msra.gmra.mrb[16].mxu0 %vm2526_vm3, %v2616_v46  ;;  %v2612_v37 = vmul.f32 %v11514_v45, %v11498_v58 }
 0x7fe   : > { %v11516_v51 = vpop.eup %11515  ;;  %10337 = vmatpush3.bf16.msra.mxu0 %v11329_v39 }
 0x7ff   : > { %v2617_v47 = vpack.c.bf16 %v2612_v37, %v2611_v48  ;;  %v2613_v20 = vmul.f32 %v11516_v51, %v11500_v59  ;;  %10358 = vmatprep.subr.bf16.mxu0 %v11330_v18  ;;  %v9437_v48 = vld [vmem:[%s14277_s11 + $0x40] sm:$0xff]  ;;  %v9439_v51 = vld [vmem:[%s14277_s11 + $0x50] sm:$0xff] }
 0x800   : > { %v11518_v54 = vpop.eup %11517 }
 0x801   : > { %10332 = vmatprep.mubr.msk.bf16.mxu0 %vm2526_vm3, %v2617_v47  ;;  %v2614_v36 = vmul.f32 %v11518_v54, %v11502_v1  ;;  %v9438_v54 = vld [vmem:[%s14277_s11 + $0x48] sm:$0xff] }
 0x803   : > { %v2618_v0 = vpack.c.bf16 %v2614_v36, %v2613_v20 }
 0x805   : > { %10333 = vmatmul.mubr.msk.bf16.gmra.mrb[20].mxu0 %vm2526_vm3, %v2618_v0 }
 0x8d0   : > { %v10330_v63 = vpop.f32.mrb[16].mxu0 }
 0x8d1   : > { %v2669_v55 = vpop.f32.mrb[17].mxu0 }
 0x8d2   : > { %v10331_v3 = vpop.f32.mrb[18].mxu0 }
 0x8d3   : > { %v2701_v27 = vpack.c.bf16 %v10331_v3, %v10330_v63  ;;  %v2672_v56 = vpop.f32.mrb[19].mxu0 }
 0x8d4   : > { %v2700_v58 = vpack.c.bf16 %v2672_v56, %v2669_v55  ;;  %v9442_v55 = vld [vmem:[%s14277_s11 + $0x68] sm:$0xff] }
 0x8d6   : > { %10338 = vmatprep.mubr.msk.bf16.mxu0 %vm2436_vm2, %v2700_v58  ;;  %v9444_v58 = vld [vmem:[%s14277_s11 + $0x78] sm:$0xff] }
 0x8d7   : > { %10339 = vmatmul.mubr.msk.bf16.vlgmr.msra.gmra.mrb[24].mxu0 %vm2436_vm2, %v2701_v27 }
 0x8d8   : > { %v10334_v4 = vpop.f32.mrb[20].mxu0  ;;  %10359 = vmatpush3.bf16.msra.mxu0 %v11330_v18  ;;  %v9443_v18 = vld [vmem:[%s14277_s11 + $0x70] sm:$0xff] }
 0x8d9   : > { %v2685_v59 = vpop.f32.mrb[21].mxu0  ;;  %10360 = vmatprep.subr.bf16.mxu0 %v11331_v52 }
 0x8da   : > { %v10335_v1 = vpop.f32.mrb[22].mxu0 }
 0x8db   : > { %v2703_v39 = vpack.c.bf16 %v10335_v1, %v10334_v4  ;;  %v2688_v6 = vpop.f32.mrb[23].mxu0 }
 0x8dc   : > { %v2702_v62 = vpack.c.bf16 %v2688_v6, %v2685_v59  ;;  %10361 = vmatpush3.bf16.msra.mxu0 %v11331_v52 }
 0x8de   : > { %10342 = vmatprep.mubr.msk.bf16.mxu0 %vm2436_vm2, %v2702_v62 }
 0x8df   : > { %10343 = vmatmul.mubr.msk.bf16.gmra.mrb[28].mxu0 %vm2436_vm2, %v2703_v39 }
 0x8e0   : > { %10362 = vmatprep.mubr.msk.bf16.mxu0 %vm1853_vm1, %v12793_v44 }
 0x8e7   : > { %10363 = vmatmul.mubr.msk.bf16.vlgmr.msra.gmra.mrb[32].mxu0 %vm1853_vm1, %v12801_v29 }
 0x8e8   : > { %10366 = vmatprep.mubr.msk.bf16.mxu0 %vm1853_vm1, %v12810_v42 }
 0x8ef   : > { %10367 = vmatmul.mubr.msk.bf16.gmra.mrb[36].mxu0 %vm1853_vm1, %v12816_v49 }
 0x8f0   : > { %10390 = vmatprep.mubr.msk.bf16.mxu0 %vm2436_vm2, %v3067_v19 }
 0x9ba   : > { %v10364_v7 = vpop.f32.mrb[32].mxu0 }
 0x9bb   : > { %v2946_v10 = vpop.f32.mrb[33].mxu0  ;;  %v2955_v21 = vadd.f32 %v10364_v7, %v9418_v8 }
 0x9bc   : > { %v10365_v12 = vpop.f32.mrb[34].mxu0  ;;  %v2947_v25 = vadd.f32 %v9418_v8, %v2946_v10 }
 0x9bd   : > { %v2958_v44 = vadd.f32 %v10365_v12, %v9418_v8  ;;  %v2949_v23 = vpop.f32.mrb[35].mxu0 }
 0x9be   : > { %v2950_v29 = vadd.f32 %v9418_v8, %v2949_v23 }
 0x9bf   : > { %v3072_v30 = vpack.c.bf16 %v2958_v44, %v2955_v21 }
 0x9c0   : > { %v3071_v17 = vpack.c.bf16 %v2950_v29, %v2947_v25 }
 0x9c1   : > { %v3100_v40 = vsel %vm2436_vm2, %v3072_v30, 0 }
 0x9c2   : > { %v10368_v42 = vpop.f32.mrb[36].mxu0  ;;  %11124 = vmatprep.subr.msk.bf16.mxu0 %vm2436_vm2, %v3071_v17  ;;  %v3097_v49 = vsel %vm2436_vm2, %v3071_v17, 0 }
 0x9c3   : > { %v2962_v28 = vpop.f32.mrb[37].mxu0  ;;  %10383 = vmatpush3.bf16.xpose.msra.mxu0 %v3097_v49  ;;  %v2971_v14 = vadd.f32 %v10368_v42, %v9418_v8 }
 0x9c4   : > { %v10369_v13 = vpop.f32.mrb[38].mxu0  ;;  %11125 = vmatprep.subr.msk.bf16.mxu0 %vm2436_vm2, %v3072_v30  ;;  %v2963_v35 = vadd.f32 %v9418_v8, %v2962_v28 }
 0x9c5   : > { %v2974_v19 = vadd.f32 %v10369_v13, %v9418_v8  ;;  %v2965_v33 = vpop.f32.mrb[39].mxu0 }
 0x9c6   : > { %v2966_v34 = vadd.f32 %v9418_v8, %v2965_v33 }
 0x9c7   : > { %v3074_v2 = vpack.c.bf16 %v2974_v19, %v2971_v14 }
 0x9c8   : > { %v3073_v38 = vpack.c.bf16 %v2966_v34, %v2963_v35 }
 0x9c9   : > { %v3106_v45 = vsel %vm2436_vm2, %v3074_v2, 0 }
 0x9ca   : > { %v3103_v46 = vsel %vm2436_vm2, %v3073_v38, 0 }
 0x9cb   : > { %10385 = vmatpush3.bf16.xpose.msra.mxu0 %v3100_v40 }
 0x9cc   : > { %11126 = vmatprep.subr.msk.bf16.mxu0 %vm2436_vm2, %v3073_v38 }
 0x9d3   : > { %10387 = vmatpush3.bf16.xpose.msra.mxu0 %v3103_v46 }
 0x9d4   : > { %11127 = vmatprep.subr.msk.bf16.mxu0 %vm2436_vm2, %v3074_v2 }
 0x9db   : > { %10389 = vmatpush3.bf16.xpose.msra.mxu0 %v3106_v45 }
 0x9e2   : > { %10391 = vmatmul.mubr.msk.bf16.vlgmr.msra.gmra.mrb[40].mxu0 %vm2436_vm2, %v3068_v16  ;;  %v9440_v16 = vld [vmem:[%s14277_s11 + $0x58] sm:$0xff] }
 0x9e3   : > { %10394 = vmatprep.mubr.msk.bf16.mxu0 %vm2436_vm2, %v3069_v15 }
 0x9ea   : > { %10395 = vmatmul.mubr.msk.bf16.gmra.mrb[44].mxu0 %vm2436_vm2, %v3070_v32  ;;  %v9441_v32 = vld [vmem:[%s14277_s11 + $0x60] sm:$0xff] }
 0xab5   : > { %v10392_v37 = vpop.f32.mrb[40].mxu0 }
 0xab6   : > { %v3142_v47 = vpop.f32.mrb[41].mxu0  ;;  %v3151_v24 = vadd.f32 %v10392_v37, %v9439_v51 }
 0xab7   : > { %v3143_v43 = vadd.f32 %v9437_v48, %v3142_v47  ;;  %v10393_v11 = vpop.f32.mrb[42].mxu0 }
 0xab8   : > { %v3145_v20 = vpop.f32.mrb[43].mxu0  ;;  %v3154_v22 = vadd.f32 %v10393_v11, %v9440_v16  ;;  %v3179_v0 = vsel %vm2526_vm3, %v3151_v24, -inf }
 0xab9   : > { %v3146_v31 = vadd.f32 %v9438_v54, %v3145_v20  ;;  %v3173_v15 = vsel %vm2526_vm3, %v3143_v43, -inf }
 0xaba   : > { %3174 = vmax.xlane.f32.xlu0 %v3173_v15  ;;  %v3182_v56 = vsel %vm2526_vm3, %v3154_v22, -inf }
 0xabb   : > { %v3176_v26 = vsel %vm2526_vm3, %v3146_v31, -inf }
 0xabc   : > { %3177 = vmax.xlane.f32.xlu1 %v3176_v26 }
 0xabd   : > { %v10396_v36 = vpop.f32.mrb[44].mxu0 }
 0xabe   : > { %v3158_v63 = vpop.f32.mrb[45].mxu0  ;;  %3180 = vmax.xlane.f32.xlu0 %v3179_v0  ;;  %v3167_v4 = vadd.f32 %v10396_v36, %v9443_v18  ;;  %v11332_v0 = vld [vmem:[%s14278_s1 + $0x8] sm:$0xff]   ;;  %s14294_s1 = sld [smem:[#allocation48_spill]] }
 0xabf   : > { %v3159_v3 = vadd.f32 %v9441_v32, %v3158_v63  ;;  %v10397_v27 = vpop.f32.mrb[46].mxu0  ;;  %10414 = vmatprep.subr.bf16.mxu0 %v11332_v0 }
 0xac0   : > { %v3161_v52 = vpop.f32.mrb[47].mxu0  ;;  %3183 = vmax.xlane.f32.xlu1 %v3182_v56  ;;  %v3170_v39 = vadd.f32 %v10397_v27, %v9444_v58  ;;  %v3191_v62 = vsel %vm2526_vm3, %v3167_v4, -inf  ;;  %10415 = vmatpush3.bf16.msra.mxu0 %v11332_v0 }
 0xac1   : > { %v3162_v59 = vadd.f32 %v9442_v55, %v3161_v52  ;;  %v3185_v1 = vsel %vm2526_vm3, %v3159_v3, -inf }
 0xac2   : > { %3186 = vmax.xlane.f32.xlu0 %v3185_v1  ;;  %v3194_v7 = vsel %vm2526_vm3, %v3170_v39, -inf }
 0xac3   : > { %v3188_v6 = vsel %vm2526_vm3, %v3162_v59, -inf }
 0xac4   : > { %3189 = vmax.xlane.f32.xlu1 %v3188_v6 }
 0xac6   : > { %3192 = vmax.xlane.f32.xlu0 %v3191_v62 }
 0xac8   : > { %3195 = vmax.xlane.f32.xlu1 %v3194_v7 }
 0xb47   : > { %v3175_v8 = vpop.xlane.xlu0 %3174 }
 0xb48   : > { %v3197_v10 = vsub.f32 %v3143_v43, %v3175_v8 }
 0xb49   : > { %v3178_v12 = vpop.xlane.xlu1 %3177 }
 0xb4a   : > { %v3205_v21 = vmul.f32 1.442695, %v3197_v10  ;;  %v3198_v44 = vsub.f32 %v3146_v31, %v3178_v12 }
 0xb4b   : > { %v3181_v23 = vpop.xlane.xlu0 %3180 }
 0xb4c   : > { %11519 = vpow2.f32 %v3205_v21  ;;  %v3207_v25 = vmul.f32 1.442695, %v3198_v44  ;;  %v3199_v29 = vsub.f32 %v3151_v24, %v3181_v23 }
 0xb4d   : > { %v3184_v30 = vpop.xlane.xlu1 %3183 }
 0xb4e   : > { %11521 = vpow2.f32 %v3207_v25  ;;  %v3209_v17 = vmul.f32 1.442695, %v3199_v29  ;;  %v3200_v42 = vsub.f32 %v3154_v22, %v3184_v30 }
 0xb4f   : > { %v3187_v49 = vpop.xlane.xlu0 %3186 }
 0xb50   : > { %11523 = vpow2.f32 %v3209_v17  ;;  %v3211_v28 = vmul.f32 1.442695, %v3200_v42  ;;  %v3201_v13 = vsub.f32 %v3159_v3, %v3187_v49 }
 0xb51   : > { %v3190_v14 = vpop.xlane.xlu1 %3189 }
 0xb52   : > { %11525 = vpow2.f32 %v3211_v28  ;;  %v3213_v19 = vmul.f32 1.442695, %v3201_v13  ;;  %v3202_v33 = vsub.f32 %v3162_v59, %v3190_v14 }
 0xb53   : > { %v3193_v35 = vpop.xlane.xlu0 %3192 }
 0xb54   : > { %11527 = vpow2.f32 %v3213_v19  ;;  %v3215_v34 = vmul.f32 1.442695, %v3202_v33  ;;  %v3203_v2 = vsub.f32 %v3167_v4, %v3193_v35 }
 0xb55   : > { %v3196_v38 = vpop.xlane.xlu1 %3195 }
 0xb56   : > { %v11520_v40 = vpop.eup %11519  ;;  %11529 = vpow2.f32 %v3215_v34  ;;  %v3217_v46 = vmul.f32 1.442695, %v3203_v2  ;;  %v3204_v45 = vsub.f32 %v3170_v39, %v3196_v38 }
 0xb57   : > { %v3221_v48 = vsel %vm2526_vm3, %v11520_v40, 0.0 }
 0xb58   : > { %v11522_v37 = vpop.eup %11521  ;;  %11531 = vpow2.f32 %v3217_v46  ;;  %v3219_v51 = vmul.f32 1.442695, %v3204_v45  ;;  %3222 = vadd.xlane.f32.xlu0 %v3221_v48 }
 0xb59   : > { %v3224_v47 = vsel %vm2526_vm3, %v11522_v37, 0.0 }
 0xb5a   : > { %v11524_v54 = vpop.eup %11523  ;;  %11533 = vpow2.f32 %v3219_v51  ;;  %3225 = vadd.xlane.f32.xlu1 %v3224_v47 }
 0xb5b   : > { %v3227_v43 = vsel %vm2526_vm3, %v11524_v54, 0.0 }
 0xb5c   : > { %v11526_v11 = vpop.eup %11525  ;;  %3228 = vadd.xlane.f32.xlu0 %v3227_v43 }
 0xb5d   : > { %v3230_v16 = vsel %vm2526_vm3, %v11526_v11, 0.0 }
 0xb5e   : > { %v11528_v20 = vpop.eup %11527  ;;  %3231 = vadd.xlane.f32.xlu1 %v3230_v16 }
 0xb5f   : > { %v3233_v24 = vsel %vm2526_vm3, %v11528_v20, 0.0 }
 0xb60   : > { %v11530_v31 = vpop.eup %11529  ;;  %3234 = vadd.xlane.f32.xlu0 %v3233_v24 }
 0xb61   : > { %v3236_v15 = vsel %vm2526_vm3, %v11530_v31, 0.0 }
 0xb62   : > { %v11532_v22 = vpop.eup %11531  ;;  %3237 = vadd.xlane.f32.xlu1 %v3236_v15 }
 0xb63   : > { %v3239_v26 = vsel %vm2526_vm3, %v11532_v22, 0.0 }
 0xb64   : > { %v11534_v32 = vpop.eup %11533  ;;  %3240 = vadd.xlane.f32.xlu0 %v3239_v26 }
 0xb65   : > { %v3242_v36 = vsel %vm2526_vm3, %v11534_v32, 0.0 }
 0xb66   : > { %3243 = vadd.xlane.f32.xlu1 %v3242_v36 }
 0xbe5   : > { %v3223_v18 = vpop.xlane.xlu0 %3222 }
 0xbe6   : > { %11535 = vrcp.f32 %v3223_v18 }
 0xbe7   : > { %v3226_v63 = vpop.xlane.xlu1 %3225 }
 0xbe8   : > { %11537 = vrcp.f32 %v3226_v63 }
 0xbe9   : > { %v3229_v55 = vpop.xlane.xlu0 %3228 }
 0xbea   : > { %11539 = vrcp.f32 %v3229_v55 }
 0xbeb   : > { %v3232_v3 = vpop.xlane.xlu1 %3231 }
 0xbec   : > { %11541 = vrcp.f32 %v3232_v3 }
 0xbed   : > { %v3235_v27 = vpop.xlane.xlu0 %3234 }
 0xbee   : > { %11543 = vrcp.f32 %v3235_v27 }
 0xbef   : > { %v3238_v56 = vpop.xlane.xlu1 %3237 }
 0xbf0   : > { %v11536_v58 = vpop.eup %11535  ;;  %11545 = vrcp.f32 %v3238_v56 }
 0xbf1   : > { %v3241_v52 = vpop.xlane.xlu0 %3240  ;;  %v3253_v1 = vmul.f32 %v11536_v58, %v11520_v40 }
 0xbf2   : > { %v11538_v4 = vpop.eup %11537  ;;  %11547 = vrcp.f32 %v3241_v52 }
 0xbf3   : > { %v3244_v59 = vpop.xlane.xlu1 %3243  ;;  %v3254_v39 = vmul.f32 %v11538_v4, %v11522_v37  ;;  %v9356_v37 = vld [vmem:[%s14279_s2] ss:$0 sm:$0xff]  ;;  %s14286_s2 = sld [smem:[#allocation43_spill]] }
 0xbf4   : > { %v11540_v6 = vpop.eup %11539  ;;  %11549 = vrcp.f32 %v3244_v59  ;;  %v2132_v47 = vadd.f32 %v9356_v37, %v12691_v41  ;;  %v2134_v43 = vadd.f32 %v9356_v37, %v12700_v53  ;;  %v2135_v15 = vadd.f32 %v9356_v37, %v12707_v60 }
 0xbf5   : > { %v3261_v62 = vpack.c.bf16 %v3254_v39, %v3253_v1  ;;  %v3255_v8 = vmul.f32 %v11540_v6, %v11524_v54  ;;  %v2136_v36 = vadd.f32 %v9356_v37, %v12710_v61  ;;  %v2138_v0 = vadd.f32 %v9356_v37, %v12720_v57 }
 0xbf6   : > { %v11542_v7 = vpop.eup %11541  ;;  %v2137_v3 = vadd.f32 %v9356_v37, %v12717_v5  ;;  %v2139_v58 = vadd.f32 %v9356_v37, %v12726_v9 }
 0xbf7   : > { %v3256_v10 = vmul.f32 %v11542_v7, %v11526_v11  ;;  %10406 = vmatprep.mubr.msk.bf16.mxu1 %vm2526_vm3, %v3261_v62 }
 0xbf8   : > { %v11544_v12 = vpop.eup %11543 }
 0xbf9   : > { %v3262_v21 = vpack.c.bf16 %v3256_v10, %v3255_v8  ;;  %v3257_v23 = vmul.f32 %v11544_v12, %v11528_v20  ;;  %v2133_v20 = vadd.f32 %v9356_v37, %v12697_v50 }
 0xbfa   : > { %v11546_v44 = vpop.eup %11545 }
 0xbfb   : > { %10407 = vmatmul.mubr.msk.bf16.vlgmr.msra.gmra.mrb[40].mxu1 %vm2526_vm3, %v3262_v21  ;;  %v3258_v25 = vmul.f32 %v11546_v44, %v11530_v31 }
 0xbfc   : > { %v11548_v29 = vpop.eup %11547 }
 0xbfd   : > { %v3263_v30 = vpack.c.bf16 %v3258_v25, %v3257_v23  ;;  %v3259_v42 = vmul.f32 %v11548_v29, %v11532_v22 }
 0xbfe   : > { %v11550_v17 = vpop.eup %11549 }
 0xbff   : > { %10410 = vmatprep.mubr.msk.bf16.mxu1 %vm2526_vm3, %v3263_v30  ;;  %v3260_v49 = vmul.f32 %v11550_v17, %v11534_v32 }
 0xc01   : > { %v3264_v28 = vpack.c.bf16 %v3260_v49, %v3259_v42 }
 0xc03   : > { %10411 = vmatmul.mubr.msk.bf16.gmra.mrb[44].mxu1 %vm2526_vm3, %v3264_v28 }
 0xcce   : > { %v10408_v13 = vpop.f32.mrb[40].mxu1 }
 0xccf   : > { %v3315_v14 = vpop.f32.mrb[41].mxu1 }
 0xcd0   : > { %v10409_v19 = vpop.f32.mrb[42].mxu1 }
 0xcd1   : > { %v3347_v33 = vpack.c.bf16 %v10409_v19, %v10408_v13  ;;  %v3318_v35 = vpop.f32.mrb[43].mxu1 }
 0xcd2   : > { %v3346_v34 = vpack.c.bf16 %v3318_v35, %v3315_v14 }
 0xcd4   : > { %10416 = vmatprep.mubr.msk.bf16.mxu0 %vm2436_vm2, %v3346_v34 }
 0xcd5   : > { %10417 = vmatmul.mubr.msk.bf16.vlgmr.msra.gmra.mrb[24].mxu0 %vm2436_vm2, %v3347_v33 }
 0xcd6   : > { %v10412_v2 = vpop.f32.mrb[44].mxu1 }
 0xcd7   : > { %v3331_v38 = vpop.f32.mrb[45].mxu1 }
 0xcd8   : > { %v10413_v40 = vpop.f32.mrb[46].mxu1 }
 0xcd9   : > { %v3349_v46 = vpack.c.bf16 %v10413_v40, %v10412_v2  ;;  %v3334_v45 = vpop.f32.mrb[47].mxu1 }
 0xcda   : > { %v3348_v48 = vpack.c.bf16 %v3334_v45, %v3331_v38 }
 0xcdc   : > { %10420 = vmatprep.mubr.msk.bf16.mxu0 %vm2436_vm2, %v3348_v48 }
 0xcdd   : > { %10421 = vmatmul.mubr.msk.bf16.gmra.mrb[28].mxu0 %vm2436_vm2, %v3349_v46 }
 0xda8   : > { %v10418_v51 = vpop.f32.mrb[24].mxu0 }
 0xda9   : > { %v3405_v54 = vpop.f32.mrb[25].mxu0  ;;  %v13042_v31 = vadd.f32 %v10418_v51, %v2134_v43 }
 0xdaa   : > { %v13039_v11 = vadd.f32 %v3405_v54, %v2132_v47  ;;  %v10419_v16 = vpop.f32.mrb[26].mxu0 }
 0xdab   : > { %v3408_v24 = vpop.f32.mrb[27].mxu0  ;;  %v13049_v41 = vadd.f32 %v10419_v16, %v2135_v15  ;;  %v3452_v50 = vsel %vm1853_vm1, %v13042_v31, 0.0 }
 0xdac   : > { %v13045_v22 = vadd.f32 %v3408_v24, %v2133_v20  ;;  %v3446_v26 = vsel %vm1853_vm1, %v13039_v11, 0.0 }
 0xdad   : > { %3447 = vadd.xlane.f32.xlu0 %v3446_v26  ;;  %v3455_v55 = vsel %vm1853_vm1, %v13049_v41, 0.0  ;;  %v11333_v26 = vld [vmem:[%s14280_s15] sm:$0xff]  }
 0xdae   : > { %v3449_v53 = vsel %vm1853_vm1, %v13045_v22, 0.0  ;;  %10424 = vmatprep.subr.bf16.mxu1 %v11333_v26 }
 0xdaf   : > { %3450 = vadd.xlane.f32.xlu1 %v3449_v53  ;;  %10425 = vmatpush3.bf16.msra.mxu1 %v11333_v26  ;;  %v11334_v53 = vld [vmem:[%s14280_s15 + $0x8] sm:$0xff]  }
 0xdb0   : > { %v10422_v32 = vpop.f32.mrb[28].mxu0  ;;  %10426 = vmatprep.subr.bf16.mxu1 %v11334_v53 }
 0xdb1   : > { %3453 = vadd.xlane.f32.xlu0 %v3452_v50  ;;  %v3421_v60 = vpop.f32.mrb[29].mxu0  ;;  %v13062_v56 = vadd.f32 %v10422_v32, %v2138_v0 }
 0xdb2   : > { %v13057_v18 = vadd.f32 %v3421_v60, %v2136_v36  ;;  %v10423_v63 = vpop.f32.mrb[30].mxu0 }
 0xdb3   : > { %3456 = vadd.xlane.f32.xlu1 %v3455_v55  ;;  %v3424_v27 = vpop.f32.mrb[31].mxu0  ;;  %v13069_v57 = vadd.f32 %v10423_v63, %v2139_v58  ;;  %v3464_v5 = vsel %vm1853_vm1, %v13062_v56, 0.0  ;;  %10427 = vmatpush3.bf16.msra.mxu1 %v11334_v53 }
 0xdb4   : > { %v13065_v52 = vadd.f32 %v3424_v27, %v2137_v3  ;;  %v3458_v61 = vsel %vm1853_vm1, %v13057_v18, 0.0 }
 0xdb5   : > { %3459 = vadd.xlane.f32.xlu0 %v3458_v61  ;;  %v3467_v59 = vsel %vm1853_vm1, %v13069_v57, 0.0 }
 0xdb6   : > { %v3461_v4 = vsel %vm1853_vm1, %v13065_v52, 0.0 }
 0xdb7   : > { %3462 = vadd.xlane.f32.xlu1 %v3461_v4 }
 0xdb9   : > { %3465 = vadd.xlane.f32.xlu0 %v3464_v5 }
 0xdbb   : > { %3468 = vadd.xlane.f32.xlu1 %v3467_v59 }
 0xe3a   : > { %v3448_v9 = vpop.xlane.xlu0 %3447 }
 0xe3b   : > { %v3470_v1 = vmul.f32 0.03125, %v3448_v9 }
 0xe3c   : > { %v3451_v39 = vpop.xlane.xlu1 %3450 }
 0xe3d   : > { %v13078_v6 = vsub.f32 %v13039_v11, %v3470_v1  ;;  %v3471_v62 = vmul.f32 0.03125, %v3451_v39 }
 0xe3e   : > { %v3454_v7 = vpop.xlane.xlu0 %3453 }
 0xe3f   : > { %v13081_v8 = vsub.f32 %v13045_v22, %v3471_v62  ;;  %v3472_v10 = vmul.f32 0.03125, %v3454_v7  ;;  %v3486_v12 = vmul.f32 %v13078_v6, %v13078_v6 }
 0xe40   : > { %v3457_v21 = vpop.xlane.xlu1 %3456 }
 0xe41   : > { %v13086_v44 = vsub.f32 %v13042_v31, %v3472_v10  ;;  %v3473_v23 = vmul.f32 0.03125, %v3457_v21  ;;  %v3494_v25 = vsel %vm1853_vm1, %v3486_v12, 0.0  ;;  %v3487_v29 = vmul.f32 %v13081_v8, %v13081_v8 }
 0xe42   : > { %3495 = vadd.xlane.f32.xlu0 %v3494_v25  ;;  %v3460_v30 = vpop.xlane.xlu0 %3459 }
 0xe43   : > { %v13092_v17 = vsub.f32 %v13049_v41, %v3473_v23  ;;  %v3474_v42 = vmul.f32 0.03125, %v3460_v30  ;;  %v3497_v49 = vsel %vm1853_vm1, %v3487_v29, 0.0  ;;  %v3488_v28 = vmul.f32 %v13086_v44, %v13086_v44  ;;  %v9460_v23 = vld [vmem:[%s14281_s26] ss:$0 sm:$0xff]  ;;  %s14287_s26 = sld [smem:[#allocation41_spill]] }
 0xe44   : > { %3498 = vadd.xlane.f32.xlu1 %v3497_v49  ;;  %v3463_v13 = vpop.xlane.xlu1 %3462 }
 0xe45   : > { %v13098_v14 = vsub.f32 %v13057_v18, %v3474_v42  ;;  %v3475_v19 = vmul.f32 0.03125, %v3463_v13  ;;  %v3500_v33 = vsel %vm1853_vm1, %v3488_v28, 0.0  ;;  %v3489_v35 = vmul.f32 %v13092_v17, %v13092_v17 }
 0xe46   : > { %3501 = vadd.xlane.f32.xlu0 %v3500_v33  ;;  %v3466_v34 = vpop.xlane.xlu0 %3465  ;;  %v9461_v33 = vld [vmem:[%s14282_s10] ss:$0 sm:$0xff]  ;;  %s14288_s10 = sld [smem:[#allocation42_spill]] }
 0xe47   : > { %v13104_v2 = vsub.f32 %v13065_v52, %v3475_v19  ;;  %v3476_v38 = vmul.f32 0.03125, %v3466_v34  ;;  %v3503_v40 = vsel %vm1853_vm1, %v3489_v35, 0.0  ;;  %v3490_v46 = vmul.f32 %v13098_v14, %v13098_v14 }
 0xe48   : > { %3504 = vadd.xlane.f32.xlu1 %v3503_v40  ;;  %v3469_v45 = vpop.xlane.xlu1 %3468 }
 0xe49   : > { %v13110_v48 = vsub.f32 %v13062_v56, %v3476_v38  ;;  %v3477_v37 = vmul.f32 0.03125, %v3469_v45  ;;  %v3506_v51 = vsel %vm1853_vm1, %v3490_v46, 0.0  ;;  %v3491_v47 = vmul.f32 %v13104_v2, %v13104_v2 }
 0xe4a   : > { %3507 = vadd.xlane.f32.xlu0 %v3506_v51 }
 0xe4b   : > { %v13116_v54 = vsub.f32 %v13069_v57, %v3477_v37  ;;  %v3509_v43 = vsel %vm1853_vm1, %v3491_v47, 0.0  ;;  %v3492_v16 = vmul.f32 %v13110_v48, %v13110_v48 }
 0xe4c   : > { %3510 = vadd.xlane.f32.xlu1 %v3509_v43 }
 0xe4d   : > { %v3512_v20 = vsel %vm1853_vm1, %v3492_v16, 0.0  ;;  %v3493_v24 = vmul.f32 %v13116_v54, %v13116_v54 }
 0xe4e   : > { %3513 = vadd.xlane.f32.xlu0 %v3512_v20 }
 0xe4f   : > { %v3515_v15 = vsel %vm1853_vm1, %v3493_v24, 0.0 }
 0xe50   : > { %3516 = vadd.xlane.f32.xlu1 %v3515_v15 }
 0xecf   : > { %v3496_v32 = vpop.xlane.xlu0 %3495 }
 0xed0   : > { %v3518_v50 = vmul.f32 0.03125, %v3496_v32 }
 0xed1   : > { %v3499_v36 = vpop.xlane.xlu1 %3498 }
 0xed2   : > { %v3526_v60 = vadd.f32 1e-05, %v3518_v50  ;;  %v3519_v0 = vmul.f32 0.03125, %v3499_v36 }
 0xed3   : > { %v3502_v63 = vpop.xlane.xlu0 %3501 }
 0xed4   : > { %11551 = vrsqrt.f32 %v3526_v60  ;;  %v3527_v55 = vadd.f32 1e-05, %v3519_v0  ;;  %v3520_v3 = vmul.f32 0.03125, %v3502_v63 }
 0xed5   : > { %v3505_v27 = vpop.xlane.xlu1 %3504 }
 0xed6   : > { %11553 = vrsqrt.f32 %v3527_v55  ;;  %v3528_v58 = vadd.f32 1e-05, %v3520_v3  ;;  %v3521_v61 = vmul.f32 0.03125, %v3505_v27  ;;  %v11336_v27 = vld [vmem:[%s14283_s28 + $0x8] sm:$0xff]  }
 0xed7   : > { %v3508_v4 = vpop.xlane.xlu0 %3507 }
 0xed8   : > { %11555 = vrsqrt.f32 %v3528_v58  ;;  %v3529_v5 = vadd.f32 1e-05, %v3521_v61  ;;  %v3522_v59 = vmul.f32 0.03125, %v3508_v4  ;;  %v11338_v58 = vld [vmem:[%s14283_s28 + $0x18] sm:$0xff]   ;;  %v11339_v61 = vld [vmem:[%s14283_s28 + $0x20] sm:$0xff]   ;;  %v11340_v4 = vld [vmem:[%s14283_s28 + $0x28] sm:$0xff]  }
 0xed9   : > { %v3511_v9 = vpop.xlane.xlu1 %3510 }
 0xeda   : > { %11557 = vrsqrt.f32 %v3529_v5  ;;  %v3530_v1 = vadd.f32 1e-05, %v3522_v59  ;;  %v3523_v39 = vmul.f32 0.03125, %v3511_v9  ;;  %v11341_v5 = vld [vmem:[%s14283_s28 + $0x30] sm:$0xff]   ;;  %v11342_v59 = vld [vmem:[%s14283_s28 + $0x38] sm:$0xff]  }
 0xedb   : > { %v3514_v62 = vpop.xlane.xlu0 %3513  ;;  %v9462_v9 = vld [vmem:[%s14284_s23] ss:$0 sm:$0xff]  ;;  %s14289_s23 = sld [smem:[#allocation44_spill]] }
 0xedc   : > { %11559 = vrsqrt.f32 %v3530_v1  ;;  %v3531_v7 = vadd.f32 1e-05, %v3523_v39  ;;  %v3524_v10 = vmul.f32 0.03125, %v3514_v62 }
 0xedd   : > { %v3517_v12 = vpop.xlane.xlu1 %3516 }
 0xede   : > { %v11552_v21 = vpop.eup %11551  ;;  %11561 = vrsqrt.f32 %v3531_v7  ;;  %v3532_v25 = vadd.f32 1e-05, %v3524_v10  ;;  %v3525_v29 = vmul.f32 0.03125, %v3517_v12 }
 0xedf   : > { %v3542_v30 = vmul.f32 %v11552_v21, %v13078_v6 }
 0xee0   : > { %v11554_v42 = vpop.eup %11553  ;;  %11563 = vrsqrt.f32 %v3532_v25  ;;  %v3533_v49 = vadd.f32 1e-05, %v3525_v29 }
 0xee1   : > { %v3543_v28 = vmul.f32 %v11554_v42, %v13081_v8  ;;  %v3556_v13 = vmul.f32 %v9460_v23, %v3542_v30 }
 0xee2   : > { %v11556_v19 = vpop.eup %11555  ;;  %11565 = vrsqrt.f32 %v3533_v49 }
 0xee3   : > { %v3544_v35 = vmul.f32 %v11556_v19, %v13086_v44  ;;  %v3557_v34 = vmul.f32 %v9460_v23, %v3543_v28  ;;  %v3570_v45 = vadd.f32 %v9461_v33, %v3556_v13 }
 0xee4   : > { %v11558_v38 = vpop.eup %11557 }
 0xee5   : > { %v3558_v40 = vmul.f32 %v9460_v23, %v3544_v35  ;;  %v3545_v46 = vmul.f32 %v11558_v38, %v13092_v17  ;;  %v3571_v37 = vadd.f32 %v9461_v33, %v3557_v34 }
 0xee6   : > { %v11560_v51 = vpop.eup %11559 }
 0xee7   : > { %v3559_v6 = vmul.f32 %v9460_v23, %v3545_v46  ;;  %v3578_v47 = vpack.c.bf16 %v3571_v37, %v3570_v45  ;;  %v3546_v43 = vmul.f32 %v11560_v51, %v13098_v14  ;;  %v3572_v8 = vadd.f32 %v9461_v33, %v3558_v40 }
 0xee8   : > { %v11562_v16 = vpop.eup %11561 }
 0xee9   : > { %v3573_v20 = vadd.f32 %v9461_v33, %v3559_v6  ;;  %10428 = vmatprep.mubr.msk.bf16.mxu1 %vm1853_vm1, %v3578_v47  ;;  %v3547_v24 = vmul.f32 %v11562_v16, %v13104_v2  ;;  %v3560_v44 = vmul.f32 %v9460_v23, %v3546_v43 }
 0xeea   : > { %v11564_v15 = vpop.eup %11563 }
 0xeeb   : > { %v3579_v26 = vpack.c.bf16 %v3573_v20, %v3572_v8  ;;  %v3561_v53 = vmul.f32 %v9460_v23, %v3547_v24  ;;  %v3548_v17 = vmul.f32 %v11564_v15, %v13110_v48  ;;  %v3574_v50 = vadd.f32 %v9461_v33, %v3560_v44  ;;  %v11335_v48 = vld [vmem:[%s14283_s28] sm:$0xff]  }
 0xeec   : > { %v11566_v32 = vpop.eup %11565  ;;  %10436 = vmatprep.subr.bf16.mxu1 %v11335_v48 }
 0xeed   : > { %10429 = vmatmul.mubr.msk.bf16.vlgmr.msra.gmra.mrb[48].mxu1 %vm1853_vm1, %v3579_v26  ;;  %v3575_v14 = vadd.f32 %v9461_v33, %v3561_v53  ;;  %v3549_v36 = vmul.f32 %v11566_v32, %v13116_v54  ;;  %v3562_v60 = vmul.f32 %v9460_v23, %v3548_v17  ;;  %v11337_v54 = vld [vmem:[%s14283_s28 + $0x10] sm:$0xff]  }
 0xeee   : > { %10437 = vmatpush3.bf16.msra.mxu1 %v11335_v48 }
 0xeef   : > { %v3580_v0 = vpack.c.bf16 %v3575_v14, %v3574_v50  ;;  %v3563_v2 = vmul.f32 %v9460_v23, %v3549_v36  ;;  %v3576_v63 = vadd.f32 %v9461_v33, %v3562_v60  ;;  %10438 = vmatprep.subr.bf16.mxu1 %v11336_v27 }
 0xef1   : > { %10432 = vmatprep.mubr.msk.bf16.mxu1 %vm1853_vm1, %v3580_v0  ;;  %v3577_v55 = vadd.f32 %v9461_v33, %v3563_v2 }
 0xef2   : > { %10439 = vmatpush3.bf16.msra.mxu1 %v11336_v27 }
 0xef3   : > { %v3581_v3 = vpack.c.bf16 %v3577_v55, %v3576_v63  ;;  %10440 = vmatprep.subr.bf16.mxu1 %v11337_v54 }
 0xef5   : > { %10433 = vmatmul.mubr.msk.bf16.gmra.mrb[52].mxu1 %vm1853_vm1, %v3581_v3 }
 0xef6   : > { %10441 = vmatpush3.bf16.msra.mxu1 %v11337_v54 }
 0xef7   : > { %10442 = vmatprep.subr.bf16.mxu1 %v11338_v58 }
 0xefa   : > { %10443 = vmatpush3.bf16.msra.mxu1 %v11338_v58 }
 0xefb   : > { %10444 = vmatprep.subr.bf16.mxu1 %v11339_v61 }
 0xefe   : > { %10445 = vmatpush3.bf16.msra.mxu1 %v11339_v61 }
 0xeff   : > { %10446 = vmatprep.subr.bf16.mxu1 %v11340_v4 }
 0xf02   : > { %10447 = vmatpush3.bf16.msra.mxu1 %v11340_v4 }
 0xf03   : > { %10448 = vmatprep.subr.bf16.mxu1 %v11341_v5 }
 0xf06   : > { %10449 = vmatpush3.bf16.msra.mxu1 %v11341_v5 }
 0xf07   : > { %10450 = vmatprep.subr.bf16.mxu1 %v11342_v59 }
 0xf0a   : > { %10451 = vmatpush3.bf16.msra.mxu1 %v11342_v59 }
 0xfc0   : > { %v10430_v1 = vpop.f32.mrb[48].mxu1 }
 0xfc1   : > { %v13150_v39 = vadd.f32 %v10430_v1, %v9462_v9  ;;  %v3651_v62 = vpop.f32.mrb[49].mxu1 }
 0xfc2   : > { %v13152_v7 = vadd.f32 %v9462_v9, %v3651_v62  ;;  %v10431_v10 = vpop.f32.mrb[50].mxu1 }
 0xfc3   : > { %v3684_v12 = vmul.f32 %v13150_v39, %v13150_v39  ;;  %v13156_v21 = vadd.f32 %v10431_v10, %v9462_v9  ;;  %v3654_v23 = vpop.f32.mrb[51].mxu1 }
 0xfc4   : > { %v3682_v25 = vmul.f32 %v13152_v7, %v13152_v7  ;;  %v13160_v29 = vadd.f32 %v9462_v9, %v3654_v23 }
 0xfc5   : > { %v3692_v30 = vmul.f32 %v3684_v12, %v13150_v39  ;;  %v3685_v42 = vmul.f32 %v13156_v21, %v13156_v21 }
 0xfc6   : > { %v3690_v49 = vmul.f32 %v3682_v25, %v13152_v7  ;;  %v3683_v28 = vmul.f32 %v13160_v29, %v13160_v29 }
 0xfc7   : > { %v3700_v13 = vmul.f32 0.044715, %v3692_v30  ;;  %v3693_v19 = vmul.f32 %v3685_v42, %v13156_v21 }
 0xfc8   : > { %v3698_v33 = vmul.f32 0.044715, %v3690_v49  ;;  %v3691_v35 = vmul.f32 %v3683_v28, %v13160_v29  ;;  %v10434_v34 = vpop.f32.mrb[52].mxu1 }
 0xfc9   : > { %v3708_v38 = vadd.f32 %v3700_v13, %v13150_v39  ;;  %v3701_v40 = vmul.f32 0.044715, %v3693_v19  ;;  %v13171_v46 = vadd.f32 %v10434_v34, %v9462_v9  ;;  %v3667_v45 = vpop.f32.mrb[53].mxu1 }
 0xfca   : > { %v3706_v37 = vadd.f32 %v3698_v33, %v13152_v7  ;;  %v3699_v51 = vmul.f32 0.044715, %v3691_v35  ;;  %v13174_v6 = vadd.f32 %v9462_v9, %v3667_v45  ;;  %v10435_v47 = vpop.f32.mrb[54].mxu1 }
 0xfcb   : > { %v3716_v43 = vmul.f32 0.7978846, %v3708_v38  ;;  %v3709_v16 = vadd.f32 %v3701_v40, %v13156_v21  ;;  %v3688_v8 = vmul.f32 %v13171_v46, %v13171_v46  ;;  %v13179_v20 = vadd.f32 %v10435_v47, %v9462_v9  ;;  %v3670_v24 = vpop.f32.mrb[55].mxu1 }
 0xfcc   : > { %v3714_v44 = vmul.f32 0.7978846, %v3706_v37  ;;  %v3707_v15 = vadd.f32 %v3699_v51, %v13160_v29  ;;  %v3686_v26 = vmul.f32 %v13174_v6, %v13174_v6  ;;  %v13184_v53 = vadd.f32 %v9462_v9, %v3670_v24 }
 0xfcd   : > { %11567 = vtanh.f32 %v3716_v43  ;;  %v3717_v17 = vmul.f32 0.7978846, %v3709_v16  ;;  %v3696_v32 = vmul.f32 %v3688_v8, %v13171_v46  ;;  %v3689_v50 = vmul.f32 %v13179_v20, %v13179_v20 }
 0xfce   : > { %11569 = vtanh.f32 %v3714_v44  ;;  %v3715_v14 = vmul.f32 0.7978846, %v3707_v15  ;;  %v3694_v36 = vmul.f32 %v3686_v26, %v13174_v6  ;;  %v3687_v60 = vmul.f32 %v13184_v53, %v13184_v53 }
 0xfcf   : > { %11571 = vtanh.f32 %v3717_v17  ;;  %v3704_v0 = vmul.f32 0.044715, %v3696_v32  ;;  %v3697_v2 = vmul.f32 %v3689_v50, %v13179_v20 }
 0xfd0   : > { %11573 = vtanh.f32 %v3715_v14  ;;  %v3702_v63 = vmul.f32 0.044715, %v3694_v36  ;;  %v3695_v55 = vmul.f32 %v3687_v60, %v13184_v53  ;;  %v9469_v36 = vld [vmem:[%s14285_s16] ss:$0 sm:$0xff]  ;;  %s14290_s16 = sld [smem:[#allocation45_spill]] }
 0xfd1   : > { %v3712_v3 = vadd.f32 %v3704_v0, %v13171_v46  ;;  %v3705_v48 = vmul.f32 0.044715, %v3697_v2 }
 0xfd2   : > { %v3710_v27 = vadd.f32 %v3702_v63, %v13174_v6  ;;  %v3703_v54 = vmul.f32 0.044715, %v3695_v55 }
 0xfd3   : > { %v3720_v58 = vmul.f32 0.7978846, %v3712_v3  ;;  %v3713_v61 = vadd.f32 %v3705_v48, %v13179_v20 }
 0xfd4   : > { %v3718_v4 = vmul.f32 0.7978846, %v3710_v27  ;;  %v3711_v5 = vadd.f32 %v3703_v54, %v13184_v53 }
 0xfd5   : > { %11575 = vtanh.f32 %v3720_v58  ;;  %v3721_v59 = vmul.f32 0.7978846, %v3713_v61 }
 0xfd6   : > { %11577 = vtanh.f32 %v3718_v4  ;;  %v3719_v9 = vmul.f32 0.7978846, %v3711_v5 }
 0xfd7   : > { %v11568_v1 = vpop.eup %11567  ;;  %11579 = vtanh.f32 %v3721_v59 }
 0xfd8   : > { %v11570_v62 = vpop.eup %11569  ;;  %v3732_v10 = vadd.f32 1.0, %v11568_v1  ;;  %11581 = vtanh.f32 %v3719_v9 }
 0xfd9   : > { %v11572_v12 = vpop.eup %11571  ;;  %v3730_v23 = vadd.f32 1.0, %v11570_v62 }
 0xfda   : > { %v11574_v25 = vpop.eup %11573  ;;  %v3740_v30 = vmul.f32 0.5, %v3732_v10  ;;  %v3733_v42 = vadd.f32 1.0, %v11572_v12 }
 0xfdb   : > { %v3731_v49 = vadd.f32 1.0, %v11574_v25  ;;  %v3738_v28 = vmul.f32 0.5, %v3730_v23 }
 0xfdc   : > { %v3741_v13 = vmul.f32 0.5, %v3733_v42  ;;  %v3748_v33 = vmul.f32 %v3740_v30, %v13150_v39 }
 0xfdd   : > { %v3739_v19 = vmul.f32 0.5, %v3731_v49  ;;  %v3746_v38 = vmul.f32 %v3738_v28, %v13152_v7 }
 0xfde   : > { %v3749_v35 = vmul.f32 %v3741_v13, %v13156_v21 }
 0xfdf   : > { %v11576_v34 = vpop.eup %11575  ;;  %v3747_v40 = vmul.f32 %v3739_v19, %v13160_v29 }
 0xfe0   : > { %v11578_v45 = vpop.eup %11577  ;;  %v3755_v37 = vpack.c.bf16 %v3749_v35, %v3748_v33  ;;  %v3736_v51 = vadd.f32 1.0, %v11576_v34 }
 0xfe1   : > { %v11580_v47 = vpop.eup %11579  ;;  %v3754_v43 = vpack.c.bf16 %v3747_v40, %v3746_v38  ;;  %v3734_v16 = vadd.f32 1.0, %v11578_v45 }
 0xfe2   : > { %v11582_v8 = vpop.eup %11581  ;;  %v3737_v24 = vadd.f32 1.0, %v11580_v47  ;;  %v3744_v44 = vmul.f32 0.5, %v3736_v51 }
 0xfe3   : > { %10452 = vmatprep.mubr.bf16.mxu1 %v3754_v43  ;;  %v3735_v15 = vadd.f32 1.0, %v11582_v8  ;;  %v3742_v39 = vmul.f32 0.5, %v3734_v16 }
 0xfe4   : > { %10453 = vmatmul.mubr.bf16.vlgmr.msra.gmra.mrb[56].mxu1 %v3755_v37  ;;  %v3745_v21 = vmul.f32 0.5, %v3737_v24  ;;  %v3752_v7 = vmul.f32 %v3744_v44, %v13171_v46 }
 0xfe5   : > { %v3743_v26 = vmul.f32 0.5, %v3735_v15  ;;  %v3750_v17 = vmul.f32 %v3742_v39, %v13174_v6 }
 0xfe6   : > { %v3753_v29 = vmul.f32 %v3745_v21, %v13179_v20 }
 0xfe7   : > { %v3751_v32 = vmul.f32 %v3743_v26, %v13184_v53 }
 0xfe8   : > { %v3757_v50 = vpack.c.bf16 %v3753_v29, %v3752_v7 }
 0xfe9   : > { %v3756_v14 = vpack.c.bf16 %v3751_v32, %v3750_v17 }
 0xfeb   : > { %10456 = vmatprep.mubr.bf16.mxu1 %v3756_v14 }
 0xfec   : > { %10457 = vmatmul.mubr.bf16.gmra.mrb[60].mxu1 %v3757_v50 }
0x10b7   : > { %v10454_v60 = vpop.f32.mrb[56].mxu1 }
0x10b8   : > { %v3863_v0 = vpop.f32.mrb[57].mxu1  ;;  %v3872_v2 = vadd.f32 %v10454_v60, %v9469_v36 }
0x10b9   : > { %v3864_v63 = vadd.f32 %v9469_v36, %v3863_v0  ;;  %v10455_v55 = vpop.f32.mrb[58].mxu1 }
0x10ba   : > { %v3866_v3 = vpop.f32.mrb[59].mxu1  ;;  %v3875_v46 = vadd.f32 %v10455_v55, %v9469_v36  ;;  %v13211_v6 = vadd.f32 %v13042_v31, %v3872_v2 }
0x10bb   : > { %v13208_v48 = vadd.f32 %v13039_v11, %v3864_v63  ;;  %v3867_v20 = vadd.f32 %v9469_v36, %v3866_v3 }
0x10bc   : > { %v13219_v54 = vadd.f32 %v13049_v41, %v3875_v46 }
0x10bd   : > { %v13214_v53 = vadd.f32 %v13045_v22, %v3867_v20  ;;  %v3904_v27 = vsel %vm1853_vm1, %v13208_v48, 0.0  ;;  %v3910_v22 = vsel %vm1853_vm1, %v13211_v6, 0.0 }
0x10be   : > { %3905 = vadd.xlane.f32.xlu0 %v3904_v27  ;;  %v3913_v62 = vsel %vm1853_vm1, %v13219_v54, 0.0  ;;  %v11343_v27 = vld [vmem:[%s14286_s2] sm:$0xff]  }
0x10bf   : > { %v10458_v58 = vpop.f32.mrb[60].mxu1  ;;  %v3907_v11 = vsel %vm1853_vm1, %v13214_v53, 0.0  ;;  %10460 = vmatprep.subr.bf16.mxu0 %v11343_v27 }
0x10c0   : > { %3908 = vadd.xlane.f32.xlu1 %v3907_v11  ;;  %v3879_v61 = vpop.f32.mrb[61].mxu1  ;;  %v3888_v4 = vadd.f32 %v10458_v58, %v9469_v36  ;;  %v11345_v58 = vld [vmem:[%s14286_s2 + $0x40] sm:$0xff]   ;;  %10461 = vmatpush3.bf16.msra.mxu0 %v11343_v27  ;;  %v11344_v11 = vld [vmem:[%s14286_s2 + $0x8] sm:$0xff]  }
0x10c1   : > { %v3880_v5 = vadd.f32 %v9469_v36, %v3879_v61  ;;  %v10459_v31 = vpop.f32.mrb[62].mxu1  ;;  %10484 = vmatprep.subr.bf16.mxu1 %v11345_v58  ;;  %v11346_v61 = vld [vmem:[%s14286_s2 + $0x48] sm:$0xff]   ;;  %10462 = vmatprep.subr.bf16.mxu0 %v11344_v11 }
0x10c2   : > { %3911 = vadd.xlane.f32.xlu0 %v3910_v22  ;;  %v3882_v59 = vpop.f32.mrb[63].mxu1  ;;  %v3891_v1 = vadd.f32 %v10459_v31, %v9469_v36  ;;  %v13231_v10 = vadd.f32 %v13062_v56, %v3888_v4  ;;  %10485 = vmatpush3.bf16.msra.mxu1 %v11345_v58  ;;  %v13300_v4 = vld [vmem:[%s14286_s2 + $0x20] sm:$0xff]  }
0x10c3   : > { %v13226_v9 = vadd.f32 %v13057_v18, %v3880_v5  ;;  %v3883_v41 = vadd.f32 %v9469_v36, %v3882_v59  ;;  %10486 = vmatprep.subr.bf16.mxu1 %v11346_v61 }
0x10c4   : > { %3914 = vadd.xlane.f32.xlu1 %v3913_v62  ;;  %v13239_v25 = vadd.f32 %v13069_v57, %v3891_v1  ;;  %v3922_v30 = vsel %vm1853_vm1, %v13231_v10, 0.0  ;;  %10463 = vmatpush3.bf16.msra.mxu0 %v11344_v11 }
0x10c5   : > { %v13234_v12 = vadd.f32 %v13065_v52, %v3883_v41  ;;  %v3916_v23 = vsel %vm1853_vm1, %v13226_v9, 0.0  ;;  %10472 = vmatprep.subr.bf16.mxu0 %v13300_v4 }
0x10c6   : > { %3917 = vadd.xlane.f32.xlu0 %v3916_v23  ;;  %v3925_v56 = vsel %vm1853_vm1, %v13239_v25, 0.0  ;;  %10487 = vmatpush3.bf16.msra.mxu1 %v11346_v61 }
0x10c7   : > { %v3919_v18 = vsel %vm1853_vm1, %v13234_v12, 0.0 }
0x10c8   : > { %3920 = vadd.xlane.f32.xlu1 %v3919_v18 }
0x10ca   : > { %3923 = vadd.xlane.f32.xlu0 %v3922_v30 }
0x10cc   : > { %3926 = vadd.xlane.f32.xlu1 %v3925_v56 }
0x114b   : > { %v3906_v52 = vpop.xlane.xlu0 %3905 }
0x114c   : > { %v3928_v42 = vmul.f32 0.03125, %v3906_v52 }
0x114d   : > { %v3909_v49 = vpop.xlane.xlu1 %3908 }
0x114e   : > { %v13248_v28 = vsub.f32 %v13208_v48, %v3928_v42  ;;  %v3929_v57 = vmul.f32 0.03125, %v3909_v49 }
0x114f   : > { %v3912_v13 = vpop.xlane.xlu0 %3911 }
0x1150   : > { %v13251_v19 = vsub.f32 %v13214_v53, %v3929_v57  ;;  %v3930_v33 = vmul.f32 0.03125, %v3912_v13  ;;  %v3944_v35 = vmul.f32 %v13248_v28, %v13248_v28 }
0x1151   : > { %v3915_v34 = vpop.xlane.xlu1 %3914 }
0x1152   : > { %v13256_v38 = vsub.f32 %v13211_v6, %v3930_v33  ;;  %v3931_v40 = vmul.f32 0.03125, %v3915_v34  ;;  %v3952_v45 = vsel %vm1853_vm1, %v3944_v35, 0.0  ;;  %v3945_v37 = vmul.f32 %v13251_v19, %v13251_v19 }
0x1153   : > { %3953 = vadd.xlane.f32.xlu0 %v3952_v45  ;;  %v3918_v51 = vpop.xlane.xlu0 %3917 }
0x1154   : > { %v13262_v47 = vsub.f32 %v13219_v54, %v3931_v40  ;;  %v3932_v43 = vmul.f32 0.03125, %v3918_v51  ;;  %v3955_v16 = vsel %vm1853_vm1, %v3945_v37, 0.0  ;;  %v3946_v8 = vmul.f32 %v13256_v38, %v13256_v38  ;;  %v9478_v51 = vld [vmem:[%s14287_s26] ss:$0 sm:$0xff]  ;;  %s14291_s26 = sld [smem:[#allocation46_spill]] }
0x1155   : > { %3956 = vadd.xlane.f32.xlu1 %v3955_v16  ;;  %v3921_v24 = vpop.xlane.xlu1 %3920 }
0x1156   : > { %v13268_v44 = vsub.f32 %v13226_v9, %v3932_v43  ;;  %v3933_v15 = vmul.f32 0.03125, %v3921_v24  ;;  %v3958_v39 = vsel %vm1853_vm1, %v3946_v8, 0.0  ;;  %v3947_v21 = vmul.f32 %v13262_v47, %v13262_v47 }
0x1157   : > { %3959 = vadd.xlane.f32.xlu0 %v3958_v39  ;;  %v3924_v26 = vpop.xlane.xlu0 %3923 }
0x1158   : > { %v13274_v7 = vsub.f32 %v13234_v12, %v3933_v15  ;;  %v3934_v29 = vmul.f32 0.03125, %v3924_v26  ;;  %v3961_v17 = vsel %vm1853_vm1, %v3947_v21, 0.0  ;;  %v3948_v32 = vmul.f32 %v13268_v44, %v13268_v44 }
0x1159   : > { %3962 = vadd.xlane.f32.xlu1 %v3961_v17  ;;  %v3927_v50 = vpop.xlane.xlu1 %3926 }
0x115a   : > { %v13280_v14 = vsub.f32 %v13231_v10, %v3934_v29  ;;  %v3935_v36 = vmul.f32 0.03125, %v3927_v50  ;;  %v3964_v60 = vsel %vm1853_vm1, %v3948_v32, 0.0  ;;  %v3949_v0 = vmul.f32 %v13274_v7, %v13274_v7  ;;  %v9479_v29 = vld [vmem:[%s14288_s10] ss:$0 sm:$0xff]  ;;  %s14292_s10 = sld [smem:[#allocation47_spill]] }
0x115b   : > { %3965 = vadd.xlane.f32.xlu0 %v3964_v60 }
0x115c   : > { %v13286_v2 = vsub.f32 %v13239_v25, %v3935_v36  ;;  %v3967_v63 = vsel %vm1853_vm1, %v3949_v0, 0.0  ;;  %v3950_v55 = vmul.f32 %v13280_v14, %v13280_v14 }
0x115d   : > { %3968 = vadd.xlane.f32.xlu1 %v3967_v63 }
0x115e   : > { %v3970_v3 = vsel %vm1853_vm1, %v3950_v55, 0.0  ;;  %v3951_v46 = vmul.f32 %v13286_v2, %v13286_v2 }
0x115f   : > { %3971 = vadd.xlane.f32.xlu0 %v3970_v3 }
0x1160   : > { %v3973_v20 = vsel %vm1853_vm1, %v3951_v46, 0.0 }
0x1161   : > { %3974 = vadd.xlane.f32.xlu1 %v3973_v20 }
0x11e0   : > { %v3954_v5 = vpop.xlane.xlu0 %3953 }
0x11e1   : > { %v3976_v31 = vmul.f32 0.03125, %v3954_v5 }
0x11e2   : > { %v3957_v22 = vpop.xlane.xlu1 %3956 }
0x11e3   : > { %v3984_v59 = vadd.f32 1e-05, %v3976_v31  ;;  %v3977_v1 = vmul.f32 0.03125, %v3957_v22 }
0x11e4   : > { %v3960_v41 = vpop.xlane.xlu0 %3959 }
0x11e5   : > { %11583 = vrsqrt.f32 %v3984_v59  ;;  %v3985_v62 = vadd.f32 1e-05, %v3977_v1  ;;  %v3978_v23 = vmul.f32 0.03125, %v3960_v41 }
0x11e6   : > { %v3963_v18 = vpop.xlane.xlu1 %3962 }
0x11e7   : > { %11585 = vrsqrt.f32 %v3985_v62  ;;  %v3986_v30 = vadd.f32 1e-05, %v3978_v23  ;;  %v3979_v56 = vmul.f32 0.03125, %v3963_v18  ;;  %v9481_v18 = vld [vmem:[%s14289_s23] ss:$0 sm:$0xff] }
0x11e8   : > { %v3966_v52 = vpop.xlane.xlu0 %3965 }
0x11e9   : > { %11587 = vrsqrt.f32 %v3986_v30  ;;  %v3987_v42 = vadd.f32 1e-05, %v3979_v56  ;;  %v3980_v49 = vmul.f32 0.03125, %v3966_v52  ;;  %v9505_v56 = vld [vmem:[%s14289_s23 + $0x4] ss:$0 sm:$0xff] }
0x11ea   : > { %v3969_v57 = vpop.xlane.xlu1 %3968 }
0x11eb   : > { %11589 = vrsqrt.f32 %v3987_v42  ;;  %v3988_v13 = vadd.f32 1e-05, %v3980_v49  ;;  %v3981_v33 = vmul.f32 0.03125, %v3969_v57 }
0x11ec   : > { %v3972_v35 = vpop.xlane.xlu0 %3971 }
0x11ed   : > { %11591 = vrsqrt.f32 %v3988_v13  ;;  %v3989_v34 = vadd.f32 1e-05, %v3981_v33  ;;  %v3982_v40 = vmul.f32 0.03125, %v3972_v35 }
0x11ee   : > { %v3975_v45 = vpop.xlane.xlu1 %3974 }
0x11ef   : > { %v11584_v37 = vpop.eup %11583  ;;  %11593 = vrsqrt.f32 %v3989_v34  ;;  %v3990_v43 = vadd.f32 1e-05, %v3982_v40  ;;  %v3983_v16 = vmul.f32 0.03125, %v3975_v45 }
0x11f0   : > { %v4000_v8 = vmul.f32 %v11584_v37, %v13248_v28 }
0x11f1   : > { %v11586_v24 = vpop.eup %11585  ;;  %11595 = vrsqrt.f32 %v3990_v43  ;;  %v3991_v15 = vadd.f32 1e-05, %v3983_v16 }
0x11f2   : > { %v4014_v39 = vmul.f32 %v9478_v51, %v4000_v8  ;;  %v4001_v21 = vmul.f32 %v11586_v24, %v13251_v19 }
0x11f3   : > { %v11588_v26 = vpop.eup %11587  ;;  %11597 = vrsqrt.f32 %v3991_v15 }
0x11f4   : > { %v4015_v17 = vmul.f32 %v9478_v51, %v4001_v21  ;;  %v4002_v32 = vmul.f32 %v11588_v26, %v13256_v38  ;;  %v4028_v36 = vadd.f32 %v9479_v29, %v4014_v39 }
0x11f5   : > { %v11590_v50 = vpop.eup %11589 }
0x11f6   : > { %v4029_v60 = vadd.f32 %v9479_v29, %v4015_v17  ;;  %v4016_v0 = vmul.f32 %v9478_v51, %v4002_v32  ;;  %v4003_v63 = vmul.f32 %v11590_v50, %v13262_v47 }
0x11f7   : > { %v11592_v28 = vpop.eup %11591 }
0x11f8   : > { %v4017_v55 = vmul.f32 %v9478_v51, %v4003_v63  ;;  %v4004_v3 = vmul.f32 %v11592_v28, %v13268_v44  ;;  %v13310_v46 = vpack.c.bf16 %v4029_v60, %v4028_v36  ;;  %v4030_v20 = vadd.f32 %v9479_v29, %v4016_v0  ;;  %v11348_v44 = vld [vmem:[%s14286_s2 + $0x28] sm:$0xff]  }
0x11f9   : > { %v11594_v19 = vpop.eup %11593 }
0x11fa   : > { %v4031_v27 = vadd.f32 %v9479_v29, %v4017_v55  ;;  %v4018_v58 = vmul.f32 %v9478_v51, %v4004_v3  ;;  %v4005_v11 = vmul.f32 %v11594_v19, %v13274_v7  ;;  %10464 = vmatprep.mubr.msk.bf16.mxu0 %vm1853_vm1, %v13310_v46  ;;  %10488 = vmatprep.mubr.msk.bf16.mxu1 %vm1853_vm1, %v13310_v46 }
0x11fb   : > { %v11596_v38 = vpop.eup %11595 }
0x11fc   : > { %v4019_v47 = vmul.f32 %v9478_v51, %v4005_v11  ;;  %v4006_v61 = vmul.f32 %v11596_v38, %v13280_v14  ;;  %v13318_v5 = vpack.c.bf16 %v4031_v27, %v4030_v20  ;;  %v4032_v22 = vadd.f32 %v9479_v29, %v4018_v58 }
0x11fd   : > { %v11598_v31 = vpop.eup %11597 }
0x11fe   : > { %v4033_v59 = vadd.f32 %v9479_v29, %v4019_v47  ;;  %v4020_v1 = vmul.f32 %v9478_v51, %v4006_v61  ;;  %v4007_v41 = vmul.f32 %v11598_v31, %v13286_v2  ;;  %10465 = vmatmul.mubr.msk.bf16.vlgmr.msra.gmra.mrb[48].mxu0 %vm1853_vm1, %v13318_v5  ;;  %10489 = vmatmul.mubr.msk.bf16.vlgmr.msra.gmra.mrb[64].mxu1 %vm1853_vm1, %v13318_v5 }
0x11ff   : > { %10473 = vmatpush3.bf16.msra.mxu0 %v13300_v4 }
0x1200   : > { %v4021_v7 = vmul.f32 %v9478_v51, %v4007_v41  ;;  %v13327_v14 = vpack.c.bf16 %v4033_v59, %v4032_v22  ;;  %10474 = vmatprep.subr.bf16.mxu0 %v11348_v44  ;;  %v4034_v62 = vadd.f32 %v9479_v29, %v4020_v1 }
0x1202   : > { %v4035_v23 = vadd.f32 %v9479_v29, %v4021_v7  ;;  %10468 = vmatprep.mubr.msk.bf16.mxu0 %vm1853_vm1, %v13327_v14  ;;  %10492 = vmatprep.mubr.msk.bf16.mxu1 %vm1853_vm1, %v13327_v14 }
0x1203   : > { %10475 = vmatpush3.bf16.msra.mxu0 %v11348_v44  ;;  %v9493_v44 = vld [vmem:[%s14289_s23 + $0x2] ss:$0 sm:$0xff] }
0x1204   : > { %v13333_v2 = vpack.c.bf16 %v4035_v23, %v4034_v62 }
0x1206   : > { %10469 = vmatmul.mubr.msk.bf16.gmra.mrb[52].mxu0 %vm1853_vm1, %v13333_v2  ;;  %10493 = vmatmul.mubr.msk.bf16.gmra.mrb[68].mxu1 %vm1853_vm1, %v13333_v2 }
0x1207   : > { %10476 = vmatprep.mubr.msk.bf16.mxu0 %vm1853_vm1, %v13310_v46 }
0x120e   : > { %10477 = vmatmul.mubr.msk.bf16.vlgmr.msra.gmra.mrb[56].mxu0 %vm1853_vm1, %v13318_v5 }
0x120f   : > { %10480 = vmatprep.mubr.msk.bf16.mxu0 %vm1853_vm1, %v13327_v14 }
0x1216   : > { %10481 = vmatmul.mubr.msk.bf16.gmra.mrb[60].mxu0 %vm1853_vm1, %v13333_v2 }
0x12d1   : > { %v10466_v4 = vpop.f32.mrb[48].mxu0  ;;  %v10490_v30 = vpop.f32.mrb[64].mxu1 }
0x12d2   : > { %v4124_v52 = vpop.f32.mrb[49].mxu0  ;;  %v4304_v42 = vpop.f32.mrb[65].mxu1  ;;  %v13349_v13 = vadd.f32 %v10466_v4, %v9481_v18  ;;  %v4313_v33 = vadd.f32 %v10490_v30, %v9505_v56 }
0x12d3   : > { %v10467_v49 = vpop.f32.mrb[50].mxu0  ;;  %v10491_v57 = vpop.f32.mrb[66].mxu1  ;;  %v4125_v37 = vadd.f32 %v9481_v18, %v4124_v52  ;;  %v4305_v51 = vadd.f32 %v9505_v56, %v4304_v42 }
0x12d4   : > { %v13351_v35 = vadd.f32 %v10467_v49, %v9481_v18  ;;  %v4316_v34 = vadd.f32 %v10491_v57, %v9505_v56  ;;  %v4127_v40 = vpop.f32.mrb[51].mxu0  ;;  %v4307_v45 = vpop.f32.mrb[67].mxu1 }
0x12d5   : > { %v4128_v43 = vadd.f32 %v9481_v18, %v4127_v40  ;;  %v4308_v16 = vadd.f32 %v9505_v56, %v4307_v45 }
0x12d6   : > { %v4336_v8 = vpack.c.bf16 %v13351_v35, %v13349_v13  ;;  %v4533_v24 = vpack.c.bf16 %v4316_v34, %v4313_v33  ;;  %v4343_v13 = vld [vmem:[%s14290_s16] sm:$0xff] }
0x12d7   : > { %v4335_v15 = vpack.c.bf16 %v4128_v43, %v4125_v37  ;;  %v4532_v39 = vpack.c.bf16 %v4308_v16, %v4305_v51  ;;  %v11349_v43 = vld [vmem:[%s14286_s2 + $0x10] sm:$0xff]  }
0x12d9   : > { %v10470_v21 = vpop.f32.mrb[52].mxu0  ;;  %v10494_v26 = vpop.f32.mrb[68].mxu1  ;;  %10504 = vmatprep.mubr.msk.bf16.mxu0 %vm2436_vm2, %v4335_v15  ;;  %10512 = vmatprep.subr.bf16.mxu1 %v4532_v39  ;;  %v11351_v15 = vld [vmem:[%s14286_s2 + $0x50] sm:$0xff]  }
0x12da   : > { %v4140_v29 = vpop.f32.mrb[53].mxu0  ;;  %v4320_v17 = vpop.f32.mrb[69].mxu1  ;;  %10513 = vmatpush3.bf16.msra.mxu1 %v4532_v39  ;;  %v13356_v36 = vadd.f32 %v10470_v21, %v9481_v18  ;;  %v4329_v60 = vadd.f32 %v10494_v26, %v9505_v56  ;;  %v11352_v39 = vld [vmem:[%s14286_s2 + $0x58] sm:$0xff]   ;;  %v4344_v26 = vld [vmem:[%s14290_s16 + $0x8] sm:$0xff] }
0x12db   : > { %v10471_v32 = vpop.f32.mrb[54].mxu0  ;;  %v10495_v50 = vpop.f32.mrb[70].mxu1  ;;  %10514 = vmatprep.subr.bf16.mxu1 %v4533_v24  ;;  %v4141_v3 = vadd.f32 %v9481_v18, %v4140_v29  ;;  %v4321_v19 = vadd.f32 %v9505_v56, %v4320_v17 }
0x12dc   : > { %v4152_v0 = vadd.f32 %v10471_v32, %v9481_v18  ;;  %v4332_v63 = vadd.f32 %v10495_v50, %v9505_v56  ;;  %v4143_v28 = vpop.f32.mrb[55].mxu0  ;;  %v4323_v55 = vpop.f32.mrb[71].mxu1  ;;  %v4346_v32 = vld [vmem:[%s14290_s16 + $0x18] sm:$0xff] }
0x12dd   : > { %v4144_v20 = vadd.f32 %v9481_v18, %v4143_v28  ;;  %v4324_v27 = vadd.f32 %v9505_v56, %v4323_v55  ;;  %v4347_v55 = vld [vmem:[%s14290_s16 + $0x20] sm:$0xff] }
0x12de   : > { %v4338_v58 = vpack.c.bf16 %v4152_v0, %v13356_v36  ;;  %v4535_v11 = vpack.c.bf16 %v4332_v63, %v4329_v60  ;;  %10515 = vmatpush3.bf16.msra.mxu1 %v4533_v24  ;;  %v11350_v24 = vld [vmem:[%s14286_s2 + $0x18] sm:$0xff]  }
0x12df   : > { %v4337_v38 = vpack.c.bf16 %v4144_v20, %v4141_v3  ;;  %v4534_v47 = vpack.c.bf16 %v4324_v27, %v4321_v19  ;;  %v4349_v20 = vld [vmem:[%s14290_s16 + $0x30] sm:$0xff] }
0x12e1   : > { %v10478_v61 = vpop.f32.mrb[56].mxu0  ;;  %10516 = vmatprep.subr.bf16.mxu1 %v4534_v47 }
0x12e2   : > { %v4214_v31 = vpop.f32.mrb[57].mxu0  ;;  %10517 = vmatpush3.bf16.msra.mxu1 %v4534_v47  ;;  %v4223_v59 = vadd.f32 %v10478_v61, %v9493_v44  ;;  %v4350_v61 = vld [vmem:[%s14290_s16 + $0x38] sm:$0xff] }
0x12e3   : > { %v10479_v22 = vpop.f32.mrb[58].mxu0  ;;  %10518 = vmatprep.subr.bf16.mxu1 %v4535_v11  ;;  %v4215_v7 = vadd.f32 %v9493_v44, %v4214_v31 }
0x12e4   : > { %v4226_v1 = vadd.f32 %v10479_v22, %v9493_v44  ;;  %v4217_v41 = vpop.f32.mrb[59].mxu0 }
0x12e5   : > { %v4218_v62 = vadd.f32 %v9493_v44, %v4217_v41 }
0x12e6   : > { %v4340_v23 = vpack.c.bf16 %v4226_v1, %v4223_v59  ;;  %10519 = vmatpush3.bf16.msra.mxu1 %v4535_v11 }
0x12e7   : > { %v4339_v4 = vpack.c.bf16 %v4218_v62, %v4215_v7  ;;  %v9530_v7 = vld [vmem:[%s14289_s23 + $0x1] ss:$0 sm:$0xff] }
0x12e8   : > { %v4367_v37 = vsel %vm2436_vm2, %v4340_v23, 0 }
0x12e9   : > { %v10482_v18 = vpop.f32.mrb[60].mxu0  ;;  %11128 = vmatprep.subr.msk.bf16.mxu0 %vm2436_vm2, %v4339_v4  ;;  %v4364_v30 = vsel %vm2436_vm2, %v4339_v4, 0 }
0x12ea   : > { %v4230_v56 = vpop.f32.mrb[61].mxu0  ;;  %10497 = vmatpush3.bf16.xpose.msra.mxu0 %v4364_v30  ;;  %v4239_v42 = vadd.f32 %v10482_v18, %v9493_v44 }
0x12eb   : > { %v10483_v52 = vpop.f32.mrb[62].mxu0  ;;  %11129 = vmatprep.subr.msk.bf16.mxu0 %vm2436_vm2, %v4340_v23  ;;  %v4231_v33 = vadd.f32 %v9493_v44, %v4230_v56 }
0x12ec   : > { %v4242_v49 = vadd.f32 %v10483_v52, %v9493_v44  ;;  %v4233_v57 = vpop.f32.mrb[63].mxu0 }
0x12ed   : > { %v4234_v34 = vadd.f32 %v9493_v44, %v4233_v57 }
0x12ee   : > { %v4342_v40 = vpack.c.bf16 %v4242_v49, %v4239_v42 }
0x12ef   : > { %v4341_v45 = vpack.c.bf16 %v4234_v34, %v4231_v33 }
0x12f0   : > { %v4373_v16 = vsel %vm2436_vm2, %v4342_v40, 0 }
0x12f1   : > { %v4370_v51 = vsel %vm2436_vm2, %v4341_v45, 0 }
0x12f2   : > { %10499 = vmatpush3.bf16.xpose.msra.mxu0 %v4367_v37 }
0x12f3   : > { %11130 = vmatprep.subr.msk.bf16.mxu0 %vm2436_vm2, %v4341_v45 }
0x12fa   : > { %10501 = vmatpush3.bf16.xpose.msra.mxu0 %v4370_v51 }
0x12fb   : > { %11131 = vmatprep.subr.msk.bf16.mxu0 %vm2436_vm2, %v4342_v40 }
0x1302   : > { %10503 = vmatpush3.bf16.xpose.msra.mxu0 %v4373_v16 }
0x1303   : > { %10538 = vmatprep.subr.bf16.mxu0 %v11349_v43 }
0x1309   : > { %10505 = vmatmul.mubr.msk.bf16.vlgmr.msra.gmra.mrb[64].mxu0 %vm2436_vm2, %v4336_v8  ;;  %v4345_v8 = vld [vmem:[%s14290_s16 + $0x10] sm:$0xff] }
0x130a   : > { %10508 = vmatprep.mubr.msk.bf16.mxu0 %vm2436_vm2, %v4337_v38  ;;  %10539 = vmatpush3.bf16.msra.mxu0 %v11349_v43 }
0x130b   : > { %10540 = vmatprep.subr.bf16.mxu0 %v11350_v24 }
0x130e   : > { %10541 = vmatpush3.bf16.msra.mxu0 %v11350_v24 }
0x130f   : > { %10562 = vmatprep.subr.bf16.mxu0 %v11351_v15 }
0x1311   : > { %10509 = vmatmul.mubr.msk.bf16.gmra.mrb[68].mxu0 %vm2436_vm2, %v4338_v58  ;;  %v4348_v58 = vld [vmem:[%s14290_s16 + $0x28] sm:$0xff] }
0x1312   : > { %10542 = vmatprep.mubr.msk.bf16.mxu0 %vm1853_vm1, %v13310_v46 }
0x1319   : > { %10543 = vmatmul.mubr.msk.bf16.vlgmr.msra.gmra.mrb[72].mxu0 %vm1853_vm1, %v13318_v5 }
0x131a   : > { %10546 = vmatprep.mubr.msk.bf16.mxu0 %vm1853_vm1, %v13327_v14  ;;  %10563 = vmatpush3.bf16.msra.mxu0 %v11351_v15 }
0x131b   : > { %10564 = vmatprep.subr.bf16.mxu0 %v11352_v39 }
0x131e   : > { %10565 = vmatpush3.bf16.msra.mxu0 %v11352_v39 }
0x1321   : > { %10547 = vmatmul.mubr.msk.bf16.gmra.mrb[76].mxu0 %vm1853_vm1, %v13333_v2 }
0x1322   : > { %10566 = vmatprep.mubr.msk.bf16.mxu0 %vm1853_vm1, %v13310_v46 }
0x1329   : > { %10567 = vmatmul.mubr.msk.bf16.vlgmr.msra.gmra.mrb[80].mxu0 %vm1853_vm1, %v13318_v5 }
0x132a   : > { %10570 = vmatprep.mubr.msk.bf16.mxu0 %vm1853_vm1, %v13327_v14 }
0x1331   : > { %10571 = vmatmul.mubr.msk.bf16.gmra.mrb[84].mxu0 %vm1853_vm1, %v13333_v2 }
0x13dc   : > { %v10506_v35 = vpop.f32.mrb[64].mxu0 }
0x13dd   : > { %v4409_v21 = vpop.f32.mrb[65].mxu0  ;;  %v13400_v36 = vadd.f32 %v10506_v35, %v4345_v8  ;;  %v9554_v8 = vld [vmem:[%s14289_s23 + $0x5] ss:$0 sm:$0xff] }
0x13de   : > { %v13397_v29 = vadd.f32 %v4409_v21, %v4343_v13  ;;  %v10507_v17 = vpop.f32.mrb[66].mxu0 }
0x13df   : > { %v4412_v50 = vpop.f32.mrb[67].mxu0  ;;  %v13406_v63 = vadd.f32 %v10507_v17, %v4346_v32  ;;  %v4446_v19 = vsel %vm2526_vm3, %v13400_v36, -inf }
0x13e0   : > { %v13402_v60 = vadd.f32 %v4412_v50, %v4344_v26  ;;  %v4440_v0 = vsel %vm2526_vm3, %v13397_v29, -inf }
0x13e1   : > { %4441 = vmax.xlane.f32.xlu0 %v4440_v0  ;;  %v4449_v47 = vsel %vm2526_vm3, %v13406_v63, -inf }
0x13e2   : > { %v4443_v28 = vsel %vm2526_vm3, %v13402_v60, -inf }
0x13e3   : > { %4444 = vmax.xlane.f32.xlu1 %v4443_v28 }
0x13e4   : > { %v10510_v3 = vpop.f32.mrb[68].mxu0 }
0x13e5   : > { %4447 = vmax.xlane.f32.xlu0 %v4446_v19  ;;  %v4425_v27 = vpop.f32.mrb[69].mxu0  ;;  %v13420_v31 = vadd.f32 %v10510_v3, %v4349_v20 }
0x13e6   : > { %v13415_v11 = vadd.f32 %v4425_v27, %v4347_v55  ;;  %v10511_v38 = vpop.f32.mrb[70].mxu0 }
0x13e7   : > { %4450 = vmax.xlane.f32.xlu1 %v4449_v47  ;;  %v4428_v44 = vpop.f32.mrb[71].mxu0  ;;  %v13426_v1 = vadd.f32 %v10511_v38, %v4350_v61  ;;  %v4458_v23 = vsel %vm2526_vm3, %v13420_v31, -inf }
0x13e8   : > { %v13422_v22 = vadd.f32 %v4428_v44, %v4348_v58  ;;  %v4452_v59 = vsel %vm2526_vm3, %v13415_v11, -inf }
0x13e9   : > { %4453 = vmax.xlane.f32.xlu0 %v4452_v59  ;;  %v4461_v56 = vsel %vm2526_vm3, %v13426_v1, -inf }
0x13ea   : > { %v4455_v41 = vsel %vm2526_vm3, %v13422_v22, -inf }
0x13eb   : > { %4456 = vmax.xlane.f32.xlu1 %v4455_v41 }
0x13ec   : > { %v10544_v62 = vpop.f32.mrb[72].mxu0 }
0x13ed   : > { %v13433_v4 = vadd.f32 %v10544_v62, %v9530_v7  ;;  %v4769_v18 = vpop.f32.mrb[73].mxu0  ;;  %4459 = vmax.xlane.f32.xlu0 %v4458_v23 }
0x13ee   : > { %v10545_v30 = vpop.f32.mrb[74].mxu0  ;;  %v13439_v49 = vadd.f32 %v9530_v7, %v4769_v18 }
0x13ef   : > { %v13437_v52 = vadd.f32 %v10545_v30, %v9530_v7  ;;  %v4772_v42 = vpop.f32.mrb[75].mxu0  ;;  %4462 = vmax.xlane.f32.xlu1 %v4461_v56 }
0x13f0   : > { %v13441_v57 = vadd.f32 %v9530_v7, %v4772_v42 }
0x13f1   : > { %v4981_v33 = vpack.c.bf16 %v13437_v52, %v13433_v4 }
0x13f2   : > { %v4980_v34 = vpack.c.bf16 %v13441_v57, %v13439_v49 }
0x13f4   : > { %v10548_v40 = vpop.f32.mrb[76].mxu0 }
0x13f5   : > { %v13447_v45 = vadd.f32 %v10548_v40, %v9530_v7  ;;  %v4785_v37 = vpop.f32.mrb[77].mxu0 }
0x13f6   : > { %v13449_v51 = vadd.f32 %v9530_v7, %v4785_v37  ;;  %v10549_v43 = vpop.f32.mrb[78].mxu0 }
0x13f7   : > { %v13451_v16 = vadd.f32 %v10549_v43, %v9530_v7  ;;  %v4788_v24 = vpop.f32.mrb[79].mxu0 }
0x13f8   : > { %v13453_v15 = vadd.f32 %v9530_v7, %v4788_v24 }
0x13f9   : > { %v4983_v39 = vpack.c.bf16 %v13451_v16, %v13447_v45 }
0x13fa   : > { %v4982_v13 = vpack.c.bf16 %v13453_v15, %v13449_v51 }
0x13fc   : > { %v10568_v35 = vpop.f32.mrb[80].mxu0 }
0x13fd   : > { %v4949_v21 = vpop.f32.mrb[81].mxu0  ;;  %v4958_v17 = vadd.f32 %v10568_v35, %v9554_v8 }
0x13fe   : > { %v10569_v26 = vpop.f32.mrb[82].mxu0  ;;  %v4950_v0 = vadd.f32 %v9554_v8, %v4949_v21 }
0x13ff   : > { %v4961_v32 = vadd.f32 %v10569_v26, %v9554_v8  ;;  %v4952_v50 = vpop.f32.mrb[83].mxu0 }
0x1400   : > { %v4953_v28 = vadd.f32 %v9554_v8, %v4952_v50 }
0x1401   : > { %v5179_v55 = vpack.c.bf16 %v4961_v32, %v4958_v17 }
0x1402   : > { %v5178_v3 = vpack.c.bf16 %v4953_v28, %v4950_v0 }
0x1404   : > { %v10572_v19 = vpop.f32.mrb[84].mxu0  ;;  %10590 = vmatprep.subr.bf16.mxu0 %v5178_v3 }
0x1405   : > { %v4965_v20 = vpop.f32.mrb[85].mxu0  ;;  %10591 = vmatpush3.bf16.msra.mxu0 %v5178_v3  ;;  %v4974_v58 = vadd.f32 %v10572_v19, %v9554_v8 }
0x1406   : > { %v10573_v27 = vpop.f32.mrb[86].mxu0  ;;  %10592 = vmatprep.subr.bf16.mxu0 %v5179_v55  ;;  %v4966_v61 = vadd.f32 %v9554_v8, %v4965_v20 }
0x1407   : > { %v4977_v38 = vadd.f32 %v10573_v27, %v9554_v8  ;;  %v4968_v47 = vpop.f32.mrb[87].mxu0 }
0x1408   : > { %v4969_v44 = vadd.f32 %v9554_v8, %v4968_v47 }
0x1409   : > { %v5181_v59 = vpack.c.bf16 %v4977_v38, %v4974_v58  ;;  %10593 = vmatpush3.bf16.msra.mxu0 %v5179_v55 }
0x140a   : > { %v5180_v41 = vpack.c.bf16 %v4969_v44, %v4966_v61 }
0x140c   : > { %10594 = vmatprep.subr.bf16.mxu0 %v5180_v41 }
0x140d   : > { %10595 = vmatpush3.bf16.msra.mxu0 %v5180_v41 }
0x140e   : > { %10596 = vmatprep.subr.bf16.mxu0 %v5181_v59 }
0x1411   : > { %10597 = vmatpush3.bf16.msra.mxu0 %v5181_v59 }
0x146e   : > { %v4442_v7 = vpop.xlane.xlu0 %4441 }
0x146f   : > { %v4464_v62 = vsub.f32 %v13397_v29, %v4442_v7  ;;  %v11353_v7 = vld [vmem:[%s14291_s26] sm:$0xff]  }
0x1470   : > { %v4445_v23 = vpop.xlane.xlu1 %4444  ;;  %10528 = vmatprep.subr.bf16.mxu1 %v11353_v7 }
0x1471   : > { %v4472_v18 = vmul.f32 1.442695, %v4464_v62  ;;  %v4465_v30 = vsub.f32 %v13402_v60, %v4445_v23 }
0x1472   : > { %v4448_v56 = vpop.xlane.xlu0 %4447 }
0x1473   : > { %11599 = vpow2.f32 %v4472_v18  ;;  %v4474_v42 = vmul.f32 1.442695, %v4465_v30  ;;  %v4466_v40 = vsub.f32 %v13400_v36, %v4448_v56 }
0x1474   : > { %v4451_v37 = vpop.xlane.xlu1 %4450 }
0x1475   : > { %11601 = vpow2.f32 %v4474_v42  ;;  %v4476_v43 = vmul.f32 1.442695, %v4466_v40  ;;  %v4467_v24 = vsub.f32 %v13406_v63, %v4451_v37 }
0x1476   : > { %v4454_v35 = vpop.xlane.xlu0 %4453 }
0x1477   : > { %11603 = vpow2.f32 %v4476_v43  ;;  %v4478_v8 = vmul.f32 1.442695, %v4467_v24  ;;  %v4468_v21 = vsub.f32 %v13415_v11, %v4454_v35 }
0x1478   : > { %v4457_v29 = vpop.xlane.xlu1 %4456 }
0x1479   : > { %11605 = vpow2.f32 %v4478_v8  ;;  %v4480_v26 = vmul.f32 1.442695, %v4468_v21  ;;  %v4469_v60 = vsub.f32 %v13422_v22, %v4457_v29 }
0x147a   : > { %v4460_v17 = vpop.xlane.xlu0 %4459 }
0x147b   : > { %11607 = vpow2.f32 %v4480_v26  ;;  %v4482_v32 = vmul.f32 1.442695, %v4469_v60  ;;  %v4470_v36 = vsub.f32 %v13420_v31, %v4460_v17 }
0x147c   : > { %v4463_v50 = vpop.xlane.xlu1 %4462 }
0x147d   : > { %v11600_v0 = vpop.eup %11599  ;;  %11609 = vpow2.f32 %v4482_v32  ;;  %v4484_v28 = vmul.f32 1.442695, %v4470_v36  ;;  %v4471_v63 = vsub.f32 %v13426_v1, %v4463_v50 }
0x147e   : > { %v4488_v55 = vsel %vm2526_vm3, %v11600_v0, 0.0 }
0x147f   : > { %v11602_v3 = vpop.eup %11601  ;;  %11611 = vpow2.f32 %v4484_v28  ;;  %v4486_v11 = vmul.f32 1.442695, %v4471_v63  ;;  %4489 = vadd.xlane.f32.xlu0 %v4488_v55 }
0x1480   : > { %v4491_v19 = vsel %vm2526_vm3, %v11602_v3, 0.0 }
0x1481   : > { %v11604_v22 = vpop.eup %11603  ;;  %11613 = vpow2.f32 %v4486_v11  ;;  %4492 = vadd.xlane.f32.xlu1 %v4491_v19 }
0x1482   : > { %v4494_v20 = vsel %vm2526_vm3, %v11604_v22, 0.0 }
0x1483   : > { %v11606_v31 = vpop.eup %11605  ;;  %4495 = vadd.xlane.f32.xlu0 %v4494_v20  ;;  %v11354_v20 = vld [vmem:[%s14286_s2 + $0x30] sm:$0xff]  }
0x1484   : > { %v4497_v27 = vsel %vm2526_vm3, %v11606_v31, 0.0 }
0x1485   : > { %v11608_v58 = vpop.eup %11607  ;;  %4498 = vadd.xlane.f32.xlu1 %v4497_v27 }
0x1486   : > { %v4500_v1 = vsel %vm2526_vm3, %v11608_v58, 0.0 }
0x1487   : > { %v11610_v38 = vpop.eup %11609  ;;  %4501 = vadd.xlane.f32.xlu0 %v4500_v1 }
0x1488   : > { %v4503_v47 = vsel %vm2526_vm3, %v11610_v38, 0.0 }
0x1489   : > { %v11612_v61 = vpop.eup %11611  ;;  %4504 = vadd.xlane.f32.xlu1 %v4503_v47 }
0x148a   : > { %v4506_v44 = vsel %vm2526_vm3, %v11612_v61, 0.0 }
0x148b   : > { %v11614_v59 = vpop.eup %11613  ;;  %4507 = vadd.xlane.f32.xlu0 %v4506_v44  ;;  %v11355_v44 = vld [vmem:[%s14286_s2 + $0x38] sm:$0xff]   ;;  %s14298_s2 = sld [smem:[#allocation52_spill]] }
0x148c   : > { %v4509_v41 = vsel %vm2526_vm3, %v11614_v59, 0.0 }
0x148d   : > { %4510 = vadd.xlane.f32.xlu1 %v4509_v41 }
0x150c   : > { %v4490_v62 = vpop.xlane.xlu0 %4489 }
0x150d   : > { %11615 = vrcp.f32 %v4490_v62 }
0x150e   : > { %v4493_v23 = vpop.xlane.xlu1 %4492 }
0x150f   : > { %11617 = vrcp.f32 %v4493_v23 }
0x1510   : > { %v4496_v18 = vpop.xlane.xlu0 %4495 }
0x1511   : > { %11619 = vrcp.f32 %v4496_v18 }
0x1512   : > { %v4499_v30 = vpop.xlane.xlu1 %4498 }
0x1513   : > { %11621 = vrcp.f32 %v4499_v30  ;;  %v9542_v30 = vld [vmem:[%s14289_s23 + $0x3] ss:$0 sm:$0xff] }
0x1514   : > { %v4502_v56 = vpop.xlane.xlu0 %4501 }
0x1515   : > { %11623 = vrcp.f32 %v4502_v56 }
0x1516   : > { %v4505_v42 = vpop.xlane.xlu1 %4504 }
0x1517   : > { %v11616_v40 = vpop.eup %11615  ;;  %11625 = vrcp.f32 %v4505_v42 }
0x1518   : > { %v4508_v37 = vpop.xlane.xlu0 %4507  ;;  %v4520_v35 = vmul.f32 %v11616_v40, %v11600_v0 }
0x1519   : > { %v11618_v43 = vpop.eup %11617  ;;  %11627 = vrcp.f32 %v4508_v37 }
0x151a   : > { %v4511_v24 = vpop.xlane.xlu1 %4510  ;;  %v4521_v8 = vmul.f32 %v11618_v43, %v11602_v3 }
0x151b   : > { %v11620_v21 = vpop.eup %11619  ;;  %11629 = vrcp.f32 %v4511_v24 }
0x151c   : > { %v4528_v29 = vpack.c.bf16 %v4521_v8, %v4520_v35  ;;  %v4522_v60 = vmul.f32 %v11620_v21, %v11604_v22 }
0x151d   : > { %v11622_v26 = vpop.eup %11621 }
0x151e   : > { %v4523_v17 = vmul.f32 %v11622_v26, %v11606_v31  ;;  %10520 = vmatprep.mubr.msk.bf16.mxu1 %vm2526_vm3, %v4528_v29 }
0x151f   : > { %v11624_v32 = vpop.eup %11623 }
0x1520   : > { %v4529_v36 = vpack.c.bf16 %v4523_v17, %v4522_v60  ;;  %v4524_v28 = vmul.f32 %v11624_v32, %v11608_v58 }
0x1521   : > { %v11626_v50 = vpop.eup %11625 }
0x1522   : > { %10521 = vmatmul.mubr.msk.bf16.vlgmr.msra.gmra.mrb[72].mxu1 %vm2526_vm3, %v4529_v36  ;;  %v4525_v63 = vmul.f32 %v11626_v50, %v11610_v38 }
0x1523   : > { %v11628_v55 = vpop.eup %11627  ;;  %10529 = vmatpush3.bf16.msra.mxu1 %v11353_v7 }
0x1524   : > { %v4530_v0 = vpack.c.bf16 %v4525_v63, %v4524_v28  ;;  %v4526_v11 = vmul.f32 %v11628_v55, %v11612_v61  ;;  %10550 = vmatprep.subr.bf16.mxu1 %v11354_v20  ;;  %v9561_v28 = vld [vmem:[%s14290_s16 + $0x40] sm:$0xff]  ;;  %v9563_v55 = vld [vmem:[%s14290_s16 + $0x50] sm:$0xff] }
0x1525   : > { %v11630_v3 = vpop.eup %11629 }
0x1526   : > { %10524 = vmatprep.mubr.msk.bf16.mxu1 %vm2526_vm3, %v4530_v0  ;;  %v4527_v19 = vmul.f32 %v11630_v3, %v11614_v59  ;;  %v9562_v3 = vld [vmem:[%s14290_s16 + $0x48] sm:$0xff] }
0x1528   : > { %v4531_v22 = vpack.c.bf16 %v4527_v19, %v4526_v11 }
0x152a   : > { %10525 = vmatmul.mubr.msk.bf16.gmra.mrb[76].mxu1 %vm2526_vm3, %v4531_v22 }
0x15f5   : > { %v10522_v31 = vpop.f32.mrb[72].mxu1 }
0x15f6   : > { %v4582_v27 = vpop.f32.mrb[73].mxu1 }
0x15f7   : > { %v10523_v1 = vpop.f32.mrb[74].mxu1 }
0x15f8   : > { %v4614_v47 = vpack.c.bf16 %v10523_v1, %v10522_v31  ;;  %v4585_v58 = vpop.f32.mrb[75].mxu1 }
0x15f9   : > { %v4613_v38 = vpack.c.bf16 %v4585_v58, %v4582_v27  ;;  %v9566_v27 = vld [vmem:[%s14290_s16 + $0x68] sm:$0xff] }
0x15fb   : > { %10530 = vmatprep.mubr.msk.bf16.mxu1 %vm2436_vm2, %v4613_v38  ;;  %v9568_v38 = vld [vmem:[%s14290_s16 + $0x78] sm:$0xff] }
0x15fc   : > { %10531 = vmatmul.mubr.msk.bf16.vlgmr.msra.gmra.mrb[80].mxu1 %vm2436_vm2, %v4614_v47 }
0x15fd   : > { %v10526_v41 = vpop.f32.mrb[76].mxu1  ;;  %10551 = vmatpush3.bf16.msra.mxu1 %v11354_v20  ;;  %v9567_v20 = vld [vmem:[%s14290_s16 + $0x70] sm:$0xff] }
0x15fe   : > { %v4598_v61 = vpop.f32.mrb[77].mxu1  ;;  %10552 = vmatprep.subr.bf16.mxu1 %v11355_v44 }
0x15ff   : > { %v10527_v59 = vpop.f32.mrb[78].mxu1 }
0x1600   : > { %v4616_v7 = vpack.c.bf16 %v10527_v59, %v10526_v41  ;;  %v4601_v62 = vpop.f32.mrb[79].mxu1 }
0x1601   : > { %v4615_v23 = vpack.c.bf16 %v4601_v62, %v4598_v61  ;;  %10553 = vmatpush3.bf16.msra.mxu1 %v11355_v44 }
0x1603   : > { %10534 = vmatprep.mubr.msk.bf16.mxu1 %vm2436_vm2, %v4615_v23 }
0x1604   : > { %10535 = vmatmul.mubr.msk.bf16.gmra.mrb[84].mxu1 %vm2436_vm2, %v4616_v7 }
0x1605   : > { %10554 = vmatprep.mubr.msk.bf16.mxu1 %vm1853_vm1, %v13310_v46 }
0x160c   : > { %10555 = vmatmul.mubr.msk.bf16.vlgmr.msra.gmra.mrb[88].mxu1 %vm1853_vm1, %v13318_v5 }
0x160d   : > { %10558 = vmatprep.mubr.msk.bf16.mxu1 %vm1853_vm1, %v13327_v14 }
0x1614   : > { %10559 = vmatmul.mubr.msk.bf16.gmra.mrb[92].mxu1 %vm1853_vm1, %v13333_v2 }
0x1615   : > { %10582 = vmatprep.mubr.msk.bf16.mxu1 %vm2436_vm2, %v4980_v34 }
0x16df   : > { %v10556_v18 = vpop.f32.mrb[88].mxu1 }
0x16e0   : > { %v4859_v56 = vpop.f32.mrb[89].mxu1  ;;  %v4868_v40 = vadd.f32 %v10556_v18, %v9542_v30 }
0x16e1   : > { %v10557_v42 = vpop.f32.mrb[90].mxu1  ;;  %v4860_v43 = vadd.f32 %v9542_v30, %v4859_v56 }
0x16e2   : > { %v4871_v46 = vadd.f32 %v10557_v42, %v9542_v30  ;;  %v4862_v37 = vpop.f32.mrb[91].mxu1 }
0x16e3   : > { %v4863_v5 = vadd.f32 %v9542_v30, %v4862_v37 }
0x16e4   : > { %v4985_v24 = vpack.c.bf16 %v4871_v46, %v4868_v40 }
0x16e5   : > { %v4984_v35 = vpack.c.bf16 %v4863_v5, %v4860_v43 }
0x16e6   : > { %v5013_v32 = vsel %vm2436_vm2, %v4985_v24, 0 }
0x16e7   : > { %v10560_v14 = vpop.f32.mrb[92].mxu1  ;;  %11132 = vmatprep.subr.msk.bf16.mxu1 %vm2436_vm2, %v4984_v35  ;;  %v5010_v2 = vsel %vm2436_vm2, %v4984_v35, 0 }
0x16e8   : > { %v4875_v8 = vpop.f32.mrb[93].mxu1  ;;  %10575 = vmatpush3.bf16.xpose.msra.mxu1 %v5010_v2  ;;  %v4884_v57 = vadd.f32 %v10560_v14, %v9542_v30 }
0x16e9   : > { %v10561_v49 = vpop.f32.mrb[94].mxu1  ;;  %11133 = vmatprep.subr.msk.bf16.mxu1 %vm2436_vm2, %v4985_v24  ;;  %v4876_v29 = vadd.f32 %v9542_v30, %v4875_v8 }
0x16ea   : > { %v4887_v34 = vadd.f32 %v10561_v49, %v9542_v30  ;;  %v4878_v21 = vpop.f32.mrb[95].mxu1 }
0x16eb   : > { %v4879_v26 = vadd.f32 %v9542_v30, %v4878_v21 }
0x16ec   : > { %v4987_v60 = vpack.c.bf16 %v4887_v34, %v4884_v57 }
0x16ed   : > { %v4986_v17 = vpack.c.bf16 %v4879_v26, %v4876_v29 }
0x16ee   : > { %v5019_v50 = vsel %vm2436_vm2, %v4987_v60, 0 }
0x16ef   : > { %v5016_v36 = vsel %vm2436_vm2, %v4986_v17, 0 }
0x16f0   : > { %10577 = vmatpush3.bf16.xpose.msra.mxu1 %v5013_v32 }
0x16f1   : > { %11134 = vmatprep.subr.msk.bf16.mxu1 %vm2436_vm2, %v4986_v17 }
0x16f8   : > { %10579 = vmatpush3.bf16.xpose.msra.mxu1 %v5016_v36 }
0x16f9   : > { %11135 = vmatprep.subr.msk.bf16.mxu1 %vm2436_vm2, %v4987_v60 }
0x1700   : > { %10581 = vmatpush3.bf16.xpose.msra.mxu1 %v5019_v50 }
0x1707   : > { %10583 = vmatmul.mubr.msk.bf16.vlgmr.msra.gmra.mrb[96].mxu1 %vm2436_vm2, %v4981_v33  ;;  %v9564_v33 = vld [vmem:[%s14290_s16 + $0x58] sm:$0xff] }
0x1708   : > { %10586 = vmatprep.mubr.msk.bf16.mxu1 %vm2436_vm2, %v4982_v13 }
0x170f   : > { %10587 = vmatmul.mubr.msk.bf16.gmra.mrb[100].mxu1 %vm2436_vm2, %v4983_v39  ;;  %v9565_v39 = vld [vmem:[%s14290_s16 + $0x60] sm:$0xff] }
0x17da   : > { %v10584_v63 = vpop.f32.mrb[96].mxu1 }
0x17db   : > { %v5055_v0 = vpop.f32.mrb[97].mxu1  ;;  %v5064_v51 = vadd.f32 %v10584_v63, %v9563_v55 }
0x17dc   : > { %v5056_v4 = vadd.f32 %v9561_v28, %v5055_v0  ;;  %v10585_v52 = vpop.f32.mrb[98].mxu1 }
0x17dd   : > { %v5058_v11 = vpop.f32.mrb[99].mxu1  ;;  %v5067_v45 = vadd.f32 %v10585_v52, %v9564_v33  ;;  %v5092_v22 = vsel %vm2526_vm3, %v5064_v51, -inf }
0x17de   : > { %v5059_v15 = vadd.f32 %v9562_v3, %v5058_v11  ;;  %v5086_v13 = vsel %vm2526_vm3, %v5056_v4, -inf }
0x17df   : > { %5087 = vmax.xlane.f32.xlu0 %v5086_v13  ;;  %v5095_v58 = vsel %vm2526_vm3, %v5067_v45, -inf }
0x17e0   : > { %v5089_v16 = vsel %vm2526_vm3, %v5059_v15, -inf }
0x17e1   : > { %5090 = vmax.xlane.f32.xlu1 %v5089_v16 }
0x17e2   : > { %v10588_v19 = vpop.f32.mrb[100].mxu1 }
0x17e3   : > { %v5071_v31 = vpop.f32.mrb[101].mxu1  ;;  %5093 = vmax.xlane.f32.xlu0 %v5092_v22  ;;  %v5080_v41 = vadd.f32 %v10588_v19, %v9567_v20  ;;  %v11356_v22 = vld [vmem:[%s14291_s26 + $0x8] sm:$0xff]  }
0x17e4   : > { %v5072_v1 = vadd.f32 %v9565_v39, %v5071_v31  ;;  %v10589_v47 = vpop.f32.mrb[102].mxu1  ;;  %10606 = vmatprep.subr.bf16.mxu1 %v11356_v22 }
0x17e5   : > { %v5074_v44 = vpop.f32.mrb[103].mxu1  ;;  %5096 = vmax.xlane.f32.xlu1 %v5095_v58  ;;  %v5083_v7 = vadd.f32 %v10589_v47, %v9568_v38  ;;  %v5104_v23 = vsel %vm2526_vm3, %v5080_v41, -inf  ;;  %10607 = vmatpush3.bf16.msra.mxu1 %v11356_v22 }
0x17e6   : > { %v5075_v61 = vadd.f32 %v9566_v27, %v5074_v44  ;;  %v5098_v59 = vsel %vm2526_vm3, %v5072_v1, -inf }
0x17e7   : > { %5099 = vmax.xlane.f32.xlu0 %v5098_v59  ;;  %v5107_v18 = vsel %vm2526_vm3, %v5083_v7, -inf }
0x17e8   : > { %v5101_v62 = vsel %vm2526_vm3, %v5075_v61, -inf }
0x17e9   : > { %5102 = vmax.xlane.f32.xlu1 %v5101_v62 }
0x17eb   : > { %5105 = vmax.xlane.f32.xlu0 %v5104_v23 }
0x17ed   : > { %5108 = vmax.xlane.f32.xlu1 %v5107_v18 }
0x186c   : > { %v5088_v30 = vpop.xlane.xlu0 %5087 }
0x186d   : > { %v5110_v56 = vsub.f32 %v5056_v4, %v5088_v30 }
0x186e   : > { %v5091_v42 = vpop.xlane.xlu1 %5090 }
0x186f   : > { %v5118_v40 = vmul.f32 1.442695, %v5110_v56  ;;  %v5111_v46 = vsub.f32 %v5059_v15, %v5091_v42 }
0x1870   : > { %v5094_v37 = vpop.xlane.xlu0 %5093 }
0x1871   : > { %11631 = vpow2.f32 %v5118_v40  ;;  %v5120_v43 = vmul.f32 1.442695, %v5111_v46  ;;  %v5112_v5 = vsub.f32 %v5064_v51, %v5094_v37 }
0x1872   : > { %v5097_v24 = vpop.xlane.xlu1 %5096 }
0x1873   : > { %11633 = vpow2.f32 %v5120_v43  ;;  %v5122_v35 = vmul.f32 1.442695, %v5112_v5  ;;  %v5113_v14 = vsub.f32 %v5067_v45, %v5097_v24 }
0x1874   : > { %v5100_v2 = vpop.xlane.xlu0 %5099 }
0x1875   : > { %11635 = vpow2.f32 %v5122_v35  ;;  %v5124_v8 = vmul.f32 1.442695, %v5113_v14  ;;  %v5114_v49 = vsub.f32 %v5072_v1, %v5100_v2 }
0x1876   : > { %v5103_v57 = vpop.xlane.xlu1 %5102 }
0x1877   : > { %11637 = vpow2.f32 %v5124_v8  ;;  %v5126_v34 = vmul.f32 1.442695, %v5114_v49  ;;  %v5115_v21 = vsub.f32 %v5075_v61, %v5103_v57 }
0x1878   : > { %v5106_v29 = vpop.xlane.xlu0 %5105 }
0x1879   : > { %11639 = vpow2.f32 %v5126_v34  ;;  %v5128_v26 = vmul.f32 1.442695, %v5115_v21  ;;  %v5116_v60 = vsub.f32 %v5080_v41, %v5106_v29 }
0x187a   : > { %v5109_v17 = vpop.xlane.xlu1 %5108 }
0x187b   : > { %v11632_v32 = vpop.eup %11631  ;;  %11641 = vpow2.f32 %v5128_v26  ;;  %v5130_v36 = vmul.f32 1.442695, %v5116_v60  ;;  %v5117_v50 = vsub.f32 %v5083_v7, %v5109_v17 }
0x187c   : > { %v5134_v28 = vsel %vm2526_vm3, %v11632_v32, 0.0 }
0x187d   : > { %v11634_v63 = vpop.eup %11633  ;;  %11643 = vpow2.f32 %v5130_v36  ;;  %v5132_v55 = vmul.f32 1.442695, %v5117_v50  ;;  %5135 = vadd.xlane.f32.xlu0 %v5134_v28 }
0x187e   : > { %v5137_v0 = vsel %vm2526_vm3, %v11634_v63, 0.0 }
0x187f   : > { %v11636_v3 = vpop.eup %11635  ;;  %11645 = vpow2.f32 %v5132_v55  ;;  %5138 = vadd.xlane.f32.xlu1 %v5137_v0 }
0x1880   : > { %v5140_v4 = vsel %vm2526_vm3, %v11636_v3, 0.0 }
0x1881   : > { %v11638_v52 = vpop.eup %11637  ;;  %5141 = vadd.xlane.f32.xlu0 %v5140_v4 }
0x1882   : > { %v5143_v33 = vsel %vm2526_vm3, %v11638_v52, 0.0 }
0x1883   : > { %v11640_v11 = vpop.eup %11639  ;;  %5144 = vadd.xlane.f32.xlu1 %v5143_v33 }
0x1884   : > { %v5146_v51 = vsel %vm2526_vm3, %v11640_v11, 0.0 }
0x1885   : > { %v11642_v15 = vpop.eup %11641  ;;  %5147 = vadd.xlane.f32.xlu0 %v5146_v51 }
0x1886   : > { %v5149_v13 = vsel %vm2526_vm3, %v11642_v15, 0.0 }
0x1887   : > { %v11644_v45 = vpop.eup %11643  ;;  %5150 = vadd.xlane.f32.xlu1 %v5149_v13 }
0x1888   : > { %v5152_v16 = vsel %vm2526_vm3, %v11644_v45, 0.0 }
0x1889   : > { %v11646_v39 = vpop.eup %11645  ;;  %5153 = vadd.xlane.f32.xlu0 %v5152_v16 }
0x188a   : > { %v5155_v19 = vsel %vm2526_vm3, %v11646_v39, 0.0 }
0x188b   : > { %5156 = vadd.xlane.f32.xlu1 %v5155_v19 }
0x190a   : > { %v5136_v20 = vpop.xlane.xlu0 %5135 }
0x190b   : > { %11647 = vrcp.f32 %v5136_v20 }
0x190c   : > { %v5139_v31 = vpop.xlane.xlu1 %5138 }
0x190d   : > { %11649 = vrcp.f32 %v5139_v31 }
0x190e   : > { %v5142_v27 = vpop.xlane.xlu0 %5141 }
0x190f   : > { %11651 = vrcp.f32 %v5142_v27 }
0x1910   : > { %v5145_v1 = vpop.xlane.xlu1 %5144 }
0x1911   : > { %11653 = vrcp.f32 %v5145_v1 }
0x1912   : > { %v5148_v47 = vpop.xlane.xlu0 %5147 }
0x1913   : > { %11655 = vrcp.f32 %v5148_v47 }
0x1914   : > { %v5151_v58 = vpop.xlane.xlu1 %5150 }
0x1915   : > { %v11648_v38 = vpop.eup %11647  ;;  %11657 = vrcp.f32 %v5151_v58 }
0x1916   : > { %v5154_v44 = vpop.xlane.xlu0 %5153  ;;  %v5166_v59 = vmul.f32 %v11648_v38, %v11632_v32 }
0x1917   : > { %v11650_v41 = vpop.eup %11649  ;;  %11659 = vrcp.f32 %v5154_v44 }
0x1918   : > { %v5157_v61 = vpop.xlane.xlu1 %5156  ;;  %v5167_v7 = vmul.f32 %v11650_v41, %v11634_v63  ;;  %v9480_v63 = vld [vmem:[%s14292_s10] ss:$0 sm:$0xff]  ;;  %s14293_s10 = sld [smem:[#allocation49_spill]] }
0x1919   : > { %v11652_v62 = vpop.eup %11651  ;;  %11661 = vrcp.f32 %v5157_v61  ;;  %v4047_v0 = vadd.f32 %v9480_v63, %v13208_v48  ;;  %v4049_v4 = vadd.f32 %v9480_v63, %v13211_v6  ;;  %v4050_v13 = vadd.f32 %v9480_v63, %v13219_v54 }
0x191a   : > { %v5174_v23 = vpack.c.bf16 %v5167_v7, %v5166_v59  ;;  %v5168_v30 = vmul.f32 %v11652_v62, %v11636_v3  ;;  %v4051_v19 = vadd.f32 %v9480_v63, %v13226_v9  ;;  %v4053_v22 = vadd.f32 %v9480_v63, %v13231_v10 }
0x191b   : > { %v11654_v18 = vpop.eup %11653  ;;  %v4052_v1 = vadd.f32 %v9480_v63, %v13234_v12  ;;  %v4054_v38 = vadd.f32 %v9480_v63, %v13239_v25 }
0x191c   : > { %v5169_v56 = vmul.f32 %v11654_v18, %v11638_v52  ;;  %10598 = vmatprep.mubr.msk.bf16.mxu0 %vm2526_vm3, %v5174_v23 }
0x191d   : > { %v11656_v42 = vpop.eup %11655 }
0x191e   : > { %v5175_v40 = vpack.c.bf16 %v5169_v56, %v5168_v30  ;;  %v5170_v37 = vmul.f32 %v11656_v42, %v11640_v11  ;;  %v4048_v11 = vadd.f32 %v9480_v63, %v13214_v53 }
0x191f   : > { %v11658_v46 = vpop.eup %11657 }
0x1920   : > { %10599 = vmatmul.mubr.msk.bf16.vlgmr.msra.gmra.mrb[88].mxu0 %vm2526_vm3, %v5175_v40  ;;  %v5171_v43 = vmul.f32 %v11658_v46, %v11642_v15 }
0x1921   : > { %v11660_v5 = vpop.eup %11659 }
0x1922   : > { %v5176_v24 = vpack.c.bf16 %v5171_v43, %v5170_v37  ;;  %v5172_v14 = vmul.f32 %v11660_v5, %v11644_v45 }
0x1923   : > { %v11662_v35 = vpop.eup %11661 }
0x1924   : > { %10602 = vmatprep.mubr.msk.bf16.mxu0 %vm2526_vm3, %v5176_v24  ;;  %v5173_v2 = vmul.f32 %v11662_v35, %v11646_v39 }
0x1926   : > { %v5177_v8 = vpack.c.bf16 %v5173_v2, %v5172_v14 }
0x1928   : > { %10603 = vmatmul.mubr.msk.bf16.gmra.mrb[92].mxu0 %vm2526_vm3, %v5177_v8 }
0x19f3   : > { %v10600_v49 = vpop.f32.mrb[88].mxu0 }
0x19f4   : > { %v5228_v57 = vpop.f32.mrb[89].mxu0 }
0x19f5   : > { %v10601_v34 = vpop.f32.mrb[90].mxu0 }
0x19f6   : > { %v5260_v21 = vpack.c.bf16 %v10601_v34, %v10600_v49  ;;  %v5231_v29 = vpop.f32.mrb[91].mxu0 }
0x19f7   : > { %v5259_v26 = vpack.c.bf16 %v5231_v29, %v5228_v57 }
0x19f9   : > { %10608 = vmatprep.mubr.msk.bf16.mxu1 %vm2436_vm2, %v5259_v26 }
0x19fa   : > { %10609 = vmatmul.mubr.msk.bf16.vlgmr.msra.gmra.mrb[80].mxu1 %vm2436_vm2, %v5260_v21 }
0x19fb   : > { %v10604_v60 = vpop.f32.mrb[92].mxu0 }
0x19fc   : > { %v5244_v17 = vpop.f32.mrb[93].mxu0 }
0x19fd   : > { %v10605_v32 = vpop.f32.mrb[94].mxu0 }
0x19fe   : > { %v5262_v36 = vpack.c.bf16 %v10605_v32, %v10604_v60  ;;  %v5247_v50 = vpop.f32.mrb[95].mxu0 }
0x19ff   : > { %v5261_v28 = vpack.c.bf16 %v5247_v50, %v5244_v17 }
0x1a01   : > { %10612 = vmatprep.mubr.msk.bf16.mxu1 %vm2436_vm2, %v5261_v28 }
0x1a02   : > { %10613 = vmatmul.mubr.msk.bf16.gmra.mrb[84].mxu1 %vm2436_vm2, %v5262_v36 }
0x1acd   : > { %v10610_v55 = vpop.f32.mrb[80].mxu1 }
0x1ace   : > { %v5318_v3 = vpop.f32.mrb[81].mxu1  ;;  %v13559_v15 = vadd.f32 %v10610_v55, %v4049_v4 }
0x1acf   : > { %v13556_v52 = vadd.f32 %v5318_v3, %v4047_v0  ;;  %v10611_v33 = vpop.f32.mrb[82].mxu1 }
0x1ad0   : > { %v5321_v51 = vpop.f32.mrb[83].mxu1  ;;  %v13566_v48 = vadd.f32 %v10611_v33, %v4050_v13  ;;  %v5365_v53 = vsel %vm1853_vm1, %v13559_v15, 0.0 }
0x1ad1   : > { %v13562_v45 = vadd.f32 %v5321_v51, %v4048_v11  ;;  %v5359_v16 = vsel %vm1853_vm1, %v13556_v52, 0.0 }
0x1ad2   : > { %5360 = vadd.xlane.f32.xlu0 %v5359_v16  ;;  %v5368_v27 = vsel %vm1853_vm1, %v13566_v48, 0.0  ;;  %v11357_v16 = vld [vmem:[%s14293_s10] sm:$0xff]  }
0x1ad3   : > { %v5362_v6 = vsel %vm1853_vm1, %v13562_v45, 0.0  ;;  %10616 = vmatprep.subr.bf16.mxu0 %v11357_v16 }
0x1ad4   : > { %5363 = vadd.xlane.f32.xlu1 %v5362_v6  ;;  %10617 = vmatpush3.bf16.msra.mxu0 %v11357_v16  ;;  %v11358_v6 = vld [vmem:[%s14293_s10 + $0x8] sm:$0xff]  }
0x1ad5   : > { %v10614_v39 = vpop.f32.mrb[84].mxu1  ;;  %10618 = vmatprep.subr.bf16.mxu0 %v11358_v6 }
0x1ad6   : > { %5366 = vadd.xlane.f32.xlu0 %v5365_v53  ;;  %v5334_v54 = vpop.f32.mrb[85].mxu1  ;;  %v13579_v58 = vadd.f32 %v10614_v39, %v4053_v22 }
0x1ad7   : > { %v13574_v20 = vadd.f32 %v5334_v54, %v4051_v19  ;;  %v10615_v31 = vpop.f32.mrb[86].mxu1 }
0x1ad8   : > { %5369 = vadd.xlane.f32.xlu1 %v5368_v27  ;;  %v5337_v47 = vpop.f32.mrb[87].mxu1  ;;  %v13586_v10 = vadd.f32 %v10615_v31, %v4054_v38  ;;  %v5377_v12 = vsel %vm1853_vm1, %v13579_v58, 0.0  ;;  %10619 = vmatpush3.bf16.msra.mxu0 %v11358_v6 }
0x1ad9   : > { %v13582_v44 = vadd.f32 %v5337_v47, %v4052_v1  ;;  %v5371_v9 = vsel %vm1853_vm1, %v13574_v20, 0.0 }
0x1ada   : > { %5372 = vadd.xlane.f32.xlu0 %v5371_v9  ;;  %v5380_v61 = vsel %vm1853_vm1, %v13586_v10, 0.0 }
0x1adb   : > { %v5374_v41 = vsel %vm1853_vm1, %v13582_v44, 0.0 }
0x1adc   : > { %5375 = vadd.xlane.f32.xlu1 %v5374_v41 }
0x1ade   : > { %5378 = vadd.xlane.f32.xlu0 %v5377_v12 }
0x1ae0   : > { %5381 = vadd.xlane.f32.xlu1 %v5380_v61 }
0x1b5f   : > { %v5361_v25 = vpop.xlane.xlu0 %5360 }
0x1b60   : > { %v5383_v59 = vmul.f32 0.03125, %v5361_v25 }
0x1b61   : > { %v5364_v7 = vpop.xlane.xlu1 %5363 }
0x1b62   : > { %v13595_v62 = vsub.f32 %v13556_v52, %v5383_v59  ;;  %v5384_v23 = vmul.f32 0.03125, %v5364_v7 }
0x1b63   : > { %v5367_v18 = vpop.xlane.xlu0 %5366 }
0x1b64   : > { %v13598_v30 = vsub.f32 %v13562_v45, %v5384_v23  ;;  %v5385_v56 = vmul.f32 0.03125, %v5367_v18  ;;  %v5399_v42 = vmul.f32 %v13595_v62, %v13595_v62 }
0x1b65   : > { %v5370_v40 = vpop.xlane.xlu1 %5369 }
0x1b66   : > { %v13603_v46 = vsub.f32 %v13559_v15, %v5385_v56  ;;  %v5386_v37 = vmul.f32 0.03125, %v5370_v40  ;;  %v5407_v43 = vsel %vm1853_vm1, %v5399_v42, 0.0  ;;  %v5400_v5 = vmul.f32 %v13598_v30, %v13598_v30 }
0x1b67   : > { %5408 = vadd.xlane.f32.xlu0 %v5407_v43  ;;  %v5373_v24 = vpop.xlane.xlu0 %5372 }
0x1b68   : > { %v13609_v35 = vsub.f32 %v13566_v48, %v5386_v37  ;;  %v5387_v14 = vmul.f32 0.03125, %v5373_v24  ;;  %v5410_v2 = vsel %vm1853_vm1, %v5400_v5, 0.0  ;;  %v5401_v8 = vmul.f32 %v13603_v46, %v13603_v46  ;;  %v9584_v37 = vld [vmem:[%s14294_s1] ss:$0 sm:$0xff]  ;;  %s14295_s1 = sld [smem:[#allocation50_spill]] }
0x1b69   : > { %5411 = vadd.xlane.f32.xlu1 %v5410_v2  ;;  %v5376_v49 = vpop.xlane.xlu1 %5375 }
0x1b6a   : > { %v13615_v57 = vsub.f32 %v13574_v20, %v5387_v14  ;;  %v5388_v34 = vmul.f32 0.03125, %v5376_v49  ;;  %v5413_v21 = vsel %vm1853_vm1, %v5401_v8, 0.0  ;;  %v5402_v29 = vmul.f32 %v13609_v35, %v13609_v35 }
0x1b6b   : > { %5414 = vadd.xlane.f32.xlu0 %v5413_v21  ;;  %v5379_v26 = vpop.xlane.xlu0 %5378  ;;  %v9585_v21 = vld [vmem:[#allocation2] ss:$0 sm:$0xff] }
0x1b6c   : > { %v13621_v60 = vsub.f32 %v13582_v44, %v5388_v34  ;;  %v5389_v17 = vmul.f32 0.03125, %v5379_v26  ;;  %v5416_v32 = vsel %vm1853_vm1, %v5402_v29, 0.0  ;;  %v5403_v36 = vmul.f32 %v13615_v57, %v13615_v57 }
0x1b6d   : > { %5417 = vadd.xlane.f32.xlu1 %v5416_v32  ;;  %v5382_v50 = vpop.xlane.xlu1 %5381 }
0x1b6e   : > { %v13627_v28 = vsub.f32 %v13579_v58, %v5389_v17  ;;  %v5390_v63 = vmul.f32 0.03125, %v5382_v50  ;;  %v5419_v55 = vsel %vm1853_vm1, %v5403_v36, 0.0  ;;  %v5404_v0 = vmul.f32 %v13621_v60, %v13621_v60 }
0x1b6f   : > { %5420 = vadd.xlane.f32.xlu0 %v5419_v55 }
0x1b70   : > { %v13633_v3 = vsub.f32 %v13586_v10, %v5390_v63  ;;  %v5422_v4 = vsel %vm1853_vm1, %v5404_v0, 0.0  ;;  %v5405_v33 = vmul.f32 %v13627_v28, %v13627_v28 }
0x1b71   : > { %5423 = vadd.xlane.f32.xlu1 %v5422_v4 }
0x1b72   : > { %v5425_v11 = vsel %vm1853_vm1, %v5405_v33, 0.0  ;;  %v5406_v51 = vmul.f32 %v13633_v3, %v13633_v3 }
0x1b73   : > { %5426 = vadd.xlane.f32.xlu0 %v5425_v11 }
0x1b74   : > { %v5428_v13 = vsel %vm1853_vm1, %v5406_v51, 0.0 }
0x1b75   : > { %5429 = vadd.xlane.f32.xlu1 %v5428_v13 }
0x1bf4   : > { %v5409_v39 = vpop.xlane.xlu0 %5408 }
0x1bf5   : > { %v5431_v53 = vmul.f32 0.03125, %v5409_v39 }
0x1bf6   : > { %v5412_v19 = vpop.xlane.xlu1 %5411 }
0x1bf7   : > { %v5439_v54 = vadd.f32 1e-05, %v5431_v53  ;;  %v5432_v22 = vmul.f32 0.03125, %v5412_v19 }
0x1bf8   : > { %v5415_v31 = vpop.xlane.xlu0 %5414 }
0x1bf9   : > { %11663 = vrsqrt.f32 %v5439_v54  ;;  %v5440_v27 = vadd.f32 1e-05, %v5432_v22  ;;  %v5433_v1 = vmul.f32 0.03125, %v5415_v31 }
0x1bfa   : > { %v5418_v47 = vpop.xlane.xlu1 %5417 }
0x1bfb   : > { %11665 = vrsqrt.f32 %v5440_v27  ;;  %v5441_v38 = vadd.f32 1e-05, %v5433_v1  ;;  %v5434_v9 = vmul.f32 0.03125, %v5418_v47  ;;  %v11359_v1 = vld [vmem:[%s14295_s1] sm:$0xff]   ;;  %v11361_v47 = vld [vmem:[%s14295_s1 + $0x10] sm:$0xff]  }
0x1bfc   : > { %v5421_v41 = vpop.xlane.xlu0 %5420  ;;  %10628 = vmatprep.subr.bf16.mxu0 %v11359_v1 }
0x1bfd   : > { %11667 = vrsqrt.f32 %v5441_v38  ;;  %v5442_v12 = vadd.f32 1e-05, %v5434_v9  ;;  %v5435_v61 = vmul.f32 0.03125, %v5421_v41  ;;  %v11362_v38 = vld [vmem:[%s14295_s1 + $0x18] sm:$0xff]   ;;  %v11363_v9 = vld [vmem:[%s14295_s1 + $0x20] sm:$0xff]   ;;  %v11364_v41 = vld [vmem:[%s14295_s1 + $0x28] sm:$0xff]  }
0x1bfe   : > { %v5424_v25 = vpop.xlane.xlu1 %5423 }
0x1bff   : > { %11669 = vrsqrt.f32 %v5442_v12  ;;  %v5443_v59 = vadd.f32 1e-05, %v5435_v61  ;;  %v5436_v7 = vmul.f32 0.03125, %v5424_v25  ;;  %v11365_v12 = vld [vmem:[%s14295_s1 + $0x30] sm:$0xff]   ;;  %v11366_v61 = vld [vmem:[%s14295_s1 + $0x38] sm:$0xff]  }
0x1c00   : > { %v5427_v23 = vpop.xlane.xlu0 %5426  ;;  %v9586_v25 = vld [vmem:[#allocation4] ss:$0 sm:$0xff] }
0x1c01   : > { %11671 = vrsqrt.f32 %v5443_v59  ;;  %v5444_v18 = vadd.f32 1e-05, %v5436_v7  ;;  %v5437_v56 = vmul.f32 0.03125, %v5427_v23 }
0x1c02   : > { %v5430_v42 = vpop.xlane.xlu1 %5429 }
0x1c03   : > { %v11664_v40 = vpop.eup %11663  ;;  %11673 = vrsqrt.f32 %v5444_v18  ;;  %v5445_v43 = vadd.f32 1e-05, %v5437_v56  ;;  %v5438_v5 = vmul.f32 0.03125, %v5430_v42 }
0x1c04   : > { %v5455_v24 = vmul.f32 %v11664_v40, %v13595_v62 }
0x1c05   : > { %v11666_v14 = vpop.eup %11665  ;;  %11675 = vrsqrt.f32 %v5445_v43  ;;  %v5446_v2 = vadd.f32 1e-05, %v5438_v5 }
0x1c06   : > { %v5456_v8 = vmul.f32 %v11666_v14, %v13598_v30  ;;  %v5469_v49 = vmul.f32 %v9584_v37, %v5455_v24 }
0x1c07   : > { %v11668_v34 = vpop.eup %11667  ;;  %11677 = vrsqrt.f32 %v5446_v2 }
0x1c08   : > { %v5457_v29 = vmul.f32 %v11668_v34, %v13603_v46  ;;  %v5470_v26 = vmul.f32 %v9584_v37, %v5456_v8  ;;  %v5483_v50 = vadd.f32 %v9585_v21, %v5469_v49 }
0x1c09   : > { %v11670_v17 = vpop.eup %11669 }
0x1c0a   : > { %v5471_v32 = vmul.f32 %v9584_v37, %v5457_v29  ;;  %v5458_v36 = vmul.f32 %v11670_v17, %v13609_v35  ;;  %v5484_v63 = vadd.f32 %v9585_v21, %v5470_v26 }
0x1c0b   : > { %v11672_v55 = vpop.eup %11671 }
0x1c0c   : > { %v5472_v62 = vmul.f32 %v9584_v37, %v5458_v36  ;;  %v5459_v0 = vmul.f32 %v11672_v55, %v13615_v57  ;;  %v5491_v4 = vpack.c.bf16 %v5484_v63, %v5483_v50  ;;  %v5485_v30 = vadd.f32 %v9585_v21, %v5471_v32 }
0x1c0d   : > { %v11674_v33 = vpop.eup %11673 }
0x1c0e   : > { %v5486_v11 = vadd.f32 %v9585_v21, %v5472_v62  ;;  %v5460_v51 = vmul.f32 %v11674_v33, %v13621_v60  ;;  %10620 = vmatprep.mubr.msk.bf16.mxu0 %vm1853_vm1, %v5491_v4  ;;  %v5473_v46 = vmul.f32 %v9584_v37, %v5459_v0 }
0x1c0f   : > { %v11676_v13 = vpop.eup %11675 }
0x1c10   : > { %v5461_v16 = vmul.f32 %v11676_v13, %v13627_v28  ;;  %v5492_v35 = vpack.c.bf16 %v5486_v11, %v5485_v30  ;;  %v5474_v6 = vmul.f32 %v9584_v37, %v5460_v51  ;;  %v5487_v57 = vadd.f32 %v9585_v21, %v5473_v46 }
0x1c11   : > { %v11678_v39 = vpop.eup %11677 }
0x1c12   : > { %v5462_v53 = vmul.f32 %v11678_v39, %v13633_v3  ;;  %10621 = vmatmul.mubr.msk.bf16.vlgmr.msra.gmra.mrb[96].mxu0 %vm1853_vm1, %v5492_v35  ;;  %v5488_v19 = vadd.f32 %v9585_v21, %v5474_v6  ;;  %v5475_v54 = vmul.f32 %v9584_v37, %v5461_v16  ;;  %v11360_v3 = vld [vmem:[%s14295_s1 + $0x8] sm:$0xff]   ;;  %s14296_s1 = sld [smem:[#allocation51_spill]] }
0x1c13   : > { %10629 = vmatpush3.bf16.msra.mxu0 %v11359_v1 }
0x1c14   : > { %v5493_v60 = vpack.c.bf16 %v5488_v19, %v5487_v57  ;;  %v5476_v22 = vmul.f32 %v9584_v37, %v5462_v53  ;;  %v5489_v31 = vadd.f32 %v9585_v21, %v5475_v54  ;;  %10630 = vmatprep.subr.bf16.mxu0 %v11360_v3 }
0x1c16   : > { %10624 = vmatprep.mubr.msk.bf16.mxu0 %vm1853_vm1, %v5493_v60  ;;  %v5490_v28 = vadd.f32 %v9585_v21, %v5476_v22 }
0x1c17   : > { %10631 = vmatpush3.bf16.msra.mxu0 %v11360_v3 }
0x1c18   : > { %v5494_v27 = vpack.c.bf16 %v5490_v28, %v5489_v31  ;;  %10632 = vmatprep.subr.bf16.mxu0 %v11361_v47 }
0x1c1a   : > { %10625 = vmatmul.mubr.msk.bf16.gmra.mrb[100].mxu0 %vm1853_vm1, %v5494_v27 }
0x1c1b   : > { %10633 = vmatpush3.bf16.msra.mxu0 %v11361_v47 }
0x1c1c   : > { %10634 = vmatprep.subr.bf16.mxu0 %v11362_v38 }
0x1c1f   : > { %10635 = vmatpush3.bf16.msra.mxu0 %v11362_v38 }
0x1c20   : > { %10636 = vmatprep.subr.bf16.mxu0 %v11363_v9 }
0x1c23   : > { %10637 = vmatpush3.bf16.msra.mxu0 %v11363_v9 }
0x1c24   : > { %10638 = vmatprep.subr.bf16.mxu0 %v11364_v41 }
0x1c27   : > { %10639 = vmatpush3.bf16.msra.mxu0 %v11364_v41 }
0x1c28   : > { %10640 = vmatprep.subr.bf16.mxu0 %v11365_v12 }
0x1c2b   : > { %10641 = vmatpush3.bf16.msra.mxu0 %v11365_v12 }
0x1c2c   : > { %10642 = vmatprep.subr.bf16.mxu0 %v11366_v61 }
0x1c2f   : > { %10643 = vmatpush3.bf16.msra.mxu0 %v11366_v61 }
0x1ce5   : > { %v10622_v59 = vpop.f32.mrb[96].mxu0 }
0x1ce6   : > { %v13665_v7 = vadd.f32 %v10622_v59, %v9586_v25  ;;  %v5564_v23 = vpop.f32.mrb[97].mxu0 }
0x1ce7   : > { %v13667_v18 = vadd.f32 %v9586_v25, %v5564_v23  ;;  %v10623_v56 = vpop.f32.mrb[98].mxu0 }
0x1ce8   : > { %v5597_v42 = vmul.f32 %v13665_v7, %v13665_v7  ;;  %v13671_v40 = vadd.f32 %v10623_v56, %v9586_v25  ;;  %v5567_v37 = vpop.f32.mrb[99].mxu0 }
0x1ce9   : > { %v5595_v43 = vmul.f32 %v13667_v18, %v13667_v18  ;;  %v13675_v5 = vadd.f32 %v9586_v25, %v5567_v37 }
0x1cea   : > { %v5605_v24 = vmul.f32 %v5597_v42, %v13665_v7  ;;  %v5598_v14 = vmul.f32 %v13671_v40, %v13671_v40 }
0x1ceb   : > { %v5603_v2 = vmul.f32 %v5595_v43, %v13667_v18  ;;  %v5596_v8 = vmul.f32 %v13675_v5, %v13675_v5 }
0x1cec   : > { %v5613_v49 = vmul.f32 0.044715, %v5605_v24  ;;  %v5606_v34 = vmul.f32 %v5598_v14, %v13671_v40 }
0x1ced   : > { %v5611_v21 = vmul.f32 0.044715, %v5603_v2  ;;  %v5604_v29 = vmul.f32 %v5596_v8, %v13675_v5  ;;  %v10626_v26 = vpop.f32.mrb[100].mxu0 }
0x1cee   : > { %v5621_v17 = vadd.f32 %v5613_v49, %v13665_v7  ;;  %v5614_v32 = vmul.f32 0.044715, %v5606_v34  ;;  %v13686_v36 = vadd.f32 %v10626_v26, %v9586_v25  ;;  %v5580_v50 = vpop.f32.mrb[101].mxu0 }
0x1cef   : > { %v5619_v63 = vadd.f32 %v5611_v21, %v13667_v18  ;;  %v5612_v55 = vmul.f32 0.044715, %v5604_v29  ;;  %v13689_v62 = vadd.f32 %v9586_v25, %v5580_v50  ;;  %v10627_v0 = vpop.f32.mrb[102].mxu0 }
0x1cf0   : > { %v5629_v4 = vmul.f32 0.7978846, %v5621_v17  ;;  %v5622_v33 = vadd.f32 %v5614_v32, %v13671_v40  ;;  %v5601_v30 = vmul.f32 %v13686_v36, %v13686_v36  ;;  %v13694_v11 = vadd.f32 %v10627_v0, %v9586_v25  ;;  %v5583_v51 = vpop.f32.mrb[103].mxu0 }
0x1cf1   : > { %v5627_v46 = vmul.f32 0.7978846, %v5619_v63  ;;  %v5620_v13 = vadd.f32 %v5612_v55, %v13675_v5  ;;  %v5599_v16 = vmul.f32 %v13689_v62, %v13689_v62  ;;  %v13699_v35 = vadd.f32 %v9586_v25, %v5583_v51 }
0x1cf2   : > { %11679 = vtanh.f32 %v5629_v4  ;;  %v5630_v6 = vmul.f32 0.7978846, %v5622_v33  ;;  %v5609_v39 = vmul.f32 %v5601_v30, %v13686_v36  ;;  %v5602_v53 = vmul.f32 %v13694_v11, %v13694_v11 }
0x1cf3   : > { %11681 = vtanh.f32 %v5627_v46  ;;  %v5628_v57 = vmul.f32 0.7978846, %v5620_v13  ;;  %v5607_v19 = vmul.f32 %v5599_v16, %v13689_v62  ;;  %v5600_v54 = vmul.f32 %v13699_v35, %v13699_v35 }
0x1cf4   : > { %11683 = vtanh.f32 %v5630_v6  ;;  %v5617_v60 = vmul.f32 0.044715, %v5609_v39  ;;  %v5610_v22 = vmul.f32 %v5602_v53, %v13694_v11 }
0x1cf5   : > { %11685 = vtanh.f32 %v5628_v57  ;;  %v5615_v31 = vmul.f32 0.044715, %v5607_v19  ;;  %v5608_v28 = vmul.f32 %v5600_v54, %v13699_v35  ;;  %v5815_v19 = vld [vmem:[%s14296_s1] sm:$0xff] }
0x1cf6   : > { %v5625_v27 = vadd.f32 %v5617_v60, %v13686_v36  ;;  %v5618_v1 = vmul.f32 0.044715, %v5610_v22  ;;  %10668 = vmatprep.mubr.msk.f32.mxu1 %vm2526_vm3, %v5815_v19  ;;  %v9608_v54 = vld [vmem:[%s14296_s1 + $0x20] sm:$0xff] }
0x1cf7   : > { %v5623_v3 = vadd.f32 %v5615_v31, %v13689_v62  ;;  %v5616_v47 = vmul.f32 0.044715, %v5608_v28  ;;  %v9593_v60 = vld [vmem:[#allocation6] ss:$0 sm:$0xff] }
0x1cf8   : > { %v5633_v38 = vmul.f32 0.7978846, %v5625_v27  ;;  %v5626_v9 = vadd.f32 %v5618_v1, %v13694_v11 }
0x1cf9   : > { %v5631_v41 = vmul.f32 0.7978846, %v5623_v3  ;;  %v5624_v12 = vadd.f32 %v5616_v47, %v13699_v35 }
0x1cfa   : > { %11687 = vtanh.f32 %v5633_v38  ;;  %v5634_v61 = vmul.f32 0.7978846, %v5626_v9 }
0x1cfb   : > { %11689 = vtanh.f32 %v5631_v41  ;;  %v5632_v25 = vmul.f32 0.7978846, %v5624_v12 }
0x1cfc   : > { %v11680_v59 = vpop.eup %11679  ;;  %11691 = vtanh.f32 %v5634_v61 }
0x1cfd   : > { %v11682_v23 = vpop.eup %11681  ;;  %v5645_v56 = vadd.f32 1.0, %v11680_v59  ;;  %11693 = vtanh.f32 %v5632_v25 }
0x1cfe   : > { %v11684_v42 = vpop.eup %11683  ;;  %v5643_v37 = vadd.f32 1.0, %v11682_v23 }
0x1cff   : > { %v11686_v43 = vpop.eup %11685  ;;  %v5653_v24 = vmul.f32 0.5, %v5645_v56  ;;  %v5646_v14 = vadd.f32 1.0, %v11684_v42 }
0x1d00   : > { %v5644_v2 = vadd.f32 1.0, %v11686_v43  ;;  %v5651_v8 = vmul.f32 0.5, %v5643_v37 }
0x1d01   : > { %v5654_v49 = vmul.f32 0.5, %v5646_v14  ;;  %v5661_v21 = vmul.f32 %v5653_v24, %v13665_v7  ;;  %v9612_v14 = vld [vmem:[%s14296_s1 + $0x30] sm:$0xff] }
0x1d02   : > { %v5652_v34 = vmul.f32 0.5, %v5644_v2  ;;  %v5659_v17 = vmul.f32 %v5651_v8, %v13667_v18  ;;  %v9613_v2 = vld [vmem:[%s14296_s1 + $0x38] sm:$0xff] }
0x1d03   : > { %v5662_v29 = vmul.f32 %v5654_v49, %v13671_v40 }
0x1d04   : > { %v11688_v26 = vpop.eup %11687  ;;  %v5660_v32 = vmul.f32 %v5652_v34, %v13675_v5 }
0x1d05   : > { %v11690_v50 = vpop.eup %11689  ;;  %v5668_v63 = vpack.c.bf16 %v5662_v29, %v5661_v21  ;;  %v5649_v55 = vadd.f32 1.0, %v11688_v26 }
0x1d06   : > { %v11692_v0 = vpop.eup %11691  ;;  %v5667_v4 = vpack.c.bf16 %v5660_v32, %v5659_v17  ;;  %v5647_v33 = vadd.f32 1.0, %v11690_v50 }
0x1d07   : > { %v11694_v30 = vpop.eup %11693  ;;  %v5650_v51 = vadd.f32 1.0, %v11692_v0  ;;  %v5657_v46 = vmul.f32 0.5, %v5649_v55 }
0x1d08   : > { %10644 = vmatprep.mubr.bf16.mxu0 %v5667_v4  ;;  %v5648_v7 = vadd.f32 1.0, %v11694_v30  ;;  %v5655_v13 = vmul.f32 0.5, %v5647_v33 }
0x1d09   : > { %10645 = vmatmul.mubr.bf16.vlgmr.msra.gmra.mrb[104].mxu0 %v5668_v63  ;;  %v5658_v40 = vmul.f32 0.5, %v5650_v51  ;;  %v5665_v18 = vmul.f32 %v5657_v46, %v13686_v36 }
0x1d0a   : > { %v5656_v16 = vmul.f32 0.5, %v5648_v7  ;;  %v5663_v6 = vmul.f32 %v5655_v13, %v13689_v62 }
0x1d0b   : > { %v5666_v5 = vmul.f32 %v5658_v40, %v13694_v11 }
0x1d0c   : > { %v5664_v39 = vmul.f32 %v5656_v16, %v13699_v35 }
0x1d0d   : > { %v5670_v53 = vpack.c.bf16 %v5666_v5, %v5665_v18 }
0x1d0e   : > { %v5669_v57 = vpack.c.bf16 %v5664_v39, %v5663_v6 }
0x1d10   : > { %10648 = vmatprep.mubr.bf16.mxu0 %v5669_v57 }
0x1d11   : > { %10649 = vmatmul.mubr.bf16.gmra.mrb[108].mxu0 %v5670_v53 }
0x1d12   : > { %10706 = vmatprep.mubr.msk.f32.mxu0 %vm2526_vm3, %v9608_v54 }
0x1ddc   : > { %v10646_v22 = vpop.f32.mrb[104].mxu0 }
0x1ddd   : > { %v5785_v31 = vadd.f32 %v10646_v22, %v9593_v60  ;;  %v5776_v36 = vpop.f32.mrb[105].mxu0 }
0x1dde   : > { %v5777_v28 = vadd.f32 %v9593_v60, %v5776_v36  ;;  %v10647_v11 = vpop.f32.mrb[106].mxu0 }
0x1ddf   : > { %v5788_v27 = vadd.f32 %v10647_v11, %v9593_v60  ;;  %v5779_v62 = vpop.f32.mrb[107].mxu0  ;;  %v5809_v35 = vadd.f32 %v13559_v15, %v5785_v31 }
0x1de0   : > { %v5780_v1 = vadd.f32 %v9593_v60, %v5779_v62  ;;  %v5807_v47 = vadd.f32 %v13556_v52, %v5777_v28 }
0x1de1   : > { %v5810_v3 = vadd.f32 %v13566_v48, %v5788_v27 }
0x1de2   : > { %v5808_v38 = vadd.f32 %v13562_v45, %v5780_v1 }
0x1de3   : > { %v10986_v9 = vpack.c.bf16 %v5810_v3, %v5809_v35 }
0x1de4   : > { %v10982_v41 = vpack.c.bf16 %v5808_v38, %v5807_v47  ;;  %v10650_v12 = vpop.f32.mrb[108].mxu0 }
0x1de5   : > { %v5801_v61 = vadd.f32 %v10650_v12, %v9593_v60  ;;  %v5792_v25 = vpop.f32.mrb[109].mxu0 }
0x1de6   : > { %v5793_v59 = vadd.f32 %v9593_v60, %v5792_v25  ;;  %v10651_v23 = vpop.f32.mrb[110].mxu0  ;;  %10983 = vmatprep.subr.bf16.mxu1 %v10982_v41  ;;  %11015 = vmatprep.subr.bf16.mxu0 %v10982_v41 }
0x1de7   : > { %v5804_v56 = vadd.f32 %v10651_v23, %v9593_v60  ;;  %v5795_v42 = vpop.f32.mrb[111].mxu0  ;;  %10985 = vmatpush3.bf16.msra.mxu1 %v10982_v41  ;;  %11017 = vmatpush3.bf16.msra.mxu0 %v10982_v41  ;;  %v5813_v52 = vadd.f32 %v13579_v58, %v5801_v61  ;;  %v5816_v58 = vld [vmem:[%s14296_s1 + $0x8] sm:$0xff] }
0x1de8   : > { %v5796_v15 = vadd.f32 %v9593_v60, %v5795_v42  ;;  %10987 = vmatprep.subr.bf16.mxu1 %v10986_v9  ;;  %11019 = vmatprep.subr.bf16.mxu0 %v10986_v9  ;;  %v5811_v48 = vadd.f32 %v13574_v20, %v5793_v59  ;;  %v9604_v20 = vld [vmem:[%s14296_s1 + $0x10] sm:$0xff] }
0x1de9   : > { %v5814_v45 = vadd.f32 %v13586_v10, %v5804_v56  ;;  %v9609_v10 = vld [vmem:[%s14296_s1 + $0x28] sm:$0xff] }
0x1dea   : > { %v5812_v37 = vadd.f32 %v13582_v44, %v5796_v15  ;;  %v9605_v44 = vld [vmem:[%s14296_s1 + $0x18] sm:$0xff]  ;;  %s14297_s1 = sld [smem:[#allocation54_spill]] }
0x1deb   : > { %v10994_v43 = vpack.c.bf16 %v5814_v45, %v5813_v52  ;;  %10989 = vmatpush3.bf16.msra.mxu1 %v10986_v9  ;;  %11021 = vmatpush3.bf16.msra.mxu0 %v10986_v9 }
0x1dec   : > { %v10990_v24 = vpack.c.bf16 %v5812_v37, %v5811_v48 }
0x1dee   : > { %10991 = vmatprep.subr.bf16.mxu1 %v10990_v24  ;;  %11023 = vmatprep.subr.bf16.mxu0 %v10990_v24 }
0x1def   : > { %10993 = vmatpush3.bf16.msra.mxu1 %v10990_v24  ;;  %11025 = vmatpush3.bf16.msra.mxu0 %v10990_v24 }
0x1df0   : > { %10995 = vmatprep.subr.bf16.mxu1 %v10994_v43  ;;  %11027 = vmatprep.subr.bf16.mxu0 %v10994_v43 }
0x1df3   : > { %10997 = vmatpush3.bf16.msra.mxu1 %v10994_v43  ;;  %11029 = vmatpush3.bf16.msra.mxu0 %v10994_v43 }
0x1df4   : > { %10999 = vmatprep.subr.bf16.mxu1 %v10982_v41 }
0x1df6   : > { %10669 = vmatmul.mubr.msk.f32.vlgmr.msra.gmra.mrb[104].mxu1 %vm2526_vm3, %v5816_v58  ;;  %10707 = vmatmul.mubr.msk.f32.vlgmr.msra.gmra.mrb[112].mxu0 %vm2526_vm3, %v9609_v10  ;;  %v11368_v58 = vld [vmem:[%s14297_s1 + $0x18] sm:$0xff]  }
0x1df7   : > { %11001 = vmatpush3.bf16.msra.mxu1 %v10982_v41  ;;  %10687 = vmatprep.mubr.msk.f32.mxu1 %vm2526_vm3, %v9604_v20 }
0x1df8   : > { %11003 = vmatprep.subr.bf16.mxu1 %v10986_v9 }
0x1dfb   : > { %11005 = vmatpush3.bf16.msra.mxu1 %v10986_v9 }
0x1dfc   : > { %11007 = vmatprep.subr.bf16.mxu1 %v10990_v24 }
0x1dff   : > { %11009 = vmatpush3.bf16.msra.mxu1 %v10990_v24 }
0x1e00   : > { %11011 = vmatprep.subr.bf16.mxu1 %v10994_v43 }
0x1e03   : > { %11013 = vmatpush3.bf16.msra.mxu1 %v10994_v43 }
0x1e04   : > { %11031 = vmatprep.subr.bf16.mxu1 %v10982_v41 }
0x1e06   : > { %10688 = vmatmul.mubr.msk.f32.vlgmr.msra.gmra.mrb[106].mxu1 %vm2526_vm3, %v9605_v44 }
0x1e07   : > { %11033 = vmatpush3.bf16.msra.mxu1 %v10982_v41  ;;  %10725 = vmatprep.mubr.msk.f32.mxu1 %vm2526_vm3, %v9612_v14 }
0x1e08   : > { %11035 = vmatprep.subr.bf16.mxu1 %v10986_v9 }
0x1e0b   : > { %11037 = vmatpush3.bf16.msra.mxu1 %v10986_v9 }
0x1e0c   : > { %11039 = vmatprep.subr.bf16.mxu1 %v10990_v24 }
0x1e0f   : > { %11041 = vmatpush3.bf16.msra.mxu1 %v10990_v24  ;;  %v12155_v24 = vmov 0.0  }
0x1e10   : > { %11043 = vmatprep.subr.bf16.mxu1 %v10994_v43  ;;  %10728 = vmatprep.subr.bf16.mxu0 %v12155_v24 }
0x1e11   : > { %10732 = vmatprep.mubr.msk.bf16.mxu0 %vm12156_vm4, %v12155_v24 }
0x1e13   : > { %11045 = vmatpush3.bf16.msra.mxu1 %v10994_v43  ;;  %v11367_v43 = vld [vmem:[%s14297_s1 + $0x10] sm:$0xff]  }
0x1e14   : > { %10729 = vmatpush3.bf16.msra.mxu0 %v11367_v43  ;;  %10760 = vmatprep.subr.bf16.mxu1 %v12155_v24 }
0x1e15   : > { %10730 = vmatprep.subr.bf16.mxu0 %v12155_v24 }
0x1e16   : > { %10726 = vmatmul.mubr.msk.f32.vlgmr.msra.gmra.mrb[108].mxu1 %vm2526_vm3, %v9613_v2 }
0x1e17   : > { %10768 = vmatprep.mubr.msk.bf16.mxu1 %vm12156_vm4, %v12155_v24 }
0x1e18   : > { %10731 = vmatpush3.bf16.msra.mxu0 %v11368_v58 }
0x1e19   : > { %10736 = vmatprep.subr.bf16.mxu0 %v12155_v24 }
0x1ec9   : > { %v10670_v8 = vpop.f32.mrb[104].mxu1  ;;  %v10708_v49 = vpop.f32.mrb[112].mxu0 }
0x1eca   : > { %v5889_v34 = vpop.f32.mrb[105].mxu1  ;;  %v6153_v21 = vsel %vm1853_vm1, %v10670_v8, 0.0  ;;  %v6057_v29 = vpop.f32.mrb[113].mxu0  ;;  %v6169_v17 = vsel %vm1853_vm1, %v10708_v49, 0.0 }
0x1ecb   : > { %6154 = vadd.xlane.f32.xlu1 %v6153_v21  ;;  %v6150_v26 = vsel %vm1853_vm1, %v5889_v34, 0.0  ;;  %v6166_v32 = vsel %vm1853_vm1, %v6057_v29, 0.0 }
0x1ecc   : > { %6151 = vadd.xlane.f32.xlu0 %v6150_v26 }
0x1ecf   : > { %6170 = vadd.xlane.f32.xlu1 %v6169_v17 }
0x1ed0   : > { %6167 = vadd.xlane.f32.xlu0 %v6166_v32 }
0x1ed9   : > { %v10689_v50 = vpop.f32.mrb[106].mxu1 }
0x1eda   : > { %v5973_v63 = vpop.f32.mrb[107].mxu1  ;;  %v6161_v55 = vsel %vm1853_vm1, %v10689_v50, 0.0 }
0x1edb   : > { %6162 = vadd.xlane.f32.xlu1 %v6161_v55  ;;  %v6158_v0 = vsel %vm1853_vm1, %v5973_v63, 0.0 }
0x1edc   : > { %6159 = vadd.xlane.f32.xlu0 %v6158_v0 }
0x1ee9   : > { %v10727_v4 = vpop.f32.mrb[108].mxu1 }
0x1eea   : > { %v6141_v33 = vpop.f32.mrb[109].mxu1  ;;  %v6177_v30 = vsel %vm1853_vm1, %v10727_v4, 0.0 }
0x1eeb   : > { %6178 = vadd.xlane.f32.xlu1 %v6177_v30  ;;  %v6174_v51 = vsel %vm1853_vm1, %v6141_v33, 0.0  ;;  %v9619_v30 = vld [vmem:[%s14298_s2 + $0x1] ss:$0 sm:$0xff] }
0x1eec   : > { %6175 = vadd.xlane.f32.xlu0 %v6174_v51 }
0x1f58   : > { %v6155_v46 = vpop.xlane.xlu1 %6154 }
0x1f59   : > { %v6152_v7 = vpop.xlane.xlu0 %6151 }
0x1f5c   : > { %v6171_v13 = vpop.xlane.xlu1 %6170 }
0x1f5d   : > { %v6168_v40 = vpop.xlane.xlu0 %6167 }
0x1f68   : > { %v6163_v16 = vpop.xlane.xlu1 %6162 }
0x1f69   : > { %v6160_v18 = vpop.xlane.xlu0 %6159  ;;  %v6165_v5 = vadd.f32 %v6163_v16, %v6155_v46 }
0x1f6a   : > { %v6164_v6 = vadd.f32 %v6160_v18, %v6152_v7 }
0x1f6b   : > { %v6173_v39 = vadd.f32 %v6171_v13, %v6165_v5  ;;  %v9621_v13 = vld [vmem:[%s14299_s4 + $0x1] ss:$0 sm:$0xff] }
0x1f6c   : > { %v6172_v57 = vadd.f32 %v6168_v40, %v6164_v6  ;;  %v11369_v6 = vld [vmem:[%s14297_s1] sm:$0xff]  }
0x1f78   : > { %v6179_v53 = vpop.xlane.xlu1 %6178 }
0x1f79   : > { %v6181_v19 = vadd.f32 %v6179_v53, %v6173_v39  ;;  %v6176_v54 = vpop.xlane.xlu0 %6175 }
0x1f7a   : > { %v6180_v60 = vadd.f32 %v6176_v54, %v6172_v57  ;;  %v11370_v54 = vld [vmem:[%s14297_s1 + $0x8] sm:$0xff]  }
0x1f7b   : > { %v6184_v22 = vmul.f32 0.0078125, %v6181_v19  ;;  %v9616_v19 = vld [vmem:[%s14298_s2] ss:$0 sm:$0xff] }
0x1f7c   : > { %v6183_v31 = vmul.f32 0.0078125, %v6180_v60 }
0x1f7d   : > { %v13753_v36 = vsub.f32 %v10670_v8, %v6184_v22  ;;  %v13755_v28 = vsub.f32 %v10689_v50, %v6184_v22  ;;  %v13768_v47 = vsub.f32 %v10708_v49, %v6184_v22  ;;  %v13778_v25 = vsub.f32 %v10727_v4, %v6184_v22 }
0x1f7e   : > { %v13757_v11 = vsub.f32 %v5889_v34, %v6183_v31  ;;  %v13759_v27 = vsub.f32 %v5973_v63, %v6183_v31  ;;  %v13773_v41 = vsub.f32 %v6057_v29, %v6183_v31  ;;  %v13783_v56 = vsub.f32 %v6141_v33, %v6183_v31  ;;  %v9617_v31 = vld [vmem:[%s14299_s4] ss:$0 sm:$0xff] }
0x1f7f   : > { %v6188_v62 = vmul.f32 %v13753_v36, %v13753_v36  ;;  %v6200_v3 = vmul.f32 %v13755_v28, %v13755_v28  ;;  %v6212_v61 = vmul.f32 %v13768_v47, %v13768_v47  ;;  %v6224_v15 = vmul.f32 %v13778_v25, %v13778_v25 }
0x1f80   : > { %v6187_v1 = vmul.f32 %v13757_v11, %v13757_v11  ;;  %v6199_v9 = vmul.f32 %v13759_v27, %v13759_v27  ;;  %v6211_v23 = vmul.f32 %v13773_v41, %v13773_v41  ;;  %v6223_v45 = vmul.f32 %v13783_v56, %v13783_v56 }
0x1f81   : > { %v6192_v35 = vsel %vm1853_vm1, %v6188_v62, 0.0  ;;  %v6204_v12 = vsel %vm1853_vm1, %v6200_v3, 0.0  ;;  %v6216_v42 = vsel %vm1853_vm1, %v6212_v61, 0.0  ;;  %v6228_v48 = vsel %vm1853_vm1, %v6224_v15, 0.0  ;;  %v11372_v3 = vld [vmem:[%s14297_s1 + $0x28] sm:$0xff]  }
0x1f82   : > { %6193 = vadd.xlane.f32.xlu1 %v6192_v35  ;;  %v6189_v38 = vsel %vm1853_vm1, %v6187_v1, 0.0  ;;  %v6201_v59 = vsel %vm1853_vm1, %v6199_v9, 0.0  ;;  %v6213_v52 = vsel %vm1853_vm1, %v6211_v23, 0.0  ;;  %v6225_v37 = vsel %vm1853_vm1, %v6223_v45, 0.0  ;;  %v9633_v35 = vld [vmem:[%s14298_s2 + $0x2] ss:$0 sm:$0xff] }
0x1f83   : > { %6190 = vadd.xlane.f32.xlu0 %v6189_v38  ;;  %v9644_v15 = vld [vmem:[%s14298_s2 + $0x3] ss:$0 sm:$0xff]  ;;  %s14301_s2 = sld [smem:[#allocation56_spill]] }
0x1f86   : > { %6205 = vadd.xlane.f32.xlu1 %v6204_v12  ;;  %v9635_v12 = vld [vmem:[%s14299_s4 + $0x2] ss:$0 sm:$0xff] }
0x1f87   : > { %6202 = vadd.xlane.f32.xlu0 %v6201_v59 }
0x1f8a   : > { %6217 = vadd.xlane.f32.xlu1 %v6216_v42 }
0x1f8b   : > { %6214 = vadd.xlane.f32.xlu0 %v6213_v52  ;;  %v11374_v52 = vld [vmem:[%s14297_s1 + $0x38] sm:$0xff]  }
0x1f8e   : > { %6229 = vadd.xlane.f32.xlu1 %v6228_v48 }
0x1f8f   : > { %6226 = vadd.xlane.f32.xlu0 %v6225_v37  ;;  %v9646_v37 = vld [vmem:[%s14299_s4 + $0x3] ss:$0 sm:$0xff]  ;;  %s14302_s4 = sld [smem:[#allocation57_spill]] }
0x200f   : > { %v6194_v10 = vpop.xlane.xlu1 %6193 }
0x2010   : > { %v6191_v20 = vpop.xlane.xlu0 %6190 }
0x2013   : > { %v6206_v44 = vpop.xlane.xlu1 %6205 }
0x2014   : > { %v6203_v14 = vpop.xlane.xlu0 %6202  ;;  %v6208_v8 = vadd.f32 %v6206_v44, %v6194_v10 }
0x2015   : > { %v6207_v34 = vadd.f32 %v6203_v14, %v6191_v20 }
0x2017   : > { %v6218_v2 = vpop.xlane.xlu1 %6217 }
0x2018   : > { %v6215_v49 = vpop.xlane.xlu0 %6214  ;;  %v6220_v21 = vadd.f32 %v6218_v2, %v6208_v8 }
0x2019   : > { %v6219_v29 = vadd.f32 %v6215_v49, %v6207_v34 }
0x201b   : > { %v6230_v26 = vpop.xlane.xlu1 %6229 }
0x201c   : > { %v6232_v17 = vadd.f32 %v6230_v26, %v6220_v21  ;;  %v6227_v32 = vpop.xlane.xlu0 %6226 }
0x201d   : > { %v6231_v50 = vadd.f32 %v6227_v32, %v6219_v29 }
0x201e   : > { %v6234_v63 = vmul.f32 0.0078125, %v6232_v17 }
0x201f   : > { %v6233_v55 = vmul.f32 0.0078125, %v6231_v50 }
0x2020   : > { %v6236_v0 = vadd.f32 1e-05, %v6234_v63 }
0x2021   : > { %v6235_v4 = vadd.f32 1e-05, %v6233_v55 }
0x2022   : > { %11695 = vrsqrt.f32 %v6236_v0 }
0x2023   : > { %11697 = vrsqrt.f32 %v6235_v4 }
0x202c   : > { %v11696_v33 = vpop.eup %11695 }
0x202d   : > { %v11698_v51 = vpop.eup %11697  ;;  %v6265_v46 = vmul.f32 %v11696_v33, %v13755_v28  ;;  %v6240_v57 = vmul.f32 %v11696_v33, %v13753_v36  ;;  %v11371_v36 = vld [vmem:[%s14297_s1 + $0x20] sm:$0xff]   ;;  %v6405_v1 = vmul.f32 %v11696_v33, %v13768_v47  ;;  %v11373_v47 = vld [vmem:[%s14297_s1 + $0x30] sm:$0xff]   ;;  %v6491_v42 = vmul.f32 %v11696_v33, %v13778_v25  ;;  %s14300_s1 = sld [smem:[#allocation55_spill]] }
0x202e   : > { %v6264_v7 = vmul.f32 %v11698_v51, %v13759_v27  ;;  %v6239_v53 = vmul.f32 %v11698_v51, %v13757_v11  ;;  %v6404_v62 = vmul.f32 %v11698_v51, %v13773_v41  ;;  %v6490_v23 = vmul.f32 %v11698_v51, %v13783_v56 }
0x202f   : > { %v6275_v40 = vmul.f32 %v9619_v30, %v6265_v46  ;;  %v6249_v22 = vmul.f32 %v9616_v19, %v6240_v57  ;;  %v6415_v9 = vmul.f32 %v9633_v35, %v6405_v1  ;;  %v6501_v48 = vmul.f32 %v9644_v15, %v6491_v42 }
0x2030   : > { %v6274_v16 = vmul.f32 %v9619_v30, %v6264_v7  ;;  %v6248_v60 = vmul.f32 %v9616_v19, %v6239_v53  ;;  %v6414_v38 = vmul.f32 %v9633_v35, %v6404_v62  ;;  %v6500_v45 = vmul.f32 %v9644_v15, %v6490_v23  ;;  %v9654_v53 = vld [vmem:[#allocation7] ss:$0 sm:$0xff] }
0x2031   : > { %v6285_v18 = vadd.f32 %v9621_v13, %v6275_v40  ;;  %v6258_v11 = vadd.f32 %v9617_v31, %v6249_v22  ;;  %v6425_v61 = vadd.f32 %v9635_v12, %v6415_v9  ;;  %v6511_v58 = vadd.f32 %v9646_v37, %v6501_v48  ;;  %v9655_v22 = vld [vmem:[#allocation9] ss:$0 sm:$0xff] }
0x2032   : > { %v6284_v5 = vadd.f32 %v9621_v13, %v6274_v16  ;;  %v6257_v28 = vadd.f32 %v9617_v31, %v6248_v60  ;;  %v6424_v41 = vadd.f32 %v9635_v12, %v6414_v38  ;;  %v6510_v43 = vadd.f32 %v9646_v37, %v6500_v45  ;;  %v9687_v9 = vld [vmem:[%s14301_s2 + $0x8] ss:$0 sm:$0xff] }
0x2033   : > { %v11375_v55 = vld [vmem:[%s14300_s1] sm:$0xff]   ;;  %v11377_v4 = vld [vmem:[%s14300_s1 + $0x8] sm:$0xff]   ;;  %v11379_v30 = vld [vmem:[%s14300_s1 + $0x10] sm:$0xff]  }
0x2034   : > { %v6286_v39 = vpack.c.bf16 %v6285_v18, %v6284_v5  ;;  %v6259_v27 = vpack.c.bf16 %v6258_v11, %v6257_v28  ;;  %v6426_v59 = vpack.c.bf16 %v6425_v61, %v6424_v41  ;;  %v6512_v56 = vpack.c.bf16 %v6511_v58, %v6510_v43  ;;  %v11376_v0 = vld [vmem:[%s14300_s1 + $0x100] sm:$0xff]   ;;  %10761 = vmatpush3.bf16.msra.mxu1 %v11375_v55  ;;  %v11378_v33 = vld [vmem:[%s14300_s1 + $0x108] sm:$0xff]   ;;  %v11380_v51 = vld [vmem:[%s14300_s1 + $0x110] sm:$0xff]  }
0x2035   : > { %10762 = vmatprep.subr.bf16.mxu1 %v12155_v24  ;;  %v11381_v46 = vld [vmem:[%s14300_s1 + $0x18] sm:$0xff]   ;;  %v11384_v62 = vld [vmem:[%s14300_s1 + $0x88] sm:$0xff]   ;;  %v11385_v1 = vld [vmem:[%s14300_s1 + $0x90] sm:$0xff]  }
0x2036   : > { %10733 = vmatmul.mubr.msk.bf16.vlgmr.msra.gmra.mrb[116].mxu0 %vm1853_vm1, %v6286_v39  ;;  %v11382_v7 = vld [vmem:[%s14300_s1 + $0x118] sm:$0xff]   ;;  %v9672_v58 = vld [vmem:[%s14301_s2 + $0x4] ss:$0 sm:$0xff] }
0x2037   : > { %10737 = vmatpush3.bf16.msra.mxu0 %v11369_v6  ;;  %10740 = vmatprep.mubr.msk.bf16.mxu0 %vm12156_vm4, %v12155_v24  ;;  %v11386_v35 = vld [vmem:[%s14300_s1 + $0x98] sm:$0xff]  }
0x2038   : > { %10738 = vmatprep.subr.bf16.mxu0 %v12155_v24  ;;  %10763 = vmatpush3.bf16.msra.mxu1 %v11377_v4 }
0x2039   : > { %10764 = vmatprep.subr.bf16.mxu1 %v12155_v24 }
0x203b   : > { %10739 = vmatpush3.bf16.msra.mxu0 %v11370_v54 }
0x203c   : > { %10744 = vmatprep.subr.bf16.mxu0 %v12155_v24  ;;  %10765 = vmatpush3.bf16.msra.mxu1 %v11379_v30 }
0x203d   : > { %10766 = vmatprep.subr.bf16.mxu1 %v12155_v24 }
0x2040   : > { %10767 = vmatpush3.bf16.msra.mxu1 %v11381_v46 }
0x2041   : > { %10772 = vmatprep.subr.bf16.mxu1 %v12155_v24 }
0x2042   : > { %10741 = vmatmul.mubr.msk.bf16.vlgmr.msra.gmra.mrb[116].mxu0 %vm1853_vm1, %v6259_v27 }
0x2043   : > { %10745 = vmatpush3.bf16.msra.mxu0 %v11371_v36  ;;  %10748 = vmatprep.mubr.msk.bf16.mxu0 %vm12156_vm4, %v12155_v24  ;;  %v11383_v36 = vld [vmem:[%s14300_s1 + $0x80] sm:$0xff]  }
0x2044   : > { %10746 = vmatprep.subr.bf16.mxu0 %v12155_v24 }
0x2047   : > { %10747 = vmatpush3.bf16.msra.mxu0 %v11372_v3  ;;  %v9657_v3 = vld [vmem:[%s14301_s2] ss:$0 sm:$0xff] }
0x2048   : > { %10752 = vmatprep.subr.bf16.mxu0 %v12155_v24 }
0x204e   : > { %10749 = vmatmul.mubr.msk.bf16.vlgmr.msra.gmra.mrb[116].mxu0 %vm1853_vm1, %v6426_v59 }
0x204f   : > { %10753 = vmatpush3.bf16.msra.mxu0 %v11373_v47  ;;  %10756 = vmatprep.mubr.msk.bf16.mxu0 %vm12156_vm4, %v12155_v24 }
0x2050   : > { %10754 = vmatprep.subr.bf16.mxu0 %v12155_v24 }
0x2053   : > { %10755 = vmatpush3.bf16.msra.mxu0 %v11374_v52 }
0x2054   : > { %10784 = vmatprep.subr.bf16.mxu0 %v12155_v24 }
0x205a   : > { %10757 = vmatmul.mubr.msk.bf16.vlgmr.msra.gmra.mrb[116].mxu0 %vm1853_vm1, %v6512_v56 }
0x205b   : > { %10792 = vmatprep.mubr.msk.bf16.mxu0 %vm12156_vm4, %v12155_v24  ;;  %10785 = vmatpush3.bf16.msra.mxu0 %v11376_v0 }
0x205c   : > { %10786 = vmatprep.subr.bf16.mxu0 %v12155_v24 }
0x205f   : > { %10787 = vmatpush3.bf16.msra.mxu0 %v11378_v33 }
0x2060   : > { %10788 = vmatprep.subr.bf16.mxu0 %v12155_v24 }
0x2063   : > { %10789 = vmatpush3.bf16.msra.mxu0 %v11380_v51 }
0x2064   : > { %10790 = vmatprep.subr.bf16.mxu0 %v12155_v24 }
0x2067   : > { %10791 = vmatpush3.bf16.msra.mxu0 %v11382_v7 }
0x2068   : > { %10802 = vmatprep.subr.bf16.mxu0 %v12155_v24 }
0x212d   : > { %v13843_v25 = vpop.f32.mrb[116].mxu0 }
0x212e   : > { %v10758_v10 = vpop.f32.mrb[117].mxu0  ;;  %v6578_v20 = vsel %vm2526_vm3, %v13843_v25, 0.0 }
0x212f   : > { %6579 = vadd.xlane.f32.xlu0 %v6578_v20  ;;  %v13847_v44 = vpop.f32.mrb[118].mxu0 }
0x2130   : > { %v10759_v14 = vpop.f32.mrb[119].mxu0  ;;  %v6581_v2 = vsel %vm2526_vm3, %v13847_v44, 0.0 }
0x2131   : > { %6582 = vadd.xlane.f32.xlu1 %v6581_v2 }
0x21bc   : > { %v6580_v8 = vpop.xlane.xlu0 %6579 }
0x21bd   : > { %v6585_v49 = vmul.f32 0.015625, %v6580_v8 }
0x21be   : > { %v6583_v34 = vpop.xlane.xlu1 %6582 }
0x21bf   : > { %v6587_v21 = vsub.f32 %v13843_v25, %v6585_v49  ;;  %v6586_v29 = vmul.f32 0.015625, %v6583_v34 }
0x21c1   : > { %v6588_v26 = vsub.f32 %v13847_v44, %v6586_v29  ;;  %v6589_v17 = vmul.f32 %v6587_v21, %v6587_v21 }
0x21c3   : > { %v6591_v32 = vsel %vm2526_vm3, %v6589_v17, 0.0  ;;  %v6590_v50 = vmul.f32 %v6588_v26, %v6588_v26 }
0x21c4   : > { %6592 = vadd.xlane.f32.xlu0 %v6591_v32 }
0x21c5   : > { %v6594_v63 = vsel %vm2526_vm3, %v6590_v50, 0.0 }
0x21c6   : > { %6595 = vadd.xlane.f32.xlu1 %v6594_v63 }
0x2251   : > { %v6593_v13 = vpop.xlane.xlu0 %6592 }
0x2252   : > { %v6597_v40 = vmul.f32 0.015625, %v6593_v13 }
0x2253   : > { %v6596_v16 = vpop.xlane.xlu1 %6595 }
0x2254   : > { %v6599_v18 = vadd.f32 1e-05, %v6597_v40  ;;  %v6598_v5 = vmul.f32 0.015625, %v6596_v16 }
0x2256   : > { %11699 = vrsqrt.f32 %v6599_v18  ;;  %v6600_v6 = vadd.f32 1e-05, %v6598_v5 }
0x2258   : > { %11701 = vrsqrt.f32 %v6600_v6  ;;  %v11403_v6 = vld [vmem:[%s14303_s5] sm:$0xff]  }
0x2260   : > { %v11700_v39 = vpop.eup %11699 }
0x2261   : > { %v6603_v57 = vmul.f32 %v11700_v39, %v6587_v21  ;;  %v6880_v21 = vld [vmem:[%s14302_s4] sm:$0xff] }
0x2262   : > { %v11702_v19 = vpop.eup %11701 }
0x2263   : > { %v6611_v54 = vmul.f32 %v9654_v53, %v6603_v57  ;;  %v6604_v60 = vmul.f32 %v11702_v19, %v6588_v26  ;;  %v6881_v26 = vld [vmem:[%s14302_s4 + $0x8] sm:$0xff] }
0x2265   : > { %v6612_v31 = vmul.f32 %v9654_v53, %v6604_v60  ;;  %v6619_v28 = vadd.f32 %v9655_v22, %v6611_v54 }
0x2267   : > { %v6620_v11 = vadd.f32 %v9655_v22, %v6612_v31  ;;  %v11387_v22 = vld [vmem:[%s14300_s1 + $0x20] sm:$0xff]  }
0x2269   : > { %v13872_v27 = vpack.c.bf16 %v6620_v11, %v6619_v28  ;;  %v11388_v28 = vld [vmem:[%s14300_s1 + $0x28] sm:$0xff]   ;;  %v11389_v11 = vld [vmem:[%s14300_s1 + $0x30] sm:$0xff]  }
0x226b   : > { %10769 = vmatmul.mubr.msk.bf16.vlgmr.msra.gmra.mrb[112].mxu1 %vm2526_vm3, %v13872_v27  ;;  %10793 = vmatmul.mubr.msk.bf16.vlgmr.msra.gmra.mrb[120].mxu0 %vm2526_vm3, %v13872_v27 }
0x226c   : > { %10773 = vmatpush3.bf16.msra.mxu1 %v11383_v36  ;;  %10780 = vmatprep.mubr.msk.bf16.mxu1 %vm12156_vm4, %v12155_v24  ;;  %v11390_v36 = vld [vmem:[%s14300_s1 + $0x38] sm:$0xff]  }
0x226d   : > { %10774 = vmatprep.subr.bf16.mxu1 %v12155_v24  ;;  %10804 = vmatprep.mubr.msk.bf16.mxu0 %vm12156_vm4, %v12155_v24 }
0x2270   : > { %10775 = vmatpush3.bf16.msra.mxu1 %v11384_v62  ;;  %v11391_v62 = vld [vmem:[%s14300_s1 + $0x120] sm:$0xff]  }
0x2271   : > { %10776 = vmatprep.subr.bf16.mxu1 %v12155_v24 }
0x2274   : > { %10777 = vmatpush3.bf16.msra.mxu1 %v11385_v1  ;;  %v11392_v1 = vld [vmem:[%s14300_s1 + $0x128] sm:$0xff]  }
0x2275   : > { %10778 = vmatprep.subr.bf16.mxu1 %v12155_v24 }
0x2278   : > { %10779 = vmatpush3.bf16.msra.mxu1 %v11386_v35  ;;  %v11393_v35 = vld [vmem:[%s14300_s1 + $0x130] sm:$0xff]  }
0x2279   : > { %10796 = vmatprep.subr.bf16.mxu1 %v12155_v24 }
0x227b   : > { %10781 = vmatmul.mubr.msk.bf16.vlgmr.msra.gmra.mrb[116].mxu1 %vm2526_vm3, %v13872_v27 }
0x227c   : > { %10798 = vmatprep.mubr.msk.bf16.mxu1 %vm12156_vm4, %v12155_v24 }
0x233e   : > { %v6707_v38 = vpop.f32.mrb[112].mxu1  ;;  %v6871_v12 = vpop.f32.mrb[120].mxu0 }
0x233f   : > { %v10770_v41 = vpop.f32.mrb[113].mxu1  ;;  %v10794_v61 = vpop.f32.mrb[121].mxu0  ;;  %v6708_v23 = vadd.f32 %v9657_v3, %v6707_v38  ;;  %v6872_v42 = vadd.f32 %v9687_v9, %v6871_v12  ;;  %v11395_v38 = vld [vmem:[%s14300_s1 + $0x40] sm:$0xff]   ;;  %v11397_v12 = vld [vmem:[%s14300_s1 + $0x50] sm:$0xff]  }
0x2340   : > { %v6710_v47 = vpop.f32.mrb[114].mxu1  ;;  %v6874_v59 = vpop.f32.mrb[122].mxu0  ;;  %v11398_v41 = vld [vmem:[%s14300_s1 + $0x58] sm:$0xff]   ;;  %v11399_v61 = vld [vmem:[%s14300_s1 + $0x140] sm:$0xff]  }
0x2341   : > { %v6711_v15 = vadd.f32 %v9657_v3, %v6710_v47  ;;  %v6875_v52 = vadd.f32 %v9687_v9, %v6874_v59  ;;  %v10771_v45 = vpop.f32.mrb[115].mxu1  ;;  %v10795_v48 = vpop.f32.mrb[123].mxu0  ;;  %v11394_v3 = vld [vmem:[%s14300_s1 + $0x138] sm:$0xff]   ;;  %v11396_v9 = vld [vmem:[%s14300_s1 + $0x48] sm:$0xff]   ;;  %v11401_v59 = vld [vmem:[%s14300_s1 + $0x150] sm:$0xff]  }
0x2342   : > { %v11400_v47 = vld [vmem:[%s14300_s1 + $0x148] sm:$0xff]   ;;  %v11404_v45 = vld [vmem:[%s14300_s1 + $0xa0] sm:$0xff]  }
0x2343   : > { %v6878_v37 = vpack.c.bf16 %v6711_v15, %v6708_v23  ;;  %v6952_v43 = vpack.c.bf16 %v6875_v52, %v6872_v42  ;;  %v11402_v23 = vld [vmem:[%s14300_s1 + $0x158] sm:$0xff]  }
0x2345   : > { %10803 = vmatpush3.bf16.msra.mxu0 %v6952_v43  ;;  %v11405_v43 = vld [vmem:[%s14300_s1 + $0xa8] sm:$0xff]  }
0x2346   : > { %10814 = vmatprep.subr.bf16.mxu0 %v12155_v24 }
0x234e   : > { %v6789_v56 = vpop.f32.mrb[116].mxu1 }
0x234f   : > { %v10782_v10 = vpop.f32.mrb[117].mxu1  ;;  %v6790_v14 = vadd.f32 %v9672_v58, %v6789_v56  ;;  %v11407_v56 = vld [vmem:[%s14300_s1 + $0xb8] sm:$0xff]  }
0x2350   : > { %v6792_v20 = vpop.f32.mrb[118].mxu1  ;;  %v9706_v10 = vld [vmem:[%s14301_s2 + $0x1] ss:$0 sm:$0xff] }
0x2351   : > { %v6793_v2 = vadd.f32 %v9672_v58, %v6792_v20  ;;  %v10783_v8 = vpop.f32.mrb[119].mxu1  ;;  %v11406_v58 = vld [vmem:[%s14300_s1 + $0xb0] sm:$0xff]  }
0x2353   : > { %v6879_v49 = vpack.c.bf16 %v6793_v2, %v6790_v14 }
0x2355   : > { %v6886_v34 = vsel %vm2436_vm2, %v6879_v49, 0 }
0x2356   : > { %10797 = vmatpush3.bf16.xpose.msra.mxu1 %v6886_v34 }
0x2357   : > { %10808 = vmatprep.subr.bf16.mxu1 %v12155_v24 }
0x235d   : > { %10799 = vmatmul.mubr.msk.bf16.vlgmr.msra.gmra.mrb[120].mxu1 %vm2436_vm2, %v6878_v37 }
0x235e   : > { %10810 = vmatprep.mubr.msk.bf16.mxu1 %vm12156_vm4, %v12155_v24  ;;  %10809 = vmatpush3.bf16.msra.mxu1 %v11403_v6 }
0x235f   : > { %10826 = vmatprep.subr.bf16.mxu1 %v12155_v24 }
0x2430   : > { %v6922_v29 = vpop.f32.mrb[120].mxu1 }
0x2431   : > { %v6923_v17 = vadd.f32 %v6922_v29, %v6880_v21  ;;  %v10800_v32 = vpop.f32.mrb[121].mxu1  ;;  %v9736_v29 = vld [vmem:[%s14301_s2 + $0x9] ss:$0 sm:$0xff] }
0x2432   : > { %v6925_v50 = vpop.f32.mrb[122].mxu1 }
0x2433   : > { %v6926_v63 = vadd.f32 %v6925_v50, %v6881_v26  ;;  %v10801_v55 = vpop.f32.mrb[123].mxu1  ;;  %v6929_v0 = vsel %vm2436_vm2, %v6923_v17, -inf }
0x2434   : > { %6930 = vmax.xlane.f32.xlu0 %v6929_v0 }
0x2435   : > { %v6932_v4 = vsel %vm2436_vm2, %v6926_v63, -inf }
0x2436   : > { %6933 = vmax.xlane.f32.xlu1 %v6932_v4  ;;  %v9759_v4 = vld [vmem:[%s14301_s2 + $0x2] ss:$0 sm:$0xff] }
0x24c1   : > { %v6931_v33 = vpop.xlane.xlu0 %6930 }
0x24c2   : > { %v6935_v30 = vsub.f32 %v6923_v17, %v6931_v33 }
0x24c3   : > { %v6934_v51 = vpop.xlane.xlu1 %6933 }
0x24c4   : > { %v6937_v46 = vmul.f32 1.442695, %v6935_v30  ;;  %v6936_v7 = vsub.f32 %v6926_v63, %v6934_v51 }
0x24c6   : > { %11703 = vpow2.f32 %v6937_v46  ;;  %v6939_v13 = vmul.f32 1.442695, %v6936_v7 }
0x24c8   : > { %11705 = vpow2.f32 %v6939_v13 }
0x24d0   : > { %v11704_v40 = vpop.eup %11703 }
0x24d1   : > { %v6941_v16 = vsel %vm2436_vm2, %v11704_v40, 0.0 }
0x24d2   : > { %v11706_v18 = vpop.eup %11705  ;;  %6942 = vadd.xlane.f32.xlu0 %v6941_v16  ;;  %v9789_v16 = vld [vmem:[%s14301_s2 + $0xa] ss:$0 sm:$0xff] }
0x24d3   : > { %v6944_v5 = vsel %vm2436_vm2, %v11706_v18, 0.0 }
0x24d4   : > { %6945 = vadd.xlane.f32.xlu1 %v6944_v5 }
0x255f   : > { %v6943_v39 = vpop.xlane.xlu0 %6942 }
0x2560   : > { %11707 = vrcp.f32 %v6943_v39 }
0x2561   : > { %v6946_v53 = vpop.xlane.xlu1 %6945 }
0x2562   : > { %11709 = vrcp.f32 %v6946_v53 }
0x256a   : > { %v11708_v57 = vpop.eup %11707 }
0x256b   : > { %v6949_v54 = vmul.f32 %v11708_v57, %v11704_v40 }
0x256c   : > { %v11710_v19 = vpop.eup %11709 }
0x256d   : > { %v6950_v60 = vmul.f32 %v11710_v19, %v11706_v18 }
0x256f   : > { %v6951_v31 = vpack.c.bf16 %v6950_v60, %v6949_v54  ;;  %v9721_v54 = vld [vmem:[%s14301_s2 + $0x5] ss:$0 sm:$0xff] }
0x2571   : > { %10805 = vmatmul.mubr.msk.bf16.vlgmr.msra.gmra.mrb[124].mxu0 %vm2436_vm2, %v6951_v31 }
0x2572   : > { %10815 = vmatpush3.bf16.msra.mxu0 %v11387_v22  ;;  %10822 = vmatprep.mubr.msk.bf16.mxu0 %vm12156_vm4, %v12155_v24 }
0x2573   : > { %10816 = vmatprep.subr.bf16.mxu0 %v12155_v24 }
0x2576   : > { %10817 = vmatpush3.bf16.msra.mxu0 %v11388_v28 }
0x2577   : > { %10818 = vmatprep.subr.bf16.mxu0 %v12155_v24 }
0x257a   : > { %10819 = vmatpush3.bf16.msra.mxu0 %v11389_v11 }
0x257b   : > { %10820 = vmatprep.subr.bf16.mxu0 %v12155_v24 }
0x257e   : > { %10821 = vmatpush3.bf16.msra.mxu0 %v11390_v36 }
0x257f   : > { %10838 = vmatprep.subr.bf16.mxu0 %v12155_v24 }
0x2581   : > { %10823 = vmatmul.mubr.msk.bf16.vlgmr.msra.gmra.mrb[128].mxu0 %vm2526_vm3, %v13872_v27 }
0x2582   : > { %10839 = vmatpush3.bf16.msra.mxu0 %v11391_v62  ;;  %10846 = vmatprep.mubr.msk.bf16.mxu0 %vm12156_vm4, %v12155_v24 }
0x2583   : > { %10840 = vmatprep.subr.bf16.mxu0 %v12155_v24 }
0x2586   : > { %10841 = vmatpush3.bf16.msra.mxu0 %v11392_v1 }
0x2587   : > { %10842 = vmatprep.subr.bf16.mxu0 %v12155_v24 }
0x258a   : > { %10843 = vmatpush3.bf16.msra.mxu0 %v11393_v35  ;;  %v9742_v35 = vld [vmem:[%s14302_s4 + $0x10] sm:$0xff] }
0x258b   : > { %10844 = vmatprep.subr.bf16.mxu0 %v12155_v24 }
0x258e   : > { %10845 = vmatpush3.bf16.msra.mxu0 %v11394_v3 }
0x258f   : > { %10868 = vmatprep.subr.bf16.mxu0 %v12155_v24 }
0x2591   : > { %10847 = vmatmul.mubr.msk.bf16.vlgmr.msra.gmra.mrb[132].mxu0 %vm2526_vm3, %v13872_v27 }
0x2592   : > { %10869 = vmatpush3.bf16.msra.mxu0 %v11395_v38  ;;  %10876 = vmatprep.mubr.msk.bf16.mxu0 %vm12156_vm4, %v12155_v24  ;;  %v9743_v38 = vld [vmem:[%s14302_s4 + $0x18] sm:$0xff] }
0x2593   : > { %10870 = vmatprep.subr.bf16.mxu0 %v12155_v24 }
0x2596   : > { %10871 = vmatpush3.bf16.msra.mxu0 %v11396_v9 }
0x2597   : > { %10872 = vmatprep.subr.bf16.mxu0 %v12155_v24 }
0x259a   : > { %10873 = vmatpush3.bf16.msra.mxu0 %v11397_v12 }
0x259b   : > { %10874 = vmatprep.subr.bf16.mxu0 %v12155_v24 }
0x259e   : > { %10875 = vmatpush3.bf16.msra.mxu0 %v11398_v41 }
0x259f   : > { %10892 = vmatprep.subr.bf16.mxu0 %v12155_v24 }
0x25a1   : > { %10877 = vmatmul.mubr.msk.bf16.vlgmr.msra.gmra.mrb[136].mxu0 %vm2526_vm3, %v13872_v27 }
0x25a2   : > { %10893 = vmatpush3.bf16.msra.mxu0 %v11399_v61  ;;  %10900 = vmatprep.mubr.msk.bf16.mxu0 %vm12156_vm4, %v12155_v24 }
0x25a3   : > { %10894 = vmatprep.subr.bf16.mxu0 %v12155_v24 }
0x25a6   : > { %10895 = vmatpush3.bf16.msra.mxu0 %v11400_v47 }
0x25a7   : > { %10896 = vmatprep.subr.bf16.mxu0 %v12155_v24 }
0x25aa   : > { %10897 = vmatpush3.bf16.msra.mxu0 %v11401_v59 }
0x25ab   : > { %10898 = vmatprep.subr.bf16.mxu0 %v12155_v24 }
0x25ae   : > { %10899 = vmatpush3.bf16.msra.mxu0 %v11402_v23 }
0x25af   : > { %10910 = vmatprep.subr.bf16.mxu0 %v12155_v24 }
0x25b1   : > { %10901 = vmatmul.mubr.msk.bf16.vlgmr.msra.gmra.mrb[140].mxu0 %vm2526_vm3, %v13872_v27 }
0x25b2   : > { %10912 = vmatprep.mubr.msk.bf16.mxu0 %vm12156_vm4, %v12155_v24 }
0x2644   : > { %v6990_v42 = vpop.f32.mrb[124].mxu0 }
0x2645   : > { %v10806_v15 = vpop.f32.mrb[125].mxu0 }
0x2646   : > { %v6993_v52 = vpop.f32.mrb[126].mxu0 }
0x2647   : > { %v6997_v48 = vpack.c.bf16 %v6993_v52, %v6990_v42  ;;  %v10807_v37 = vpop.f32.mrb[127].mxu0 }
0x2649   : > { %10811 = vmatmul.mubr.msk.bf16.vlgmr.msra.gmra.mrb[124].mxu1 %vm2436_vm2, %v6997_v48 }
0x264a   : > { %10827 = vmatpush3.bf16.msra.mxu1 %v11404_v45  ;;  %10834 = vmatprep.mubr.msk.bf16.mxu1 %vm12156_vm4, %v12155_v24 }
0x264b   : > { %10828 = vmatprep.subr.bf16.mxu1 %v12155_v24 }
0x264e   : > { %10829 = vmatpush3.bf16.msra.mxu1 %v11405_v43 }
0x264f   : > { %10830 = vmatprep.subr.bf16.mxu1 %v12155_v24 }
0x2652   : > { %10831 = vmatpush3.bf16.msra.mxu1 %v11406_v58 }
0x2653   : > { %10832 = vmatprep.subr.bf16.mxu1 %v12155_v24 }
0x2654   : > { %v7127_v20 = vpop.f32.mrb[128].mxu0 }
0x2655   : > { %v10824_v14 = vpop.f32.mrb[129].mxu0  ;;  %v7128_v8 = vadd.f32 %v9706_v10, %v7127_v20 }
0x2656   : > { %v7130_v2 = vpop.f32.mrb[130].mxu0  ;;  %10833 = vmatpush3.bf16.msra.mxu1 %v11407_v56 }
0x2657   : > { %v7131_v49 = vadd.f32 %v9706_v10, %v7130_v2  ;;  %v10825_v34 = vpop.f32.mrb[131].mxu0  ;;  %10850 = vmatprep.subr.bf16.mxu1 %v12155_v24 }
0x2659   : > { %v7298_v21 = vpack.c.bf16 %v7131_v49, %v7128_v8  ;;  %10835 = vmatmul.mubr.msk.bf16.vlgmr.msra.gmra.mrb[128].mxu1 %vm2526_vm3, %v13872_v27 }
0x265a   : > { %10852 = vmatprep.mubr.msk.bf16.mxu1 %vm12156_vm4, %v12155_v24 }
0x2664   : > { %v7291_v26 = vpop.f32.mrb[132].mxu0 }
0x2665   : > { %v10848_v17 = vpop.f32.mrb[133].mxu0  ;;  %v7292_v50 = vadd.f32 %v9736_v29, %v7291_v26 }
0x2666   : > { %v7294_v32 = vpop.f32.mrb[134].mxu0 }
0x2667   : > { %v7295_v63 = vadd.f32 %v9736_v29, %v7294_v32  ;;  %v10849_v55 = vpop.f32.mrb[135].mxu0 }
0x2669   : > { %v7373_v0 = vpack.c.bf16 %v7295_v63, %v7292_v50  ;;  %v11409_v50 = vld [vmem:[%s14300_s1 + $0xc0] sm:$0xff]  }
0x2674   : > { %v7549_v33 = vpop.f32.mrb[136].mxu0 }
0x2675   : > { %v10878_v30 = vpop.f32.mrb[137].mxu0  ;;  %v13979_v46 = vadd.f32 %v9759_v4, %v7549_v33  ;;  %v11412_v33 = vld [vmem:[%s14300_s1 + $0xd8] sm:$0xff]  }
0x2676   : > { %v7552_v51 = vpop.f32.mrb[138].mxu0  ;;  %v9774_v30 = vld [vmem:[%s14301_s2 + $0x6] ss:$0 sm:$0xff] }
0x2677   : > { %v13981_v7 = vadd.f32 %v9759_v4, %v7552_v51  ;;  %v10879_v13 = vpop.f32.mrb[139].mxu0  ;;  %v11411_v4 = vld [vmem:[%s14300_s1 + $0xd0] sm:$0xff]  }
0x2679   : > { %v7720_v40 = vpack.c.bf16 %v13981_v7, %v13979_v46 }
0x2684   : > { %v7713_v18 = vpop.f32.mrb[140].mxu0 }
0x2685   : > { %v10902_v5 = vpop.f32.mrb[141].mxu0  ;;  %v7714_v39 = vadd.f32 %v9789_v16, %v7713_v18 }
0x2686   : > { %v7716_v6 = vpop.f32.mrb[142].mxu0 }
0x2687   : > { %v7717_v53 = vadd.f32 %v9789_v16, %v7716_v6  ;;  %v10903_v57 = vpop.f32.mrb[143].mxu0 }
0x2688   : > { %v9795_v57 = vld [vmem:[%s14302_s4 + $0x20] sm:$0xff] }
0x2689   : > { %v7795_v19 = vpack.c.bf16 %v7717_v53, %v7714_v39 }
0x268b   : > { %10911 = vmatpush3.bf16.msra.mxu0 %v7795_v19 }
0x268c   : > { %10922 = vmatprep.subr.bf16.mxu0 %v12155_v24 }
0x272c   : > { %v7209_v60 = vpop.f32.mrb[128].mxu1 }
0x272d   : > { %v10836_v22 = vpop.f32.mrb[129].mxu1  ;;  %v7210_v28 = vadd.f32 %v9721_v54, %v7209_v60 }
0x272e   : > { %v7212_v31 = vpop.f32.mrb[130].mxu1 }
0x272f   : > { %v7213_v11 = vadd.f32 %v9721_v54, %v7212_v31  ;;  %v10837_v36 = vpop.f32.mrb[131].mxu1  ;;  %v9796_v54 = vld [vmem:[%s14302_s4 + $0x28] sm:$0xff] }
0x2731   : > { %v7299_v62 = vpack.c.bf16 %v7213_v11, %v7210_v28 }
0x2733   : > { %v7307_v1 = vsel %vm2436_vm2, %v7299_v62, 0 }
0x2734   : > { %10851 = vmatpush3.bf16.xpose.msra.mxu1 %v7307_v1 }
0x2735   : > { %10856 = vmatprep.subr.bf16.mxu1 %v12155_v24 }
0x273b   : > { %10853 = vmatmul.mubr.msk.bf16.vlgmr.msra.gmra.mrb[132].mxu1 %vm2436_vm2, %v7298_v21  ;;  %v11408_v21 = vld [vmem:[%s14303_s5 + $0x8] sm:$0xff]  }
0x273c   : > { %10857 = vmatpush3.bf16.msra.mxu1 %v7373_v0  ;;  %10858 = vmatprep.mubr.msk.bf16.mxu1 %vm12156_vm4, %v12155_v24  ;;  %v11410_v0 = vld [vmem:[%s14300_s1 + $0xc8] sm:$0xff]  }
0x273d   : > { %10862 = vmatprep.subr.bf16.mxu1 %v12155_v24 }
0x280e   : > { %v7343_v3 = vpop.f32.mrb[132].mxu1 }
0x280f   : > { %v7344_v9 = vadd.f32 %v9742_v35, %v7343_v3  ;;  %v10854_v12 = vpop.f32.mrb[133].mxu1 }
0x2810   : > { %v7346_v41 = vpop.f32.mrb[134].mxu1 }
0x2811   : > { %v7347_v61 = vadd.f32 %v9743_v38, %v7346_v41  ;;  %v10855_v47 = vpop.f32.mrb[135].mxu1  ;;  %v7350_v59 = vsel %vm2436_vm2, %v7344_v9, -inf }
0x2812   : > { %7351 = vmax.xlane.f32.xlu0 %v7350_v59 }
0x2813   : > { %v7353_v23 = vsel %vm2436_vm2, %v7347_v61, -inf }
0x2814   : > { %7354 = vmax.xlane.f32.xlu1 %v7353_v23 }
0x289f   : > { %v7352_v42 = vpop.xlane.xlu0 %7351 }
0x28a0   : > { %v7356_v15 = vsub.f32 %v7344_v9, %v7352_v42 }
0x28a1   : > { %v7355_v52 = vpop.xlane.xlu1 %7354 }
0x28a2   : > { %v7358_v45 = vmul.f32 1.442695, %v7356_v15  ;;  %v7357_v48 = vsub.f32 %v7347_v61, %v7355_v52  ;;  %v11421_v61 = vld [vmem:[%s14303_s5 + $0x10] sm:$0xff]  }
0x28a4   : > { %11711 = vpow2.f32 %v7358_v45  ;;  %v7360_v37 = vmul.f32 1.442695, %v7357_v48  ;;  %v11413_v45 = vld [vmem:[%s14300_s1 + $0x60] sm:$0xff]  }
0x28a6   : > { %11713 = vpow2.f32 %v7360_v37  ;;  %v11414_v37 = vld [vmem:[%s14300_s1 + $0x68] sm:$0xff]  }
0x28ae   : > { %v11712_v43 = vpop.eup %11711 }
0x28af   : > { %v7362_v58 = vsel %vm2436_vm2, %v11712_v43, 0.0 }
0x28b0   : > { %v11714_v56 = vpop.eup %11713  ;;  %7363 = vadd.xlane.f32.xlu0 %v7362_v58  ;;  %v11416_v58 = vld [vmem:[%s14300_s1 + $0x78] sm:$0xff]  }
0x28b1   : > { %v7365_v10 = vsel %vm2436_vm2, %v11714_v56, 0.0 }
0x28b2   : > { %7366 = vadd.xlane.f32.xlu1 %v7365_v10  ;;  %v11418_v10 = vld [vmem:[%s14300_s1 + $0x168] sm:$0xff]  }
0x293d   : > { %v7364_v20 = vpop.xlane.xlu0 %7363 }
0x293e   : > { %11715 = vrcp.f32 %v7364_v20  ;;  %v11419_v20 = vld [vmem:[%s14300_s1 + $0x170] sm:$0xff]  }
0x293f   : > { %v7367_v14 = vpop.xlane.xlu1 %7366 }
0x2940   : > { %11717 = vrcp.f32 %v7367_v14  ;;  %v11420_v14 = vld [vmem:[%s14300_s1 + $0x178] sm:$0xff]  }
0x2948   : > { %v11716_v2 = vpop.eup %11715 }
0x2949   : > { %v7370_v49 = vmul.f32 %v11716_v2, %v11712_v43  ;;  %v11415_v43 = vld [vmem:[%s14300_s1 + $0x70] sm:$0xff]  }
0x294a   : > { %v11718_v8 = vpop.eup %11717 }
0x294b   : > { %v7371_v34 = vmul.f32 %v11718_v8, %v11714_v56  ;;  %v11417_v56 = vld [vmem:[%s14300_s1 + $0x160] sm:$0xff]  }
0x294d   : > { %v7372_v29 = vpack.c.bf16 %v7371_v34, %v7370_v49  ;;  %v11422_v34 = vld [vmem:[%s14300_s1 + $0xe0] sm:$0xff]  }
0x294f   : > { %10859 = vmatmul.mubr.msk.bf16.vlgmr.msra.gmra.mrb[136].mxu1 %vm2436_vm2, %v7372_v29 }
0x2950   : > { %10863 = vmatpush3.bf16.msra.mxu1 %v11408_v21  ;;  %10864 = vmatprep.mubr.msk.bf16.mxu1 %vm12156_vm4, %v12155_v24 }
0x2951   : > { %10880 = vmatprep.subr.bf16.mxu1 %v12155_v24 }
0x2a22   : > { %v7411_v26 = vpop.f32.mrb[136].mxu1 }
0x2a23   : > { %v10860_v17 = vpop.f32.mrb[137].mxu1 }
0x2a24   : > { %v7414_v32 = vpop.f32.mrb[138].mxu1  ;;  %v11424_v17 = vld [vmem:[%s14300_s1 + $0xf0] sm:$0xff]  }
0x2a25   : > { %v7418_v63 = vpack.c.bf16 %v7414_v32, %v7411_v26  ;;  %v10861_v55 = vpop.f32.mrb[139].mxu1  ;;  %v11423_v26 = vld [vmem:[%s14300_s1 + $0xe8] sm:$0xff]   ;;  %v11425_v32 = vld [vmem:[%s14300_s1 + $0xf8] sm:$0xff]   ;;  %s14304_s1 = sld [smem:[#allocation60_spill]] }
0x2a27   : > { %10865 = vmatmul.mubr.msk.bf16.vlgmr.msra.gmra.mrb[124].mxu1 %vm2436_vm2, %v7418_v63 }
0x2a28   : > { %10881 = vmatpush3.bf16.msra.mxu1 %v11409_v50  ;;  %10888 = vmatprep.mubr.msk.bf16.mxu1 %vm12156_vm4, %v12155_v24  ;;  %v9812_v50 = vld [vmem:[%s14301_s2 + $0x3] ss:$0 sm:$0xff] }
0x2a29   : > { %10882 = vmatprep.subr.bf16.mxu1 %v12155_v24 }
0x2a2c   : > { %10883 = vmatpush3.bf16.msra.mxu1 %v11410_v0 }
0x2a2d   : > { %10884 = vmatprep.subr.bf16.mxu1 %v12155_v24 }
0x2a30   : > { %10885 = vmatpush3.bf16.msra.mxu1 %v11411_v4 }
0x2a31   : > { %10886 = vmatprep.subr.bf16.mxu1 %v12155_v24 }
0x2a34   : > { %10887 = vmatpush3.bf16.msra.mxu1 %v11412_v33 }
0x2a35   : > { %10904 = vmatprep.subr.bf16.mxu1 %v12155_v24 }
0x2a37   : > { %10889 = vmatmul.mubr.msk.bf16.vlgmr.msra.gmra.mrb[140].mxu1 %vm2526_vm3, %v13872_v27 }
0x2a38   : > { %10906 = vmatprep.mubr.msk.bf16.mxu1 %vm12156_vm4, %v12155_v24 }
0x2b0a   : > { %v7631_v51 = vpop.f32.mrb[140].mxu1 }
0x2b0b   : > { %v10890_v13 = vpop.f32.mrb[141].mxu1  ;;  %v7632_v18 = vadd.f32 %v9774_v30, %v7631_v51 }
0x2b0c   : > { %v7634_v16 = vpop.f32.mrb[142].mxu1  ;;  %v9842_v13 = vld [vmem:[%s14301_s2 + $0xb] ss:$0 sm:$0xff] }
0x2b0d   : > { %v7635_v5 = vadd.f32 %v9774_v30, %v7634_v16  ;;  %v10891_v6 = vpop.f32.mrb[143].mxu1 }
0x2b0f   : > { %v7721_v39 = vpack.c.bf16 %v7635_v5, %v7632_v18 }
0x2b11   : > { %v7729_v53 = vsel %vm2436_vm2, %v7721_v39, 0 }
0x2b12   : > { %10905 = vmatpush3.bf16.xpose.msra.mxu1 %v7729_v53 }
0x2b13   : > { %10916 = vmatprep.subr.bf16.mxu1 %v12155_v24 }
0x2b19   : > { %10907 = vmatmul.mubr.msk.bf16.vlgmr.msra.gmra.mrb[144].mxu1 %vm2436_vm2, %v7720_v40 }
0x2b1a   : > { %10918 = vmatprep.mubr.msk.bf16.mxu1 %vm12156_vm4, %v12155_v24  ;;  %10917 = vmatpush3.bf16.msra.mxu1 %v11421_v61 }
0x2b1b   : > { %10934 = vmatprep.subr.bf16.mxu1 %v12155_v24 }
0x2bec   : > { %v7765_v19 = vpop.f32.mrb[144].mxu1 }
0x2bed   : > { %v7766_v60 = vadd.f32 %v9795_v57, %v7765_v19  ;;  %v10908_v22 = vpop.f32.mrb[145].mxu1  ;;  %v9827_v19 = vld [vmem:[%s14301_s2 + $0x7] ss:$0 sm:$0xff]  ;;  %s14305_s2 = sld [smem:[#allocation62_spill]] }
0x2bee   : > { %v7768_v31 = vpop.f32.mrb[146].mxu1 }
0x2bef   : > { %v7769_v28 = vadd.f32 %v9796_v54, %v7768_v31  ;;  %v10909_v11 = vpop.f32.mrb[147].mxu1  ;;  %v7772_v36 = vsel %vm2436_vm2, %v7766_v60, -inf }
0x2bf0   : > { %7773 = vmax.xlane.f32.xlu0 %v7772_v36 }
0x2bf1   : > { %v7775_v62 = vsel %vm2436_vm2, %v7769_v28, -inf }
0x2bf2   : > { %7776 = vmax.xlane.f32.xlu1 %v7775_v62  ;;  %v9848_v62 = vld [vmem:[%s14302_s4 + $0x30] sm:$0xff] }
0x2c7d   : > { %v7774_v46 = vpop.xlane.xlu0 %7773 }
0x2c7e   : > { %v7778_v7 = vsub.f32 %v7766_v60, %v7774_v46 }
0x2c7f   : > { %v7777_v40 = vpop.xlane.xlu1 %7776 }
0x2c80   : > { %v7780_v1 = vmul.f32 1.442695, %v7778_v7  ;;  %v7779_v35 = vsub.f32 %v7769_v28, %v7777_v40  ;;  %v9849_v7 = vld [vmem:[%s14302_s4 + $0x38] sm:$0xff] }
0x2c82   : > { %11719 = vpow2.f32 %v7780_v1  ;;  %v7782_v3 = vmul.f32 1.442695, %v7779_v35 }
0x2c84   : > { %11721 = vpow2.f32 %v7782_v3 }
0x2c8c   : > { %v11720_v38 = vpop.eup %11719 }
0x2c8d   : > { %v7784_v9 = vsel %vm2436_vm2, %v11720_v38, 0.0 }
0x2c8e   : > { %v11722_v12 = vpop.eup %11721  ;;  %7785 = vadd.xlane.f32.xlu0 %v7784_v9 }
0x2c8f   : > { %v7787_v41 = vsel %vm2436_vm2, %v11722_v12, 0.0 }
0x2c90   : > { %7788 = vadd.xlane.f32.xlu1 %v7787_v41 }
0x2d1b   : > { %v7786_v47 = vpop.xlane.xlu0 %7785 }
0x2d1c   : > { %11723 = vrcp.f32 %v7786_v47 }
0x2d1d   : > { %v7789_v59 = vpop.xlane.xlu1 %7788 }
0x2d1e   : > { %11725 = vrcp.f32 %v7789_v59 }
0x2d26   : > { %v11724_v23 = vpop.eup %11723 }
0x2d27   : > { %v7792_v15 = vmul.f32 %v11724_v23, %v11720_v38 }
0x2d28   : > { %v11726_v42 = vpop.eup %11725 }
0x2d29   : > { %v7793_v52 = vmul.f32 %v11726_v42, %v11722_v12 }
0x2d2b   : > { %v7794_v48 = vpack.c.bf16 %v7793_v52, %v7792_v15 }
0x2d2d   : > { %10913 = vmatmul.mubr.msk.bf16.vlgmr.msra.gmra.mrb[144].mxu0 %vm2436_vm2, %v7794_v48 }
0x2d2e   : > { %10923 = vmatpush3.bf16.msra.mxu0 %v11413_v45  ;;  %10930 = vmatprep.mubr.msk.bf16.mxu0 %vm12156_vm4, %v12155_v24 }
0x2d2f   : > { %10924 = vmatprep.subr.bf16.mxu0 %v12155_v24 }
0x2d32   : > { %10925 = vmatpush3.bf16.msra.mxu0 %v11414_v37 }
0x2d33   : > { %10926 = vmatprep.subr.bf16.mxu0 %v12155_v24 }
0x2d36   : > { %10927 = vmatpush3.bf16.msra.mxu0 %v11415_v43 }
0x2d37   : > { %10928 = vmatprep.subr.bf16.mxu0 %v12155_v24 }
0x2d3a   : > { %10929 = vmatpush3.bf16.msra.mxu0 %v11416_v58 }
0x2d3b   : > { %10946 = vmatprep.subr.bf16.mxu0 %v12155_v24 }
0x2d3d   : > { %10931 = vmatmul.mubr.msk.bf16.vlgmr.msra.gmra.mrb[148].mxu0 %vm2526_vm3, %v13872_v27 }
0x2d3e   : > { %10947 = vmatpush3.bf16.msra.mxu0 %v11417_v56  ;;  %10954 = vmatprep.mubr.msk.bf16.mxu0 %vm12156_vm4, %v12155_v24 }
0x2d3f   : > { %10948 = vmatprep.subr.bf16.mxu0 %v12155_v24 }
0x2d42   : > { %10949 = vmatpush3.bf16.msra.mxu0 %v11418_v10 }
0x2d43   : > { %10950 = vmatprep.subr.bf16.mxu0 %v12155_v24 }
0x2d46   : > { %10951 = vmatpush3.bf16.msra.mxu0 %v11419_v20 }
0x2d47   : > { %10952 = vmatprep.subr.bf16.mxu0 %v12155_v24 }
0x2d4a   : > { %10953 = vmatpush3.bf16.msra.mxu0 %v11420_v14  ;;  %v11426_v14 = vld [vmem:[%s14303_s5 + $0x18] sm:$0xff]  }
0x2d4d   : > { %10955 = vmatmul.mubr.msk.bf16.vlgmr.msra.gmra.mrb[152].mxu0 %vm2526_vm3, %v13872_v27 }
0x2e00   : > { %v7833_v2 = vpop.f32.mrb[144].mxu0 }
0x2e01   : > { %v10914_v8 = vpop.f32.mrb[145].mxu0 }
0x2e02   : > { %v7836_v49 = vpop.f32.mrb[146].mxu0 }
0x2e03   : > { %v7840_v21 = vpack.c.bf16 %v7836_v49, %v7833_v2  ;;  %v10915_v29 = vpop.f32.mrb[147].mxu0 }
0x2e05   : > { %10919 = vmatmul.mubr.msk.bf16.vlgmr.msra.gmra.mrb[124].mxu1 %vm2436_vm2, %v7840_v21 }
0x2e06   : > { %10935 = vmatpush3.bf16.msra.mxu1 %v11422_v34  ;;  %10942 = vmatprep.mubr.msk.bf16.mxu1 %vm12156_vm4, %v12155_v24 }
0x2e07   : > { %10936 = vmatprep.subr.bf16.mxu1 %v12155_v24 }
0x2e0a   : > { %10937 = vmatpush3.bf16.msra.mxu1 %v11423_v26  ;;  %v9656_v26 = vld [vmem:[#allocation10] ss:$0 sm:$0xff] }
0x2e0b   : > { %10938 = vmatprep.subr.bf16.mxu1 %v12155_v24 }
0x2e0e   : > { %10939 = vmatpush3.bf16.msra.mxu1 %v11424_v17  ;;  %v6629_v17 = vadd.f32 %v9656_v26, %v13843_v25 }
0x2e0f   : > { %10940 = vmatprep.subr.bf16.mxu1 %v12155_v24 }
0x2e10   : > { %v7971_v63 = vpop.f32.mrb[148].mxu0 }
0x2e11   : > { %v10932_v55 = vpop.f32.mrb[149].mxu0  ;;  %v7972_v4 = vadd.f32 %v9812_v50, %v7971_v63 }
0x2e12   : > { %v7974_v0 = vpop.f32.mrb[150].mxu0  ;;  %10941 = vmatpush3.bf16.msra.mxu1 %v11425_v32  ;;  %v6630_v55 = vadd.f32 %v9656_v26, %v13847_v44  ;;  %v8373_v26 = vlaneseq }
0x2e13   : > { %v7975_v33 = vadd.f32 %v9812_v50, %v7974_v0  ;;  %v10933_v30 = vpop.f32.mrb[151].mxu0  ;;  %10958 = vmatprep.subr.bf16.mxu1 %v12155_v24 }
0x2e15   : > { %v8142_v51 = vpack.c.bf16 %v7975_v33, %v7972_v4  ;;  %10943 = vmatmul.mubr.msk.bf16.vlgmr.msra.gmra.mrb[148].mxu1 %vm2526_vm3, %v13872_v27 }
0x2e16   : > { %10960 = vmatprep.mubr.msk.bf16.mxu1 %vm12156_vm4, %v12155_v24 }
0x2e20   : > { %v8135_v16 = vpop.f32.mrb[152].mxu0 }
0x2e21   : > { %v10956_v18 = vpop.f32.mrb[153].mxu0  ;;  %v8136_v6 = vadd.f32 %v9842_v13, %v8135_v16 }
0x2e22   : > { %v8138_v5 = vpop.f32.mrb[154].mxu0 }
0x2e23   : > { %v8139_v39 = vadd.f32 %v9842_v13, %v8138_v5  ;;  %v10957_v53 = vpop.f32.mrb[155].mxu0 }
0x2e25   : > { %v8217_v57 = vpack.c.bf16 %v8139_v39, %v8136_v6 }
0x2ee8   : > { %v8053_v54 = vpop.f32.mrb[148].mxu1 }
0x2ee9   : > { %v10944_v60 = vpop.f32.mrb[149].mxu1  ;;  %v8054_v31 = vadd.f32 %v9827_v19, %v8053_v54  ;;  %v11427_v54 = vld [vmem:[%s14304_s1] ss:$8 sps:$4 sm:$0xff]  }
0x2eea   : > { %v8056_v22 = vpop.f32.mrb[150].mxu1  ;;  %v11432_v60 = vld [vmem:[%s14304_s1 + $0x14] ss:$8 sps:$4 sm:$0xff]  }
0x2eeb   : > { %v8057_v28 = vadd.f32 %v9827_v19, %v8056_v22  ;;  %v10945_v27 = vpop.f32.mrb[151].mxu1  ;;  %v11429_v19 = vld [vmem:[%s14304_s1 + $0x4] ss:$8 sps:$4 sm:$0xff]   ;;  %v11430_v22 = vld [vmem:[%s14304_s1 + $0x10] ss:$8 sps:$4 sm:$0xff]  }
0x2eec   : > { %8426 = vmatprep.subr.bf16.mxu0 %v11429_v19  ;;  %v11436_v27 = vld [vmem:[%s14304_s1 + $0x30] ss:$8 sps:$4 sm:$0xff]  }
0x2eed   : > { %v8143_v11 = vpack.c.bf16 %v8057_v28, %v8054_v31  ;;  %8427 = vmatpush1.bf16.msra.mxu0 %v11427_v54  ;;  %v11435_v31 = vld [vmem:[%s14304_s1 + $0x24] ss:$8 sps:$4 sm:$0xff]   ;;  %v11433_v28 = vld [vmem:[%s14304_s1 + $0x20] ss:$8 sps:$4 sm:$0xff]  }
0x2eee   : > { %8428 = vmatprep.subr.bf16.mxu0 %v11432_v60 }
0x2eef   : > { %v8151_v36 = vsel %vm2436_vm2, %v8143_v11, 0  ;;  %v11438_v11 = vld [vmem:[%s14304_s1 + $0x34] ss:$8 sps:$4 sm:$0xff]   ;;  %s14306_s1 = sld [smem:[#allocation61_spill]] }
0x2ef0   : > { %10959 = vmatpush3.bf16.xpose.msra.mxu1 %v8151_v36  ;;  %v12157_v36 = vmov 0  }
0x2ef1   : > { %10964 = vmatprep.subr.bf16.mxu1 %v12155_v24  ;;  %8429 = vmatpush1.bf16.msra.mxu0 %v11430_v22 }
0x2ef2   : > { %8430 = vmatprep.subr.bf16.mxu0 %v11435_v31  ;;  %8458 = vmatprep.mubr.bf16.mxu0 %v12157_v36 }
0x2ef3   : > { %11311 = vset.pattern.permute.xlu0 %v12157_v36 }
0x2ef5   : > { %8431 = vmatpush1.bf16.msra.mxu0 %v11433_v28 }
0x2ef6   : > { %8432 = vmatprep.subr.bf16.mxu0 %v11438_v11 }
0x2ef7   : > { %10961 = vmatmul.mubr.msk.bf16.vlgmr.msra.gmra.mrb[152].mxu1 %vm2436_vm2, %v8142_v51 }
0x2ef8   : > { %10965 = vmatpush3.bf16.msra.mxu1 %v8217_v57  ;;  %10966 = vmatprep.mubr.msk.bf16.mxu1 %vm12156_vm4, %v12155_v24 }
0x2ef9   : > { %10970 = vmatprep.subr.bf16.mxu1 %v12155_v24  ;;  %8433 = vmatpush1.bf16.msra.mxu0 %v11436_v27 }
0x2efa   : > { %10976 = vmatprep.subr.bf16.mxu0 %v12155_v24 }
0x2fca   : > { %v8187_v46 = vpop.f32.mrb[152].mxu1 }
0x2fcb   : > { %v8188_v40 = vadd.f32 %v9848_v62, %v8187_v46  ;;  %v10962_v1 = vpop.f32.mrb[153].mxu1 }
0x2fcc   : > { %v8190_v35 = vpop.f32.mrb[154].mxu1 }
0x2fcd   : > { %v8191_v3 = vadd.f32 %v9849_v7, %v8190_v35  ;;  %v10963_v38 = vpop.f32.mrb[155].mxu1  ;;  %v8194_v9 = vsel %vm2436_vm2, %v8188_v40, -inf }
0x2fce   : > { %8195 = vmax.xlane.f32.xlu0 %v8194_v9  ;;  %v9856_v38 = vld [vmem:[#allocation12] ss:$0 sm:$0xff] }
0x2fcf   : > { %v8197_v12 = vsel %vm2436_vm2, %v8191_v3, -inf }
0x2fd0   : > { %8198 = vmax.xlane.f32.xlu1 %v8197_v12 }
0x305b   : > { %v8196_v41 = vpop.xlane.xlu0 %8195 }
0x305c   : > { %v8200_v61 = vsub.f32 %v8188_v40, %v8196_v41 }
0x305d   : > { %v8199_v47 = vpop.xlane.xlu1 %8198 }
0x305e   : > { %v8202_v59 = vmul.f32 1.442695, %v8200_v61  ;;  %v8201_v23 = vsub.f32 %v8191_v3, %v8199_v47  ;;  %v9857_v47 = vld [vmem:[#allocation13] ss:$0 sm:$0xff] }
0x3060   : > { %11727 = vpow2.f32 %v8202_v59  ;;  %v8204_v42 = vmul.f32 1.442695, %v8201_v23 }
0x3062   : > { %11729 = vpow2.f32 %v8204_v42 }
0x306a   : > { %v11728_v15 = vpop.eup %11727 }
0x306b   : > { %v8206_v52 = vsel %vm2436_vm2, %v11728_v15, 0.0 }
0x306c   : > { %v11730_v45 = vpop.eup %11729  ;;  %8207 = vadd.xlane.f32.xlu0 %v8206_v52  ;;  %v11439_v52 = vld [vmem:[%s14305_s2 + $0x40] sm:$0xff]  }
0x306d   : > { %v8209_v48 = vsel %vm2436_vm2, %v11730_v45, 0.0 }
0x306e   : > { %8210 = vadd.xlane.f32.xlu1 %v8209_v48  ;;  %v11441_v48 = vld [vmem:[%s14305_s2 + $0x48] sm:$0xff]  }
0x30f9   : > { %v8208_v37 = vpop.xlane.xlu0 %8207 }
0x30fa   : > { %11731 = vrcp.f32 %v8208_v37  ;;  %v11442_v37 = vld [vmem:[%s14305_s2 + $0x8] sm:$0xff]  }
0x30fb   : > { %v8211_v43 = vpop.xlane.xlu1 %8210 }
0x30fc   : > { %11733 = vrcp.f32 %v8211_v43  ;;  %v11443_v43 = vld [vmem:[%s14305_s2 + $0x50] sm:$0xff]  }
0x3104   : > { %v11732_v58 = vpop.eup %11731 }
0x3105   : > { %v8214_v10 = vmul.f32 %v11732_v58, %v11728_v15  ;;  %v11444_v58 = vld [vmem:[%s14305_s2 + $0x10] sm:$0xff]  }
0x3106   : > { %v11734_v56 = vpop.eup %11733 }
0x3107   : > { %v8215_v20 = vmul.f32 %v11734_v56, %v11730_v45  ;;  %v11440_v45 = vld [vmem:[%s14305_s2] sm:$0xff]   ;;  %v11445_v56 = vld [vmem:[%s14305_s2 + $0x58] sm:$0xff]  }
0x3109   : > { %v8216_v2 = vpack.c.bf16 %v8215_v20, %v8214_v10  ;;  %v11446_v10 = vld [vmem:[%s14305_s2 + $0x18] sm:$0xff]   ;;  %v11447_v20 = vld [vmem:[%s14305_s2 + $0x60] sm:$0xff]  }
0x310b   : > { %10967 = vmatmul.mubr.msk.bf16.vlgmr.msra.gmra.mrb[156].mxu1 %vm2436_vm2, %v8216_v2  ;;  %v11449_v2 = vld [vmem:[%s14305_s2 + $0x68] sm:$0xff]  }
0x310c   : > { %10971 = vmatpush3.bf16.msra.mxu1 %v11426_v14  ;;  %10972 = vmatprep.mubr.msk.bf16.mxu1 %vm12156_vm4, %v12155_v24  ;;  %v11448_v14 = vld [vmem:[%s14305_s2 + $0x20] sm:$0xff]  }
0x310d   : > { %10230 = vmatprep.subr.bf16.mxu1 %v11439_v52 }
0x31de   : > { %v8255_v8 = vpop.f32.mrb[156].mxu1 }
0x31df   : > { %v10968_v49 = vpop.f32.mrb[157].mxu1 }
0x31e0   : > { %v8258_v34 = vpop.f32.mrb[158].mxu1  ;;  %v11451_v49 = vld [vmem:[%s14305_s2 + $0x70] sm:$0xff]  }
0x31e1   : > { %v8262_v21 = vpack.c.bf16 %v8258_v34, %v8255_v8  ;;  %v10969_v29 = vpop.f32.mrb[159].mxu1  ;;  %v11450_v8 = vld [vmem:[%s14305_s2 + $0x28] sm:$0xff]   ;;  %v11452_v34 = vld [vmem:[%s14305_s2 + $0x30] sm:$0xff]  }
0x31e2   : > { %v11454_v29 = vld [vmem:[%s14305_s2 + $0x38] sm:$0xff]  }
0x31e3   : > { %10973 = vmatmul.mubr.msk.bf16.vlgmr.msra.gmra.mrb[124].mxu1 %vm2436_vm2, %v8262_v21  ;;  %v11453_v21 = vld [vmem:[%s14305_s2 + $0x78] sm:$0xff]  }
0x31e4   : > { %10231 = vmatpush3.bf16.msra.mxu1 %v11440_v45 }
0x31e5   : > { %10232 = vmatprep.subr.bf16.mxu1 %v11441_v48 }
0x31e8   : > { %10233 = vmatpush3.bf16.msra.mxu1 %v11442_v37 }
0x31e9   : > { %10234 = vmatprep.subr.bf16.mxu1 %v11443_v43 }
0x31ec   : > { %10235 = vmatpush3.bf16.msra.mxu1 %v11444_v58 }
0x31ed   : > { %10236 = vmatprep.subr.bf16.mxu1 %v11445_v56 }
0x31f0   : > { %10237 = vmatpush3.bf16.msra.mxu1 %v11446_v10 }
0x31f1   : > { %10238 = vmatprep.subr.bf16.mxu1 %v11447_v20 }
0x31f4   : > { %10239 = vmatpush3.bf16.msra.mxu1 %v11448_v14  ;;  %v9867_v14 = vld [vmem:[#allocation15] ss:$0 sm:$0xff] }
0x31f5   : > { %10240 = vmatprep.subr.bf16.mxu1 %v11449_v2 }
0x31f8   : > { %10241 = vmatpush3.bf16.msra.mxu1 %v11450_v8 }
0x31f9   : > { %10242 = vmatprep.subr.bf16.mxu1 %v11451_v49 }
0x31fc   : > { %10243 = vmatpush3.bf16.msra.mxu1 %v11452_v34 }
0x31fd   : > { %10244 = vmatprep.subr.bf16.mxu1 %v11453_v21 }
0x3200   : > { %10245 = vmatpush3.bf16.msra.mxu1 %v11454_v29 }
0x32b6   : > { %v8309_v32 = vpop.f32.mrb[124].mxu1 }
0x32b7   : > { %v14097_v50 = vadd.f32 %v8309_v32, %v6629_v17  ;;  %v10974_v63 = vpop.f32.mrb[125].mxu1  ;;  %v8374_v17 = vshrl.u32 %v8373_v26, 7 }
0x32b8   : > { %v8312_v0 = vpop.f32.mrb[126].mxu1  ;;  %v8371_v63 = vld [vmem:[%s14306_s1] sm:$0x3]  ;;  %s9894_s1 = sshll.u32 %s14308_s0, 6 }
0x32b9   : > { %v14100_v4 = vadd.f32 %v8312_v0, %v6630_v55  ;;  %v10975_v33 = vpop.f32.mrb[127].mxu1  ;;  %v8320_v30 = vsel %vm2526_vm3, %v14097_v50, 0.0  ;;  %v8375_v32 = vsub.s32 0, %v8374_v17  ;;  %v8379_v55 = vsub.s32 1, %v8374_v17  ;;  %s1712_s2 = scalar_lea.vmem %s12431_s17, %s9894_s1 }
0x32ba   : > { %8321 = vadd.xlane.f32.xlu0 %v8320_v30 }
0x32bb   : > { %v8323_v51 = vsel %vm2526_vm3, %v14100_v4, 0.0  ;;  %v8376_v0 = vrot.slane %v8371_v63, %v8375_v32  ;;  %v8380_v33 = vrot.slane %v8371_v63, %v8379_v55 }
0x32bc   : > { %8324 = vadd.xlane.f32.xlu1 %v8323_v51 }
0x3347   : > { %v8322_v25 = vpop.xlane.xlu0 %8321 }
0x3348   : > { %v8326_v13 = vmul.f32 0.015625, %v8322_v25 }
0x3349   : > { %v8325_v16 = vpop.xlane.xlu1 %8324 }
0x334a   : > { %v8328_v44 = vsub.f32 %v14097_v50, %v8326_v13  ;;  %v8327_v18 = vmul.f32 0.015625, %v8325_v16 }
0x334c   : > { %v8329_v5 = vsub.f32 %v14100_v4, %v8327_v18  ;;  %v8330_v6 = vmul.f32 %v8328_v44, %v8328_v44 }
0x334e   : > { %v8332_v39 = vsel %vm2526_vm3, %v8330_v6, 0.0  ;;  %v8331_v53 = vmul.f32 %v8329_v5, %v8329_v5 }
0x334f   : > { %8333 = vadd.xlane.f32.xlu0 %v8332_v39 }
0x3350   : > { %v8335_v57 = vsel %vm2526_vm3, %v8331_v53, 0.0 }
0x3351   : > { %8336 = vadd.xlane.f32.xlu1 %v8335_v57 }
0x33dc   : > { %v8334_v62 = vpop.xlane.xlu0 %8333 }
0x33dd   : > { %v8338_v46 = vmul.f32 0.015625, %v8334_v62 }
0x33de   : > { %v8337_v7 = vpop.xlane.xlu1 %8336 }
0x33df   : > { %v8340_v40 = vadd.f32 1e-05, %v8338_v46  ;;  %v8339_v1 = vmul.f32 0.015625, %v8337_v7 }
0x33e1   : > { %11735 = vrsqrt.f32 %v8340_v40  ;;  %v8341_v35 = vadd.f32 1e-05, %v8339_v1 }
0x33e3   : > { %11737 = vrsqrt.f32 %v8341_v35 }
0x33eb   : > { %v11736_v3 = vpop.eup %11735 }
0x33ec   : > { %v8344_v9 = vmul.f32 %v11736_v3, %v8328_v44 }
0x33ed   : > { %v11738_v12 = vpop.eup %11737 }
0x33ee   : > { %v8352_v41 = vmul.f32 %v9856_v38, %v8344_v9  ;;  %v8345_v61 = vmul.f32 %v11738_v12, %v8329_v5 }
0x33f0   : > { %v8353_v59 = vmul.f32 %v9856_v38, %v8345_v61  ;;  %v8360_v23 = vadd.f32 %v9857_v47, %v8352_v41 }
0x33f2   : > { %v8361_v42 = vadd.f32 %v9857_v47, %v8353_v59 }
0x33f4   : > { %v8362_v15 = vpack.c.bf16 %v8361_v42, %v8360_v23 }
0x33f6   : > { %9866 = vmatmul.mubr.msk.bf16.vlgmr.msra.gmra.mrb[156].mxu0 %vm2526_vm3, %v8362_v15 }
0x33f7   : > { %10978 = vmatprep.mubr.msk.bf16.mxu0 %vm12156_vm4, %v12155_v24 }
0x34c9   : > { %v8460_v30 = vpop.f32.mrb[156].mxu0 }
0x34ca   : > { %v8461_v51 = vadd.f32 %v8460_v30, %v8376_v0  ;;  %v8462_v25 = vpop.f32.mrb[157].mxu0 }
0x34cb   : > { %v8463_v13 = vadd.f32 %v8462_v25, %v8380_v33  ;;  %v8464_v16 = vpop.f32.mrb[158].mxu0 }
0x34cc   : > { %v8469_v44 = vmul.f32 %v8461_v51, %v8461_v51  ;;  %v8465_v18 = vadd.f32 %v8464_v16, %v8376_v0  ;;  %v8466_v5 = vpop.f32.mrb[159].mxu0 }
0x34cd   : > { %v8470_v6 = vmul.f32 %v8463_v13, %v8463_v13  ;;  %v8467_v39 = vadd.f32 %v8466_v5, %v8380_v33 }
0x34ce   : > { %v8473_v53 = vmul.f32 %v8469_v44, %v8461_v51  ;;  %v8471_v57 = vmul.f32 %v8465_v18, %v8465_v18 }
0x34cf   : > { %v8474_v19 = vmul.f32 %v8470_v6, %v8463_v13  ;;  %v8472_v54 = vmul.f32 %v8467_v39, %v8467_v39 }
0x34d0   : > { %v8477_v60 = vmul.f32 0.044715, %v8473_v53  ;;  %v8475_v22 = vmul.f32 %v8471_v57, %v8465_v18 }
0x34d1   : > { %v8478_v31 = vmul.f32 0.044715, %v8474_v19  ;;  %v8476_v28 = vmul.f32 %v8472_v54, %v8467_v39 }
0x34d2   : > { %v8481_v27 = vadd.f32 %v8477_v60, %v8461_v51  ;;  %v8479_v11 = vmul.f32 0.044715, %v8475_v22  ;;  %v9884_v60 = vld [vmem:[#allocation16] ss:$0 sm:$0xff] }
0x34d3   : > { %v8482_v36 = vadd.f32 %v8478_v31, %v8463_v13  ;;  %v8480_v62 = vmul.f32 0.044715, %v8476_v28 }
0x34d4   : > { %v8485_v46 = vmul.f32 0.7978846, %v8481_v27  ;;  %v8483_v7 = vadd.f32 %v8479_v11, %v8465_v18  ;;  %v9885_v11 = vld [vmem:[#allocation18] ss:$0 sm:$0xff] }
0x34d5   : > { %v8486_v40 = vmul.f32 0.7978846, %v8482_v36  ;;  %v8484_v1 = vadd.f32 %v8480_v62, %v8467_v39  ;;  %v8784_v62 = vld [vmem:[%s12426_s21 + $0x8] sm:$0xff] }
0x34d6   : > { %11739 = vtanh.f32 %v8485_v46  ;;  %v8487_v35 = vmul.f32 0.7978846, %v8483_v7  ;;  %v8792_v46 = vld [vmem:[%s12426_s21 + $0x48] sm:$0xff] }
0x34d7   : > { %11741 = vtanh.f32 %v8486_v40  ;;  %v8488_v3 = vmul.f32 0.7978846, %v8484_v1 }
0x34d8   : > { %11743 = vtanh.f32 %v8487_v35  ;;  %v11046_v35 = vpack.c.bf16 %v8792_v46, %v8784_v62 }
0x34d9   : > { %11745 = vtanh.f32 %v8488_v3 }
0x34e0   : > { %v11740_v38 = vpop.eup %11739 }
0x34e1   : > { %v11742_v9 = vpop.eup %11741  ;;  %v8493_v12 = vadd.f32 1.0, %v11740_v38  ;;  %v8783_v38 = vld [vmem:[%s12426_s21] sm:$0xff] }
0x34e2   : > { %v11744_v41 = vpop.eup %11743  ;;  %v8494_v61 = vadd.f32 1.0, %v11742_v9  ;;  %v8791_v9 = vld [vmem:[%s12426_s21 + $0x40] sm:$0xff] }
0x34e3   : > { %v11746_v47 = vpop.eup %11745  ;;  %v8497_v59 = vmul.f32 0.5, %v8493_v12  ;;  %v8495_v23 = vadd.f32 1.0, %v11744_v41  ;;  %v8730_v12 = vld [vmem:[%s12416_s29] sm:$0xf]  ;;  %v11048_v41 = vpack.c.bf16 %v8791_v9, %v8783_v38 }
0x34e4   : > { %v8496_v42 = vadd.f32 1.0, %v11746_v47  ;;  %v8498_v15 = vmul.f32 0.5, %v8494_v61  ;;  %v8786_v61 = vld [vmem:[%s12426_s21 + $0x18] sm:$0xff] }
0x34e5   : > { %v8499_v52 = vmul.f32 0.5, %v8495_v23  ;;  %v8501_v48 = vmul.f32 %v8497_v59, %v8461_v51  ;;  %v8794_v47 = vld [vmem:[%s12426_s21 + $0x58] sm:$0xff]  ;;  %v8785_v23 = vld [vmem:[%s12426_s21 + $0x10] sm:$0xff] }
0x34e6   : > { %v8500_v45 = vmul.f32 0.5, %v8496_v42  ;;  %v8502_v43 = vmul.f32 %v8498_v15, %v8463_v13  ;;  %v11050_v59 = vpack.c.bf16 %v8794_v47, %v8786_v61  ;;  %v8793_v42 = vld [vmem:[%s12426_s21 + $0x50] sm:$0xff] }
0x34e7   : > { %v8503_v37 = vmul.f32 %v8499_v52, %v8465_v18  ;;  %v8788_v52 = vld [vmem:[%s12426_s21 + $0x28] sm:$0xff] }
0x34e8   : > { %v8504_v58 = vmul.f32 %v8500_v45, %v8467_v39  ;;  %v8796_v45 = vld [vmem:[%s12426_s21 + $0x68] sm:$0xff] }
0x34e9   : > { %v8505_v56 = vpack.c.bf16 %v8503_v37, %v8501_v48  ;;  %v11052_v37 = vpack.c.bf16 %v8793_v42, %v8785_v23 }
0x34ea   : > { %v8506_v10 = vpack.c.bf16 %v8504_v58, %v8502_v43 }
0x34ec   : > { %8674 = vmatprep.mubr.bf16.mxu1 %v8506_v10  ;;  %v8787_v10 = vld [vmem:[%s12426_s21 + $0x20] sm:$0xff] }
0x34ed   : > { %8675 = vmatmul.mubr.bf16.vlgmr.msra.gmra.mrb[160].mxu1 %v8505_v56  ;;  %v11054_v56 = vpack.c.bf16 %v8796_v45, %v8788_v52 }
0x35c0   : > { %v10246_v20 = vpop.f32.mrb[160].mxu1 }
0x35c1   : > { %v10247_v2 = vpop.f32.mrb[161].mxu1 }
0x35c2   : > { %v10248_v8 = vadd.f32 %v10247_v2, %v10246_v20  ;;  %v10249_v49 = vpop.f32.mrb[162].mxu1  ;;  %v8795_v20 = vld [vmem:[%s12426_s21 + $0x60] sm:$0xff]  ;;  %v8790_v2 = vld [vmem:[%s12426_s21 + $0x38] sm:$0xff] }
0x35c3   : > { %v10250_v34 = vpop.f32.mrb[163].mxu1 }
0x35c4   : > { %v8677_v21 = vadd.f32 %v10248_v8, %v9867_v14  ;;  %v10251_v29 = vadd.f32 %v10250_v34, %v10249_v49  ;;  %v8798_v8 = vld [vmem:[%s12426_s21 + $0x78] sm:$0xff]  ;;  %v11056_v34 = vpack.c.bf16 %v8795_v20, %v8787_v10 }
0x35c6   : > { %v8680_v26 = vadd.f32 %v10251_v29, %v9867_v14  ;;  %v8683_v17 = vadd.f32 %v14097_v50, %v8677_v21  ;;  %v11058_v21 = vpack.c.bf16 %v8798_v8, %v8790_v2  ;;  %v8789_v29 = vld [vmem:[%s12426_s21 + $0x30] sm:$0xff] }
0x35c8   : > { %v8687_v32 = vsel %vm2526_vm3, %v8683_v17, 0.0  ;;  %v8684_v63 = vadd.f32 %v14100_v4, %v8680_v26  ;;  %v8731_v4 = vld [vmem:[%s12421_s3] sm:$0xff]  ;;  %v8797_v26 = vld [vmem:[%s12426_s21 + $0x70] sm:$0xff] }
0x35c9   : > { %8688 = vadd.xlane.f32.xlu0 %v8687_v32 }
0x35ca   : > { %v8690_v55 = vsel %vm2526_vm3, %v8684_v63, 0.0 }
0x35cb   : > { %8691 = vadd.xlane.f32.xlu1 %v8690_v55 }
0x3656   : > { %v8689_v0 = vpop.xlane.xlu0 %8688 }
0x3657   : > { %v8693_v33 = vmul.f32 0.015625, %v8689_v0 }
0x3658   : > { %v8692_v30 = vpop.xlane.xlu1 %8691 }
0x3659   : > { %v8695_v51 = vsub.f32 %v8683_v17, %v8693_v33  ;;  %v8694_v25 = vmul.f32 0.015625, %v8692_v30  ;;  %v11060_v17 = vpack.c.bf16 %v8797_v26, %v8789_v29 }
0x365b   : > { %v8696_v13 = vsub.f32 %v8684_v63, %v8694_v25  ;;  %v8697_v16 = vmul.f32 %v8695_v51, %v8695_v51 }
0x365d   : > { %v8699_v44 = vsel %vm2526_vm3, %v8697_v16, 0.0  ;;  %v8698_v18 = vmul.f32 %v8696_v13, %v8696_v13 }
0x365e   : > { %8700 = vadd.xlane.f32.xlu0 %v8699_v44 }
0x365f   : > { %v8702_v50 = vsel %vm2526_vm3, %v8698_v18, 0.0 }
0x3660   : > { %8703 = vadd.xlane.f32.xlu1 %v8702_v50 }
0x3674   : > { %8734 = vperm.xlu0 %11311, %v8731_v4  }
0x36eb   : > { %v8701_v5 = vpop.xlane.xlu0 %8700 }
0x36ec   : > { %v8705_v6 = vmul.f32 0.015625, %v8701_v5 }
0x36ed   : > { %v8704_v39 = vpop.xlane.xlu1 %8703 }
0x36ee   : > { %v8707_v53 = vadd.f32 1e-05, %v8705_v6  ;;  %v8706_v57 = vmul.f32 0.015625, %v8704_v39 }
0x36f0   : > { %11747 = vrsqrt.f32 %v8707_v53  ;;  %v8708_v19 = vadd.f32 1e-05, %v8706_v57 }
0x36f2   : > { %11749 = vrsqrt.f32 %v8708_v19 }
0x36f3   : > { %v8735_v15 = vpop.permute.xlu0 %8734 }
0x36fa   : > { %v11748_v54 = vpop.eup %11747 }
0x36fb   : > { %v8711_v22 = vmul.f32 %v11748_v54, %v8695_v51 }
0x36fc   : > { %v11750_v31 = vpop.eup %11749 }
0x36fd   : > { %v8712_v28 = vmul.f32 %v11750_v31, %v8696_v13  ;;  %v8719_v27 = vmul.f32 %v9884_v60, %v8711_v22 }
0x36ff   : > { %v8720_v36 = vmul.f32 %v9884_v60, %v8712_v28  ;;  %v8727_v7 = vadd.f32 %v9885_v11, %v8719_v27 }
0x3701   : > { %v8728_v40 = vadd.f32 %v9885_v11, %v8720_v36 }
0x3703   : > { %v8729_v1 = vpack.c.bf16 %v8728_v40, %v8727_v7 }
0x3705   : > { %v8741_v3 = vsel %vm2526_vm3, %v8729_v1, 0 }
0x3706   : > { %10977 = vmatpush3.bf16.xpose.msra.mxu0 %v8741_v3 }
0x3707   : > { %11047 = vmatprep.subr.bf16.mxu0 %v11046_v35 }
0x370d   : > { %10979 = vmatmul.mubr.msk.bf16.vlgmr.msra.gmra.mrb[160].mxu0 %vm2526_vm3, %v8730_v12 }
0x370e   : > { %11049 = vmatpush1.bf16.msra.mxu0 %v11048_v41  ;;  %8866 = vmatprep.mubr.f32.mxu0 %v12155_v24 }
0x370f   : > { %11051 = vmatprep.subr.bf16.mxu0 %v11050_v59 }
0x37e0   : > { %v8777_v48 = vpop.f32.mrb[160].mxu0 }
0x37e1   : > { %v8778_v43 = vadd.f32 %v8777_v48, %v8735_v15  ;;  %v10980_v58 = vpop.f32.mrb[161].mxu0 }
0x37e2   : > { %v8780_v14 = vpop.f32.mrb[162].mxu0 }
0x37e3   : > { %v10981_v49 = vpop.f32.mrb[163].mxu0  ;;  %9887 = vmatmul.mubr.msk.f32.vlgmr.msra.gmra.mrb[114].mxu0 %vm2436_vm2, %v8778_v43 }
0x37e4   : > { %11053 = vmatpush1.bf16.msra.mxu0 %v11052_v37  ;;  %8937 = vmatprep.mubr.f32.mxu0 %v12155_v24 }
0x37e5   : > { %11055 = vmatprep.subr.bf16.mxu0 %v11054_v56 }
0x37e7   : > { %9888 = vmatmul.mubr.msk.f32.vlgmr.msra.gmra.mrb[164].mxu0 %vm2436_vm2, %v8778_v43 }
0x37e8   : > { %11057 = vmatpush1.bf16.msra.mxu0 %v11056_v34  ;;  %9008 = vmatprep.mubr.f32.mxu0 %v12155_v24 }
0x37e9   : > { %11059 = vmatprep.subr.bf16.mxu0 %v11058_v21 }
0x37eb   : > { %9889 = vmatmul.mubr.msk.f32.vlgmr.msra.gmra.mrb[166].mxu0 %vm2436_vm2, %v8778_v43 }
0x37ec   : > { %11061 = vmatpush1.bf16.msra.mxu0 %v11060_v17  ;;  %9079 = vmatprep.mubr.f32.mxu0 %v12155_v24 }
0x37ef   : > { %9890 = vmatmul.mubr.msk.f32.vlgmr.msra.gmra.mrb[168].mxu0 %vm2436_vm2, %v8778_v43 }
0x38b6   : > { %v8868_v32 = vpop.f32.mrb[114].mxu0 }
0x38b7   : > { %9086 = vst [vmem:[%s1712_s2] sm:$0xff] %v8868_v32  ;;  %v8870_v63 = vpop.f32.mrb[115].mxu0 }
0x38b8   : > { %9087 = vst [vmem:[%s1712_s2 + $0x8] sm:$0xff] %v8870_v63 }
0x38ba   : > { %v8939_v55 = vpop.f32.mrb[164].mxu0 }
0x38bb   : > { %9088 = vst [vmem:[%s1712_s2 + $0x10] sm:$0xff] %v8939_v55  ;;  %v8941_v0 = vpop.f32.mrb[165].mxu0 }
0x38bc   : > { %9089 = vst [vmem:[%s1712_s2 + $0x18] sm:$0xff] %v8941_v0 }
0x38be   : > { %v9010_v33 = vpop.f32.mrb[166].mxu0 }
0x38bf   : > { %9090 = vst [vmem:[%s1712_s2 + $0x20] sm:$0xff] %v9010_v33  ;;  %v9012_v30 = vpop.f32.mrb[167].mxu0 }
0x38c0   : > { %9091 = vst [vmem:[%s1712_s2 + $0x28] sm:$0xff] %v9012_v30 }
0x38c2   : > { %v9081_v51 = vpop.f32.mrb[168].mxu0 }
0x38c3   : > { %9092 = vst [vmem:[%s1712_s2 + $0x30] sm:$0xff] %v9081_v51  ;;  %v9083_v25 = vpop.f32.mrb[169].mxu0 }
0x38c4   : > { %9093 = vst [vmem:[%s1712_s2 + $0x38] sm:$0xff] %v9083_v25 }
0x38c5 PF: > { %s123_s7 = sadd.s32 1, %s12089_s7  }
0x38c6   : > { %p120_p11 = scmp.ge.s32.totalorder %s123_s7, 4  }
0x38c8   :  { %122 = sbr.rel (!%p120_p11) target bundleno = 104 (0x68), region = 424 }
0x38cf   :  { %9115 = vsyncpa [#allocation3], 1 }
0x38d0   :  { %9117 = vsyncpa [#allocation3 + $0x1], 1 }
0x38d1   :  { %9118 = vsyncpa [#allocation5], 1 }
0x38d2   :  { %9119 = vsyncpa [#allocation8], 1 }
0x38d3   :  { %9120 = vsyncpa [#allocation11], 1 }
0x38d4   :  { %9121 = vsyncpa [#allocation14], 1 }
0x38d5   :  { %9122 = vsyncpa [#allocation17], 1 }

</bundles_post_ra>
